<compile_context>
chip_gen: v7x
topology: tpu7x:2x2x1
jax: 0.10.0
libtpu: 0.0.40
codegen_flags: <defaults>
</compile_context>

<pallas_src>
import math

import jax
import jax.numpy as jnp
from jax.experimental import pallas as pl
from jax.experimental.pallas import tpu as pltpu

# ---- dinov2_vits14 linear-probe configuration (deterministic synthetic
# weights, small image so the example stays tiny: 28x28 -> 2x2 patches + CLS).
B = 2
IN_CHANS = 3
IMG = 28
PATCH = 14
DIM = 384                  # dim for every model_name != 'dinov2_vitb14'
DEPTH = 12                 # ViT-S/14 depth
HEADS = 6
HEAD_DIM = DIM // HEADS    # 64
MLP_DIM = 4 * DIM          # 1536
NUM_CLASSES = 10
N_PATCHES = (IMG // PATCH) ** 2
T = N_PATCHES + 1          # +1 CLS token (= 5)
T_PAD = 8                  # pad tokens per image to a sublane multiple
BT = B * T_PAD             # rows of the resident activation (= 16)
K_PATCH = IN_CHANS * PATCH * PATCH   # 588
K_PAD = 640                # pad patch-embed K to a multiple of 128
N_PAD = 128                # lane-dense padded classifier output
LS_INIT = 1e-5             # DINOv2 LayerScale init
EPS = 1e-6
SCALE = HEAD_DIM ** -0.5


# --------------------------- in-kernel helpers -------------------------------

def _layernorm(x, g, b):
    mean = jnp.mean(x, axis=-1, keepdims=True)
    var = jnp.mean(jnp.square(x - mean), axis=-1, keepdims=True)
    return (x - mean) * jax.lax.rsqrt(var + EPS) * g + b


def _gelu(x):
    # TODO(synk): PyTorch nn.GELU defaults to the exact erf form; using the
    # tanh approximation since lax.erf is not guaranteed to lower in Mosaic.
    c = math.sqrt(2.0 / math.pi)
    return 0.5 * x * (1.0 + jnp.tanh(c * (x + 0.044715 * x * x * x)))


# --------------------------- fused ViT kernel --------------------------------
# grid = (DEPTH,), one program per transformer block; activations stay resident
# in VMEM scratch; layer 0 additionally does the patch embed + CLS + pos-embed;
# the last layer additionally does the final LayerNorm + linear-probe head.

def _fused_vit_kernel(
    # constant-index inputs (fetched once, block index never changes)
    patches_ref, pw_ref, pb_ref, clspos_ref, mask_ref,
    normg_ref, normb_ref, hw_ref, hb_ref,
    # per-layer streamed inputs (leading DEPTH axis)
    vec_ref, qkvb_ref, fc1b_ref, qkvw_ref, projw_ref, fc1w_ref, fc2w_ref,
    # output
    out_ref,
    # scratch
    h_scr,
):
    layer = pl.program_id(0)

    # ---- layer 0: patch embed (Conv2d k=s=14 == matmul) + CLS + pos embed ----
    @pl.when(layer == 0)
    def _init():
        tok = jnp.dot(patches_ref[...].astype(jnp.bfloat16), pw_ref[...],
                      preferred_element_type=jnp.float32) + pb_ref[...]
        clspos = clspos_ref[...]                                   # (T, DIM)
        pad = jnp.zeros((T_PAD - T, DIM), jnp.float32)
        blocks = []
        for b in range(B):
            blocks.append(clspos[0:1, :])                          # CLS + pos[0]
            blocks.append(tok[b * N_PATCHES:(b + 1) * N_PATCHES, :]
                          + clspos[1:, :])
            blocks.append(pad)                                     # padded rows
        h_scr[...] = jnp.concatenate(blocks, axis=0)               # one aligned store

    # packed per-layer (8, DIM) vectors:
    #   [ln1_g, ln1_b, proj_b, ls1, ln2_g, ln2_b, fc2_b, ls2]
    vec = vec_ref[0]                                               # (8, DIM) f32
    ln1_g, ln1_b = vec[0:1], vec[1:2]
    proj_b, ls1 = vec[2:3], vec[3:4]
    ln2_g, ln2_b = vec[4:5], vec[5:6]
    fc2_b, ls2 = vec[6:7], vec[7:8]

    h = h_scr[...]                                                 # (BT, DIM) f32
    mask = mask_ref[...]                                           # (BT, BT) additive

    # ------------------------- attention branch ------------------------------
    y = _layernorm(h, ln1_g, ln1_b)
    qkv = jnp.dot(y.astype(jnp.bfloat16), qkvw_ref[0],
                  preferred_element_type=jnp.float32) + qkvb_ref[0]  # (BT, 3*DIM)

    heads_out = []
    for hh in range(HEADS):
        q = qkv[:, hh * HEAD_DIM:(hh + 1) * HEAD_DIM] * SCALE        # (BT, Dh)
        k = qkv[:, DIM + hh * HEAD_DIM:DIM + (hh + 1) * HEAD_DIM]
        v = qkv[:, 2 * DIM + hh * HEAD_DIM:2 * DIM + (hh + 1) * HEAD_DIM]
        s = jax.lax.dot_general(q, k, (((1,), (1,)), ((), ())),
                                preferred_element_type=jnp.float32) + mask
        s = s - jnp.max(s, axis=-1, keepdims=True)
        p = jnp.exp(s)
        p = p * pl.reciprocal(jnp.sum(p, axis=-1, keepdims=True), approx=True)
        heads_out.append(jnp.dot(p, v, preferred_element_type=jnp.float32))
    attn = jnp.concatenate(heads_out, axis=-1)                     # (BT, DIM)

    o = jnp.dot(attn.astype(jnp.bfloat16), projw_ref[0],
                preferred_element_type=jnp.float32) + proj_b
    h = h + ls1 * o                                                # LayerScale 1

    # ---------------------------- MLP branch ----------------------------------
    y = _layernorm(h, ln2_g, ln2_b)
    y = jnp.dot(y.astype(jnp.bfloat16), fc1w_ref[0],
                preferred_element_type=jnp.float32) + fc1b_ref[0]
    y = _gelu(y)
    y = jnp.dot(y.astype(jnp.bfloat16), fc2w_ref[0],
                preferred_element_type=jnp.float32) + fc2_b
    h = h + ls2 * y                                                # LayerScale 2
    h_scr[...] = h

    # ---- last layer: final LayerNorm + linear-probe head (lane-dense out) ----
    @pl.when(layer == DEPTH - 1)
    def _final():
        hn = _layernorm(h, normg_ref[...], normb_ref[...])
        logits = jnp.dot(hn.astype(jnp.bfloat16), hw_ref[...],
                         preferred_element_type=jnp.float32) + hb_ref[...]
        out_ref[...] = logits.astype(out_ref.dtype)


def fused_forward(patches, mask, p):
    """patches: (B*N_PATCHES, K_PAD) f32 -> (BT, N_PAD) f32 logits (all rows)."""

    def const_spec(a):   # whole array resident, fetched once
        return pl.BlockSpec(a.shape, lambda l: (0, 0))

    def layer_spec(a):   # stream layer l's slice each grid step
        return pl.BlockSpec((1,) + a.shape[1:], lambda l: (l, 0, 0))

    grid_spec = pltpu.PrefetchScalarGridSpec(
        num_scalar_prefetch=0,
        grid=(DEPTH,),
        in_specs=[
            const_spec(patches),
            const_spec(p["patch_w"]), const_spec(p["patch_b"]),
            const_spec(p["cls_pos"]), const_spec(mask),
            const_spec(p["norm_g"]), const_spec(p["norm_b"]),
            const_spec(p["head_w"]), const_spec(p["head_b"]),
            layer_spec(p["blk_vec"]),
            layer_spec(p["blk_qkv_b"]), layer_spec(p["blk_fc1_b"]),
            layer_spec(p["blk_qkv_w"]), layer_spec(p["blk_proj_w"]),
            layer_spec(p["blk_fc1_w"]), layer_spec(p["blk_fc2_w"]),
        ],
        out_specs=pl.BlockSpec((BT, N_PAD), lambda l: (0, 0)),
        scratch_shapes=[
            pltpu.VMEM((BT, DIM), jnp.float32),       # resident activation h
        ],
    )
    return pl.pallas_call(
        _fused_vit_kernel,
        out_shape=jax.ShapeDtypeStruct((BT, N_PAD), jnp.float32),
        grid_spec=grid_spec,
        compiler_params=pltpu.CompilerParams(
            dimension_semantics=("arbitrary",),       # depth loop is sequential
            # ~3.4 MB bf16 weights / layer, double-buffered (+constants) < 8 MB;
            # 32 MiB scoped VMEM is safe on v5e/v6e/v7x.  Kernel is weight-DMA
            # bound; deeper Buffered() buys nothing since compute < DMA.
            vmem_limit_bytes=32 * 1024 * 1024,
        ),
    )(patches, p["patch_w"], p["patch_b"], p["cls_pos"], mask, p["norm_g"],
      p["norm_b"], p["head_w"], p["head_b"], p["blk_vec"], p["blk_qkv_b"],
      p["blk_fc1_b"], p["blk_qkv_w"], p["blk_proj_w"], p["blk_fc1_w"],
      p["blk_fc2_w"])


# --------------------------- params & forward --------------------------------

def build_attn_mask():
    # Additive mask: row r may attend to column c iff they belong to the same
    # image AND column c is a real (non-padded) token.  Padded rows end up
    # fully masked -> uniform softmax -> finite garbage that is never read.
    r = jnp.arange(BT)[:, None]
    c = jnp.arange(BT)[None, :]
    valid = ((r // T_PAD) == (c // T_PAD)) & ((c % T_PAD) < T)
    return jnp.where(valid, 0.0, -1e30).astype(jnp.float32)


def init_params(key):
    def dense(k, shape):
        return 0.02 * jax.random.normal(k, shape, jnp.float32)

    ks = jax.random.split(key, 6)

    # patch-embed weight, zero-padded along K to a multiple of 128, bf16
    patch_w = jnp.zeros((K_PAD, DIM), jnp.float32)
    patch_w = patch_w.at[:K_PATCH].set(dense(ks[0], (K_PATCH, DIM)))

    cls_token = dense(ks[1], (DIM,))
    pos_embed = dense(ks[2], (T, DIM))
    cls_pos = pos_embed.at[0, :].add(cls_token)       # row 0 = CLS token + pos[0]

    # classifier head, zero-padded to a lane-dense 128-wide output, bf16
    head_w = jnp.zeros((DIM, N_PAD), jnp.float32)
    head_w = head_w.at[:, :NUM_CLASSES].set(dense(ks[3], (DIM, NUM_CLASSES)))

    bk = jax.random.split(ks[4], 4)
    ones = jnp.ones((DEPTH, 1, DIM), jnp.float32)
    zeros = jnp.zeros((DEPTH, 1, DIM), jnp.float32)
    ls = jnp.full((DEPTH, 1, DIM), LS_INIT, jnp.float32)
    # packed per-layer vectors: [ln1_g, ln1_b, proj_b, ls1, ln2_g, ln2_b, fc2_b, ls2]
    blk_vec = jnp.concatenate([ones, zeros, zeros, ls, ones, zeros, zeros, ls],
                              axis=1)                 # (DEPTH, 8, DIM)

    return {
        "patch_w": patch_w.astype(jnp.bfloat16),
        "patch_b": jnp.zeros((1, DIM), jnp.float32),
        "cls_pos": cls_pos,
        "norm_g": jnp.ones((1, DIM), jnp.float32),
        "norm_b": jnp.zeros((1, DIM), jnp.float32),
        "head_w": head_w.astype(jnp.bfloat16),
        "head_b": jnp.zeros((1, N_PAD), jnp.float32),
        "blk_vec": blk_vec,
        "blk_qkv_b": jnp.zeros((DEPTH, 1, 3 * DIM), jnp.float32),
        "blk_fc1_b": jnp.zeros((DEPTH, 1, MLP_DIM), jnp.float32),
        "blk_qkv_w": dense(bk[0], (DEPTH, DIM, 3 * DIM)).astype(jnp.bfloat16),
        "blk_proj_w": dense(bk[1], (DEPTH, DIM, DIM)).astype(jnp.bfloat16),
        "blk_fc1_w": dense(bk[2], (DEPTH, DIM, MLP_DIM)).astype(jnp.bfloat16),
        "blk_fc2_w": dense(bk[3], (DEPTH, MLP_DIM, DIM)).astype(jnp.bfloat16),
    }


def forward(params, x):
    # Conv2d(3, DIM, k=14, s=14) lowered to a matmul over flattened patches.
    gh = gw = IMG // PATCH
    patches = x.reshape(B, IN_CHANS, gh, PATCH, gw, PATCH)
    patches = patches.transpose(0, 2, 4, 1, 3, 5)               # (B, gh, gw, C, p, p)
    patches = patches.reshape(B * N_PATCHES, K_PATCH)
    patches = jnp.pad(patches, ((0, 0), (0, K_PAD - K_PATCH)))  # K 588 -> 640

    mask = build_attn_mask()
    out = fused_forward(patches, mask, params)                  # (BT, N_PAD)
    # CLS-token features -> linear probe logits (unpad the 128 lanes to 10).
    logits = out.reshape(B, T_PAD, N_PAD)[:, 0, :NUM_CLASSES]
    return logits


if __name__ == "__main__":
    key = jax.random.PRNGKey(0)
    pkey, xkey = jax.random.split(key)
    params = init_params(pkey)
    x = jax.random.normal(xkey, (B, IN_CHANS, IMG, IMG), jnp.float32)

    logits = jax.jit(forward)(params, x)
    jax.block_until_ready(logits)
    assert logits.shape == (B, NUM_CLASSES) and logits.dtype == jnp.float32
    print("KERNEL_OK")
</pallas_src>

<mosaic_0001>
module attributes {stable_mosaic.version = 11 : i64} {
  func.func @_fused_vit_kernel(%arg0: i32, %arg1: memref<8x640xf32, #tpu.memory_space<vmem>>, %arg2: memref<640x384xbf16, #tpu.memory_space<vmem>>, %arg3: memref<1x384xf32, #tpu.memory_space<vmem>>, %arg4: memref<5x384xf32, #tpu.memory_space<vmem>>, %arg5: memref<16x16xf32, #tpu.memory_space<vmem>>, %arg6: memref<1x384xf32, #tpu.memory_space<vmem>>, %arg7: memref<1x384xf32, #tpu.memory_space<vmem>>, %arg8: memref<384x128xbf16, #tpu.memory_space<vmem>>, %arg9: memref<1x128xf32, #tpu.memory_space<vmem>>, %arg10: memref<1x8x384xf32, #tpu.memory_space<vmem>>, %arg11: memref<1x1x1152xf32, #tpu.memory_space<vmem>>, %arg12: memref<1x1x1536xf32, #tpu.memory_space<vmem>>, %arg13: memref<1x384x1152xbf16, #tpu.memory_space<vmem>>, %arg14: memref<1x384x384xbf16, #tpu.memory_space<vmem>>, %arg15: memref<1x384x1536xbf16, #tpu.memory_space<vmem>>, %arg16: memref<1x1536x384xbf16, #tpu.memory_space<vmem>>, %arg17: memref<16x128xf32, #tpu.memory_space<vmem>>, %arg18: memref<16x384xf32, #tpu.memory_space<vmem>>) attributes {dimension_semantics = [#tpu.dimension_semantics<arbitrary>], iteration_bounds = array<i64: 12>, scalar_prefetch = 0 : i64, scratch_operands = 1 : i64, tpu.core_type = #tpu.core_type<tc>, window_params = [{pipeline_mode = #tpu.pipeline_mode<synchronous>, transform_indices = @transform_0, window_bounds = array<i64: 8, 640>}, {pipeline_mode = #tpu.pipeline_mode<synchronous>, transform_indices = @transform_1, window_bounds = array<i64: 640, 384>}, {pipeline_mode = #tpu.pipeline_mode<synchronous>, transform_indices = @transform_2, window_bounds = array<i64: 1, 384>}, {pipeline_mode = #tpu.pipeline_mode<synchronous>, transform_indices = @transform_3, window_bounds = array<i64: 5, 384>}, {pipeline_mode = #tpu.pipeline_mode<synchronous>, transform_indices = @transform_4, window_bounds = array<i64: 16, 16>}, {pipeline_mode = #tpu.pipeline_mode<synchronous>, transform_indices = @transform_5, window_bounds = array<i64: 1, 384>}, {pipeline_mode = #tpu.pipeline_mode<synchronous>, transform_indices = @transform_6, window_bounds = array<i64: 1, 384>}, {pipeline_mode = #tpu.pipeline_mode<synchronous>, transform_indices = @transform_7, window_bounds = array<i64: 384, 128>}, {pipeline_mode = #tpu.pipeline_mode<synchronous>, transform_indices = @transform_8, window_bounds = array<i64: 1, 128>}, {transform_indices = @transform_9, window_bounds = array<i64: 1, 8, 384>}, {transform_indices = @transform_10, window_bounds = array<i64: 1, 1, 1152>}, {transform_indices = @transform_11, window_bounds = array<i64: 1, 1, 1536>}, {transform_indices = @transform_12, window_bounds = array<i64: 1, 384, 1152>}, {transform_indices = @transform_13, window_bounds = array<i64: 1, 384, 384>}, {transform_indices = @transform_14, window_bounds = array<i64: 1, 384, 1536>}, {transform_indices = @transform_15, window_bounds = array<i64: 1, 1536, 384>}, {pipeline_mode = #tpu.pipeline_mode<synchronous>, transform_indices = @transform_16, window_bounds = array<i64: 16, 128>}]} {
    %c0_i32 = arith.constant 0 : i32
    %0 = arith.cmpi eq, %arg0, %c0_i32 : i32
    %1 = arith.extui %0 : i1 to i32
    %c0_i32_0 = arith.constant 0 : i32
    %2 = arith.cmpi ne, %1, %c0_i32_0 : i32
    scf.if %2 {
      %c0_75 = arith.constant 0 : index
      %c0_76 = arith.constant 0 : index
      %219 = vector.load %arg1[%c0_75, %c0_76] : memref<8x640xf32, #tpu.memory_space<vmem>>, vector<8x640xf32>
      %220 = arith.truncf %219 : vector<8x640xf32> to vector<8x640xbf16>
      %c0_77 = arith.constant 0 : index
      %c0_78 = arith.constant 0 : index
      %221 = vector.load %arg2[%c0_77, %c0_78] : memref<640x384xbf16, #tpu.memory_space<vmem>>, vector<640x384xbf16>
      %cst_79 = arith.constant dense<0.000000e+00> : vector<8x384xf32>
      %222 = tpu.matmul %220, %221, %cst_79 {dimension_numbers = #tpu.dot_dimension_numbers<[1], [0], [0], [1], [0, 0, 1, 1], [], []>} : vector<8x640xbf16>, vector<640x384xbf16>, vector<8x384xf32> -> vector<8x384xf32>
      %c0_80 = arith.constant 0 : index
      %c0_81 = arith.constant 0 : index
      %223 = vector.load %arg3[%c0_80, %c0_81] : memref<1x384xf32, #tpu.memory_space<vmem>>, vector<1x384xf32>
      %224 = vector.broadcast %223 : vector<1x384xf32> to vector<8x384xf32>
      %225 = arith.addf %222, %224 : vector<8x384xf32>
      %c0_82 = arith.constant 0 : index
      %c0_83 = arith.constant 0 : index
      %226 = vector.load %arg4[%c0_82, %c0_83] : memref<5x384xf32, #tpu.memory_space<vmem>>, vector<5x384xf32>
      %cst_84 = arith.constant 0.000000e+00 : f32
      %227 = vector.broadcast %cst_84 : f32 to vector<3x384xf32>
      %228 = vector.extract_strided_slice %226 {offsets = [0, 0], sizes = [1, 384], strides = [1, 1]} : vector<5x384xf32> to vector<1x384xf32>
      %229 = vector.extract_strided_slice %225 {offsets = [0, 0], sizes = [4, 384], strides = [1, 1]} : vector<8x384xf32> to vector<4x384xf32>
      %230 = vector.extract_strided_slice %226 {offsets = [1, 0], sizes = [4, 384], strides = [1, 1]} : vector<5x384xf32> to vector<4x384xf32>
      %231 = arith.addf %229, %230 : vector<4x384xf32>
      %232 = vector.extract_strided_slice %226 {offsets = [0, 0], sizes = [1, 384], strides = [1, 1]} : vector<5x384xf32> to vector<1x384xf32>
      %233 = vector.extract_strided_slice %225 {offsets = [4, 0], sizes = [4, 384], strides = [1, 1]} : vector<8x384xf32> to vector<4x384xf32>
      %234 = vector.extract_strided_slice %226 {offsets = [1, 0], sizes = [4, 384], strides = [1, 1]} : vector<5x384xf32> to vector<4x384xf32>
      %235 = arith.addf %233, %234 : vector<4x384xf32>
      %236 = tpu.concatenate %228, %231, %227, %232, %235, %227 in 0 : vector<1x384xf32>, vector<4x384xf32>, vector<3x384xf32>, vector<1x384xf32>, vector<4x384xf32>, vector<3x384xf32> -> vector<16x384xf32>
      %c0_85 = arith.constant 0 : index
      %c0_86 = arith.constant 0 : index
      %237 = vector.load %arg18[%c0_85, %c0_86] : memref<16x384xf32, #tpu.memory_space<vmem>>, vector<16x384xf32>
      tpu.vector_store %arg18[%c0_85, %c0_86], %236 {strides = array<i32>} : memref<16x384xf32, #tpu.memory_space<vmem>>, vector<16x384xf32>,
    } else {
    }
    %c0 = arith.constant 0 : index
    %c0_1 = arith.constant 0 : index
    %c0_2 = arith.constant 0 : index
    %3 = vector.load %arg10[%c0, %c0_1, %c0_2] : memref<1x8x384xf32, #tpu.memory_space<vmem>>, vector<1x8x384xf32>
    %4 = vector.shape_cast %3 : vector<1x8x384xf32> to vector<8x384xf32>
    %5 = vector.extract_strided_slice %4 {offsets = [0, 0], sizes = [1, 384], strides = [1, 1]} : vector<8x384xf32> to vector<1x384xf32>
    %6 = vector.extract_strided_slice %4 {offsets = [1, 0], sizes = [1, 384], strides = [1, 1]} : vector<8x384xf32> to vector<1x384xf32>
    %7 = vector.extract_strided_slice %4 {offsets = [2, 0], sizes = [1, 384], strides = [1, 1]} : vector<8x384xf32> to vector<1x384xf32>
    %8 = vector.extract_strided_slice %4 {offsets = [3, 0], sizes = [1, 384], strides = [1, 1]} : vector<8x384xf32> to vector<1x384xf32>
    %9 = vector.extract_strided_slice %4 {offsets = [4, 0], sizes = [1, 384], strides = [1, 1]} : vector<8x384xf32> to vector<1x384xf32>
    %10 = vector.extract_strided_slice %4 {offsets = [5, 0], sizes = [1, 384], strides = [1, 1]} : vector<8x384xf32> to vector<1x384xf32>
    %11 = vector.extract_strided_slice %4 {offsets = [6, 0], sizes = [1, 384], strides = [1, 1]} : vector<8x384xf32> to vector<1x384xf32>
    %12 = vector.extract_strided_slice %4 {offsets = [7, 0], sizes = [1, 384], strides = [1, 1]} : vector<8x384xf32> to vector<1x384xf32>
    %c0_3 = arith.constant 0 : index
    %c0_4 = arith.constant 0 : index
    %13 = vector.load %arg18[%c0_3, %c0_4] : memref<16x384xf32, #tpu.memory_space<vmem>>, vector<16x384xf32>
    %c0_5 = arith.constant 0 : index
    %c0_6 = arith.constant 0 : index
    %14 = vector.load %arg5[%c0_5, %c0_6] : memref<16x16xf32, #tpu.memory_space<vmem>>, vector<16x16xf32>
    %cst = arith.constant dense<0.000000e+00> : vector<16xf32>
    %15 = vector.multi_reduction <add>, %13, %cst [1] : vector<16x384xf32> to vector<16xf32>
    %16 = vector.shape_cast %15 : vector<16xf32> to vector<16x1xf32>
    %cst_7 = arith.constant 3.840000e+02 : f32
    %17 = vector.broadcast %cst_7 : f32 to vector<16x1xf32>
    %18 = arith.divf %16, %17 : vector<16x1xf32>
    %19 = vector.broadcast %18 : vector<16x1xf32> to vector<16x384xf32>
    %20 = arith.subf %13, %19 : vector<16x384xf32>
    %21 = arith.mulf %20, %20 : vector<16x384xf32>
    %cst_8 = arith.constant dense<0.000000e+00> : vector<16xf32>
    %22 = vector.multi_reduction <add>, %21, %cst_8 [1] : vector<16x384xf32> to vector<16xf32>
    %23 = vector.shape_cast %22 : vector<16xf32> to vector<16x1xf32>
    %cst_9 = arith.constant 3.840000e+02 : f32
    %24 = vector.broadcast %cst_9 : f32 to vector<16x1xf32>
    %25 = arith.divf %23, %24 : vector<16x1xf32>
    %26 = vector.broadcast %18 : vector<16x1xf32> to vector<16x384xf32>
    %27 = arith.subf %13, %26 : vector<16x384xf32>
    %cst_10 = arith.constant 9.99999997E-7 : f32
    %28 = vector.broadcast %cst_10 : f32 to vector<16x1xf32>
    %29 = arith.addf %25, %28 : vector<16x1xf32>
    %30 = math.rsqrt %29 : vector<16x1xf32>
    %31 = vector.broadcast %30 : vector<16x1xf32> to vector<16x384xf32>
    %32 = arith.mulf %27, %31 : vector<16x384xf32>
    %33 = vector.broadcast %5 : vector<1x384xf32> to vector<16x384xf32>
    %34 = arith.mulf %32, %33 : vector<16x384xf32>
    %35 = vector.broadcast %6 : vector<1x384xf32> to vector<16x384xf32>
    %36 = arith.addf %34, %35 : vector<16x384xf32>
    %37 = arith.truncf %36 : vector<16x384xf32> to vector<16x384xbf16>
    %c0_11 = arith.constant 0 : index
    %c0_12 = arith.constant 0 : index
    %c0_13 = arith.constant 0 : index
    %38 = vector.load %arg13[%c0_11, %c0_12, %c0_13] : memref<1x384x1152xbf16, #tpu.memory_space<vmem>>, vector<1x384x1152xbf16>
    %39 = vector.shape_cast %38 : vector<1x384x1152xbf16> to vector<384x1152xbf16>
    %cst_14 = arith.constant dense<0.000000e+00> : vector<16x1152xf32>
    %40 = tpu.matmul %37, %39, %cst_14 {dimension_numbers = #tpu.dot_dimension_numbers<[1], [0], [0], [1], [0, 0, 1, 1], [], []>} : vector<16x384xbf16>, vector<384x1152xbf16>, vector<16x1152xf32> -> vector<16x1152xf32>
    %c0_15 = arith.constant 0 : index
    %c0_16 = arith.constant 0 : index
    %c0_17 = arith.constant 0 : index
    %41 = vector.load %arg11[%c0_15, %c0_16, %c0_17] : memref<1x1x1152xf32, #tpu.memory_space<vmem>>, vector<1x1x1152xf32>
    %42 = vector.shape_cast %41 : vector<1x1x1152xf32> to vector<1x1152xf32>
    %43 = vector.broadcast %42 : vector<1x1152xf32> to vector<16x1152xf32>
    %44 = arith.addf %40, %43 : vector<16x1152xf32>
    %45 = vector.extract_strided_slice %44 {offsets = [0, 0], sizes = [16, 64], strides = [1, 1]} : vector<16x1152xf32> to vector<16x64xf32>
    %cst_18 = arith.constant 1.250000e-01 : f32
    %46 = vector.broadcast %cst_18 : f32 to vector<16x64xf32>
    %47 = arith.mulf %45, %46 : vector<16x64xf32>
    %48 = vector.extract_strided_slice %44 {offsets = [0, 384], sizes = [16, 64], strides = [1, 1]} : vector<16x1152xf32> to vector<16x64xf32>
    %49 = vector.extract_strided_slice %44 {offsets = [0, 768], sizes = [16, 64], strides = [1, 1]} : vector<16x1152xf32> to vector<16x64xf32>
    %cst_19 = arith.constant dense<0.000000e+00> : vector<16x16xf32>
    %50 = tpu.matmul %47, %48, %cst_19 {dimension_numbers = #tpu.dot_dimension_numbers<[1], [1], [0], [0], [0, 0, 1, 0], [], []>} : vector<16x64xf32>, vector<16x64xf32>, vector<16x16xf32> -> vector<16x16xf32>
    %51 = arith.addf %50, %14 : vector<16x16xf32>
    %cst_20 = arith.constant dense<0xFF800000> : vector<16xf32>
    %52 = vector.multi_reduction <maximumf>, %51, %cst_20 [1] : vector<16x16xf32> to vector<16xf32>
    %53 = vector.shape_cast %52 : vector<16xf32> to vector<16x1xf32>
    %54 = vector.broadcast %53 : vector<16x1xf32> to vector<16x16xf32>
    %55 = arith.subf %51, %54 : vector<16x16xf32>
    %56 = math.exp %55 : vector<16x16xf32>
    %cst_21 = arith.constant dense<0.000000e+00> : vector<16xf32>
    %57 = vector.multi_reduction <add>, %56, %cst_21 [1] : vector<16x16xf32> to vector<16xf32>
    %58 = vector.shape_cast %57 : vector<16xf32> to vector<16x1xf32>
    %59 = tpu.reciprocal %58 {approx = true} : vector<16x1xf32> -> vector<16x1xf32>
    %60 = vector.broadcast %59 : vector<16x1xf32> to vector<16x16xf32>
    %61 = arith.mulf %56, %60 : vector<16x16xf32>
    %cst_22 = arith.constant dense<0.000000e+00> : vector<16x64xf32>
    %62 = tpu.matmul %61, %49, %cst_22 {dimension_numbers = #tpu.dot_dimension_numbers<[1], [0], [0], [1], [0, 0, 1, 1], [], []>} : vector<16x16xf32>, vector<16x64xf32>, vector<16x64xf32> -> vector<16x64xf32>
    %63 = vector.extract_strided_slice %44 {offsets = [0, 64], sizes = [16, 64], strides = [1, 1]} : vector<16x1152xf32> to vector<16x64xf32>
    %cst_23 = arith.constant 1.250000e-01 : f32
    %64 = vector.broadcast %cst_23 : f32 to vector<16x64xf32>
    %65 = arith.mulf %63, %64 : vector<16x64xf32>
    %66 = vector.extract_strided_slice %44 {offsets = [0, 448], sizes = [16, 64], strides = [1, 1]} : vector<16x1152xf32> to vector<16x64xf32>
    %67 = vector.extract_strided_slice %44 {offsets = [0, 832], sizes = [16, 64], strides = [1, 1]} : vector<16x1152xf32> to vector<16x64xf32>
    %cst_24 = arith.constant dense<0.000000e+00> : vector<16x16xf32>
    %68 = tpu.matmul %65, %66, %cst_24 {dimension_numbers = #tpu.dot_dimension_numbers<[1], [1], [0], [0], [0, 0, 1, 0], [], []>} : vector<16x64xf32>, vector<16x64xf32>, vector<16x16xf32> -> vector<16x16xf32>
    %69 = arith.addf %68, %14 : vector<16x16xf32>
    %cst_25 = arith.constant dense<0xFF800000> : vector<16xf32>
    %70 = vector.multi_reduction <maximumf>, %69, %cst_25 [1] : vector<16x16xf32> to vector<16xf32>
    %71 = vector.shape_cast %70 : vector<16xf32> to vector<16x1xf32>
    %72 = vector.broadcast %71 : vector<16x1xf32> to vector<16x16xf32>
    %73 = arith.subf %69, %72 : vector<16x16xf32>
    %74 = math.exp %73 : vector<16x16xf32>
    %cst_26 = arith.constant dense<0.000000e+00> : vector<16xf32>
    %75 = vector.multi_reduction <add>, %74, %cst_26 [1] : vector<16x16xf32> to vector<16xf32>
    %76 = vector.shape_cast %75 : vector<16xf32> to vector<16x1xf32>
    %77 = tpu.reciprocal %76 {approx = true} : vector<16x1xf32> -> vector<16x1xf32>
    %78 = vector.broadcast %77 : vector<16x1xf32> to vector<16x16xf32>
    %79 = arith.mulf %74, %78 : vector<16x16xf32>
    %cst_27 = arith.constant dense<0.000000e+00> : vector<16x64xf32>
    %80 = tpu.matmul %79, %67, %cst_27 {dimension_numbers = #tpu.dot_dimension_numbers<[1], [0], [0], [1], [0, 0, 1, 1], [], []>} : vector<16x16xf32>, vector<16x64xf32>, vector<16x64xf32> -> vector<16x64xf32>
    %81 = vector.extract_strided_slice %44 {offsets = [0, 128], sizes = [16, 64], strides = [1, 1]} : vector<16x1152xf32> to vector<16x64xf32>
    %cst_28 = arith.constant 1.250000e-01 : f32
    %82 = vector.broadcast %cst_28 : f32 to vector<16x64xf32>
    %83 = arith.mulf %81, %82 : vector<16x64xf32>
    %84 = vector.extract_strided_slice %44 {offsets = [0, 512], sizes = [16, 64], strides = [1, 1]} : vector<16x1152xf32> to vector<16x64xf32>
    %85 = vector.extract_strided_slice %44 {offsets = [0, 896], sizes = [16, 64], strides = [1, 1]} : vector<16x1152xf32> to vector<16x64xf32>
    %cst_29 = arith.constant dense<0.000000e+00> : vector<16x16xf32>
    %86 = tpu.matmul %83, %84, %cst_29 {dimension_numbers = #tpu.dot_dimension_numbers<[1], [1], [0], [0], [0, 0, 1, 0], [], []>} : vector<16x64xf32>, vector<16x64xf32>, vector<16x16xf32> -> vector<16x16xf32>
    %87 = arith.addf %86, %14 : vector<16x16xf32>
    %cst_30 = arith.constant dense<0xFF800000> : vector<16xf32>
    %88 = vector.multi_reduction <maximumf>, %87, %cst_30 [1] : vector<16x16xf32> to vector<16xf32>
    %89 = vector.shape_cast %88 : vector<16xf32> to vector<16x1xf32>
    %90 = vector.broadcast %89 : vector<16x1xf32> to vector<16x16xf32>
    %91 = arith.subf %87, %90 : vector<16x16xf32>
    %92 = math.exp %91 : vector<16x16xf32>
    %cst_31 = arith.constant dense<0.000000e+00> : vector<16xf32>
    %93 = vector.multi_reduction <add>, %92, %cst_31 [1] : vector<16x16xf32> to vector<16xf32>
    %94 = vector.shape_cast %93 : vector<16xf32> to vector<16x1xf32>
    %95 = tpu.reciprocal %94 {approx = true} : vector<16x1xf32> -> vector<16x1xf32>
    %96 = vector.broadcast %95 : vector<16x1xf32> to vector<16x16xf32>
    %97 = arith.mulf %92, %96 : vector<16x16xf32>
    %cst_32 = arith.constant dense<0.000000e+00> : vector<16x64xf32>
    %98 = tpu.matmul %97, %85, %cst_32 {dimension_numbers = #tpu.dot_dimension_numbers<[1], [0], [0], [1], [0, 0, 1, 1], [], []>} : vector<16x16xf32>, vector<16x64xf32>, vector<16x64xf32> -> vector<16x64xf32>
    %99 = vector.extract_strided_slice %44 {offsets = [0, 192], sizes = [16, 64], strides = [1, 1]} : vector<16x1152xf32> to vector<16x64xf32>
    %cst_33 = arith.constant 1.250000e-01 : f32
    %100 = vector.broadcast %cst_33 : f32 to vector<16x64xf32>
    %101 = arith.mulf %99, %100 : vector<16x64xf32>
    %102 = vector.extract_strided_slice %44 {offsets = [0, 576], sizes = [16, 64], strides = [1, 1]} : vector<16x1152xf32> to vector<16x64xf32>
    %103 = vector.extract_strided_slice %44 {offsets = [0, 960], sizes = [16, 64], strides = [1, 1]} : vector<16x1152xf32> to vector<16x64xf32>
    %cst_34 = arith.constant dense<0.000000e+00> : vector<16x16xf32>
    %104 = tpu.matmul %101, %102, %cst_34 {dimension_numbers = #tpu.dot_dimension_numbers<[1], [1], [0], [0], [0, 0, 1, 0], [], []>} : vector<16x64xf32>, vector<16x64xf32>, vector<16x16xf32> -> vector<16x16xf32>
    %105 = arith.addf %104, %14 : vector<16x16xf32>
    %cst_35 = arith.constant dense<0xFF800000> : vector<16xf32>
    %106 = vector.multi_reduction <maximumf>, %105, %cst_35 [1] : vector<16x16xf32> to vector<16xf32>
    %107 = vector.shape_cast %106 : vector<16xf32> to vector<16x1xf32>
    %108 = vector.broadcast %107 : vector<16x1xf32> to vector<16x16xf32>
    %109 = arith.subf %105, %108 : vector<16x16xf32>
    %110 = math.exp %109 : vector<16x16xf32>
    %cst_36 = arith.constant dense<0.000000e+00> : vector<16xf32>
    %111 = vector.multi_reduction <add>, %110, %cst_36 [1] : vector<16x16xf32> to vector<16xf32>
    %112 = vector.shape_cast %111 : vector<16xf32> to vector<16x1xf32>
    %113 = tpu.reciprocal %112 {approx = true} : vector<16x1xf32> -> vector<16x1xf32>
    %114 = vector.broadcast %113 : vector<16x1xf32> to vector<16x16xf32>
    %115 = arith.mulf %110, %114 : vector<16x16xf32>
    %cst_37 = arith.constant dense<0.000000e+00> : vector<16x64xf32>
    %116 = tpu.matmul %115, %103, %cst_37 {dimension_numbers = #tpu.dot_dimension_numbers<[1], [0], [0], [1], [0, 0, 1, 1], [], []>} : vector<16x16xf32>, vector<16x64xf32>, vector<16x64xf32> -> vector<16x64xf32>
    %117 = vector.extract_strided_slice %44 {offsets = [0, 256], sizes = [16, 64], strides = [1, 1]} : vector<16x1152xf32> to vector<16x64xf32>
    %cst_38 = arith.constant 1.250000e-01 : f32
    %118 = vector.broadcast %cst_38 : f32 to vector<16x64xf32>
    %119 = arith.mulf %117, %118 : vector<16x64xf32>
    %120 = vector.extract_strided_slice %44 {offsets = [0, 640], sizes = [16, 64], strides = [1, 1]} : vector<16x1152xf32> to vector<16x64xf32>
    %121 = vector.extract_strided_slice %44 {offsets = [0, 1024], sizes = [16, 64], strides = [1, 1]} : vector<16x1152xf32> to vector<16x64xf32>
    %cst_39 = arith.constant dense<0.000000e+00> : vector<16x16xf32>
    %122 = tpu.matmul %119, %120, %cst_39 {dimension_numbers = #tpu.dot_dimension_numbers<[1], [1], [0], [0], [0, 0, 1, 0], [], []>} : vector<16x64xf32>, vector<16x64xf32>, vector<16x16xf32> -> vector<16x16xf32>
    %123 = arith.addf %122, %14 : vector<16x16xf32>
    %cst_40 = arith.constant dense<0xFF800000> : vector<16xf32>
    %124 = vector.multi_reduction <maximumf>, %123, %cst_40 [1] : vector<16x16xf32> to vector<16xf32>
    %125 = vector.shape_cast %124 : vector<16xf32> to vector<16x1xf32>
    %126 = vector.broadcast %125 : vector<16x1xf32> to vector<16x16xf32>
    %127 = arith.subf %123, %126 : vector<16x16xf32>
    %128 = math.exp %127 : vector<16x16xf32>
    %cst_41 = arith.constant dense<0.000000e+00> : vector<16xf32>
    %129 = vector.multi_reduction <add>, %128, %cst_41 [1] : vector<16x16xf32> to vector<16xf32>
    %130 = vector.shape_cast %129 : vector<16xf32> to vector<16x1xf32>
    %131 = tpu.reciprocal %130 {approx = true} : vector<16x1xf32> -> vector<16x1xf32>
    %132 = vector.broadcast %131 : vector<16x1xf32> to vector<16x16xf32>
    %133 = arith.mulf %128, %132 : vector<16x16xf32>
    %cst_42 = arith.constant dense<0.000000e+00> : vector<16x64xf32>
    %134 = tpu.matmul %133, %121, %cst_42 {dimension_numbers = #tpu.dot_dimension_numbers<[1], [0], [0], [1], [0, 0, 1, 1], [], []>} : vector<16x16xf32>, vector<16x64xf32>, vector<16x64xf32> -> vector<16x64xf32>
    %135 = vector.extract_strided_slice %44 {offsets = [0, 320], sizes = [16, 64], strides = [1, 1]} : vector<16x1152xf32> to vector<16x64xf32>
    %cst_43 = arith.constant 1.250000e-01 : f32
    %136 = vector.broadcast %cst_43 : f32 to vector<16x64xf32>
    %137 = arith.mulf %135, %136 : vector<16x64xf32>
    %138 = vector.extract_strided_slice %44 {offsets = [0, 704], sizes = [16, 64], strides = [1, 1]} : vector<16x1152xf32> to vector<16x64xf32>
    %139 = vector.extract_strided_slice %44 {offsets = [0, 1088], sizes = [16, 64], strides = [1, 1]} : vector<16x1152xf32> to vector<16x64xf32>
    %cst_44 = arith.constant dense<0.000000e+00> : vector<16x16xf32>
    %140 = tpu.matmul %137, %138, %cst_44 {dimension_numbers = #tpu.dot_dimension_numbers<[1], [1], [0], [0], [0, 0, 1, 0], [], []>} : vector<16x64xf32>, vector<16x64xf32>, vector<16x16xf32> -> vector<16x16xf32>
    %141 = arith.addf %140, %14 : vector<16x16xf32>
    %cst_45 = arith.constant dense<0xFF800000> : vector<16xf32>
    %142 = vector.multi_reduction <maximumf>, %141, %cst_45 [1] : vector<16x16xf32> to vector<16xf32>
    %143 = vector.shape_cast %142 : vector<16xf32> to vector<16x1xf32>
    %144 = vector.broadcast %143 : vector<16x1xf32> to vector<16x16xf32>
    %145 = arith.subf %141, %144 : vector<16x16xf32>
    %146 = math.exp %145 : vector<16x16xf32>
    %cst_46 = arith.constant dense<0.000000e+00> : vector<16xf32>
    %147 = vector.multi_reduction <add>, %146, %cst_46 [1] : vector<16x16xf32> to vector<16xf32>
    %148 = vector.shape_cast %147 : vector<16xf32> to vector<16x1xf32>
    %149 = tpu.reciprocal %148 {approx = true} : vector<16x1xf32> -> vector<16x1xf32>
    %150 = vector.broadcast %149 : vector<16x1xf32> to vector<16x16xf32>
    %151 = arith.mulf %146, %150 : vector<16x16xf32>
    %cst_47 = arith.constant dense<0.000000e+00> : vector<16x64xf32>
    %152 = tpu.matmul %151, %139, %cst_47 {dimension_numbers = #tpu.dot_dimension_numbers<[1], [0], [0], [1], [0, 0, 1, 1], [], []>} : vector<16x16xf32>, vector<16x64xf32>, vector<16x64xf32> -> vector<16x64xf32>
    %153 = tpu.concatenate %62, %80, %98, %116, %134, %152 in 1 : vector<16x64xf32>, vector<16x64xf32>, vector<16x64xf32>, vector<16x64xf32>, vector<16x64xf32>, vector<16x64xf32> -> vector<16x384xf32>
    %154 = arith.truncf %153 : vector<16x384xf32> to vector<16x384xbf16>
    %c0_48 = arith.constant 0 : index
    %c0_49 = arith.constant 0 : index
    %c0_50 = arith.constant 0 : index
    %155 = vector.load %arg14[%c0_48, %c0_49, %c0_50] : memref<1x384x384xbf16, #tpu.memory_space<vmem>>, vector<1x384x384xbf16>
    %156 = vector.shape_cast %155 : vector<1x384x384xbf16> to vector<384x384xbf16>
    %cst_51 = arith.constant dense<0.000000e+00> : vector<16x384xf32>
    %157 = tpu.matmul %154, %156, %cst_51 {dimension_numbers = #tpu.dot_dimension_numbers<[1], [0], [0], [1], [0, 0, 1, 1], [], []>} : vector<16x384xbf16>, vector<384x384xbf16>, vector<16x384xf32> -> vector<16x384xf32>
    %158 = vector.broadcast %7 : vector<1x384xf32> to vector<16x384xf32>
    %159 = arith.addf %157, %158 : vector<16x384xf32>
    %160 = vector.broadcast %8 : vector<1x384xf32> to vector<16x384xf32>
    %161 = arith.mulf %160, %159 : vector<16x384xf32>
    %162 = arith.addf %13, %161 : vector<16x384xf32>
    %cst_52 = arith.constant dense<0.000000e+00> : vector<16xf32>
    %163 = vector.multi_reduction <add>, %162, %cst_52 [1] : vector<16x384xf32> to vector<16xf32>
    %164 = vector.shape_cast %163 : vector<16xf32> to vector<16x1xf32>
    %cst_53 = arith.constant 3.840000e+02 : f32
    %165 = vector.broadcast %cst_53 : f32 to vector<16x1xf32>
    %166 = arith.divf %164, %165 : vector<16x1xf32>
    %167 = vector.broadcast %166 : vector<16x1xf32> to vector<16x384xf32>
    %168 = arith.subf %162, %167 : vector<16x384xf32>
    %169 = arith.mulf %168, %168 : vector<16x384xf32>
    %cst_54 = arith.constant dense<0.000000e+00> : vector<16xf32>
    %170 = vector.multi_reduction <add>, %169, %cst_54 [1] : vector<16x384xf32> to vector<16xf32>
    %171 = vector.shape_cast %170 : vector<16xf32> to vector<16x1xf32>
    %cst_55 = arith.constant 3.840000e+02 : f32
    %172 = vector.broadcast %cst_55 : f32 to vector<16x1xf32>
    %173 = arith.divf %171, %172 : vector<16x1xf32>
    %174 = vector.broadcast %166 : vector<16x1xf32> to vector<16x384xf32>
    %175 = arith.subf %162, %174 : vector<16x384xf32>
    %cst_56 = arith.constant 9.99999997E-7 : f32
    %176 = vector.broadcast %cst_56 : f32 to vector<16x1xf32>
    %177 = arith.addf %173, %176 : vector<16x1xf32>
    %178 = math.rsqrt %177 : vector<16x1xf32>
    %179 = vector.broadcast %178 : vector<16x1xf32> to vector<16x384xf32>
    %180 = arith.mulf %175, %179 : vector<16x384xf32>
    %181 = vector.broadcast %9 : vector<1x384xf32> to vector<16x384xf32>
    %182 = arith.mulf %180, %181 : vector<16x384xf32>
    %183 = vector.broadcast %10 : vector<1x384xf32> to vector<16x384xf32>
    %184 = arith.addf %182, %183 : vector<16x384xf32>
    %185 = arith.truncf %184 : vector<16x384xf32> to vector<16x384xbf16>
    %c0_57 = arith.constant 0 : index
    %c0_58 = arith.constant 0 : index
    %c0_59 = arith.constant 0 : index
    %186 = vector.load %arg15[%c0_57, %c0_58, %c0_59] : memref<1x384x1536xbf16, #tpu.memory_space<vmem>>, vector<1x384x1536xbf16>
    %187 = vector.shape_cast %186 : vector<1x384x1536xbf16> to vector<384x1536xbf16>
    %cst_60 = arith.constant dense<0.000000e+00> : vector<16x1536xf32>
    %188 = tpu.matmul %185, %187, %cst_60 {dimension_numbers = #tpu.dot_dimension_numbers<[1], [0], [0], [1], [0, 0, 1, 1], [], []>} : vector<16x384xbf16>, vector<384x1536xbf16>, vector<16x1536xf32> -> vector<16x1536xf32>
    %c0_61 = arith.constant 0 : index
    %c0_62 = arith.constant 0 : index
    %c0_63 = arith.constant 0 : index
    %189 = vector.load %arg12[%c0_61, %c0_62, %c0_63] : memref<1x1x1536xf32, #tpu.memory_space<vmem>>, vector<1x1x1536xf32>
    %190 = vector.shape_cast %189 : vector<1x1x1536xf32> to vector<1x1536xf32>
    %191 = vector.broadcast %190 : vector<1x1536xf32> to vector<16x1536xf32>
    %192 = arith.addf %188, %191 : vector<16x1536xf32>
    %cst_64 = arith.constant 5.000000e-01 : f32
    %193 = vector.broadcast %cst_64 : f32 to vector<16x1536xf32>
    %194 = arith.mulf %193, %192 : vector<16x1536xf32>
    %cst_65 = arith.constant 4.471500e-02 : f32
    %195 = vector.broadcast %cst_65 : f32 to vector<16x1536xf32>
    %196 = arith.mulf %195, %192 : vector<16x1536xf32>
    %197 = arith.mulf %196, %192 : vector<16x1536xf32>
    %198 = arith.mulf %197, %192 : vector<16x1536xf32>
    %199 = arith.addf %192, %198 : vector<16x1536xf32>
    %cst_66 = arith.constant 0.797884583 : f32
    %200 = vector.broadcast %cst_66 : f32 to vector<16x1536xf32>
    %201 = arith.mulf %200, %199 : vector<16x1536xf32>
    %202 = math.tanh %201 : vector<16x1536xf32>
    %cst_67 = arith.constant 1.000000e+00 : f32
    %203 = vector.broadcast %cst_67 : f32 to vector<16x1536xf32>
    %204 = arith.addf %203, %202 : vector<16x1536xf32>
    %205 = arith.mulf %194, %204 : vector<16x1536xf32>
    %206 = arith.truncf %205 : vector<16x1536xf32> to vector<16x1536xbf16>
    %c0_68 = arith.constant 0 : index
    %c0_69 = arith.constant 0 : index
    %c0_70 = arith.constant 0 : index
    %207 = vector.load %arg16[%c0_68, %c0_69, %c0_70] : memref<1x1536x384xbf16, #tpu.memory_space<vmem>>, vector<1x1536x384xbf16>
    %208 = vector.shape_cast %207 : vector<1x1536x384xbf16> to vector<1536x384xbf16>
    %cst_71 = arith.constant dense<0.000000e+00> : vector<16x384xf32>
    %209 = tpu.matmul %206, %208, %cst_71 {dimension_numbers = #tpu.dot_dimension_numbers<[1], [0], [0], [1], [0, 0, 1, 1], [], []>} : vector<16x1536xbf16>, vector<1536x384xbf16>, vector<16x384xf32> -> vector<16x384xf32>
    %210 = vector.broadcast %11 : vector<1x384xf32> to vector<16x384xf32>
    %211 = arith.addf %209, %210 : vector<16x384xf32>
    %212 = vector.broadcast %12 : vector<1x384xf32> to vector<16x384xf32>
    %213 = arith.mulf %212, %211 : vector<16x384xf32>
    %214 = arith.addf %162, %213 : vector<16x384xf32>
    %c0_72 = arith.constant 0 : index
    %c0_73 = arith.constant 0 : index
    %215 = vector.load %arg18[%c0_72, %c0_73] : memref<16x384xf32, #tpu.memory_space<vmem>>, vector<16x384xf32>
    tpu.vector_store %arg18[%c0_72, %c0_73], %214 {strides = array<i32>} : memref<16x384xf32, #tpu.memory_space<vmem>>, vector<16x384xf32>,
    %c11_i32 = arith.constant 11 : i32
    %216 = arith.cmpi eq, %arg0, %c11_i32 : i32
    %217 = arith.extui %216 : i1 to i32
    %c0_i32_74 = arith.constant 0 : i32
    %218 = arith.cmpi ne, %217, %c0_i32_74 : i32
    scf.if %218 {
      %c0_75 = arith.constant 0 : index
      %c0_76 = arith.constant 0 : index
      %219 = vector.load %arg6[%c0_75, %c0_76] : memref<1x384xf32, #tpu.memory_space<vmem>>, vector<1x384xf32>
      %c0_77 = arith.constant 0 : index
      %c0_78 = arith.constant 0 : index
      %220 = vector.load %arg7[%c0_77, %c0_78] : memref<1x384xf32, #tpu.memory_space<vmem>>, vector<1x384xf32>
      %cst_79 = arith.constant dense<0.000000e+00> : vector<16xf32>
      %221 = vector.multi_reduction <add>, %214, %cst_79 [1] : vector<16x384xf32> to vector<16xf32>
      %222 = vector.shape_cast %221 : vector<16xf32> to vector<16x1xf32>
      %cst_80 = arith.constant 3.840000e+02 : f32
      %223 = vector.broadcast %cst_80 : f32 to vector<16x1xf32>
      %224 = arith.divf %222, %223 : vector<16x1xf32>
      %225 = vector.broadcast %224 : vector<16x1xf32> to vector<16x384xf32>
      %226 = arith.subf %214, %225 : vector<16x384xf32>
      %227 = arith.mulf %226, %226 : vector<16x384xf32>
      %cst_81 = arith.constant dense<0.000000e+00> : vector<16xf32>
      %228 = vector.multi_reduction <add>, %227, %cst_81 [1] : vector<16x384xf32> to vector<16xf32>
      %229 = vector.shape_cast %228 : vector<16xf32> to vector<16x1xf32>
      %cst_82 = arith.constant 3.840000e+02 : f32
      %230 = vector.broadcast %cst_82 : f32 to vector<16x1xf32>
      %231 = arith.divf %229, %230 : vector<16x1xf32>
      %232 = vector.broadcast %224 : vector<16x1xf32> to vector<16x384xf32>
      %233 = arith.subf %214, %232 : vector<16x384xf32>
      %cst_83 = arith.constant 9.99999997E-7 : f32
      %234 = vector.broadcast %cst_83 : f32 to vector<16x1xf32>
      %235 = arith.addf %231, %234 : vector<16x1xf32>
      %236 = math.rsqrt %235 : vector<16x1xf32>
      %237 = vector.broadcast %236 : vector<16x1xf32> to vector<16x384xf32>
      %238 = arith.mulf %233, %237 : vector<16x384xf32>
      %239 = vector.broadcast %219 : vector<1x384xf32> to vector<16x384xf32>
      %240 = arith.mulf %238, %239 : vector<16x384xf32>
      %241 = vector.broadcast %220 : vector<1x384xf32> to vector<16x384xf32>
      %242 = arith.addf %240, %241 : vector<16x384xf32>
      %243 = arith.truncf %242 : vector<16x384xf32> to vector<16x384xbf16>
      %c0_84 = arith.constant 0 : index
      %c0_85 = arith.constant 0 : index
      %244 = vector.load %arg8[%c0_84, %c0_85] : memref<384x128xbf16, #tpu.memory_space<vmem>>, vector<384x128xbf16>
      %cst_86 = arith.constant dense<0.000000e+00> : vector<16x128xf32>
      %245 = tpu.matmul %243, %244, %cst_86 {dimension_numbers = #tpu.dot_dimension_numbers<[1], [0], [0], [1], [0, 0, 1, 1], [], []>} : vector<16x384xbf16>, vector<384x128xbf16>, vector<16x128xf32> -> vector<16x128xf32>
      %c0_87 = arith.constant 0 : index
      %c0_88 = arith.constant 0 : index
      %246 = vector.load %arg9[%c0_87, %c0_88] : memref<1x128xf32, #tpu.memory_space<vmem>>, vector<1x128xf32>
      %247 = vector.broadcast %246 : vector<1x128xf32> to vector<16x128xf32>
      %248 = arith.addf %245, %247 : vector<16x128xf32>
      %c0_89 = arith.constant 0 : index
      %c0_90 = arith.constant 0 : index
      %249 = vector.load %arg17[%c0_89, %c0_90] : memref<16x128xf32, #tpu.memory_space<vmem>>, vector<16x128xf32>
      tpu.vector_store %arg17[%c0_89, %c0_90], %248 {strides = array<i32>} : memref<16x128xf32, #tpu.memory_space<vmem>>, vector<16x128xf32>,
    } else {
    }
    return
  }
  func.func @transform_0(%arg0: i32) -> (i32, i32) {
    %c0_i32 = arith.constant 0 : i32
    %c0_i32_0 = arith.constant 0 : i32
    %c0_i32_1 = arith.constant 0 : i32
    return %c0_i32, %c0_i32_0 : i32, i32
  }
  func.func @transform_1(%arg0: i32) -> (i32, i32) {
    %c0_i32 = arith.constant 0 : i32
    %c0_i32_0 = arith.constant 0 : i32
    %c0_i32_1 = arith.constant 0 : i32
    return %c0_i32, %c0_i32_0 : i32, i32
  }
  func.func @transform_2(%arg0: i32) -> (i32, i32) {
    %c0_i32 = arith.constant 0 : i32
    %c0_i32_0 = arith.constant 0 : i32
    %c0_i32_1 = arith.constant 0 : i32
    return %c0_i32, %c0_i32_0 : i32, i32
  }
  func.func @transform_3(%arg0: i32) -> (i32, i32) {
    %c0_i32 = arith.constant 0 : i32
    %c0_i32_0 = arith.constant 0 : i32
    %c0_i32_1 = arith.constant 0 : i32
    return %c0_i32, %c0_i32_0 : i32, i32
  }
  func.func @transform_4(%arg0: i32) -> (i32, i32) {
    %c0_i32 = arith.constant 0 : i32
    %c0_i32_0 = arith.constant 0 : i32
    %c0_i32_1 = arith.constant 0 : i32
    return %c0_i32, %c0_i32_0 : i32, i32
  }
  func.func @transform_5(%arg0: i32) -> (i32, i32) {
    %c0_i32 = arith.constant 0 : i32
    %c0_i32_0 = arith.constant 0 : i32
    %c0_i32_1 = arith.constant 0 : i32
    return %c0_i32, %c0_i32_0 : i32, i32
  }
  func.func @transform_6(%arg0: i32) -> (i32, i32) {
    %c0_i32 = arith.constant 0 : i32
    %c0_i32_0 = arith.constant 0 : i32
    %c0_i32_1 = arith.constant 0 : i32
    return %c0_i32, %c0_i32_0 : i32, i32
  }
  func.func @transform_7(%arg0: i32) -> (i32, i32) {
    %c0_i32 = arith.constant 0 : i32
    %c0_i32_0 = arith.constant 0 : i32
    %c0_i32_1 = arith.constant 0 : i32
    return %c0_i32, %c0_i32_0 : i32, i32
  }
  func.func @transform_8(%arg0: i32) -> (i32, i32) {
    %c0_i32 = arith.constant 0 : i32
    %c0_i32_0 = arith.constant 0 : i32
    %c0_i32_1 = arith.constant 0 : i32
    return %c0_i32, %c0_i32_0 : i32, i32
  }
  func.func @transform_9(%arg0: i32) -> (i32, i32, i32) {
    %c0_i32 = arith.constant 0 : i32
    %c0_i32_0 = arith.constant 0 : i32
    %c0_i32_1 = arith.constant 0 : i32
    return %arg0, %c0_i32, %c0_i32_0 : i32, i32, i32
  }
  func.func @transform_10(%arg0: i32) -> (i32, i32, i32) {
    %c0_i32 = arith.constant 0 : i32
    %c0_i32_0 = arith.constant 0 : i32
    %c0_i32_1 = arith.constant 0 : i32
    return %arg0, %c0_i32, %c0_i32_0 : i32, i32, i32
  }
  func.func @transform_11(%arg0: i32) -> (i32, i32, i32) {
    %c0_i32 = arith.constant 0 : i32
    %c0_i32_0 = arith.constant 0 : i32
    %c0_i32_1 = arith.constant 0 : i32
    return %arg0, %c0_i32, %c0_i32_0 : i32, i32, i32
  }
  func.func @transform_12(%arg0: i32) -> (i32, i32, i32) {
    %c0_i32 = arith.constant 0 : i32
    %c0_i32_0 = arith.constant 0 : i32
    %c0_i32_1 = arith.constant 0 : i32
    return %arg0, %c0_i32, %c0_i32_0 : i32, i32, i32
  }
  func.func @transform_13(%arg0: i32) -> (i32, i32, i32) {
    %c0_i32 = arith.constant 0 : i32
    %c0_i32_0 = arith.constant 0 : i32
    %c0_i32_1 = arith.constant 0 : i32
    return %arg0, %c0_i32, %c0_i32_0 : i32, i32, i32
  }
  func.func @transform_14(%arg0: i32) -> (i32, i32, i32) {
    %c0_i32 = arith.constant 0 : i32
    %c0_i32_0 = arith.constant 0 : i32
    %c0_i32_1 = arith.constant 0 : i32
    return %arg0, %c0_i32, %c0_i32_0 : i32, i32, i32
  }
  func.func @transform_15(%arg0: i32) -> (i32, i32, i32) {
    %c0_i32 = arith.constant 0 : i32
    %c0_i32_0 = arith.constant 0 : i32
    %c0_i32_1 = arith.constant 0 : i32
    return %arg0, %c0_i32, %c0_i32_0 : i32, i32, i32
  }
  func.func @transform_16(%arg0: i32) -> (i32, i32) {
    %c0_i32 = arith.constant 0 : i32
    %c0_i32_0 = arith.constant 0 : i32
    %c0_i32_1 = arith.constant 0 : i32
    return %c0_i32, %c0_i32_0 : i32, i32
  }
}

</mosaic_0001>

<bundles_post_ra>
// kernel: forward.1
= control target key start
LH: loop header
LB: loop body
LE: loop exit
PB: predicated region body
PF: predicated region fallthrough
CT: control target
= control target key end

     0   :  { %s17796_s0 = inlined_call_operand.vmem [shape: f32[8,640], index: 0, kind: input, shape index: {}]   ;;  %s17797_s1 = inlined_call_operand.hbm [shape: bf16[640,384], index: 1, kind: input, shape index: {}]   ;;  %s17798_s2 = inlined_call_operand.hbm [shape: f32[1,384], index: 2, kind: input, shape index: {}]   ;;  %s17799_s3 = inlined_call_operand.hbm [shape: f32[5,384], index: 3, kind: input, shape index: {}]   ;;  %s17800_s4 = inlined_call_operand.vmem [shape: f32[16,16], index: 4, kind: input, shape index: {}]   ;;  %s17801_s5 = inlined_call_operand.hbm [shape: f32[1,384], index: 5, kind: input, shape index: {}]   ;;  %s17802_s6 = inlined_call_operand.hbm [shape: f32[1,384], index: 6, kind: input, shape index: {}]   ;;  %s17803_s7 = inlined_call_operand.hbm [shape: bf16[384,128], index: 7, kind: input, shape index: {}]   ;;  %s17804_s8 = inlined_call_operand.hbm [shape: f32[1,128], index: 8, kind: input, shape index: {}]   ;;  %s17805_s9 = inlined_call_operand.hbm [shape: f32[12,8,384], index: 9, kind: input, shape index: {}]   ;;  %s17806_s10 = inlined_call_operand.hbm [shape: f32[12,1,1152], index: 10, kind: input, shape index: {}]   ;;  %s17807_s11 = inlined_call_operand.hbm [shape: f32[12,1,1536], index: 11, kind: input, shape index: {}]   ;;  %s17808_s12 = inlined_call_operand.hbm [shape: bf16[12,384,1152], index: 12, kind: input, shape index: {}]   ;;  %s17809_s13 = inlined_call_operand.hbm [shape: bf16[12,384,384], index: 13, kind: input, shape index: {}]   ;;  %s17810_s14 = inlined_call_operand.hbm [shape: bf16[12,384,1536], index: 14, kind: input, shape index: {}]   ;;  %s17811_s15 = inlined_call_operand.hbm [shape: bf16[12,1536,384], index: 15, kind: input, shape index: {}]   ;;  %s17812_s16 = inlined_call_operand.vmem [shape: f32[16,128], index: 16, kind: output, shape index: {}]  }
   0x1   :  { %17837 = sst [smem:[#allocation37_spill]] %s17796_s0 }
   0x2   :  { %17838 = sst [smem:[#allocation38_spill]] %s17798_s2 }
   0x3   :  { %17839 = sst [smem:[#allocation39_spill]] %s17800_s4 }
   0x4   :  { %17840 = sst [smem:[#allocation40_spill]] %s17801_s5 }
   0x5   :  { %17841 = sst [smem:[#allocation41_spill]] %s17803_s7 }
   0x6   :  { %17842 = sst [smem:[#allocation42_spill]] %s17805_s9 }
   0x7   :  { %17843 = sst [smem:[#allocation43_spill]] %s17807_s11 }
   0x8   :  { %17844 = sst [smem:[#allocation44_spill]] %s17809_s13 }
   0x9   :  { %17845 = sst [smem:[#allocation45_spill]] %s17810_s14 }
   0xa   :  { %17846 = sst [smem:[#allocation46_spill]] %s17811_s15 }
   0xb   :  { %17847 = sst [smem:[#allocation47_spill]] %s17812_s16 }
   0xc   :  { %21 = vsyncpa [#allocation4], 0 }
   0xd   :  { %22 = vsyncpa [#allocation6], 0 }
   0xe   :  { %23 = vsyncpa [#allocation9], 0 }
   0xf   :  { %24 = vsyncpa [#allocation12], 0 }
  0x10   :  { %25 = vsyncpa [#allocation15], 0 }
  0x11   :  { %27 = vsyncpa [#allocation15 + $0x1], 0 }
  0x12   :  { %28 = vsyncpa [#allocation18], 0 }
  0x13   :  { %30 = vsyncpa [#allocation18 + $0x1], 0 }
  0x14   :  { %31 = vsyncpa [#allocation21], 0 }
  0x15   :  { %33 = vsyncpa [#allocation21 + $0x1], 0 }
  0x16   :  { %34 = vsyncpa [#allocation24], 0 }
  0x17   :  { %36 = vsyncpa [#allocation24 + $0x1], 0  ;;  %s15573_s21 = smov 0   ;;  %s15575_s22 = smov 0  }
  0x18   :  { %s15577_s23 = smov 0   ;;  %s15579_s24 = smov 0  }
  0x19 LB: > { %17848 = sst [smem:[#allocation33_spill]] %s15451_s23  ;;  %s15457_s25 = smov [#allocation5]   ;;  %s15455_s24 = sphi %s15579_s24, %s17896_s24   ;;  %s15451_s23 = sphi %s15577_s23, %s17898_s23   ;;  %s15447_s22 = sphi %s15575_s22, %s17900_s22   ;;  %s15443_s21 = sphi %s15573_s21, %s17899_s21  }
  0x1a   : > { %s468_s26 = sshll.u32 %s15457_s25, 4  ;;  %s15594_s27 = sadd.s32 4294967295, %s15455_s24   ;;  %s469_s26 = int_to_ptr.vmem [resolvable:$true] %s468_s26 }
  0x1b   : > { %p11493_p0 = scmp.ge.s32.totalorder %s15455_s24, 1  ;;  %p17817_p1 = scmp.eq.s32.totalorder %s15594_s27, 0 }
  0x1c   : > { %p439_p2 = scmp.lt.s32.totalorder %s15455_s24, 13  ;;  %s15458_s29 = smov [#allocation8]  }
  0x1d   : > { %s493_s30 = sshll.u32 %s15458_s29, 4  ;;  %s15459_s0 = smov [#allocation11]   ;;  %s15606_s30 = int_to_ptr.vmem [resolvable:$true] %s493_s30 }
  0x1e   : > { %p15600_p4 = pnand %p11493_p0, %p439_p2  ;;  %s514_s17 = sshll.u32 %s15459_s0, 4  ;;  %s15614_s17 = int_to_ptr.vmem [resolvable:$true] %s514_s17 }
  0x1f   : > { %s17852_s2 = sld [smem:[#allocation38_spill]] }
  0x20   : > { %s17849_s28 = scalar_select %p15600_p4, 1, 0 }
  0x21   : > { %p13299_p5 = pneg %p15600_p4 }
  0x22   : > { %17850 = sst [smem:[#allocation34_spill]] %s17849_s28 }
  0x23   : > { %p15610_p6 = pnand %p13299_p5, %p17817_p1 }
  0x25   : > { %s17851_s18 = scalar_select %p15610_p6, 1, 0 }
  0x26   : > { %s14987_s25 = scalar_lea.hbm %s17852_s2, 48  ;;  %p15624_p8 = pneg %p15610_p6 }
  0x27   : > { %p14988_p7 = scmp.ne.s32.totalorder %s17852_s2, %s14987_s25  ;;  %p14994_p11 = scmp.lt.u32.totalorder %s14987_s25, %s17852_s2 }
  0x28   : > { %s17853_s29 = scalar_select %p15624_p8, 1, 0 }
  0x29   : > { %p14990_p9 = pnand %p15624_p8, %p14988_p7 }
  0x2b   : > { %p14991_p10 = pneg %p14990_p9 }
  0x2d   : > { %p14996_p12 = pnand %p14994_p11, %p14991_p10 }
  0x2f   : > { %14999 = shalt.err (!%p14996_p12)
}
  0x30   : > { %s15000_s19 = scalar_lea.vmem %s469_s26, 48  ;;  %s15007_s4 = scalar_lea.vmem %s469_s26, 64 }
  0x31   : > { %p15001_p13 = scmp.ne.s32.totalorder %s469_s26, %s15000_s19  ;;  %p15008_p5 = scmp.lt.s32.totalorder %s469_s26, %s469_s26 }
  0x32   : > { %p15009_p3 = scmp.lt.s32.totalorder %s15007_s4, %s15000_s19 }
  0x33   : > { %p15003_p0 = pnand %p15001_p13, %p15624_p8 }
  0x34   : > { %p15010_p1 = por %p15009_p3, %p15008_p5 }
  0x35   : > { %p15004_p2 = pneg %p15003_p0 }
  0x37   : > { %p15011_p4 = pnand %p15010_p1, %p15004_p2 }
  0x39   : > { %15014 = shalt.err (!%p15011_p4)
}
  0x3a   : > { %13305 = dma.hbm_to_vmem [thread:$0]  (!%p15610_p6), %s17852_s2, 48, %s469_s26, [#allocation6]  }
  0x3b   : > { %s17854_s5 = sld [smem:[#allocation40_spill]] }
  0x41   : > { %s15015_s0 = scalar_lea.hbm %s17854_s5, 48 }
  0x42   : > { %p15016_p7 = scmp.ne.s32.totalorder %s17854_s5, %s15015_s0  ;;  %p15022_p1 = scmp.lt.u32.totalorder %s15015_s0, %s17854_s5 }
  0x44   : > { %p15018_p9 = pnand %p15016_p7, %p15624_p8 }
  0x46   : > { %p15019_p3 = pneg %p15018_p9 }
  0x48   : > { %p15024_p4 = pnand %p15022_p1, %p15019_p3 }
  0x4a   : > { %15027 = shalt.err (!%p15024_p4)
}
  0x4b   : > { %s15028_s26 = scalar_lea.vmem %s15606_s30, 48  ;;  %s15035_s14 = scalar_lea.vmem %s15606_s30, 64 }
  0x4c   : > { %p15029_p10 = scmp.ne.s32.totalorder %s15606_s30, %s15028_s26  ;;  %p15036_p13 = scmp.lt.s32.totalorder %s15606_s30, %s15606_s30 }
  0x4d   : > { %p15037_p0 = scmp.lt.s32.totalorder %s15035_s14, %s15028_s26 }
  0x4e   : > { %p15031_p11 = pnand %p15029_p10, %p15624_p8 }
  0x4f   : > { %p15038_p2 = por %p15037_p0, %p15036_p13 }
  0x50   : > { %p15032_p12 = pneg %p15031_p11 }
  0x52   : > { %p15039_p5 = pnand %p15038_p2, %p15032_p12 }
  0x54   : > { %15042 = shalt.err (!%p15039_p5)
}
  0x55   : > { %13311 = dma.hbm_to_vmem [thread:$0]  (!%p15610_p6), %s17854_s5, 48, %s15606_s30, [#allocation9]  }
  0x56   : > { %s17855_s7 = sld [smem:[#allocation41_spill]] }
  0x5c   : > { %s15043_s25 = scalar_lea.hbm %s17855_s7, 3072 }
  0x5d   : > { %p15044_p7 = scmp.ne.s32.totalorder %s17855_s7, %s15043_s25  ;;  %p15050_p1 = scmp.lt.u32.totalorder %s15043_s25, %s17855_s7 }
  0x5f   : > { %p15046_p9 = pnand %p15044_p7, %p15624_p8 }
  0x61   : > { %p15047_p3 = pneg %p15046_p9 }
  0x63   : > { %p15052_p4 = pnand %p15050_p1, %p15047_p3 }
  0x65   : > { %15055 = shalt.err (!%p15052_p4)
}
  0x66   : > { %s15056_s30 = scalar_lea.vmem %s15614_s17, 3072  ;;  %p15064_p13 = scmp.lt.s32.totalorder %s15614_s17, %s15614_s17 }
  0x67   : > { %p15057_p10 = scmp.ne.s32.totalorder %s15614_s17, %s15056_s30  ;;  %p15065_p0 = scmp.lt.s32.totalorder %s15056_s30, %s15056_s30 }
  0x69   : > { %p15059_p11 = pnand %p15057_p10, %p15624_p8  ;;  %p15066_p2 = por %p15065_p0, %p15064_p13 }
  0x6b   : > { %p15060_p12 = pneg %p15059_p11 }
  0x6d   : > { %p15067_p5 = pnand %p15066_p2, %p15060_p12 }
  0x6f   : > { %15070 = shalt.err (!%p15067_p5)
}
  0x70   : > { %s15460_s14 = smov 64   ;;  %s15461_s15 = smov 4  }
  0x71   : > { %13317 = dma.hbm_to_vmem [thread:$0]  (!%p15610_p6), %s17855_s7, 3072, %s15614_s17, [#allocation12], %s15460_s14, %s15460_s14, %s15461_s15  }
  0x72   : > { %s15688_s28 = sadd.s32 1, %s15455_s24   ;;  %s238_s0 = sadd.s32 1, %s15451_s23 }
  0x73   : > { %17856 = sst [smem:[#allocation35_spill]] %s15688_s28  ;;  %s235_s25 = ssub.s32 %s15455_s24, %s15688_s28 }
  0x74   : > { %p236_p7 = scmp.eq.s32.totalorder %s235_s25, 0  ;;  %p245_p9 = scmp.ne.s32.totalorder %s15451_s23, %s15447_s22 }
  0x75   : > { %p246_p3 = scmp.eq.s32.totalorder %s15455_s24, 0  ;;  %p251_p1 = scmp.ne.s32.totalorder %s15447_s22, %s15443_s21 }
  0x76   : > { %s15699_s19 = scalar_select %p236_p7, %s15451_s23, %s238_s0  }
  0x77   : > { %p247_p4 = por %p246_p3, %p245_p9  ;;  %p17858_p10 = scmp.eq.s32.totalorder %s15594_s27, 0 }
  0x78   : > { %17857 = sst [smem:[#allocation36_spill]] %s15699_s19  ;;  %p13350_p12 = scmp.lt.s32.totalorder %s15455_s24, 12 }
  0x79   : > { %p15703_p11 = por %p17858_p10, %p251_p1  ;;  %s15709_s17 = sand.u32 1, %s15455_s24  }
  0x7a   : > { %s15712_s26 = sand.u32 1, %s15451_s23   ;;  %p15715_p13 = pnand %p13350_p12, %p247_p4 }
  0x7b   : > { %s17859_s4 = scalar_select %p15703_p11, 1, 0 }
  0x7c   : > { %s13237_s30 = smul.u32 24, %s15712_s26  ;;  %s17861_s9 = sld [smem:[#allocation42_spill]] }
  0x7d   : > { %s17860_s14 = scalar_select %p15715_p13, 1, 0 }
  0x7e   : > { %s13238_s21 = smul.u32 384, %s15455_s24  ;;  %s543_s25 = scalar_lea.vmem [#allocation14], %s13237_s30 }
  0x7f   : > { %s551_s0 = sshll.u32 %s543_s25, 4  ;;  %p15732_p2 = pneg %p15715_p13  ;;  %s15725_s0 = int_to_ptr.vmem [resolvable:$true] %s551_s0 }
  0x81   : > { %s17862_s7 = scalar_select %p15732_p2, 1, 0 }
  0x82   : > { %s15723_s20 = scalar_lea.hbm %s17861_s9, %s13238_s21  ;;  %s15076_s16 = scalar_lea.hbm %s17861_s9, 4608 }
  0x83   : > { %s15071_s5 = scalar_lea.hbm %s15723_s20, 384  ;;  %p15077_p9 = scmp.lt.u32.totalorder %s15723_s20, %s17861_s9 }
  0x84   : > { %p15072_p0 = scmp.ne.s32.totalorder %s15723_s20, %s15071_s5  ;;  %p15078_p3 = scmp.lt.u32.totalorder %s15076_s16, %s15071_s5 }
  0x85   : > { %p15080_p4 = scmp.lt.u32.totalorder %s15071_s5, %s15723_s20 }
  0x86   : > { %p15074_p5 = pnand %p15732_p2, %p15072_p0  ;;  %p15079_p1 = por %p15078_p3, %p15077_p9 }
  0x88   : > { %p15075_p7 = pneg %p15074_p5  ;;  %p15081_p10 = por %p15080_p4, %p15079_p1 }
  0x8a   : > { %p15082_p12 = pnand %p15081_p10, %p15075_p7 }
  0x8c   : > { %15085 = shalt.err (!%p15082_p12)
}
  0x8d   : > { %s15086_s2 = scalar_lea.vmem %s15725_s0, 384  ;;  %s15462_s21 = smov [#allocation14]  }
  0x8e   : > { %p15087_p0 = scmp.ne.s32.totalorder %s15725_s0, %s15086_s2  ;;  %s15091_s15 = sshll.u32 %s15462_s21, 4  ;;  %s15092_s15 = int_to_ptr.vmem [resolvable:$false] %s15091_s15 }
  0x8f   : > { %s15093_s30 = scalar_lea.vmem %s15092_s15, 768  ;;  %p15094_p6 = scmp.lt.s32.totalorder %s15725_s0, %s15092_s15 }
  0x90   : > { %p15089_p5 = pnand %p15087_p0, %p15732_p2  ;;  %p15095_p8 = scmp.lt.s32.totalorder %s15093_s30, %s15086_s2 }
  0x92   : > { %p15090_p11 = pneg %p15089_p5  ;;  %p15096_p9 = por %p15095_p8, %p15094_p6 }
  0x94   : > { %p15097_p3 = pnand %p15096_p9, %p15090_p11 }
  0x96   : > { %15100 = shalt.err (!%p15097_p3)
}
  0x97   : > { %s17863_s5 = scalar_lea.sflag [#allocation15], %s15709_s17  ;;  %s13241_s16 = smul.u32 12, %s15712_s26 }
  0x98   : > { %13324 = dma.hbm_to_vmem [thread:$0]  (!%p15715_p13), %s15723_s20, 384, %s15725_s0, %s17863_s5  }
  0x99   : > { %s13242_s25 = smul.u32 192, %s15455_s24  ;;  %s17864_s11 = sld [smem:[#allocation43_spill]] }
  0x9a   : > { %s13245_s21 = smul.u32 576, %s15712_s26  ;;  %s581_s9 = scalar_lea.vmem [#allocation17], %s13241_s16 }
  0x9b   : > { %s589_s19 = sshll.u32 %s581_s9, 4  ;;  %s17831_s23 = scalar_lea.sflag [#allocation18], %s15709_s17  ;;  %s590_s19 = int_to_ptr.vmem [resolvable:$true] %s589_s19 }
  0x9f   : > { %s15763_s30 = scalar_lea.hbm %s17864_s11, %s13242_s25  ;;  %s15106_s5 = scalar_lea.hbm %s17864_s11, 2304 }
  0xa0   : > { %s15101_s28 = scalar_lea.hbm %s15763_s30, 192  ;;  %p15107_p7 = scmp.lt.u32.totalorder %s15763_s30, %s17864_s11 }
  0xa1   : > { %p15102_p6 = scmp.ne.s32.totalorder %s15763_s30, %s15101_s28  ;;  %p15108_p1 = scmp.lt.u32.totalorder %s15106_s5, %s15101_s28 }
  0xa2   : > { %p15110_p10 = scmp.lt.u32.totalorder %s15101_s28, %s15763_s30 }
  0xa3   : > { %p15104_p8 = pnand %p15102_p6, %p15732_p2  ;;  %p15109_p4 = por %p15108_p1, %p15107_p7 }
  0xa5   : > { %p15105_p11 = pneg %p15104_p8  ;;  %p15111_p12 = por %p15110_p10, %p15109_p4 }
  0xa7   : > { %p15112_p0 = pnand %p15111_p12, %p15105_p11 }
  0xa9   : > { %15115 = shalt.err (!%p15112_p0)
}
  0xaa   : > { %s15116_s9 = scalar_lea.vmem %s590_s19, 192  ;;  %s15463_s16 = smov [#allocation17]  }
  0xab   : > { %p15117_p5 = scmp.ne.s32.totalorder %s590_s19, %s15116_s9  ;;  %s15121_s2 = sshll.u32 %s15463_s16, 4  ;;  %s15122_s2 = int_to_ptr.vmem [resolvable:$false] %s15121_s2 }
  0xac   : > { %s15123_s20 = scalar_lea.vmem %s15122_s2, 384  ;;  %p15124_p6 = scmp.lt.s32.totalorder %s590_s19, %s15122_s2 }
  0xad   : > { %p15119_p9 = pnand %p15117_p5, %p15732_p2  ;;  %p15125_p8 = scmp.lt.s32.totalorder %s15123_s20, %s15116_s9 }
  0xaf   : > { %p15120_p3 = pneg %p15119_p9  ;;  %p15126_p13 = por %p15125_p8, %p15124_p6 }
  0xb1   : > { %p15127_p1 = pnand %p15126_p13, %p15120_p3 }
  0xb3   : > { %15130 = shalt.err (!%p15127_p1)
}
  0xb4   : > { %p17865_p7 = scmp.ne.s32.totalorder %s17860_s14, 0  ;;  %s13246_s28 = smul.u32 9216, %s15455_s24 }
  0xb5   : > { %s621_s0 = scalar_lea.vmem [#allocation20], %s13245_s21  ;;  %s17866_s13 = sld [smem:[#allocation44_spill]] }
  0xb6   : > { %13330 = dma.hbm_to_vmem [thread:$0]  (!%p17865_p7), %s15763_s30, 192, %s590_s19, %s17831_s23  }
  0xb7   : > { %s628_s5 = sshll.u32 %s621_s0, 4  ;;  %s15464_s16 = smov [#allocation3]   ;;  %s15788_s5 = int_to_ptr.vmem [resolvable:$true] %s628_s5 }
  0xb8   : > { %s15795_s2 = sshll.u32 %s15464_s16, 4  ;;  %s17833_s20 = scalar_lea.sflag [#allocation21], %s15709_s17  ;;  %s455_s2 = int_to_ptr.vmem [resolvable:$true] %s15795_s2 }
  0xbb   : > { %s15793_s9 = scalar_lea.hbm %s17866_s13, %s13246_s28  ;;  %s15136_s0 = scalar_lea.hbm %s17866_s13, 110592 }
  0xbc   : > { %s15131_s19 = scalar_lea.hbm %s15793_s9, 9216  ;;  %p15137_p10 = scmp.lt.u32.totalorder %s15793_s9, %s17866_s13 }
  0xbd   : > { %p15132_p13 = scmp.ne.s32.totalorder %s15793_s9, %s15131_s19  ;;  %p15138_p12 = scmp.lt.u32.totalorder %s15136_s0, %s15131_s19 }
  0xbe   : > { %p15140_p5 = scmp.lt.u32.totalorder %s15131_s19, %s15793_s9 }
  0xbf   : > { %p15134_p11 = pnand %p15132_p13, %p15732_p2  ;;  %p15139_p0 = por %p15138_p12, %p15137_p10 }
  0xc1   : > { %p15135_p4 = pneg %p15134_p11  ;;  %p15141_p9 = por %p15140_p5, %p15139_p0 }
  0xc3   : > { %p15142_p3 = pnand %p15141_p9, %p15135_p4 }
  0xc5   : > { %15145 = shalt.err (!%p15142_p3)
}
  0xc6   : > { %s15146_s25 = scalar_lea.vmem %s15788_s5, 9216  ;;  %s15465_s16 = smov [#allocation20]  }
  0xc7   : > { %p15147_p6 = scmp.ne.s32.totalorder %s15788_s5, %s15146_s25  ;;  %s15151_s21 = sshll.u32 %s15465_s16, 4  ;;  %s15152_s21 = int_to_ptr.vmem [resolvable:$false] %s15151_s21 }
  0xc8   : > { %s15153_s30 = scalar_lea.vmem %s15152_s21, 18432  ;;  %p15154_p13 = scmp.lt.s32.totalorder %s15788_s5, %s15152_s21 }
  0xc9   : > { %p15149_p8 = pnand %p15147_p6, %p15732_p2  ;;  %p15155_p11 = scmp.lt.s32.totalorder %s15153_s30, %s15146_s25 }
  0xcb   : > { %p15150_p1 = pneg %p15149_p8  ;;  %p15156_p10 = por %p15155_p11, %p15154_p13 }
  0xcd   : > { %p15157_p12 = pnand %p15156_p10, %p15150_p1 }
  0xcf   : > { %15160 = shalt.err (!%p15157_p12)
}
  0xd0   : > { %s17836_s19 = smov 192   ;;  %s15467_s0 = smov 12  }
  0xd1   : > { %13336 = dma.hbm_to_vmem [thread:$0]  (!%p17865_p7), %s15793_s9, 9216, %s15788_s5, %s17833_s20, %s17836_s19, %s17836_s19, %s15467_s0  }
  0xd2   : > { %s15161_s25 = scalar_lea.hbm %s17797_s1, 15360  ;;  %p17867_p0 = scmp.ne.s32.totalorder %s17853_s29, 0 }
  0xd3   : > { %p15162_p4 = scmp.ne.s32.totalorder %s17797_s1, %s15161_s25  ;;  %p15168_p3 = scmp.lt.u32.totalorder %s15161_s25, %s17797_s1 }
  0xd5   : > { %p15164_p5 = pnand %p15162_p4, %p17867_p0 }
  0xd7   : > { %p15165_p9 = pneg %p15164_p5 }
  0xd9   : > { %p15170_p6 = pnand %p15168_p3, %p15165_p9 }
  0xdb   : > { %15173 = shalt.err (!%p15170_p6)
}
  0xdc   : > { %s15174_s11 = scalar_lea.vmem %s455_s2, 15360  ;;  %p15182_p11 = scmp.lt.s32.totalorder %s455_s2, %s455_s2 }
  0xdd   : > { %p15175_p8 = scmp.ne.s32.totalorder %s455_s2, %s15174_s11  ;;  %p15183_p10 = scmp.lt.s32.totalorder %s15174_s11, %s15174_s11 }
  0xdf   : > { %p15177_p1 = pnand %p15175_p8, %p17867_p0  ;;  %p15184_p12 = por %p15183_p10, %p15182_p11 }
  0xe1   : > { %p15178_p13 = pneg %p15177_p1 }
  0xe3   : > { %p15185_p7 = pnand %p15184_p12, %p15178_p13 }
  0xe5   : > { %15188 = shalt.err (!%p15185_p7)
}
  0xe6   : > { %p17868_p4 = scmp.ne.s32.totalorder %s17851_s18, 0  ;;  %s15468_s9 = smov [#allocation7]  }
  0xe7   : > { %s479_s15 = sshll.u32 %s15468_s9, 4  ;;  %s15469_s28 = smov [#allocation10]   ;;  %s480_s15 = int_to_ptr.vmem [resolvable:$true] %s479_s15 }
  0xe8   : > { %13302 = dma.hbm_to_vmem [thread:$0]  (!%p17868_p4), %s17797_s1, 15360, %s455_s2, [#allocation4], %s17836_s19, %s17836_s19, %s15467_s0  }
  0xe9   : > { %s504_s25 = sshll.u32 %s15469_s28, 4  ;;  %s15189_s21 = scalar_lea.hbm %s17799_s3, 384  ;;  %s505_s25 = int_to_ptr.vmem [resolvable:$true] %s504_s25 }
  0xea   : > { %p15190_p7 = scmp.ne.s32.totalorder %s17799_s3, %s15189_s21  ;;  %p15196_p3 = scmp.lt.u32.totalorder %s15189_s21, %s17799_s3 }
  0xec   : > { %p15192_p5 = pnand %p15190_p7, %p17867_p0 }
  0xee   : > { %p15193_p9 = pneg %p15192_p5 }
  0xf0   : > { %p15198_p6 = pnand %p15196_p3, %p15193_p9 }
  0xf2   : > { %15201 = shalt.err (!%p15198_p6)
}
  0xf3   : > { %s15202_s2 = scalar_lea.vmem %s480_s15, 384  ;;  %p15210_p11 = scmp.lt.s32.totalorder %s480_s15, %s480_s15 }
  0xf4   : > { %p15203_p8 = scmp.ne.s32.totalorder %s480_s15, %s15202_s2  ;;  %p15211_p10 = scmp.lt.s32.totalorder %s15202_s2, %s15202_s2 }
  0xf6   : > { %p15205_p1 = pnand %p15203_p8, %p17867_p0  ;;  %p15212_p12 = por %p15211_p10, %p15210_p11 }
  0xf8   : > { %p15206_p13 = pneg %p15205_p1 }
  0xfa   : > { %p15213_p2 = pnand %p15212_p12, %p15206_p13 }
  0xfc   : > { %15216 = shalt.err (!%p15213_p2)
}
  0xfd   : > { %13308 = dma.hbm_to_vmem [thread:$0]  (!%p17868_p4), %s17799_s3, 384, %s480_s15, [#allocation6]  }
  0xfe   : > { %s15217_s28 = scalar_lea.hbm %s17802_s6, 48 }
  0xff   : > { %p15218_p7 = scmp.ne.s32.totalorder %s17802_s6, %s15217_s28  ;;  %p15224_p2 = scmp.lt.u32.totalorder %s15217_s28, %s17802_s6 }
 0x101   : > { %p15220_p5 = pnand %p15218_p7, %p17867_p0 }
 0x103   : > { %p15221_p9 = pneg %p15220_p5 }
 0x105   : > { %p15226_p3 = pnand %p15224_p2, %p15221_p9 }
 0x107   : > { %15229 = shalt.err (!%p15226_p3)
}
 0x108   : > { %s15230_s23 = scalar_lea.vmem %s505_s25, 48  ;;  %s15237_s15 = scalar_lea.vmem %s505_s25, 64 }
 0x109   : > { %p15231_p6 = scmp.ne.s32.totalorder %s505_s25, %s15230_s23  ;;  %p15238_p13 = scmp.lt.s32.totalorder %s505_s25, %s505_s25 }
 0x10a   : > { %p15239_p11 = scmp.lt.s32.totalorder %s15237_s15, %s15230_s23 }
 0x10b   : > { %p15233_p8 = pnand %p15231_p6, %p17867_p0 }
 0x10c   : > { %p15240_p10 = por %p15239_p11, %p15238_p13 }
 0x10d   : > { %p15234_p1 = pneg %p15233_p8 }
 0x10f   : > { %p15241_p12 = pnand %p15240_p10, %p15234_p1 }
 0x111   : > { %15244 = shalt.err (!%p15241_p12)
}
 0x112   : > { %13314 = dma.hbm_to_vmem [thread:$0]  (!%p17868_p4), %s17802_s6, 48, %s505_s25, [#allocation9]  }
 0x113   : > { %s15470_s5 = smov [#allocation13]   ;;  %s13239_s9 = smul.u32 9, %s15712_s26 }
 0x114   : > { %s528_s13 = sshll.u32 %s15470_s5, 4  ;;  %s13240_s28 = smul.u32 144, %s15455_s24  ;;  %s529_s13 = int_to_ptr.vmem [resolvable:$true] %s528_s13 }
 0x115   : > { %s15245_s21 = scalar_lea.hbm %s17804_s8, 16 }
 0x116   : > { %p15246_p7 = scmp.ne.s32.totalorder %s17804_s8, %s15245_s21  ;;  %p15252_p2 = scmp.lt.u32.totalorder %s15245_s21, %s17804_s8 }
 0x118   : > { %p15248_p5 = pnand %p15246_p7, %p17867_p0 }
 0x11a   : > { %p15249_p9 = pneg %p15248_p5 }
 0x11c   : > { %p15254_p3 = pnand %p15252_p2, %p15249_p9 }
 0x11e   : > { %15257 = shalt.err (!%p15254_p3)
}
 0x11f   : > { %s15258_s25 = scalar_lea.vmem %s529_s13, 16  ;;  %s15265_s20 = scalar_lea.vmem %s529_s13, 32 }
 0x120   : > { %p15259_p6 = scmp.ne.s32.totalorder %s529_s13, %s15258_s25  ;;  %p15266_p13 = scmp.lt.s32.totalorder %s529_s13, %s529_s13 }
 0x121   : > { %p15267_p11 = scmp.lt.s32.totalorder %s15265_s20, %s15258_s25 }
 0x122   : > { %p15261_p8 = pnand %p15259_p6, %p17867_p0 }
 0x123   : > { %p15268_p10 = por %p15267_p11, %p15266_p13 }
 0x124   : > { %p15262_p1 = pneg %p15261_p8 }
 0x126   : > { %p15269_p12 = pnand %p15268_p10, %p15262_p1 }
 0x128   : > { %15272 = shalt.err (!%p15269_p12)
}
 0x129   : > { %13320 = dma.hbm_to_vmem [thread:$0]  (!%p17868_p4), %s17804_s8, 16, %s529_s13, [#allocation12]  }
 0x12a   : > { %s15905_s29 = scalar_lea.hbm %s17806_s10, %s13240_s28  ;;  %s562_s30 = scalar_lea.vmem [#allocation16], %s13239_s9 }
 0x12b   : > { %s570_s23 = sshll.u32 %s562_s30, 4  ;;  %s13243_s15 = smul.u32 1728, %s15712_s26  ;;  %s571_s23 = int_to_ptr.vmem [resolvable:$true] %s570_s23 }
 0x12c   : > { %s13244_s18 = smul.u32 27648, %s15455_s24  ;;  %s15273_s2 = scalar_lea.hbm %s15905_s29, 144 }
 0x12d   : > { %p15274_p0 = scmp.ne.s32.totalorder %s15905_s29, %s15273_s2  ;;  %p17869_p7 = scmp.ne.s32.totalorder %s17862_s7, 0 }
 0x12e   : > { %s15278_s20 = scalar_lea.hbm %s17806_s10, 1728  ;;  %p15279_p4 = scmp.lt.u32.totalorder %s15905_s29, %s17806_s10 }
 0x12f   : > { %p15276_p5 = pnand %p15274_p0, %p17869_p7  ;;  %p15280_p2 = scmp.lt.u32.totalorder %s15278_s20, %s15273_s2 }
 0x130   : > { %p15282_p6 = scmp.lt.u32.totalorder %s15273_s2, %s15905_s29 }
 0x131   : > { %p15277_p9 = pneg %p15276_p5  ;;  %p15281_p3 = por %p15280_p2, %p15279_p4 }
 0x133   : > { %p15283_p8 = por %p15282_p6, %p15281_p3 }
 0x135   : > { %p15284_p1 = pnand %p15283_p8, %p15277_p9 }
 0x137   : > { %15287 = shalt.err (!%p15284_p1)
}
 0x138   : > { %s15288_s9 = scalar_lea.vmem %s571_s23, 144  ;;  %s15471_s16 = smov [#allocation16]  }
 0x139   : > { %p15289_p13 = scmp.ne.s32.totalorder %s571_s23, %s15288_s9  ;;  %s15293_s11 = sshll.u32 %s15471_s16, 4  ;;  %s15294_s11 = int_to_ptr.vmem [resolvable:$false] %s15293_s11 }
 0x13a   : > { %s15295_s21 = scalar_lea.vmem %s15294_s11, 288  ;;  %p15296_p12 = scmp.lt.s32.totalorder %s571_s23, %s15294_s11 }
 0x13b   : > { %p15291_p11 = pnand %p15289_p13, %p17869_p7  ;;  %p15297_p0 = scmp.lt.s32.totalorder %s15295_s21, %s15288_s9 }
 0x13d   : > { %p15292_p10 = pneg %p15291_p11  ;;  %p15298_p5 = por %p15297_p0, %p15296_p12 }
 0x13f   : > { %p15299_p2 = pnand %p15298_p5, %p15292_p10 }
 0x141   : > { %15302 = shalt.err (!%p15299_p2)
}
 0x142   : > { %p17870_p4 = scmp.ne.s32.totalorder %s17860_s14, 0  ;;  %s17871_s30 = scalar_lea.sflag [#allocation15], %s15709_s17 }
 0x143   : > { %s15931_s25 = scalar_lea.hbm %s17808_s12, %s13244_s18  ;;  %s600_s20 = scalar_lea.vmem [#allocation19], %s13243_s15 }
 0x144   : > { %13327 = dma.hbm_to_vmem [thread:$0]  (!%p17870_p4), %s15905_s29, 144, %s571_s23, %s17871_s30  }
 0x145   : > { %s607_s28 = sshll.u32 %s600_s20, 4  ;;  %s15303_s5 = scalar_lea.hbm %s15931_s25, 27648  ;;  %s15935_s28 = int_to_ptr.vmem [resolvable:$true] %s607_s28 }
 0x146   : > { %p15304_p9 = scmp.ne.s32.totalorder %s15931_s25, %s15303_s5  ;;  %s15308_s9 = scalar_lea.hbm %s17808_s12, 331776 }
 0x147   : > { %p15309_p8 = scmp.lt.u32.totalorder %s15931_s25, %s17808_s12  ;;  %p15310_p1 = scmp.lt.u32.totalorder %s15308_s9, %s15303_s5 }
 0x148   : > { %p15306_p3 = pnand %p15304_p9, %p17869_p7  ;;  %p15312_p11 = scmp.lt.u32.totalorder %s15303_s5, %s15931_s25 }
 0x149   : > { %p15311_p13 = por %p15310_p1, %p15309_p8 }
 0x14a   : > { %p15307_p6 = pneg %p15306_p3 }
 0x14b   : > { %p15313_p10 = por %p15312_p11, %p15311_p13 }
 0x14d   : > { %p15314_p12 = pnand %p15313_p10, %p15307_p6 }
 0x14f   : > { %15317 = shalt.err (!%p15314_p12)
}
 0x150   : > { %s15318_s15 = scalar_lea.vmem %s15935_s28, 27648  ;;  %s15472_s11 = smov [#allocation19]  }
 0x151   : > { %p15319_p0 = scmp.ne.s32.totalorder %s15935_s28, %s15318_s15  ;;  %s15323_s21 = sshll.u32 %s15472_s11, 4  ;;  %s15324_s21 = int_to_ptr.vmem [resolvable:$false] %s15323_s21 }
 0x152   : > { %s15325_s30 = scalar_lea.vmem %s15324_s21, 55296  ;;  %p15326_p9 = scmp.lt.s32.totalorder %s15935_s28, %s15324_s21 }
 0x153   : > { %p15321_p5 = pnand %p15319_p0, %p17869_p7  ;;  %p15327_p3 = scmp.lt.s32.totalorder %s15325_s30, %s15318_s15 }
 0x155   : > { %p15322_p2 = pneg %p15321_p5  ;;  %p15328_p8 = por %p15327_p3, %p15326_p9 }
 0x157   : > { %p15329_p1 = pnand %p15328_p8, %p15322_p2 }
 0x159   : > { %15332 = shalt.err (!%p15329_p1)
}
 0x15a   : > { %s15473_s2 = smov 576   ;;  %s15474_s13 = smov 36  }
 0x15b   : > { %s17872_s20 = scalar_lea.sflag [#allocation18], %s15709_s17  ;;  %s13247_s5 = smul.u32 2304, %s15712_s26 }
 0x15c   : > { %13333 = dma.hbm_to_vmem [thread:$0]  (!%p17870_p4), %s15931_s25, 27648, %s15935_s28, %s17872_s20, %s15473_s2, %s15473_s2, %s15474_s13  }
 0x15d   : > { %s13248_s29 = smul.u32 36864, %s15455_s24  ;;  %s17873_s18 = sld [smem:[#allocation45_spill]] }
 0x15e   : > { %s642_s15 = scalar_lea.vmem [#allocation22], %s13247_s5 }
 0x15f   : > { %s649_s11 = sshll.u32 %s642_s15, 4  ;;  %s15971_s11 = int_to_ptr.vmem [resolvable:$true] %s649_s11 }
 0x163   : > { %s15967_s16 = scalar_lea.hbm %s17873_s18, %s13248_s29  ;;  %s15338_s30 = scalar_lea.hbm %s17873_s18, 442368 }
 0x164   : > { %s15333_s21 = scalar_lea.hbm %s15967_s16, 36864  ;;  %p15339_p10 = scmp.lt.u32.totalorder %s15967_s16, %s17873_s18 }
 0x165   : > { %p15334_p6 = scmp.ne.s32.totalorder %s15967_s16, %s15333_s21  ;;  %p15340_p12 = scmp.lt.u32.totalorder %s15338_s30, %s15333_s21 }
 0x166   : > { %p15342_p5 = scmp.lt.u32.totalorder %s15333_s21, %s15967_s16 }
 0x167   : > { %p15336_p13 = pnand %p15334_p6, %p17869_p7  ;;  %p15341_p0 = por %p15340_p12, %p15339_p10 }
 0x169   : > { %p15337_p11 = pneg %p15336_p13  ;;  %p15343_p2 = por %p15342_p5, %p15341_p0 }
 0x16b   : > { %p15344_p9 = pnand %p15343_p2, %p15337_p11 }
 0x16d   : > { %15347 = shalt.err (!%p15344_p9)
}
 0x16e   : > { %s15348_s20 = scalar_lea.vmem %s15971_s11, 36864  ;;  %s15475_s23 = smov [#allocation22]  }
 0x16f   : > { %p15349_p3 = scmp.ne.s32.totalorder %s15971_s11, %s15348_s20  ;;  %s15353_s9 = sshll.u32 %s15475_s23, 4  ;;  %s15354_s9 = int_to_ptr.vmem [resolvable:$false] %s15353_s9 }
 0x170   : > { %s15355_s15 = scalar_lea.vmem %s15354_s9, 73728  ;;  %p15356_p6 = scmp.lt.s32.totalorder %s15971_s11, %s15354_s9 }
 0x171   : > { %p15351_p8 = pnand %p15349_p3, %p17869_p7  ;;  %p15357_p13 = scmp.lt.s32.totalorder %s15355_s15, %s15348_s20 }
 0x173   : > { %p15352_p1 = pneg %p15351_p8  ;;  %p15358_p10 = por %p15357_p13, %p15356_p6 }
 0x175   : > { %p15359_p12 = pnand %p15358_p10, %p15352_p1 }
 0x177   : > { %15362 = shalt.err (!%p15359_p12)
}
 0x178   : > { %s15476_s21 = smov 768   ;;  %s15477_s25 = smov 48  }
 0x179   : > { %s17874_s28 = scalar_lea.sflag [#allocation21], %s15709_s17  ;;  %s17875_s13 = sld [smem:[#allocation46_spill]] }
 0x17a   : > { %13339 = dma.hbm_to_vmem [thread:$0]  (!%p17870_p4), %s15967_s16, 36864, %s15971_s11, %s17874_s28, %s15476_s21, %s15476_s21, %s15477_s25  }
 0x17b   : > { %s663_s23 = scalar_lea.vmem [#allocation23], %s13247_s5  ;;  %s660_s15 = scalar_lea.sflag [#allocation24], %s15712_s26 }
 0x17c   : > { %s670_s9 = sshll.u32 %s663_s23, 4  ;;  %s16005_s9 = int_to_ptr.vmem [resolvable:$true] %s670_s9 }
 0x17f   : > { %s16001_s20 = scalar_lea.hbm %s17875_s13, %s13248_s29  ;;  %s15368_s29 = scalar_lea.hbm %s17875_s13, 442368 }
 0x180   : > { %s15363_s19 = scalar_lea.hbm %s16001_s20, 36864  ;;  %p15369_p2 = scmp.lt.u32.totalorder %s16001_s20, %s17875_s13 }
 0x181   : > { %p15364_p11 = scmp.ne.s32.totalorder %s16001_s20, %s15363_s19  ;;  %p15370_p9 = scmp.lt.u32.totalorder %s15368_s29, %s15363_s19 }
 0x182   : > { %p15372_p8 = scmp.lt.u32.totalorder %s15363_s19, %s16001_s20 }
 0x183   : > { %p15366_p0 = pnand %p15364_p11, %p17869_p7  ;;  %p15371_p3 = por %p15370_p9, %p15369_p2 }
 0x185   : > { %p15367_p5 = pneg %p15366_p0  ;;  %p15373_p1 = por %p15372_p8, %p15371_p3 }
 0x187   : > { %p15374_p6 = pnand %p15373_p1, %p15367_p5 }
 0x189   : > { %15377 = shalt.err (!%p15374_p6)
}
 0x18a   : > { %s15378_s5 = scalar_lea.vmem %s16005_s9, 36864  ;;  %s15478_s21 = smov [#allocation23]  }
 0x18b   : > { %p15379_p13 = scmp.ne.s32.totalorder %s16005_s9, %s15378_s5  ;;  %s15383_s25 = sshll.u32 %s15478_s21, 4  ;;  %s15384_s25 = int_to_ptr.vmem [resolvable:$false] %s15383_s25 }
 0x18c   : > { %s15385_s28 = scalar_lea.vmem %s15384_s25, 73728  ;;  %p15386_p11 = scmp.lt.s32.totalorder %s16005_s9, %s15384_s25 }
 0x18d   : > { %p15381_p10 = pnand %p15379_p13, %p17869_p7  ;;  %p15387_p0 = scmp.lt.s32.totalorder %s15385_s28, %s15378_s5 }
 0x18f   : > { %p15382_p12 = pneg %p15381_p10  ;;  %p15388_p2 = por %p15387_p0, %p15386_p11 }
 0x191   : > { %p15389_p9 = pnand %p15388_p2, %p15382_p12 }
 0x193   : > { %15392 = shalt.err (!%p15389_p9)
}
 0x194   : > { %s17876_s19 = smov 192   ;;  %s17877_s7 = sld [smem:[#allocation34_spill]] }
 0x195   : > { %13342 = dma.hbm_to_vmem [thread:$0]  (!%p17870_p4), %s16001_s20, 36864, %s16005_s9, %s660_s15, %s17876_s19, %s17876_s19, %s15467_s0  }
 0x19a   : > { %p17878_p7 = scmp.ne.s32.totalorder %s17877_s7, 0 }
 0x19b   : > { %p17879_p5 = scmp.eq.s32.totalorder (!%p17878_p7), %s15594_s27, 0 }
 0x19c   : > { %682 = sbr.rel (%p17878_p7) target bundleno = 6533 (0x1985), region = 84 }
 0x1a3   : > { %15410 = dma.done.wait (%p17879_p5), [#allocation4], 15360   ;;  %p17880_p3 = pmov %p17879_p5 }
 0x1a5   : > { %15412 = vsyncadd (%p17880_p3), [#allocation4], 4294951936  ;;  %p17881_p8 = pmov %p17880_p3 }
 0x1a6   : > { %p17882_p1 = pmov %p17880_p3 }
 0x1a7   : > { %15414 = dma.done.wait (%p17881_p8), [#allocation6], 432  }
 0x1a8   : > { %15416 = vsyncadd (%p17882_p1), [#allocation6], 4294966864  ;;  %p17883_p6 = pmov %p17882_p1 }
 0x1a9   : > { %p17884_p4 = pmov %p17882_p1 }
 0x1aa   : > { %15418 = dma.done.wait (%p17883_p6), [#allocation9], 96  }
 0x1ab   : > { %15420 = vsyncadd (%p17884_p4), [#allocation9], 4294967200  ;;  %p17885_p13 = pmov %p17882_p1 }
 0x1ac   : > { %p17886_p10 = pmov %p17882_p1 }
 0x1ad   : > { %15422 = dma.done.wait (%p17885_p13), [#allocation12], 3088  }
 0x1ae   : > { %15424 = vsyncadd (%p17886_p10), [#allocation12], 4294964208  ;;  %s712_s26 = sand.u32 1, %s15594_s27   ;;  %s714_s14 = sand.u32 1, %s15447_s22  }
 0x1af   : > { %s13251_s0 = smul.u32 24, %s714_s14  ;;  %s713_s30 = scalar_lea.sflag [#allocation15], %s712_s26 }
 0x1b0   : > { %p17887_p12 = scmp.ne.s32.totalorder %s17859_s4, 0 }
 0x1b1   : > { %s16054_s2 = scalar_lea.vmem [#allocation14], %s13251_s0 }
 0x1b2   : > { %15426 = dma.done.wait (%p17887_p12), %s713_s30, 528  }
 0x1b3   : > { %15428 = vsyncadd (%p17887_p12), %s713_s30, 4294966768  ;;  %s13252_s20 = smul.u32 9, %s714_s14  ;;  %s731_s15 = scalar_lea.sflag [#allocation18], %s712_s26 }
 0x1b4   : > { %s13253_s23 = smul.u32 12, %s714_s14 }
 0x1b5   : > { %s16060_s9 = scalar_lea.vmem [#allocation16], %s13252_s20 }
 0x1b6   : > { %s16062_s24 = scalar_lea.vmem [#allocation17], %s13253_s23 }
 0x1b7   : > { %15430 = dma.done.wait (%p17887_p12), %s731_s15, 27840  }
 0x1b8   : > { %15432 = vsyncadd (%p17887_p12), %s731_s15, 4294939456  ;;  %s13254_s17 = smul.u32 1728, %s714_s14  ;;  %s749_s11 = scalar_lea.sflag [#allocation21], %s712_s26 }
 0x1b9   : > { %s13255_s29 = smul.u32 576, %s714_s14 }
 0x1ba   : > { %s16068_s16 = scalar_lea.vmem [#allocation19], %s13254_s17 }
 0x1bb   : > { %s16070_s5 = scalar_lea.vmem [#allocation20], %s13255_s29 }
 0x1bc   : > { %15434 = dma.done.wait (%p17887_p12), %s749_s11, 46080  }
 0x1bd   : > { %15436 = vsyncadd (%p17887_p12), %s749_s11, 4294921216  ;;  %s13256_s21 = smul.u32 2304, %s714_s14  ;;  %s767_s28 = scalar_lea.sflag [#allocation24], %s714_s14 }
 0x1bf   : > { %s16076_s25 = scalar_lea.vmem [#allocation22], %s13256_s21  ;;  %s16078_s19 = scalar_lea.vmem [#allocation23], %s13256_s21 }
 0x1c0   : > { %15438 = dma.done.wait (%p17887_p12), %s767_s28, 36864  }
 0x1c1   : > { %15440 = vsyncadd (%p17887_p12), %s767_s28, 4294930432  ;;  %p17888_p11 = scmp.ne.s32.totalorder %s15594_s27, 0 }
 0x1c2   : > { %v13414_v0 = vld [vmem:[#allocation3 + $0x4] ss:$12 sps:$4 sm:$0xff] (!%p17888_p11)   ;;  %v15479_v2 = vmov (!%p17888_p11), 0   ;;  %v13418_v3 = vld [vmem:[#allocation3] ss:$12 sps:$4 sm:$0xff] (!%p17888_p11)   ;;  %s17889_s26 = sld [smem:[#allocation37_spill]] (!%p17888_p11) }
 0x1c3   : > { %848 = sbr.rel (%p17888_p11) target bundleno = 803 (0x323), region = 144  ;;  %v13416_v1 = vld [vmem:[#allocation3 + $0x304] ss:$12 sps:$4 sm:$0xff] (!%p17888_p11)   ;;  %1790 = vmatprep.mubr.bf16.mxu1 (!%p17888_p11), %v15479_v2  ;;  %1676 = vmatprep.subr.bf16.mxu0 (!%p17888_p11), %v13414_v0  ;;  %v13419_v4 = vld [vmem:[#allocation3 + $0x300] ss:$12 sps:$4 sm:$0xff] (!%p17888_p11)   ;;  %vm15481_vm0 = vmmov (!%p17888_p11), 0  }
 0x1c4   : > { %1758 = vmatprep.subr.bf16.mxu1 (!%p17888_p11), %v13416_v1  ;;  %v13420_v5 = vld [vmem:[#allocation3 + $0x1c] ss:$12 sps:$4 sm:$0xff] (!%p17888_p11)   ;;  %1677 = vmatpush1.bf16.msra.mxu0 (!%p17888_p11), %v13418_v3  ;;  %v13424_v7 = vld [vmem:[#allocation3 + $0x18] ss:$12 sps:$4 sm:$0xff] (!%p17888_p11)   ;;  %v13426_v9 = vld [vmem:[#allocation3 + $0x34] ss:$12 sps:$4 sm:$0xff] (!%p17888_p11)  }
 0x1c5   : > { %1759 = vmatpush1.bf16.msra.mxu1 (!%p17888_p11), %v13419_v4  ;;  %v13422_v6 = vld [vmem:[#allocation3 + $0x31c] ss:$12 sps:$4 sm:$0xff] (!%p17888_p11)   ;;  %1678 = vmatprep.subr.bf16.mxu0 (!%p17888_p11), %v13420_v5  ;;  %v13425_v8 = vld [vmem:[#allocation3 + $0x318] ss:$12 sps:$4 sm:$0xff] (!%p17888_p11)   ;;  %v13428_v10 = vld [vmem:[#allocation3 + $0x334] ss:$12 sps:$4 sm:$0xff] (!%p17888_p11)  }
 0x1c6   : > { %1760 = vmatprep.subr.bf16.mxu1 (!%p17888_p11), %v13422_v6  ;;  %v13430_v11 = vld [vmem:[#allocation3 + $0x30] ss:$12 sps:$4 sm:$0xff] (!%p17888_p11)   ;;  %v13432_v13 = vld [vmem:[#allocation3 + $0x4c] ss:$12 sps:$4 sm:$0xff] (!%p17888_p11)   ;;  %v13436_v15 = vld [vmem:[#allocation3 + $0x48] ss:$12 sps:$4 sm:$0xff] (!%p17888_p11)  }
 0x1c7   : > { %v13431_v12 = vld [vmem:[#allocation3 + $0x330] ss:$12 sps:$4 sm:$0xff] (!%p17888_p11)   ;;  %v13434_v14 = vld [vmem:[#allocation3 + $0x34c] ss:$12 sps:$4 sm:$0xff] (!%p17888_p11)   ;;  %v13437_v16 = vld [vmem:[#allocation3 + $0x348] ss:$12 sps:$4 sm:$0xff] (!%p17888_p11)  }
 0x1c8   : > { %1679 = vmatpush1.bf16.msra.mxu0 (!%p17888_p11), %v13424_v7  ;;  %v13438_v17 = vld [vmem:[#allocation3 + $0x64] ss:$12 sps:$4 sm:$0xff] (!%p17888_p11)   ;;  %v13442_v19 = vld [vmem:[#allocation3 + $0x60] ss:$12 sps:$4 sm:$0xff] (!%p17888_p11)   ;;  %v13444_v21 = vld [vmem:[#allocation3 + $0x7c] ss:$12 sps:$4 sm:$0xff] (!%p17888_p11)  }
 0x1c9   : > { %1761 = vmatpush1.bf16.msra.mxu1 (!%p17888_p11), %v13425_v8  ;;  %1680 = vmatprep.subr.bf16.mxu0 (!%p17888_p11), %v13426_v9  ;;  %v13440_v18 = vld [vmem:[#allocation3 + $0x364] ss:$12 sps:$4 sm:$0xff] (!%p17888_p11)   ;;  %v13443_v20 = vld [vmem:[#allocation3 + $0x360] ss:$12 sps:$4 sm:$0xff] (!%p17888_p11)   ;;  %v13446_v22 = vld [vmem:[#allocation3 + $0x37c] ss:$12 sps:$4 sm:$0xff] (!%p17888_p11)  }
 0x1ca   : > { %1762 = vmatprep.subr.bf16.mxu1 %v13428_v10  ;;  %v13448_v23 = vld [vmem:[#allocation3 + $0x78] ss:$12 sps:$4 sm:$0xff]   ;;  %v13450_v25 = vld [vmem:[#allocation3 + $0x94] ss:$12 sps:$4 sm:$0xff]   ;;  %v13454_v27 = vld [vmem:[#allocation3 + $0x90] ss:$12 sps:$4 sm:$0xff]  }
 0x1cb   : > { %v13449_v24 = vld [vmem:[#allocation3 + $0x378] ss:$12 sps:$4 sm:$0xff]   ;;  %v13452_v26 = vld [vmem:[#allocation3 + $0x394] ss:$12 sps:$4 sm:$0xff]   ;;  %v13455_v28 = vld [vmem:[#allocation3 + $0x390] ss:$12 sps:$4 sm:$0xff]  }
 0x1cc   : > { %1681 = vmatpush1.bf16.msra.mxu0 %v13430_v11  ;;  %v13456_v29 = vld [vmem:[#allocation3 + $0xac] ss:$12 sps:$4 sm:$0xff]   ;;  %v13460_v31 = vld [vmem:[#allocation3 + $0xa8] ss:$12 sps:$4 sm:$0xff]   ;;  %v13462_v33 = vld [vmem:[#allocation3 + $0xc4] ss:$12 sps:$4 sm:$0xff]  }
 0x1cd   : > { %1763 = vmatpush1.bf16.msra.mxu1 %v13431_v12  ;;  %1682 = vmatprep.subr.bf16.mxu0 %v13432_v13  ;;  %v13458_v30 = vld [vmem:[#allocation3 + $0x3ac] ss:$12 sps:$4 sm:$0xff]   ;;  %v13461_v32 = vld [vmem:[#allocation3 + $0x3a8] ss:$12 sps:$4 sm:$0xff]   ;;  %v13475_v45 = vld [vmem:[#allocation3 + $0xf0] ss:$12 sps:$4 sm:$0xff]  }
 0x1ce   : > { %1764 = vmatprep.subr.bf16.mxu1 %v13434_v14  ;;  %v853_v34 = vld [vmem:[%s17889_s26 + $0x20] sm:$0xff]  ;;  %v13465_v36 = vld [vmem:[#allocation3 + $0xc0] ss:$12 sps:$4 sm:$0xff]   ;;  %v13467_v39 = vld [vmem:[#allocation3 + $0xdc] ss:$12 sps:$4 sm:$0xff]   ;;  %vm1961_vm1 = vcmask 1040384  }
 0x1cf   : > { %v13464_v35 = vld [vmem:[#allocation3 + $0xc8] ss:$12 sps:$4 sm:$0xff]   ;;  %v16089_v37 = vpack.c.bf16 %v853_v34, %v853_v34  ;;  %v13469_v40 = vld [vmem:[#allocation3 + $0xe0] ss:$12 sps:$4 sm:$0xff]   ;;  %v13470_v41 = vld [vmem:[#allocation3 + $0xd8] ss:$12 sps:$4 sm:$0xff]  }
 0x1d0   : > { %1683 = vmatpush1.bf16.msra.mxu0 %v13436_v15  ;;  %v13466_v38 = vld [vmem:[#allocation3 + $0x8] ss:$12 sps:$4 sm:$0xff]   ;;  %v13471_v42 = vld [vmem:[#allocation3 + $0x20] ss:$12 sps:$4 sm:$0xff]   ;;  %v13474_v44 = vld [vmem:[#allocation3 + $0xf8] ss:$12 sps:$4 sm:$0xff]  }
 0x1d1   : > { %1765 = vmatpush1.bf16.msra.mxu1 %v13437_v16  ;;  %1684 = vmatprep.subr.bf16.mxu0 %v13438_v17  ;;  %v13472_v43 = vld [vmem:[#allocation3 + $0xf4] ss:$12 sps:$4 sm:$0xff]   ;;  %v13476_v46 = vld [vmem:[#allocation3 + $0x38] ss:$12 sps:$4 sm:$0xff]   ;;  %v13479_v48 = vld [vmem:[#allocation3 + $0x110] ss:$12 sps:$4 sm:$0xff]  }
 0x1d2   : > { %1766 = vmatprep.subr.bf16.mxu1 %v13440_v18  ;;  %v13477_v47 = vld [vmem:[#allocation3 + $0x10c] ss:$12 sps:$4 sm:$0xff]   ;;  %v13480_v49 = vld [vmem:[#allocation3 + $0x108] ss:$12 sps:$4 sm:$0xff]   ;;  %v13481_v50 = vld [vmem:[#allocation3 + $0x50] ss:$12 sps:$4 sm:$0xff]  }
 0x1d3   : > { %v13482_v51 = vld [vmem:[#allocation3 + $0x124] ss:$12 sps:$4 sm:$0xff]   ;;  %v13484_v52 = vld [vmem:[#allocation3 + $0x128] ss:$12 sps:$4 sm:$0xff]   ;;  %v13485_v53 = vld [vmem:[#allocation3 + $0x120] ss:$12 sps:$4 sm:$0xff]  }
 0x1d4   : > { %1685 = vmatpush1.bf16.msra.mxu0 %v13442_v19  ;;  %v13486_v54 = vld [vmem:[#allocation3 + $0x68] ss:$12 sps:$4 sm:$0xff]   ;;  %v850_v55 = vld [vmem:[%s17889_s26 + $0x8] sm:$0xff]  ;;  %v13489_v57 = vld [vmem:[#allocation3 + $0x140] ss:$12 sps:$4 sm:$0xff]   ;;  %vm1965_vm2 = vcmask 1044480  }
 0x1d5   : > { %1767 = vmatpush1.bf16.msra.mxu1 %v13443_v20  ;;  %1686 = vmatprep.subr.bf16.mxu0 %v13444_v21  ;;  %v13487_v56 = vld [vmem:[#allocation3 + $0x13c] ss:$12 sps:$4 sm:$0xff]   ;;  %v855_v58 = vpack.c.bf16 %v850_v55, %v850_v55  ;;  %v13490_v59 = vld [vmem:[#allocation3 + $0x138] ss:$12 sps:$4 sm:$0xff]   ;;  %v13491_v60 = vld [vmem:[#allocation3 + $0x80] ss:$12 sps:$4 sm:$0xff]  }
 0x1d6   : > { %1768 = vmatprep.subr.bf16.mxu1 %v13446_v22  ;;  %v13492_v61 = vld [vmem:[#allocation3 + $0x154] ss:$12 sps:$4 sm:$0xff]   ;;  %v13494_v62 = vld [vmem:[#allocation3 + $0x158] ss:$12 sps:$4 sm:$0xff]   ;;  %v13495_v63 = vld [vmem:[#allocation3 + $0x150] ss:$12 sps:$4 sm:$0xff]  }
 0x1d7   : > { %1708 = vmatprep.mubr.bf16.mxu0 %v855_v58  ;;  %v13496_v0 = vld [vmem:[#allocation3 + $0x98] ss:$12 sps:$4 sm:$0xff]   ;;  %v13499_v2 = vld [vmem:[#allocation3 + $0x170] ss:$12 sps:$4 sm:$0xff]   ;;  %v13500_v3 = vld [vmem:[#allocation3 + $0x168] ss:$12 sps:$4 sm:$0xff]  }
 0x1d8   : > { %1687 = vmatpush1.bf16.msra.mxu0 %v13448_v23  ;;  %v13497_v1 = vld [vmem:[#allocation3 + $0x16c] ss:$12 sps:$4 sm:$0xff]   ;;  %v13501_v4 = vld [vmem:[#allocation3 + $0xb0] ss:$12 sps:$4 sm:$0xff]   ;;  %v13505_v7 = vld [vmem:[#allocation3 + $0x248] ss:$12 sps:$4 sm:$0xff]  }
 0x1d9   : > { %1769 = vmatpush1.bf16.msra.mxu1 %v13449_v24  ;;  %1688 = vmatprep.subr.bf16.mxu0 %v13450_v25  ;;  %v13504_v5 = vld [vmem:[#allocation3 + $0x184] ss:$12 sps:$4 sm:$0xff]   ;;  %v13502_v8 = vld [vmem:[#allocation3 + $0x180] ss:$12 sps:$4 sm:$0xff]   ;;  %v13506_v10 = vld [vmem:[#allocation3 + $0x188] ss:$12 sps:$4 sm:$0xff]  }
 0x1da   : > { %1770 = vmatprep.subr.bf16.mxu1 %v13452_v26  ;;  %v849_v6 = vld [vmem:[%s17889_s26] sm:$0xff]  ;;  %v13509_v11 = vld [vmem:[#allocation3 + $0x19c] ss:$12 sps:$4 sm:$0xff]   ;;  %v13510_v12 = vld [vmem:[#allocation3 + $0x260] ss:$12 sps:$4 sm:$0xff]  }
 0x1db   : > { %v854_v9 = vpack.c.bf16 %v849_v6, %v849_v6  ;;  %v13507_v13 = vld [vmem:[#allocation3 + $0x198] ss:$12 sps:$4 sm:$0xff]   ;;  %v13511_v14 = vld [vmem:[#allocation3 + $0x1a0] ss:$12 sps:$4 sm:$0xff]   ;;  %v13512_v17 = vld [vmem:[#allocation3 + $0x1b0] ss:$12 sps:$4 sm:$0xff]  }
 0x1dc   : > { %1689 = vmatpush1.bf16.msra.mxu0 %v13454_v27  ;;  %v13514_v15 = vld [vmem:[#allocation3 + $0x1b4] ss:$12 sps:$4 sm:$0xff]   ;;  %v13515_v16 = vld [vmem:[#allocation3 + $0x278] ss:$12 sps:$4 sm:$0xff]   ;;  %v13520_v20 = vld [vmem:[#allocation3 + $0x290] ss:$12 sps:$4 sm:$0xff]  }
 0x1dd   : > { %1771 = vmatpush1.bf16.msra.mxu1 %v13455_v28  ;;  %1690 = vmatprep.subr.bf16.mxu0 %v13456_v29  ;;  %v13516_v18 = vld [vmem:[#allocation3 + $0x1b8] ss:$12 sps:$4 sm:$0xff]   ;;  %v13517_v21 = vld [vmem:[#allocation3 + $0x1c8] ss:$12 sps:$4 sm:$0xff]   ;;  %v13521_v23 = vld [vmem:[#allocation3 + $0x1d0] ss:$12 sps:$4 sm:$0xff]  }
 0x1de   : > { %1772 = vmatprep.subr.bf16.mxu1 %v13458_v30  ;;  %v13519_v19 = vld [vmem:[#allocation3 + $0x1cc] ss:$12 sps:$4 sm:$0xff]   ;;  %v13524_v25 = vld [vmem:[#allocation3 + $0x1e4] ss:$12 sps:$4 sm:$0xff]   ;;  %v13525_v26 = vld [vmem:[#allocation3 + $0x2a8] ss:$12 sps:$4 sm:$0xff]  }
 0x1df   : > { %v852_v22 = vld [vmem:[%s17889_s26 + $0x18] sm:$0xff]  ;;  %v13535_v34 = vld [vmem:[#allocation3 + $0x2d8] ss:$12 sps:$4 sm:$0xff]  }
 0x1e0   : > { %1691 = vmatpush1.bf16.msra.mxu0 %v13460_v31  ;;  %v857_v24 = vpack.c.bf16 %v852_v22, %v852_v22  ;;  %v13522_v27 = vld [vmem:[#allocation3 + $0x1e0] ss:$12 sps:$4 sm:$0xff]   ;;  %v13526_v28 = vld [vmem:[#allocation3 + $0x1e8] ss:$12 sps:$4 sm:$0xff]   ;;  %v13527_v31 = vld [vmem:[#allocation3 + $0x1f8] ss:$12 sps:$4 sm:$0xff]  }
 0x1e1   : > { %1773 = vmatpush1.bf16.msra.mxu1 %v13461_v32  ;;  %1692 = vmatprep.subr.bf16.mxu0 %v13462_v33  ;;  %v13529_v29 = vld [vmem:[#allocation3 + $0x1fc] ss:$12 sps:$4 sm:$0xff]   ;;  %v13530_v30 = vld [vmem:[#allocation3 + $0x2c0] ss:$12 sps:$4 sm:$0xff]  }
 0x1e2   : > { %12567 = vmatprep.subr.bf16.mxu1 %v13464_v35  ;;  %v13531_v32 = vld [vmem:[#allocation3 + $0x200] ss:$12 sps:$4 sm:$0xff]   ;;  %v13532_v35 = vld [vmem:[#allocation3 + $0x210] ss:$12 sps:$4 sm:$0xff]   ;;  %v13554_v55 = vld [vmem:[#allocation3 + $0x288] ss:$12 sps:$4 sm:$0xff]  }
 0x1e3   : > { %v13534_v33 = vld [vmem:[#allocation3 + $0x214] ss:$12 sps:$4 sm:$0xff]  }
 0x1e4   : > { %1791 = vmatmul.mubr.bf16.vlgmr.msra.gmra.mrb[0].mxu1 %v16089_v37  ;;  %1693 = vmatpush1.bf16.msra.mxu0 %v13465_v36  ;;  %v13536_v36 = vld [vmem:[#allocation3 + $0x218] ss:$12 sps:$4 sm:$0xff]  }
 0x1e5   : > { %12568 = vmatpush3.bf16.msra.mxu1 %v13466_v38  ;;  %1694 = vmatprep.subr.bf16.mxu0 %v13467_v39  ;;  %v13539_v38 = vld [vmem:[#allocation3 + $0x22c] ss:$12 sps:$4 sm:$0xff]   ;;  %v13540_v39 = vld [vmem:[#allocation3 + $0x2f0] ss:$12 sps:$4 sm:$0xff]  }
 0x1e6   : > { %12569 = vmatprep.subr.bf16.mxu1 %v13469_v40  ;;  %1831 = vmatprep.mubr.bf16.mxu1 %v855_v58  ;;  %v13537_v40 = vld [vmem:[#allocation3 + $0x228] ss:$12 sps:$4 sm:$0xff]   ;;  %v13558_v58 = vld [vmem:[#allocation3 + $0x2a0] ss:$12 sps:$4 sm:$0xff]  }
 0x1e8   : > { %1695 = vmatpush1.bf16.msra.mxu0 %v13470_v41  ;;  %v13541_v41 = vld [vmem:[#allocation3 + $0x230] ss:$12 sps:$4 sm:$0xff]  }
 0x1e9   : > { %12570 = vmatpush3.bf16.msra.mxu1 %v13471_v42  ;;  %1696 = vmatprep.subr.bf16.mxu0 %v13472_v43  ;;  %v851_v42 = vld [vmem:[%s17889_s26 + $0x10] sm:$0xff] }
 0x1ea   : > { %12571 = vmatprep.subr.bf16.mxu1 %v13474_v44  ;;  %v13544_v43 = vld [vmem:[#allocation3 + $0x244] ss:$12 sps:$4 sm:$0xff]   ;;  %v856_v44 = vpack.c.bf16 %v851_v42, %v851_v42 }
 0x1ec   : > { %1697 = vmatpush1.bf16.msra.mxu0 %v13475_v45  ;;  %v13542_v45 = vld [vmem:[#allocation3 + $0x240] ss:$12 sps:$4 sm:$0xff]  }
 0x1ed   : > { %12572 = vmatpush3.bf16.msra.mxu1 %v13476_v46  ;;  %1698 = vmatprep.subr.bf16.mxu0 %v13477_v47  ;;  %v13545_v46 = vld [vmem:[#allocation3 + $0x308] ss:$12 sps:$4 sm:$0xff]   ;;  %v15480_v47 = vmov 0.0  }
 0x1ee   : > { %12573 = vmatprep.subr.bf16.mxu1 %v13479_v48  ;;  %v13548_v48 = vld [vmem:[#allocation3 + $0x25c] ss:$12 sps:$4 sm:$0xff]  }
 0x1f0   : > { %1699 = vmatpush1.bf16.msra.mxu0 %v13480_v49  ;;  %v13546_v49 = vld [vmem:[#allocation3 + $0x258] ss:$12 sps:$4 sm:$0xff]  }
 0x1f1   : > { %12574 = vmatpush3.bf16.msra.mxu1 %v13481_v50  ;;  %1700 = vmatprep.subr.bf16.mxu0 %v13482_v51  ;;  %v13549_v50 = vld [vmem:[#allocation3 + $0x320] ss:$12 sps:$4 sm:$0xff]  }
 0x1f2   : > { %12575 = vmatprep.subr.bf16.mxu1 %v13484_v52  ;;  %v13552_v51 = vld [vmem:[#allocation3 + $0x274] ss:$12 sps:$4 sm:$0xff]   ;;  %v13550_v52 = vld [vmem:[#allocation3 + $0x270] ss:$12 sps:$4 sm:$0xff]  }
 0x1f4   : > { %1701 = vmatpush1.bf16.msra.mxu0 %v13485_v53  ;;  %v13553_v53 = vld [vmem:[#allocation3 + $0x338] ss:$12 sps:$4 sm:$0xff]  }
 0x1f5   : > { %12576 = vmatpush3.bf16.msra.mxu1 %v13486_v54  ;;  %1702 = vmatprep.subr.bf16.mxu0 %v13487_v56  ;;  %v13556_v54 = vld [vmem:[#allocation3 + $0x28c] ss:$12 sps:$4 sm:$0xff]   ;;  %v13557_v56 = vld [vmem:[#allocation3 + $0x350] ss:$12 sps:$4 sm:$0xff]  }
 0x1f6   : > { %12577 = vmatprep.subr.bf16.mxu1 %v13489_v57  ;;  %v13560_v57 = vld [vmem:[#allocation3 + $0x2a4] ss:$12 sps:$4 sm:$0xff]  }
 0x1f8   : > { %1703 = vmatpush1.bf16.msra.mxu0 %v13490_v59  ;;  %v13561_v59 = vld [vmem:[#allocation3 + $0x368] ss:$12 sps:$4 sm:$0xff]  }
 0x1f9   : > { %12578 = vmatpush3.bf16.msra.mxu1 %v13491_v60  ;;  %1704 = vmatprep.subr.bf16.mxu0 %v13492_v61  ;;  %v13564_v60 = vld [vmem:[#allocation3 + $0x2bc] ss:$12 sps:$4 sm:$0xff]   ;;  %v13562_v61 = vld [vmem:[#allocation3 + $0x2b8] ss:$12 sps:$4 sm:$0xff]  }
 0x1fa   : > { %12579 = vmatprep.subr.bf16.mxu1 %v13494_v62  ;;  %v13565_v62 = vld [vmem:[#allocation3 + $0x380] ss:$12 sps:$4 sm:$0xff]  }
 0x1fc   : > { %1705 = vmatpush1.bf16.msra.mxu0 %v13495_v63  ;;  %v13568_v63 = vld [vmem:[#allocation3 + $0x2d4] ss:$12 sps:$4 sm:$0xff]  }
 0x1fd   : > { %12580 = vmatpush3.bf16.msra.mxu1 %v13496_v0  ;;  %1706 = vmatprep.subr.bf16.mxu0 %v13497_v1  ;;  %v13566_v0 = vld [vmem:[#allocation3 + $0x2d0] ss:$12 sps:$4 sm:$0xff]   ;;  %v13569_v1 = vld [vmem:[#allocation3 + $0x398] ss:$12 sps:$4 sm:$0xff]  }
 0x1fe   : > { %12581 = vmatprep.subr.bf16.mxu1 %v13499_v2  ;;  %v13572_v2 = vld [vmem:[#allocation3 + $0x2ec] ss:$12 sps:$4 sm:$0xff]  }
 0x200   : > { %1707 = vmatpush1.bf16.msra.mxu0 %v13500_v3  ;;  %v13570_v3 = vld [vmem:[#allocation3 + $0x2e8] ss:$12 sps:$4 sm:$0xff]  }
 0x201   : > { %12582 = vmatpush3.bf16.msra.mxu1 %v13501_v4  ;;  %1717 = vmatprep.subr.bf16.mxu0 %v13504_v5  ;;  %v13573_v4 = vld [vmem:[#allocation3 + $0x3b0] ss:$12 sps:$4 sm:$0xff]  }
 0x202   : > { %12589 = vmatprep.subr.bf16.mxu1 %v13505_v7 }
 0x203   : > { %1709 = vmatmul.mubr.bf16.vlgmr.msra.gmra.mrb[0].mxu0 %v854_v9 }
 0x204   : > { %1832 = vmatmul.mubr.bf16.vlgmr.msra.gmra.mrb[4].mxu1 %v854_v9  ;;  %1718 = vmatpush1.bf16.msra.mxu0 %v13502_v8 }
 0x205   : > { %12590 = vmatpush3.bf16.msra.mxu1 %v13506_v10  ;;  %1719 = vmatprep.subr.bf16.mxu0 %v13509_v11 }
 0x206   : > { %12591 = vmatprep.subr.bf16.mxu1 %v13510_v12  ;;  %1871 = vmatprep.mubr.bf16.mxu1 %v857_v24 }
 0x207   : > { %1749 = vmatprep.mubr.bf16.mxu0 %v857_v24 }
 0x208   : > { %1720 = vmatpush1.bf16.msra.mxu0 %v13507_v13 }
 0x209   : > { %12592 = vmatpush3.bf16.msra.mxu1 %v13511_v14  ;;  %1721 = vmatprep.subr.bf16.mxu0 %v13514_v15  ;;  %v1021_v14 = vlaneseq }
 0x20a   : > { %12593 = vmatprep.subr.bf16.mxu1 %v13515_v16 }
 0x20b   : > { %v1022_v15 = vshrl.u32 %v1021_v14, 7 }
 0x20c   : > { %1722 = vmatpush1.bf16.msra.mxu0 %v13512_v17  ;;  %v1019_v17 = vld [vmem:[#allocation5] sm:$0x7] }
 0x20d   : > { %12594 = vmatpush3.bf16.msra.mxu1 %v13516_v18  ;;  %1723 = vmatprep.subr.bf16.mxu0 %v13519_v19  ;;  %v1031_v16 = vsub.s32 2, %v1022_v15 }
 0x20e   : > { %12595 = vmatprep.subr.bf16.mxu1 %v13520_v20 }
 0x20f   : > { %v1032_v18 = vrot.slane %v1019_v17, %v1031_v16 }
 0x210   : > { %1724 = vmatpush1.bf16.msra.mxu0 %v13517_v21 }
 0x211   : > { %12596 = vmatpush3.bf16.msra.mxu1 %v13521_v23  ;;  %1725 = vmatprep.subr.bf16.mxu0 %v13524_v25  ;;  %v1023_v25 = vsub.s32 0, %v1022_v15 }
 0x212   : > { %12597 = vmatprep.subr.bf16.mxu1 %v13525_v26  ;;  %v1027_v26 = vsub.s32 1, %v1022_v15 }
 0x214   : > { %1726 = vmatpush1.bf16.msra.mxu0 %v13522_v27  ;;  %v1921_v27 = vld [vmem:[#allocation7 + $0x10] sm:$0x1f] }
 0x215   : > { %12598 = vmatpush3.bf16.msra.mxu1 %v13526_v28  ;;  %1727 = vmatprep.subr.bf16.mxu0 %v13529_v29  ;;  %v1024_v28 = vrot.slane %v1019_v17, %v1023_v25  ;;  %v1919_v29 = vld [vmem:[#allocation7] sm:$0x1f] }
 0x216   : > { %12599 = vmatprep.subr.bf16.mxu1 %v13530_v30  ;;  %v1028_v30 = vrot.slane %v1019_v17, %v1027_v26 }
 0x218   : > { %1728 = vmatpush1.bf16.msra.mxu0 %v13527_v31  ;;  %v1927_v31 = vrot.slane %v1921_v27, 1 }
 0x219   : > { %12600 = vmatpush3.bf16.msra.mxu1 %v13531_v32  ;;  %1729 = vmatprep.subr.bf16.mxu0 %v13534_v33  ;;  %v1936_v32 = vrot.slane %v1921_v27, 5  ;;  %v1920_v33 = vld [vmem:[#allocation7 + $0x8] sm:$0x1f] }
 0x21a   : > { %12601 = vmatprep.subr.bf16.mxu1 %v13535_v34 }
 0x21c   : > { %1730 = vmatpush1.bf16.msra.mxu0 %v13532_v35 }
 0x21d   : > { %12602 = vmatpush3.bf16.msra.mxu1 %v13536_v36  ;;  %1731 = vmatprep.subr.bf16.mxu0 %v13539_v38  ;;  %v1925_v38 = vrot.slane %v1919_v29, 1 }
 0x21e   : > { %12603 = vmatprep.subr.bf16.mxu1 %v13540_v39  ;;  %v1934_v39 = vrot.slane %v1919_v29, 5 }
 0x220   : > { %1732 = vmatpush1.bf16.msra.mxu0 %v13537_v40 }
 0x221   : > { %12604 = vmatpush3.bf16.msra.mxu1 %v13541_v41  ;;  %1733 = vmatprep.subr.bf16.mxu0 %v13544_v43 }
 0x222   : > { %12893 = vmatprep.subr.bf16.mxu1 %v15480_v47 }
 0x224   : > { %1872 = vmatmul.mubr.bf16.vlgmr.msra.gmra.mrb[8].mxu1 %v856_v44  ;;  %1734 = vmatpush1.bf16.msra.mxu0 %v13542_v45  ;;  %v1935_v45 = vrot.slane %v1920_v33, 5 }
 0x225   : > { %12894 = vmatpush3.bf16.msra.mxu1 %v13545_v46  ;;  %1735 = vmatprep.subr.bf16.mxu0 %v13548_v48 }
 0x226   : > { %12895 = vmatprep.subr.bf16.mxu1 %v15480_v47  ;;  %12909 = vmatprep.mubr.msk.bf16.mxu1 %vm15481_vm0, %v15480_v47 }
 0x228   : > { %1736 = vmatpush1.bf16.msra.mxu0 %v13546_v49 }
 0x229   : > { %12896 = vmatpush3.bf16.msra.mxu1 %v13549_v50  ;;  %1737 = vmatprep.subr.bf16.mxu0 %v13552_v51 }
 0x22a   : > { %12897 = vmatprep.subr.bf16.mxu1 %v15480_v47 }
 0x22c   : > { %1738 = vmatpush1.bf16.msra.mxu0 %v13550_v52 }
 0x22d   : > { %12898 = vmatpush3.bf16.msra.mxu1 %v13553_v53  ;;  %1739 = vmatprep.subr.bf16.mxu0 %v13556_v54 }
 0x22e   : > { %12899 = vmatprep.subr.bf16.mxu1 %v15480_v47 }
 0x230   : > { %1740 = vmatpush1.bf16.msra.mxu0 %v13554_v55 }
 0x231   : > { %12900 = vmatpush3.bf16.msra.mxu1 %v13557_v56  ;;  %1741 = vmatprep.subr.bf16.mxu0 %v13560_v57 }
 0x232   : > { %12901 = vmatprep.subr.bf16.mxu1 %v15480_v47 }
 0x234   : > { %1742 = vmatpush1.bf16.msra.mxu0 %v13558_v58 }
 0x235   : > { %12902 = vmatpush3.bf16.msra.mxu1 %v13561_v59  ;;  %1743 = vmatprep.subr.bf16.mxu0 %v13564_v60 }
 0x236   : > { %12903 = vmatprep.subr.bf16.mxu1 %v15480_v47 }
 0x238   : > { %1744 = vmatpush1.bf16.msra.mxu0 %v13562_v61 }
 0x239   : > { %12904 = vmatpush3.bf16.msra.mxu1 %v13565_v62  ;;  %1745 = vmatprep.subr.bf16.mxu0 %v13568_v63 }
 0x23a   : > { %12905 = vmatprep.subr.bf16.mxu1 %v15480_v47 }
 0x23c   : > { %1746 = vmatpush1.bf16.msra.mxu0 %v13566_v0 }
 0x23d   : > { %12906 = vmatpush3.bf16.msra.mxu1 %v13569_v1  ;;  %1747 = vmatprep.subr.bf16.mxu0 %v13572_v2 }
 0x23e   : > { %12907 = vmatprep.subr.bf16.mxu1 %v15480_v47 }
 0x240   : > { %1748 = vmatpush1.bf16.msra.mxu0 %v13570_v3 }
 0x241   : > { %12908 = vmatpush3.bf16.msra.mxu1 %v13573_v4 }
 0x243   : > { %1750 = vmatmul.mubr.bf16.vlgmr.msra.gmra.mrb[0].mxu0 %v856_v44  ;;  %v1926_v44 = vrot.slane %v1920_v33, 1 }
 0x244   : > { %12910 = vmatmul.mubr.bf16.vlgmr.msra.gmra.mrb[12].mxu1 %v16089_v37 }
 0x2b7   : > { %v1792_v5 = vpop.f32.mrb[0].mxu1 }
 0x2b8   : > { %v1794_v6 = vpop.f32.mrb[1].mxu1 }
 0x2b9   : > { %v1796_v7 = vpop.f32.mrb[2].mxu1 }
 0x2ba   : > { %v1797_v8 = vpop.f32.mrb[3].mxu1 }
 0x2d7   : > { %v12583_v9 = vpop.f32.mrb[4].mxu1 }
 0x2d8   : > { %v12584_v10 = vpop.f32.mrb[5].mxu1 }
 0x2d9   : > { %v12585_v11 = vadd.f32 %v12584_v10, %v12583_v9  ;;  %v12586_v12 = vpop.f32.mrb[6].mxu1 }
 0x2da   : > { %v12587_v13 = vpop.f32.mrb[7].mxu1 }
 0x2db   : > { %v1834_v21 = vadd.f32 %v12585_v11, %v1032_v18 }
 0x2f7   : > { %v12605_v19 = vpop.f32.mrb[8].mxu1 }
 0x2f8   : > { %v12606_v20 = vpop.f32.mrb[9].mxu1 }
 0x2f9   : > { %v12607_v22 = vadd.f32 %v12606_v20, %v12605_v19  ;;  %v12608_v23 = vpop.f32.mrb[10].mxu1 }
 0x2fa   : > { %v12609_v37 = vpop.f32.mrb[11].mxu1 }
 0x2fb   : > { %v1874_v24 = vadd.f32 %v12607_v22, %v1834_v21 }
 0x316   : > { %v1751_v34 = vpop.f32.mrb[0].mxu0 }
 0x317   : > { %v1913_v35 = vpop.f32.mrb[12].mxu1  ;;  %v13117_v36 = vadd.f32 %v1751_v34, %v1024_v28  ;;  %v1753_v41 = vpop.f32.mrb[1].mxu0 }
 0x318   : > { %v1914_v40 = vadd.f32 %v1913_v35, %v1874_v24  ;;  %v12911_v42 = vpop.f32.mrb[13].mxu1  ;;  %v13119_v43 = vadd.f32 %v1753_v41, %v1028_v30  ;;  %v1755_v46 = vpop.f32.mrb[2].mxu0 }
 0x319   : > { %v1916_v47 = vpop.f32.mrb[14].mxu1  ;;  %v13118_v48 = vadd.f32 %v13117_v36, %v1792_v5  ;;  %v1756_v51 = vpop.f32.mrb[3].mxu0 }
 0x31a   : > { %v1933_v49 = vadd.f32 %v1927_v31, %v1914_v40  ;;  %v1942_v50 = vadd.f32 %v1936_v32, %v1914_v40  ;;  %v12912_v52 = vpop.f32.mrb[15].mxu1  ;;  %v13120_v53 = vadd.f32 %v13119_v43, %v1794_v6 }
 0x31b   : > { %v1931_v54 = vadd.f32 %v13118_v48, %v1925_v38  ;;  %v1940_v55 = vadd.f32 %v13118_v48, %v1934_v39 }
 0x31c   : > { %v1948_v56 = vrot.slane %v1933_v49, 7  ;;  %v1957_v57 = vrot.slane %v1942_v50, 3  ;;  %v1932_v58 = vadd.f32 %v13120_v53, %v1926_v44  ;;  %v1941_v59 = vadd.f32 %v13120_v53, %v1935_v45 }
 0x31d   : > { %v1946_v60 = vrot.slane %v1931_v54, 7  ;;  %v1955_v61 = vrot.slane %v1940_v55, 3 }
 0x31e   : > { %v1964_v62 = vsel %vm1961_vm1, %v1921_v27, %v1948_v56  ;;  %v1971_v63 = vsel %vm1961_vm1, %v1921_v27, %v1957_v57  ;;  %v1947_v2 = vrot.slane %v1932_v58, 7  ;;  %v1956_v3 = vrot.slane %v1941_v59, 3 }
 0x31f   : > { %v1968_v0 = vsel %vm1965_vm2, %v1964_v62, 0.0  ;;  %v1974_v1 = vsel %vm1965_vm2, %v1971_v63, 0.0  ;;  %v1962_v4 = vsel %vm1961_vm1, %v1919_v29, %v1946_v60  ;;  %v1969_v5 = vsel %vm1961_vm1, %v1919_v29, %v1955_v61 }
 0x320   : > { %1977 = vst [vmem:[#allocation2 + $0x10] sm:$0xff] %v1968_v0  ;;  %1980 = vst [vmem:[#allocation2 + $0x28] sm:$0xff] %v1974_v1  ;;  %v1966_v6 = vsel %vm1965_vm2, %v1962_v4, 0.0  ;;  %v1972_v7 = vsel %vm1965_vm2, %v1969_v5, 0.0  ;;  %v1963_v8 = vsel %vm1961_vm1, %v1920_v33, %v1947_v2  ;;  %v1970_v9 = vsel %vm1961_vm1, %v1920_v33, %v1956_v3 }
 0x321   : > { %1975 = vst [vmem:[#allocation2] sm:$0xff] %v1966_v6  ;;  %1978 = vst [vmem:[#allocation2 + $0x18] sm:$0xff] %v1972_v7  ;;  %v1967_v10 = vsel %vm1965_vm2, %v1963_v8, 0.0  ;;  %v1973_v11 = vsel %vm1965_vm2, %v1970_v9, 0.0 }
 0x322   : > { %1976 = vst [vmem:[#allocation2 + $0x8] sm:$0xff] %v1967_v10  ;;  %1979 = vst [vmem:[#allocation2 + $0x20] sm:$0xff] %v1973_v11 }
 0x323 PF: > { %v13619_v22 = vld [vmem:[%s16068_s16 + $0x4] ss:$36 sps:$4 sm:$0xff]   ;;  %v13622_v37 = vld [vmem:[%s16068_s16 + $0x4c] ss:$36 sps:$4 sm:$0xff]   ;;  %v13625_v25 = vld [vmem:[%s16068_s16 + $0x94] ss:$36 sps:$4 sm:$0xff]  }
 0x324   : > { %v13621_v23 = vld [vmem:[%s16068_s16] ss:$36 sps:$4 sm:$0xff]   ;;  %3467 = vmatprep.subr.bf16.mxu1 %v13619_v22  ;;  %v13624_v24 = vld [vmem:[%s16068_s16 + $0x48] ss:$36 sps:$4 sm:$0xff]   ;;  %v13627_v27 = vld [vmem:[%s16068_s16 + $0x90] ss:$36 sps:$4 sm:$0xff]  }
 0x325   : > { %3468 = vmatpush1.bf16.msra.mxu1 %v13621_v23  ;;  %v13643_v26 = vld [vmem:[%s16068_s16 + $0x484] ss:$36 sps:$4 sm:$0xff]   ;;  %v13649_v29 = vld [vmem:[%s16068_s16 + $0x4cc] ss:$36 sps:$4 sm:$0xff]   ;;  %v13628_v30 = vld [vmem:[%s16068_s16 + $0xdc] ss:$36 sps:$4 sm:$0xff]  }
 0x326   : > { %3469 = vmatprep.subr.bf16.mxu1 %v13622_v37  ;;  %v13647_v28 = vld [vmem:[%s16068_s16 + $0x480] ss:$36 sps:$4 sm:$0xff]   ;;  %3510 = vmatprep.subr.bf16.mxu0 %v13643_v26  ;;  %v13653_v31 = vld [vmem:[%s16068_s16 + $0x4c8] ss:$36 sps:$4 sm:$0xff]   ;;  %v13630_v32 = vld [vmem:[%s16068_s16 + $0xd8] ss:$36 sps:$4 sm:$0xff]  }
 0x327   : > { %v1986_v14 = vld [vmem:[#allocation2 + $0x10] sm:$0xff]  ;;  %v16121_v18 = vld [vmem:[#allocation2 + $0x28] sm:$0xff]  ;;  %3511 = vmatpush1.bf16.msra.mxu0 %v13647_v28  ;;  %v13634_v35 = vld [vmem:[%s16068_s16 + $0x16c] ss:$36 sps:$4 sm:$0xff]   ;;  %v15482_v23 = vmov 0   ;;  %vm15484_vm3 = vmmov 0  }
 0x328   : > { %v1984_v12 = vld [vmem:[#allocation2] sm:$0xff]  ;;  %v16117_v16 = vld [vmem:[#allocation2 + $0x18] sm:$0xff]  ;;  %3512 = vmatprep.subr.bf16.mxu0 %v13649_v29  ;;  %v13633_v34 = vld [vmem:[%s16068_s16 + $0x120] ss:$36 sps:$4 sm:$0xff]   ;;  %3542 = vmatprep.mubr.bf16.mxu0 %v15482_v23  ;;  %s15485_s11 = smov 64   ;;  %vm3895_vm4 = vcmask 523264  }
 0x329   : > { %v1985_v13 = vld [vmem:[#allocation2 + $0x8] sm:$0xff]  ;;  %v16119_v17 = vld [vmem:[#allocation2 + $0x20] sm:$0xff]  ;;  %3470 = vmatpush1.bf16.msra.mxu1 %v13624_v24  ;;  %v13631_v33 = vld [vmem:[%s16068_s16 + $0x124] ss:$36 sps:$4 sm:$0xff]   ;;  %s17892_s21 = sld [smem:[#allocation39_spill]]  ;;  %vm3983_vm6 = vcmask 130048  }
 0x32a   : > { %v1992_v15 = vadd.f32 %v1985_v13, %v1984_v12  ;;  %v1996_v19 = vadd.f32 %v16119_v17, %v16117_v16  ;;  %3471 = vmatprep.subr.bf16.mxu1 %v13625_v25  ;;  %v13636_v36 = vld [vmem:[%s16068_s16 + $0x168] ss:$36 sps:$4 sm:$0xff]   ;;  %v13637_v38 = vld [vmem:[%s16068_s16 + $0x1b4] ss:$36 sps:$4 sm:$0xff]   ;;  %v13640_v40 = vld [vmem:[%s16068_s16 + $0x1fc] ss:$36 sps:$4 sm:$0xff]  }
 0x32b   : > { %3513 = vmatpush1.bf16.msra.mxu0 %v13653_v31  ;;  %v13639_v39 = vld [vmem:[%s16068_s16 + $0x1b0] ss:$36 sps:$4 sm:$0xff]   ;;  %v13642_v41 = vld [vmem:[%s16068_s16 + $0x1f8] ss:$36 sps:$4 sm:$0xff]   ;;  %v13645_v42 = vld [vmem:[%s16068_s16 + $0x244] ss:$36 sps:$4 sm:$0xff]   ;;  %v2035_v31 = vlaneseq }
 0x32c   : > { %v1993_v20 = vadd.f32 %v1992_v15, %v1986_v14  ;;  %v1997_v21 = vadd.f32 %v1996_v19, %v16121_v18  ;;  %v13648_v43 = vld [vmem:[%s16068_s16 + $0x240] ss:$36 sps:$4 sm:$0xff]   ;;  %v13651_v44 = vld [vmem:[%s16068_s16 + $0x28c] ss:$36 sps:$4 sm:$0xff]   ;;  %v13655_v2 = vld [vmem:[%s16068_s16 + $0x514] ss:$36 sps:$4 sm:$0xff]  }
 0x32d   : > { %3472 = vmatpush1.bf16.msra.mxu1 %v13627_v27  ;;  %v13654_v1 = vld [vmem:[%s16068_s16 + $0x288] ss:$36 sps:$4 sm:$0xff]   ;;  %v13657_v3 = vld [vmem:[%s16068_s16 + $0x2d4] ss:$36 sps:$4 sm:$0xff]   ;;  %3514 = vmatprep.subr.bf16.mxu0 %v13655_v2  ;;  %v13661_v6 = vld [vmem:[%s16068_s16 + $0x55c] ss:$36 sps:$4 sm:$0xff]  }
 0x32e   : > { %1994 = vadd.xlane.f32.xlu0 %v1993_v20  ;;  %3473 = vmatprep.subr.bf16.mxu1 %v13628_v30  ;;  %v13659_v4 = vld [vmem:[%s16068_s16 + $0x510] ss:$36 sps:$4 sm:$0xff]   ;;  %v13663_v7 = vld [vmem:[%s16068_s16 + $0x31c] ss:$36 sps:$4 sm:$0xff]   ;;  %v13667_v10 = vld [vmem:[%s16068_s16 + $0x5a4] ss:$36 sps:$4 sm:$0xff]  }
 0x32f   : > { %v13660_v5 = vld [vmem:[%s16068_s16 + $0x2d0] ss:$36 sps:$4 sm:$0xff]   ;;  %3515 = vmatpush1.bf16.msra.mxu0 %v13659_v4  ;;  %v13665_v8 = vld [vmem:[%s16068_s16 + $0x558] ss:$36 sps:$4 sm:$0xff]   ;;  %v13669_v11 = vld [vmem:[%s16068_s16 + $0x364] ss:$36 sps:$4 sm:$0xff]   ;;  %s17893_s28 = smov %s17892_s21 }
 0x330   : > { %3516 = vmatprep.subr.bf16.mxu0 %v13661_v6  ;;  %v13666_v9 = vld [vmem:[%s16068_s16 + $0x318] ss:$36 sps:$4 sm:$0xff]   ;;  %v13675_v15 = vld [vmem:[%s16068_s16 + $0x3ac] ss:$36 sps:$4 sm:$0xff]   ;;  %vm16490_vm5 = vmpackc.low %vm3895_vm4, %vm3895_vm4  ;;  %p12539_p0 = scmp.ne.s32.totalorder %s15594_s27, 11 }
 0x331   : > { %3474 = vmatpush1.bf16.msra.mxu1 %v13630_v32  ;;  %v13681_v19 = vld [vmem:[%s16068_s16 + $0x3f4] ss:$36 sps:$4 sm:$0xff]   ;;  %v13685_v22 = vld [vmem:[%s16068_s16 + $0x67c] ss:$36 sps:$4 sm:$0xff]   ;;  %v13696_v27 = vld [vmem:[%s16068_s16 + $0xc] ss:$36 sps:$4 sm:$0xff]  }
 0x332   : > { %1998 = vadd.xlane.f32.xlu0 %v1997_v21  ;;  %3475 = vmatprep.subr.bf16.mxu1 %v13631_v33  ;;  %v13683_v20 = vld [vmem:[%s16068_s16 + $0x630] ss:$36 sps:$4 sm:$0xff]   ;;  %v13687_v37 = vld [vmem:[%s16068_s16 + $0x43c] ss:$36 sps:$4 sm:$0xff]   ;;  %vm15487_vm7 = vmmov (!%p12539_p0), 0  }
 0x333   : > { %3517 = vmatpush1.bf16.msra.mxu0 %v13665_v8  ;;  %v13684_v21 = vld [vmem:[%s16068_s16 + $0x3f0] ss:$36 sps:$4 sm:$0xff]   ;;  %v13689_v24 = vld [vmem:[%s16068_s16 + $0x678] ss:$36 sps:$4 sm:$0xff]  }
 0x334   : > { %3518 = vmatprep.subr.bf16.mxu0 %v13667_v10  ;;  %v13690_v25 = vld [vmem:[%s16068_s16 + $0x438] ss:$36 sps:$4 sm:$0xff]  }
 0x335   : > { %3476 = vmatpush1.bf16.msra.mxu1 %v13633_v34  ;;  %v13693_v26 = vld [vmem:[%s16068_s16 + $0x14] ss:$36 sps:$4 sm:$0xff]  }
 0x336   : > { %3477 = vmatprep.subr.bf16.mxu1 %v13634_v35  ;;  %v16204_v35 = vshrl.u32 %v2035_v31, 7  ;;  %v13697_v10 = vld [vmem:[%s16068_s16 + $0x58] ss:$36 sps:$4 sm:$0xff]   ;;  %v13727_v31 = vld [vmem:[%s16068_s16 + $0x1c0] ss:$36 sps:$4 sm:$0xff]  }
 0x339   : > { %3478 = vmatpush1.bf16.msra.mxu1 %v13636_v36  ;;  %v1982_v36 = vld [vmem:[%s16054_s2 + $0x8] sm:$0xff] }
 0x33a   : > { %3479 = vmatprep.subr.bf16.mxu1 %v13637_v38  ;;  %v1983_v38 = vld [vmem:[%s16054_s2 + $0x10] sm:$0xff] }
 0x33d   : > { %3480 = vmatpush1.bf16.msra.mxu1 %v13639_v39  ;;  %v16209_v39 = vsub.s32 0, %v16204_v35 }
 0x33e   : > { %3481 = vmatprep.subr.bf16.mxu1 %v13640_v40  ;;  %v1981_v40 = vld [vmem:[%s16054_s2] sm:$0xff] }
 0x341   : > { %3482 = vmatpush1.bf16.msra.mxu1 %v13642_v41 }
 0x342   : > { %3483 = vmatprep.subr.bf16.mxu1 %v13645_v42  ;;  %v16213_v42 = vsub.s32 1, %v16204_v35 }
 0x345   : > { %3484 = vmatpush1.bf16.msra.mxu1 %v13648_v43 }
 0x346   : > { %3485 = vmatprep.subr.bf16.mxu1 %v13651_v44  ;;  %v2042_v44 = vrot.slane %v1982_v36, %v16209_v39 }
 0x349   : > { %3486 = vmatpush1.bf16.msra.mxu1 %v13654_v1 }
 0x34a   : > { %3487 = vmatprep.subr.bf16.mxu1 %v13657_v3 }
 0x34d   : > { %3488 = vmatpush1.bf16.msra.mxu1 %v13660_v5  ;;  %v13694_v5 = vld [vmem:[%s16068_s16 + $0x8] ss:$36 sps:$4 sm:$0xff]  }
 0x34e   : > { %3489 = vmatprep.subr.bf16.mxu1 %v13663_v7 }
 0x351   : > { %3490 = vmatpush1.bf16.msra.mxu1 %v13666_v9 }
 0x352   : > { %3491 = vmatprep.subr.bf16.mxu1 %v13669_v11  ;;  %v13700_v11 = vld [vmem:[%s16068_s16 + $0x50] ss:$36 sps:$4 sm:$0xff]  }
 0x3bb   : > { %v1995_v45 = vpop.xlane.xlu0 %1994 }
 0x3bc   : > { %v2001_v46 = vmul.f32 0.0026041667, %v1995_v45 }
 0x3be   : > { %v16149_v47 = vsub.f32 %v1984_v12, %v2001_v46  ;;  %v16151_v48 = vsub.f32 %v1985_v13, %v2001_v46  ;;  %v16153_v49 = vsub.f32 %v1986_v14, %v2001_v46  ;;  %v13671_v12 = vld [vmem:[%s16068_s16 + $0x5a0] ss:$36 sps:$4 sm:$0xff]   ;;  %v13673_v14 = vld [vmem:[%s16068_s16 + $0x5ec] ss:$36 sps:$4 sm:$0xff]   ;;  %v2046_v46 = vrot.slane %v1983_v38, %v16209_v39 }
 0x3bf   : > { %v1999_v50 = vpop.xlane.xlu0 %1998  ;;  %v13672_v13 = vld [vmem:[%s16068_s16 + $0x360] ss:$36 sps:$4 sm:$0xff]   ;;  %3519 = vmatpush1.bf16.msra.mxu0 %v13671_v12  ;;  %v13702_v12 = vld [vmem:[%s16068_s16 + $0x54] ss:$36 sps:$4 sm:$0xff]  }
 0x3c0   : > { %v2002_v51 = vmul.f32 0.0026041667, %v1999_v50  ;;  %v2009_v52 = vmul.f32 %v16149_v47, %v16149_v47  ;;  %v2010_v53 = vmul.f32 %v16151_v48, %v16151_v48  ;;  %v2011_v54 = vmul.f32 %v16153_v49, %v16153_v49  ;;  %3492 = vmatpush1.bf16.msra.mxu1 %v13672_v13  ;;  %3520 = vmatprep.subr.bf16.mxu0 %v13673_v14  ;;  %v13705_v13 = vld [vmem:[%s16068_s16 + $0xa4] ss:$36 sps:$4 sm:$0xff]   ;;  %v13708_v14 = vld [vmem:[%s16068_s16 + $0x9c] ss:$36 sps:$4 sm:$0xff]  }
 0x3c1   : > { %3493 = vmatprep.subr.bf16.mxu1 %v13675_v15  ;;  %v13703_v15 = vld [vmem:[%s16068_s16 + $0xa0] ss:$36 sps:$4 sm:$0xff]  }
 0x3c2   : > { %v16162_v55 = vsub.f32 %v16117_v16, %v2002_v51  ;;  %v16165_v56 = vsub.f32 %v16119_v17, %v2002_v51  ;;  %v16168_v57 = vsub.f32 %v16121_v18, %v2002_v51  ;;  %v2015_v58 = vadd.f32 %v2010_v53, %v2009_v52  ;;  %v13677_v16 = vld [vmem:[%s16068_s16 + $0x5e8] ss:$36 sps:$4 sm:$0xff]   ;;  %v13679_v18 = vld [vmem:[%s16068_s16 + $0x634] ss:$36 sps:$4 sm:$0xff]  }
 0x3c3   : > { %v13678_v17 = vld [vmem:[%s16068_s16 + $0x3a8] ss:$36 sps:$4 sm:$0xff]   ;;  %3521 = vmatpush1.bf16.msra.mxu0 %v13677_v16  ;;  %v2038_v51 = vrot.slane %v1981_v40, %v16209_v39  ;;  %v2060_v53 = vrot.slane %v1982_v36, %v16213_v42  ;;  %v13706_v16 = vld [vmem:[%s16068_s16 + $0x98] ss:$36 sps:$4 sm:$0xff]  }
 0x3c4   : > { %v2016_v59 = vadd.f32 %v2015_v58, %v2011_v54  ;;  %v2012_v60 = vmul.f32 %v16162_v55, %v16162_v55  ;;  %v2013_v61 = vmul.f32 %v16165_v56, %v16165_v56  ;;  %v2014_v62 = vmul.f32 %v16168_v57, %v16168_v57  ;;  %3494 = vmatpush1.bf16.msra.mxu1 %v13678_v17  ;;  %v13711_v17 = vld [vmem:[%s16068_s16 + $0xec] ss:$36 sps:$4 sm:$0xff]  }
 0x3c5   : > { %3522 = vmatprep.subr.bf16.mxu0 %v13679_v18  ;;  %3495 = vmatprep.subr.bf16.mxu1 %v13681_v19  ;;  %v2064_v54 = vrot.slane %v1983_v38, %v16213_v42  ;;  %v13714_v18 = vld [vmem:[%s16068_s16 + $0xe4] ss:$36 sps:$4 sm:$0xff]  }
 0x3c6   : > { %2017 = vadd.xlane.f32.xlu1 %v2016_v59  ;;  %v2019_v63 = vadd.f32 %v2013_v61, %v2012_v60  ;;  %v13709_v19 = vld [vmem:[%s16068_s16 + $0xe8] ss:$36 sps:$4 sm:$0xff]   ;;  %v13736_v38 = vld [vmem:[%s16068_s16 + $0x200] ss:$36 sps:$4 sm:$0xff]  }
 0x3c7   : > { %3523 = vmatpush1.bf16.msra.mxu0 %v13683_v20  ;;  %v13712_v20 = vld [vmem:[%s16068_s16 + $0xe0] ss:$36 sps:$4 sm:$0xff]   ;;  %v13733_v36 = vld [vmem:[%s16068_s16 + $0x208] ss:$36 sps:$4 sm:$0xff]  }
 0x3c8   : > { %v2020_v0 = vadd.f32 %v2019_v63, %v2014_v62  ;;  %3496 = vmatpush1.bf16.msra.mxu1 %v13684_v21  ;;  %3524 = vmatprep.subr.bf16.mxu0 %v13685_v22  ;;  %v13717_v21 = vld [vmem:[%s16068_s16 + $0x134] ss:$36 sps:$4 sm:$0xff]   ;;  %v13720_v22 = vld [vmem:[%s16068_s16 + $0x12c] ss:$36 sps:$4 sm:$0xff]  }
 0x3c9   : > { %3497 = vmatprep.subr.bf16.mxu1 %v13687_v37  ;;  %v13715_v37 = vld [vmem:[%s16068_s16 + $0x130] ss:$36 sps:$4 sm:$0xff]  }
 0x3ca   : > { %2021 = vadd.xlane.f32.xlu1 %v2020_v0  ;;  %v13691_v0 = vld [vmem:[%s16068_s16 + $0x10] ss:$36 sps:$4 sm:$0xff]  }
 0x3cb   : > { %3525 = vmatpush1.bf16.msra.mxu0 %v13689_v24  ;;  %v13718_v24 = vld [vmem:[%s16068_s16 + $0x128] ss:$36 sps:$4 sm:$0xff]  }
 0x3cc   : > { %3498 = vmatpush1.bf16.msra.mxu1 %v13690_v25  ;;  %3639 = vmatprep.subr.bf16.mxu0 %v13693_v26  ;;  %v13723_v25 = vld [vmem:[%s16068_s16 + $0x17c] ss:$36 sps:$4 sm:$0xff]   ;;  %v13726_v26 = vld [vmem:[%s16068_s16 + $0x174] ss:$36 sps:$4 sm:$0xff]  }
 0x3cd   : > { %3553 = vmatprep.subr.bf16.mxu1 %v13696_v27  ;;  %v13721_v27 = vld [vmem:[%s16068_s16 + $0x178] ss:$36 sps:$4 sm:$0xff]  }
 0x453   : > { %v2018_v28 = vpop.xlane.xlu1 %2017 }
 0x454   : > { %v2023_v29 = vmul.f32 0.0026041667, %v2018_v28  ;;  %v13724_v28 = vld [vmem:[%s16068_s16 + $0x170] ss:$36 sps:$4 sm:$0xff]  }
 0x456   : > { %v2025_v30 = vadd.f32 1e-06, %v2023_v29  ;;  %v13729_v29 = vld [vmem:[%s16068_s16 + $0x1c4] ss:$36 sps:$4 sm:$0xff]  }
 0x457   : > { %v2022_v32 = vpop.xlane.xlu1 %2021 }
 0x458   : > { %14843 = vrsqrt.f32 %v2025_v30  ;;  %v2024_v33 = vmul.f32 0.0026041667, %v2022_v32  ;;  %v13732_v30 = vld [vmem:[%s16068_s16 + $0x1bc] ss:$36 sps:$4 sm:$0xff]  }
 0x459   : > { %v13730_v32 = vld [vmem:[%s16068_s16 + $0x1b8] ss:$36 sps:$4 sm:$0xff]  }
 0x45a   : > { %v2026_v34 = vadd.f32 1e-06, %v2024_v33  ;;  %v13735_v33 = vld [vmem:[%s16068_s16 + $0x20c] ss:$36 sps:$4 sm:$0xff]  }
 0x45c   : > { %14845 = vrsqrt.f32 %v2026_v34  ;;  %v13738_v34 = vld [vmem:[%s16068_s16 + $0x204] ss:$36 sps:$4 sm:$0xff]  }
 0x462   : > { %v14844_v41 = vpop.eup %14843 }
 0x463   : > { %v2030_v43 = vmul.f32 %v14844_v41, %v16151_v48  ;;  %v2031_v45 = vmul.f32 %v14844_v41, %v16153_v49  ;;  %v2029_v50 = vmul.f32 %v14844_v41, %v16149_v47  ;;  %v2056_v47 = vrot.slane %v1981_v40, %v16213_v42  ;;  %v13741_v40 = vld [vmem:[%s16068_s16 + $0x254] ss:$36 sps:$4 sm:$0xff]   ;;  %v13744_v41 = vld [vmem:[%s16068_s16 + $0x24c] ss:$36 sps:$4 sm:$0xff]  }
 0x465   : > { %v2048_v48 = vmul.f32 %v2042_v44, %v2030_v43  ;;  %v2049_v49 = vmul.f32 %v2046_v46, %v2031_v45  ;;  %v2047_v61 = vmul.f32 %v2038_v51, %v2029_v50  ;;  %v13739_v43 = vld [vmem:[%s16068_s16 + $0x250] ss:$36 sps:$4 sm:$0xff]   ;;  %v13747_v45 = vld [vmem:[%s16068_s16 + $0x29c] ss:$36 sps:$4 sm:$0xff]  }
 0x466   : > { %v14846_v52 = vpop.eup %14845  ;;  %v13745_v50 = vld [vmem:[%s16068_s16 + $0x298] ss:$36 sps:$4 sm:$0xff]  }
 0x467   : > { %v2033_v58 = vmul.f32 %v14846_v52, %v16165_v56  ;;  %v2034_v59 = vmul.f32 %v14846_v52, %v16168_v57  ;;  %v2032_v60 = vmul.f32 %v14846_v52, %v16162_v55  ;;  %v2066_v2 = vadd.f32 %v2060_v53, %v2048_v48  ;;  %v13699_v55 = vld [vmem:[%s16068_s16 + $0x5c] ss:$36 sps:$4 sm:$0xff]   ;;  %v13753_v52 = vld [vmem:[%s16068_s16 + $0x2e4] ss:$36 sps:$4 sm:$0xff]   ;;  %v13759_v48 = vld [vmem:[%s16068_s16 + $0x32c] ss:$36 sps:$4 sm:$0xff]  }
 0x468   : > { %v2067_v56 = vadd.f32 %v2064_v54, %v2049_v49  ;;  %v2065_v57 = vadd.f32 %v2056_v47, %v2047_v61  ;;  %v13757_v49 = vld [vmem:[%s16068_s16 + $0x328] ss:$36 sps:$4 sm:$0xff]   ;;  %v13765_v61 = vld [vmem:[%s16068_s16 + $0x374] ss:$36 sps:$4 sm:$0xff]  }
 0x469   : > { %v2051_v62 = vmul.f32 %v2042_v44, %v2033_v58  ;;  %v2052_v63 = vmul.f32 %v2046_v46, %v2034_v59  ;;  %v2050_v1 = vmul.f32 %v2038_v51, %v2032_v60  ;;  %v13742_v44 = vld [vmem:[%s16068_s16 + $0x248] ss:$36 sps:$4 sm:$0xff]   ;;  %v13750_v46 = vld [vmem:[%s16068_s16 + $0x294] ss:$36 sps:$4 sm:$0xff]   ;;  %v13760_v60 = vld [vmem:[%s16068_s16 + $0x320] ss:$36 sps:$4 sm:$0xff]  }
 0x46a   : > { %v13748_v51 = vld [vmem:[%s16068_s16 + $0x290] ss:$36 sps:$4 sm:$0xff]   ;;  %v13754_v58 = vld [vmem:[%s16068_s16 + $0x2d8] ss:$36 sps:$4 sm:$0xff]   ;;  %v13762_v59 = vld [vmem:[%s16068_s16 + $0x324] ss:$36 sps:$4 sm:$0xff]  }
 0x46b   : > { %v2069_v3 = vadd.f32 %v2060_v53, %v2051_v62  ;;  %v2070_v4 = vadd.f32 %v2064_v54, %v2052_v63  ;;  %v2068_v6 = vadd.f32 %v2056_v47, %v2050_v1  ;;  %v13756_v53 = vld [vmem:[%s16068_s16 + $0x2dc] ss:$36 sps:$4 sm:$0xff]   ;;  %v13768_v47 = vld [vmem:[%s16068_s16 + $0x36c] ss:$36 sps:$4 sm:$0xff]   ;;  %v13774_v1 = vld [vmem:[%s16068_s16 + $0x3b4] ss:$36 sps:$4 sm:$0xff]  }
 0x46c   : > { %v13751_v54 = vld [vmem:[%s16068_s16 + $0x2e0] ss:$36 sps:$4 sm:$0xff]   ;;  %v13763_v62 = vld [vmem:[%s16068_s16 + $0x370] ss:$36 sps:$4 sm:$0xff]   ;;  %v13766_v63 = vld [vmem:[%s16068_s16 + $0x368] ss:$36 sps:$4 sm:$0xff]  }
 0x46d   : > { %v16230_v7 = vpack.c.bf16 %v2069_v3, %v2066_v2  ;;  %v16232_v8 = vpack.c.bf16 %v2070_v4, %v2067_v56  ;;  %v16234_v9 = vpack.c.bf16 %v2068_v6, %v2065_v57  ;;  %v13769_v2 = vld [vmem:[%s16068_s16 + $0x3b8] ss:$36 sps:$4 sm:$0xff]   ;;  %v13772_v3 = vld [vmem:[%s16068_s16 + $0x3b0] ss:$36 sps:$4 sm:$0xff]   ;;  %v13777_v56 = vld [vmem:[%s16068_s16 + $0x404] ss:$36 sps:$4 sm:$0xff]  }
 0x46e   : > { %v13780_v4 = vld [vmem:[%s16068_s16 + $0x3fc] ss:$36 sps:$4 sm:$0xff]   ;;  %v13783_v6 = vld [vmem:[%s16068_s16 + $0x44c] ss:$36 sps:$4 sm:$0xff]  }
 0x46f   : > { %3499 = vmatprep.mubr.bf16.mxu1 %v16230_v7  ;;  %3543 = vmatmul.mubr.bf16.vlgmr.msra.gmra.mrb[0].mxu0 %v16232_v8  ;;  %v13778_v57 = vld [vmem:[%s16068_s16 + $0x3f8] ss:$36 sps:$4 sm:$0xff]  }
 0x470   : > { %3640 = vmatpush1.bf16.msra.mxu0 %v13691_v0  ;;  %3500 = vmatmul.mubr.bf16.vlgmr.msra.gmra.mrb[0].mxu1 %v16234_v9  ;;  %v13771_v0 = vld [vmem:[%s16068_s16 + $0x3bc] ss:$36 sps:$4 sm:$0xff]  }
 0x471   : > { %3554 = vmatpush1.bf16.msra.mxu1 %v13694_v5  ;;  %3671 = vmatprep.mubr.bf16.mxu0 %v16230_v7  ;;  %v13775_v5 = vld [vmem:[%s16068_s16 + $0x400] ss:$36 sps:$4 sm:$0xff]  }
 0x472   : > { %3585 = vmatprep.mubr.bf16.mxu1 %v16230_v7  ;;  %3641 = vmatprep.subr.bf16.mxu0 %v13699_v55  ;;  %v13786_v55 = vld [vmem:[%s16068_s16 + $0x444] ss:$36 sps:$4 sm:$0xff]  }
 0x473   : > { %3555 = vmatprep.subr.bf16.mxu1 %v13702_v12  ;;  %v13789_v12 = vld [vmem:[%s16068_s16 + $0x494] ss:$36 sps:$4 sm:$0xff]  }
 0x474   : > { %3642 = vmatpush1.bf16.msra.mxu0 %v13697_v10  ;;  %v13781_v10 = vld [vmem:[%s16068_s16 + $0x448] ss:$36 sps:$4 sm:$0xff]  }
 0x475   : > { %3556 = vmatpush1.bf16.msra.mxu1 %v13700_v11  ;;  %3643 = vmatprep.subr.bf16.mxu0 %v13705_v13  ;;  %v13784_v11 = vld [vmem:[%s16068_s16 + $0x440] ss:$36 sps:$4 sm:$0xff]   ;;  %v13792_v13 = vld [vmem:[%s16068_s16 + $0x48c] ss:$36 sps:$4 sm:$0xff]  }
 0x476   : > { %3557 = vmatprep.subr.bf16.mxu1 %v13708_v14  ;;  %v13787_v14 = vld [vmem:[%s16068_s16 + $0x490] ss:$36 sps:$4 sm:$0xff]  }
 0x478   : > { %3644 = vmatpush1.bf16.msra.mxu0 %v13703_v15  ;;  %v13790_v15 = vld [vmem:[%s16068_s16 + $0x488] ss:$36 sps:$4 sm:$0xff]  }
 0x479   : > { %3558 = vmatpush1.bf16.msra.mxu1 %v13706_v16  ;;  %3645 = vmatprep.subr.bf16.mxu0 %v13711_v17  ;;  %v13795_v16 = vld [vmem:[%s16068_s16 + $0x4dc] ss:$36 sps:$4 sm:$0xff]   ;;  %v13798_v17 = vld [vmem:[%s16068_s16 + $0x4d4] ss:$36 sps:$4 sm:$0xff]  }
 0x47a   : > { %3559 = vmatprep.subr.bf16.mxu1 %v13714_v18  ;;  %v13793_v18 = vld [vmem:[%s16068_s16 + $0x4d8] ss:$36 sps:$4 sm:$0xff]  }
 0x47c   : > { %3646 = vmatpush1.bf16.msra.mxu0 %v13709_v19  ;;  %v13796_v19 = vld [vmem:[%s16068_s16 + $0x4d0] ss:$36 sps:$4 sm:$0xff]  }
 0x47d   : > { %3560 = vmatpush1.bf16.msra.mxu1 %v13712_v20  ;;  %3647 = vmatprep.subr.bf16.mxu0 %v13717_v21  ;;  %v13801_v20 = vld [vmem:[%s16068_s16 + $0x524] ss:$36 sps:$4 sm:$0xff]  }
 0x47e   : > { %3561 = vmatprep.subr.bf16.mxu1 %v13720_v22  ;;  %v13799_v21 = vld [vmem:[%s16068_s16 + $0x520] ss:$36 sps:$4 sm:$0xff]  }
 0x47f   : > { %v13804_v22 = vld [vmem:[%s16068_s16 + $0x51c] ss:$36 sps:$4 sm:$0xff]  }
 0x480   : > { %3648 = vmatpush1.bf16.msra.mxu0 %v13715_v37  ;;  %v13802_v37 = vld [vmem:[%s16068_s16 + $0x518] ss:$36 sps:$4 sm:$0xff]  }
 0x481   : > { %3562 = vmatpush1.bf16.msra.mxu1 %v13718_v24  ;;  %3649 = vmatprep.subr.bf16.mxu0 %v13723_v25  ;;  %v13807_v24 = vld [vmem:[%s16068_s16 + $0x56c] ss:$36 sps:$4 sm:$0xff]  }
 0x482   : > { %3563 = vmatprep.subr.bf16.mxu1 %v13726_v26  ;;  %v13805_v25 = vld [vmem:[%s16068_s16 + $0x568] ss:$36 sps:$4 sm:$0xff]  }
 0x483   : > { %v13810_v26 = vld [vmem:[%s16068_s16 + $0x564] ss:$36 sps:$4 sm:$0xff]  }
 0x484   : > { %3650 = vmatpush1.bf16.msra.mxu0 %v13721_v27  ;;  %v13808_v27 = vld [vmem:[%s16068_s16 + $0x560] ss:$36 sps:$4 sm:$0xff]  }
 0x485   : > { %3564 = vmatpush1.bf16.msra.mxu1 %v13724_v28  ;;  %3651 = vmatprep.subr.bf16.mxu0 %v13729_v29  ;;  %v13813_v28 = vld [vmem:[%s16068_s16 + $0x5b4] ss:$36 sps:$4 sm:$0xff]  }
 0x486   : > { %3565 = vmatprep.subr.bf16.mxu1 %v13732_v30  ;;  %v13811_v29 = vld [vmem:[%s16068_s16 + $0x5b0] ss:$36 sps:$4 sm:$0xff]  }
 0x487   : > { %v13816_v30 = vld [vmem:[%s16068_s16 + $0x5ac] ss:$36 sps:$4 sm:$0xff]  }
 0x488   : > { %3652 = vmatpush1.bf16.msra.mxu0 %v13727_v31  ;;  %v13814_v31 = vld [vmem:[%s16068_s16 + $0x5a8] ss:$36 sps:$4 sm:$0xff]  }
 0x489   : > { %3566 = vmatpush1.bf16.msra.mxu1 %v13730_v32  ;;  %3653 = vmatprep.subr.bf16.mxu0 %v13735_v33  ;;  %v13819_v32 = vld [vmem:[%s16068_s16 + $0x5fc] ss:$36 sps:$4 sm:$0xff]  }
 0x48a   : > { %3567 = vmatprep.subr.bf16.mxu1 %v13738_v34  ;;  %v13817_v33 = vld [vmem:[%s16068_s16 + $0x5f8] ss:$36 sps:$4 sm:$0xff]  }
 0x48b   : > { %v13822_v34 = vld [vmem:[%s16068_s16 + $0x5f4] ss:$36 sps:$4 sm:$0xff]  }
 0x48c   : > { %3654 = vmatpush1.bf16.msra.mxu0 %v13733_v36  ;;  %v13820_v36 = vld [vmem:[%s16068_s16 + $0x5f0] ss:$36 sps:$4 sm:$0xff]  }
 0x48d   : > { %3568 = vmatpush1.bf16.msra.mxu1 %v13736_v38  ;;  %3655 = vmatprep.subr.bf16.mxu0 %v13741_v40  ;;  %v13825_v38 = vld [vmem:[%s16068_s16 + $0x644] ss:$36 sps:$4 sm:$0xff]   ;;  %v13828_v40 = vld [vmem:[%s16068_s16 + $0x63c] ss:$36 sps:$4 sm:$0xff]  }
 0x48e   : > { %3569 = vmatprep.subr.bf16.mxu1 %v13744_v41  ;;  %v13823_v41 = vld [vmem:[%s16068_s16 + $0x640] ss:$36 sps:$4 sm:$0xff]  }
 0x490   : > { %3656 = vmatpush1.bf16.msra.mxu0 %v13739_v43  ;;  %v13826_v43 = vld [vmem:[%s16068_s16 + $0x638] ss:$36 sps:$4 sm:$0xff]  }
 0x491   : > { %3570 = vmatpush1.bf16.msra.mxu1 %v13742_v44  ;;  %3657 = vmatprep.subr.bf16.mxu0 %v13747_v45  ;;  %v13831_v44 = vld [vmem:[%s16068_s16 + $0x68c] ss:$36 sps:$4 sm:$0xff]   ;;  %v13834_v45 = vld [vmem:[%s16068_s16 + $0x684] ss:$36 sps:$4 sm:$0xff]  }
 0x492   : > { %3571 = vmatprep.subr.bf16.mxu1 %v13750_v46  ;;  %v13829_v46 = vld [vmem:[%s16068_s16 + $0x688] ss:$36 sps:$4 sm:$0xff]  }
 0x494   : > { %3658 = vmatpush1.bf16.msra.mxu0 %v13745_v50  ;;  %v13832_v50 = vld [vmem:[%s16068_s16 + $0x680] ss:$36 sps:$4 sm:$0xff]  }
 0x495   : > { %3572 = vmatpush1.bf16.msra.mxu1 %v13748_v51  ;;  %3659 = vmatprep.subr.bf16.mxu0 %v13753_v52  ;;  %v13835_v51 = vld [vmem:[%s16068_s16 + $0x260] ss:$36 sps:$4 sm:$0xff]  }
 0x496   : > { %3573 = vmatprep.subr.bf16.mxu1 %v13756_v53  ;;  %v13838_v52 = vld [vmem:[%s16068_s16 + $0x1c] ss:$36 sps:$4 sm:$0xff]  }
 0x497   : > { %v13839_v53 = vld [vmem:[%s16068_s16 + $0x20] ss:$36 sps:$4 sm:$0xff]  }
 0x498   : > { %3660 = vmatpush1.bf16.msra.mxu0 %v13751_v54  ;;  %v13836_v54 = vld [vmem:[%s16068_s16 + $0x18] ss:$36 sps:$4 sm:$0xff]  }
 0x499   : > { %3574 = vmatpush1.bf16.msra.mxu1 %v13754_v58  ;;  %3661 = vmatprep.subr.bf16.mxu0 %v13759_v48  ;;  %v13840_v58 = vld [vmem:[%s16068_s16 + $0x2a8] ss:$36 sps:$4 sm:$0xff]  }
 0x49a   : > { %3575 = vmatprep.subr.bf16.mxu1 %v13762_v59  ;;  %v13843_v48 = vld [vmem:[%s16068_s16 + $0x64] ss:$36 sps:$4 sm:$0xff]  }
 0x49b   : > { %v13844_v59 = vld [vmem:[%s16068_s16 + $0x68] ss:$36 sps:$4 sm:$0xff]  }
 0x49c   : > { %3662 = vmatpush1.bf16.msra.mxu0 %v13757_v49  ;;  %v13841_v49 = vld [vmem:[%s16068_s16 + $0x60] ss:$36 sps:$4 sm:$0xff]  }
 0x49d   : > { %3576 = vmatpush1.bf16.msra.mxu1 %v13760_v60  ;;  %3663 = vmatprep.subr.bf16.mxu0 %v13765_v61  ;;  %v13845_v60 = vld [vmem:[%s16068_s16 + $0x2f0] ss:$36 sps:$4 sm:$0xff]  }
 0x49e   : > { %3577 = vmatprep.subr.bf16.mxu1 %v13768_v47  ;;  %v13848_v61 = vld [vmem:[%s16068_s16 + $0xac] ss:$36 sps:$4 sm:$0xff]  }
 0x49f   : > { %v13849_v47 = vld [vmem:[%s16068_s16 + $0xb0] ss:$36 sps:$4 sm:$0xff]  }
 0x4a0   : > { %3664 = vmatpush1.bf16.msra.mxu0 %v13763_v62  ;;  %v13846_v62 = vld [vmem:[%s16068_s16 + $0xa8] ss:$36 sps:$4 sm:$0xff]  }
 0x4a1   : > { %3578 = vmatpush1.bf16.msra.mxu1 %v13766_v63  ;;  %3665 = vmatprep.subr.bf16.mxu0 %v13771_v0  ;;  %v13850_v63 = vld [vmem:[%s16068_s16 + $0x338] ss:$36 sps:$4 sm:$0xff]  }
 0x4a2   : > { %3579 = vmatprep.subr.bf16.mxu1 %v13774_v1  ;;  %v13853_v0 = vld [vmem:[%s16068_s16 + $0xf4] ss:$36 sps:$4 sm:$0xff]  }
 0x4a3   : > { %v13851_v1 = vld [vmem:[%s16068_s16 + $0xf0] ss:$36 sps:$4 sm:$0xff]  }
 0x4a4   : > { %3666 = vmatpush1.bf16.msra.mxu0 %v13769_v2  ;;  %v13855_v2 = vld [vmem:[%s16068_s16 + $0x380] ss:$36 sps:$4 sm:$0xff]  }
 0x4a5   : > { %3580 = vmatpush1.bf16.msra.mxu1 %v13772_v3  ;;  %3667 = vmatprep.subr.bf16.mxu0 %v13777_v56  ;;  %v13858_v3 = vld [vmem:[%s16068_s16 + $0x13c] ss:$36 sps:$4 sm:$0xff]  }
 0x4a6   : > { %3581 = vmatprep.subr.bf16.mxu1 %v13780_v4  ;;  %v13859_v56 = vld [vmem:[%s16068_s16 + $0x140] ss:$36 sps:$4 sm:$0xff]   ;;  %v13856_v4 = vld [vmem:[%s16068_s16 + $0x138] ss:$36 sps:$4 sm:$0xff]  }
 0x4a8   : > { %3668 = vmatpush1.bf16.msra.mxu0 %v13775_v5  ;;  %v13860_v5 = vld [vmem:[%s16068_s16 + $0x3c8] ss:$36 sps:$4 sm:$0xff]  }
 0x4a9   : > { %3582 = vmatpush1.bf16.msra.mxu1 %v13778_v57  ;;  %3669 = vmatprep.subr.bf16.mxu0 %v13783_v6  ;;  %v13863_v57 = vld [vmem:[%s16068_s16 + $0x184] ss:$36 sps:$4 sm:$0xff]  }
 0x4aa   : > { %3583 = vmatprep.subr.bf16.mxu1 %v13786_v55  ;;  %v13864_v6 = vld [vmem:[%s16068_s16 + $0x188] ss:$36 sps:$4 sm:$0xff]   ;;  %v13861_v55 = vld [vmem:[%s16068_s16 + $0x180] ss:$36 sps:$4 sm:$0xff]  }
 0x4ac   : > { %3670 = vmatpush1.bf16.msra.mxu0 %v13781_v10  ;;  %v13865_v10 = vld [vmem:[%s16068_s16 + $0x410] ss:$36 sps:$4 sm:$0xff]  }
 0x4ad   : > { %3584 = vmatpush1.bf16.msra.mxu1 %v13784_v11  ;;  %3682 = vmatprep.subr.bf16.mxu0 %v13789_v12  ;;  %v13868_v11 = vld [vmem:[%s16068_s16 + $0x1cc] ss:$36 sps:$4 sm:$0xff]  }
 0x4ae   : > { %3596 = vmatprep.subr.bf16.mxu1 %v13792_v13  ;;  %v13869_v12 = vld [vmem:[%s16068_s16 + $0x1d0] ss:$36 sps:$4 sm:$0xff]   ;;  %v13866_v13 = vld [vmem:[%s16068_s16 + $0x1c8] ss:$36 sps:$4 sm:$0xff]  }
 0x4af   : > { %3672 = vmatmul.mubr.bf16.vlgmr.msra.gmra.mrb[4].mxu0 %v16234_v9 }
 0x4b0   : > { %3586 = vmatmul.mubr.bf16.vlgmr.msra.gmra.mrb[4].mxu1 %v16234_v9  ;;  %3683 = vmatpush1.bf16.msra.mxu0 %v13787_v14  ;;  %v13870_v14 = vld [vmem:[%s16068_s16 + $0x458] ss:$36 sps:$4 sm:$0xff]  }
 0x4b1   : > { %3597 = vmatpush1.bf16.msra.mxu1 %v13790_v15  ;;  %3684 = vmatprep.subr.bf16.mxu0 %v13795_v16  ;;  %v13873_v15 = vld [vmem:[%s16068_s16 + $0x214] ss:$36 sps:$4 sm:$0xff]  }
 0x4b2   : > { %3598 = vmatprep.subr.bf16.mxu1 %v13798_v17  ;;  %3714 = vmatprep.mubr.bf16.mxu0 %v15482_v23  ;;  %v13874_v16 = vld [vmem:[%s16068_s16 + $0x218] ss:$36 sps:$4 sm:$0xff]   ;;  %v13871_v17 = vld [vmem:[%s16068_s16 + $0x210] ss:$36 sps:$4 sm:$0xff]  }
 0x4b3   : > { %3628 = vmatprep.mubr.bf16.mxu1 %v15482_v23 }
 0x4b4   : > { %3685 = vmatpush1.bf16.msra.mxu0 %v13793_v18  ;;  %v13877_v18 = vld [vmem:[%s16068_s16 + $0x25c] ss:$36 sps:$4 sm:$0xff]  }
 0x4b5   : > { %3599 = vmatpush1.bf16.msra.mxu1 %v13796_v19  ;;  %3686 = vmatprep.subr.bf16.mxu0 %v13801_v20  ;;  %v13875_v19 = vld [vmem:[%s16068_s16 + $0x258] ss:$36 sps:$4 sm:$0xff]   ;;  %v13880_v20 = vld [vmem:[%s16068_s16 + $0x2a4] ss:$36 sps:$4 sm:$0xff]  }
 0x4b6   : > { %3600 = vmatprep.subr.bf16.mxu1 %v13804_v22  ;;  %v13883_v22 = vld [vmem:[%s16068_s16 + $0x2ec] ss:$36 sps:$4 sm:$0xff]  }
 0x4b8   : > { %3687 = vmatpush1.bf16.msra.mxu0 %v13799_v21  ;;  %v13878_v21 = vld [vmem:[%s16068_s16 + $0x2a0] ss:$36 sps:$4 sm:$0xff]  }
 0x4b9   : > { %3601 = vmatpush1.bf16.msra.mxu1 %v13802_v37  ;;  %3688 = vmatprep.subr.bf16.mxu0 %v13807_v24  ;;  %v13881_v37 = vld [vmem:[%s16068_s16 + $0x2e8] ss:$36 sps:$4 sm:$0xff]   ;;  %v13886_v24 = vld [vmem:[%s16068_s16 + $0x334] ss:$36 sps:$4 sm:$0xff]  }
 0x4ba   : > { %3602 = vmatprep.subr.bf16.mxu1 %v13810_v26  ;;  %v13889_v26 = vld [vmem:[%s16068_s16 + $0x37c] ss:$36 sps:$4 sm:$0xff]  }
 0x4bc   : > { %3689 = vmatpush1.bf16.msra.mxu0 %v13805_v25  ;;  %v13884_v25 = vld [vmem:[%s16068_s16 + $0x330] ss:$36 sps:$4 sm:$0xff]  }
 0x4bd   : > { %3603 = vmatpush1.bf16.msra.mxu1 %v13808_v27  ;;  %3690 = vmatprep.subr.bf16.mxu0 %v13813_v28  ;;  %v13887_v27 = vld [vmem:[%s16068_s16 + $0x378] ss:$36 sps:$4 sm:$0xff]   ;;  %v13892_v28 = vld [vmem:[%s16068_s16 + $0x3c4] ss:$36 sps:$4 sm:$0xff]  }
 0x4be   : > { %3604 = vmatprep.subr.bf16.mxu1 %v13816_v30  ;;  %v13895_v30 = vld [vmem:[%s16068_s16 + $0x40c] ss:$36 sps:$4 sm:$0xff]  }
 0x4c0   : > { %3691 = vmatpush1.bf16.msra.mxu0 %v13811_v29  ;;  %v13890_v29 = vld [vmem:[%s16068_s16 + $0x3c0] ss:$36 sps:$4 sm:$0xff]  }
 0x4c1   : > { %3605 = vmatpush1.bf16.msra.mxu1 %v13814_v31  ;;  %3692 = vmatprep.subr.bf16.mxu0 %v13819_v32  ;;  %v13893_v31 = vld [vmem:[%s16068_s16 + $0x408] ss:$36 sps:$4 sm:$0xff]   ;;  %v13898_v32 = vld [vmem:[%s16068_s16 + $0x454] ss:$36 sps:$4 sm:$0xff]  }
 0x4c2   : > { %3606 = vmatprep.subr.bf16.mxu1 %v13822_v34  ;;  %v13901_v34 = vld [vmem:[%s16068_s16 + $0x49c] ss:$36 sps:$4 sm:$0xff]  }
 0x4c4   : > { %3693 = vmatpush1.bf16.msra.mxu0 %v13817_v33  ;;  %v13896_v33 = vld [vmem:[%s16068_s16 + $0x450] ss:$36 sps:$4 sm:$0xff]  }
 0x4c5   : > { %3607 = vmatpush1.bf16.msra.mxu1 %v13820_v36  ;;  %3694 = vmatprep.subr.bf16.mxu0 %v13825_v38  ;;  %v13899_v36 = vld [vmem:[%s16068_s16 + $0x498] ss:$36 sps:$4 sm:$0xff]   ;;  %v13904_v38 = vld [vmem:[%s16068_s16 + $0x4e4] ss:$36 sps:$4 sm:$0xff]  }
 0x4c6   : > { %3608 = vmatprep.subr.bf16.mxu1 %v13828_v40  ;;  %v13902_v40 = vld [vmem:[%s16068_s16 + $0x4e0] ss:$36 sps:$4 sm:$0xff]  }
 0x4c8   : > { %3695 = vmatpush1.bf16.msra.mxu0 %v13823_v41  ;;  %v13907_v41 = vld [vmem:[%s16068_s16 + $0x52c] ss:$36 sps:$4 sm:$0xff]  }
 0x4c9   : > { %3609 = vmatpush1.bf16.msra.mxu1 %v13826_v43  ;;  %3696 = vmatprep.subr.bf16.mxu0 %v13831_v44  ;;  %v13905_v43 = vld [vmem:[%s16068_s16 + $0x528] ss:$36 sps:$4 sm:$0xff]   ;;  %v13910_v44 = vld [vmem:[%s16068_s16 + $0x574] ss:$36 sps:$4 sm:$0xff]  }
 0x4ca   : > { %3610 = vmatprep.subr.bf16.mxu1 %v13834_v45  ;;  %v13908_v45 = vld [vmem:[%s16068_s16 + $0x570] ss:$36 sps:$4 sm:$0xff]  }
 0x4cc   : > { %3697 = vmatpush1.bf16.msra.mxu0 %v13829_v46  ;;  %v13911_v46 = vld [vmem:[%s16068_s16 + $0x5b8] ss:$36 sps:$4 sm:$0xff]  }
 0x4cd   : > { %3611 = vmatpush1.bf16.msra.mxu1 %v13832_v50  ;;  %12620 = vmatprep.subr.bf16.mxu0 %v13835_v51  ;;  %v13916_v50 = vld [vmem:[%s16068_s16 + $0x604] ss:$36 sps:$4 sm:$0xff]  }
 0x4ce   : > { %3725 = vmatprep.subr.bf16.mxu1 %v13838_v52  ;;  %v13914_v51 = vld [vmem:[%s16068_s16 + $0x600] ss:$36 sps:$4 sm:$0xff]   ;;  %v13919_v52 = vld [vmem:[%s16068_s16 + $0x64c] ss:$36 sps:$4 sm:$0xff]  }
 0x4cf   : > { %3715 = vmatmul.mubr.bf16.vlgmr.msra.gmra.mrb[4].mxu0 %v16232_v8 }
 0x4d0   : > { %3629 = vmatmul.mubr.bf16.vlgmr.msra.gmra.mrb[4].mxu1 %v16232_v8  ;;  %12621 = vmatpush3.bf16.msra.mxu0 %v13839_v53  ;;  %v13917_v53 = vld [vmem:[%s16068_s16 + $0x648] ss:$36 sps:$4 sm:$0xff]  }
 0x4d1   : > { %3843 = vmatprep.mubr.bf16.mxu0 %v16230_v7  ;;  %3726 = vmatpush1.bf16.msra.mxu1 %v13836_v54  ;;  %v13922_v54 = vld [vmem:[%s16068_s16 + $0x694] ss:$36 sps:$4 sm:$0xff]  }
 0x4d2   : > { %3757 = vmatprep.mubr.bf16.mxu1 %v16230_v7  ;;  %12622 = vmatprep.subr.bf16.mxu0 %v13840_v58  ;;  %v13854_v7 = vld [vmem:[%s16068_s16 + $0xf8] ss:$36 sps:$4 sm:$0xff]   ;;  %v13920_v58 = vld [vmem:[%s16068_s16 + $0x690] ss:$36 sps:$4 sm:$0xff]  }
 0x4d3   : > { %3727 = vmatprep.subr.bf16.mxu1 %v13843_v48  ;;  %v13923_v48 = vld [vmem:[%s16068_s16 + $0x4a0] ss:$36 sps:$4 sm:$0xff]  }
 0x4d4   : > { %12623 = vmatpush3.bf16.msra.mxu0 %v13844_v59  ;;  %v15483_v59 = vmov 0.0  }
 0x4d5   : > { %3728 = vmatpush1.bf16.msra.mxu1 %v13841_v49  ;;  %12624 = vmatprep.subr.bf16.mxu0 %v13845_v60  ;;  %v13924_v49 = vld [vmem:[%s16068_s16 + $0x4e8] ss:$36 sps:$4 sm:$0xff]   ;;  %v13925_v60 = vld [vmem:[%s16068_s16 + $0x530] ss:$36 sps:$4 sm:$0xff]  }
 0x4d6   : > { %3729 = vmatprep.subr.bf16.mxu1 %v13848_v61  ;;  %v13926_v61 = vld [vmem:[%s16068_s16 + $0x578] ss:$36 sps:$4 sm:$0xff]  }
 0x4d8   : > { %12625 = vmatpush3.bf16.msra.mxu0 %v13849_v47  ;;  %v13927_v47 = vld [vmem:[%s16068_s16 + $0x5c0] ss:$36 sps:$4 sm:$0xff]  }
 0x4d9   : > { %3730 = vmatpush1.bf16.msra.mxu1 %v13846_v62  ;;  %12626 = vmatprep.subr.bf16.mxu0 %v13850_v63  ;;  %v16420_v62 = vld [vmem:[%s16060_s9] sm:$0xff] }
 0x4da   : > { %3731 = vmatprep.subr.bf16.mxu1 %v13853_v0  ;;  %v2321_v63 = vrot.slane %v16420_v62, %v16209_v39  ;;  %v2325_v0 = vrot.slane %v16420_v62, %v16213_v42 }
 0x4dc   : > { %12627 = vmatpush3.bf16.msra.mxu0 %v13854_v7  ;;  %v13928_v7 = vld [vmem:[%s16068_s16 + $0x608] ss:$36 sps:$4 sm:$0xff]  }
 0x4dd   : > { %3732 = vmatpush1.bf16.msra.mxu1 %v13851_v1  ;;  %12628 = vmatprep.subr.bf16.mxu0 %v13855_v2 }
 0x4de   : > { %3733 = vmatprep.subr.bf16.mxu1 %v13858_v3 }
 0x4e0   : > { %12629 = vmatpush3.bf16.msra.mxu0 %v13859_v56 }
 0x4e1   : > { %3734 = vmatpush1.bf16.msra.mxu1 %v13856_v4  ;;  %12630 = vmatprep.subr.bf16.mxu0 %v13860_v5 }
 0x4e2   : > { %3735 = vmatprep.subr.bf16.mxu1 %v13863_v57 }
 0x4e4   : > { %12631 = vmatpush3.bf16.msra.mxu0 %v13864_v6 }
 0x4e5   : > { %3736 = vmatpush1.bf16.msra.mxu1 %v13861_v55  ;;  %12632 = vmatprep.subr.bf16.mxu0 %v13865_v10  ;;  %v13929_v10 = vld [vmem:[%s16068_s16 + $0x650] ss:$36 sps:$4 sm:$0xff]  }
 0x4e6   : > { %3737 = vmatprep.subr.bf16.mxu1 %v13868_v11 }
 0x4e8   : > { %12633 = vmatpush3.bf16.msra.mxu0 %v13869_v12 }
 0x4e9   : > { %3738 = vmatpush1.bf16.msra.mxu1 %v13866_v13  ;;  %12634 = vmatprep.subr.bf16.mxu0 %v13870_v14 }
 0x4ea   : > { %3739 = vmatprep.subr.bf16.mxu1 %v13873_v15 }
 0x4ec   : > { %12635 = vmatpush3.bf16.msra.mxu0 %v13874_v16 }
 0x4ed   : > { %3740 = vmatpush1.bf16.msra.mxu1 %v13871_v17 }
 0x4ee   : > { %3741 = vmatprep.subr.bf16.mxu1 %v13877_v18 }
 0x4ef   : > { %3844 = vmatmul.mubr.bf16.vlgmr.msra.gmra.mrb[8].mxu0 %v16234_v9 }
 0x4f1   : > { %3742 = vmatpush1.bf16.msra.mxu1 %v13875_v19  ;;  %v13930_v19 = vld [vmem:[%s16068_s16 + $0x698] ss:$36 sps:$4 sm:$0xff]  }
 0x4f2   : > { %3743 = vmatprep.subr.bf16.mxu1 %v13880_v20 }
 0x4f5   : > { %3744 = vmatpush1.bf16.msra.mxu1 %v13878_v21  ;;  %v16442_v21 = vsub.s32 2, %v16204_v35 }
 0x4f6   : > { %3745 = vmatprep.subr.bf16.mxu1 %v13883_v22  ;;  %v16445_v22 = vsub.s32 4, %v16204_v35 }
 0x4f9   : > { %3746 = vmatpush1.bf16.msra.mxu1 %v13881_v37  ;;  %v16448_v37 = vsub.s32 5, %v16204_v35 }
 0x4fa   : > { %3747 = vmatprep.subr.bf16.mxu1 %v13886_v24  ;;  %v16451_v24 = vsub.s32 3, %v16204_v35 }
 0x4fd   : > { %3748 = vmatpush1.bf16.msra.mxu1 %v13884_v25  ;;  %v16455_v25 = vrot.slane %v16420_v62, %v16442_v21 }
 0x4fe   : > { %3749 = vmatprep.subr.bf16.mxu1 %v13889_v26 }
 0x501   : > { %3750 = vmatpush1.bf16.msra.mxu1 %v13887_v27  ;;  %v2341_v27 = vrot.slane %v16420_v62, %v16448_v37 }
 0x502   : > { %3751 = vmatprep.subr.bf16.mxu1 %v13892_v28 }
 0x505   : > { %3752 = vmatpush1.bf16.msra.mxu1 %v13890_v29 }
 0x506   : > { %3753 = vmatprep.subr.bf16.mxu1 %v13895_v30  ;;  %v2333_v30 = vrot.slane %v16420_v62, %v16451_v24 }
 0x509   : > { %3754 = vmatpush1.bf16.msra.mxu1 %v13893_v31 }
 0x50a   : > { %3755 = vmatprep.subr.bf16.mxu1 %v13898_v32 }
 0x50d   : > { %3756 = vmatpush1.bf16.msra.mxu1 %v13896_v33 }
 0x50e   : > { %3768 = vmatprep.subr.bf16.mxu1 %v13901_v34 }
 0x510   : > { %3758 = vmatmul.mubr.bf16.vlgmr.msra.gmra.mrb[8].mxu1 %v16234_v9  ;;  %v13913_v9 = vld [vmem:[%s16068_s16 + $0x5bc] ss:$36 sps:$4 sm:$0xff]  }
 0x511   : > { %3769 = vmatpush1.bf16.msra.mxu1 %v13899_v36  ;;  %3800 = vmatprep.mubr.bf16.mxu1 %v15482_v23 }
 0x512   : > { %3770 = vmatprep.subr.bf16.mxu1 %v13904_v38 }
 0x515   : > { %3771 = vmatpush1.bf16.msra.mxu1 %v13902_v40 }
 0x516   : > { %3772 = vmatprep.subr.bf16.mxu1 %v13907_v41 }
 0x519   : > { %3773 = vmatpush1.bf16.msra.mxu1 %v13905_v43 }
 0x51a   : > { %3774 = vmatprep.subr.bf16.mxu1 %v13910_v44 }
 0x51d   : > { %3775 = vmatpush1.bf16.msra.mxu1 %v13908_v45 }
 0x51e   : > { %3776 = vmatprep.subr.bf16.mxu1 %v13913_v9 }
 0x521   : > { %3777 = vmatpush1.bf16.msra.mxu1 %v13911_v46 }
 0x522   : > { %3778 = vmatprep.subr.bf16.mxu1 %v13916_v50 }
 0x525   : > { %3779 = vmatpush1.bf16.msra.mxu1 %v13914_v51 }
 0x526   : > { %3780 = vmatprep.subr.bf16.mxu1 %v13919_v52 }
 0x529   : > { %3781 = vmatpush1.bf16.msra.mxu1 %v13917_v53 }
 0x52a   : > { %3782 = vmatprep.subr.bf16.mxu1 %v13922_v54 }
 0x52d   : > { %3783 = vmatpush1.bf16.msra.mxu1 %v13920_v58 }
 0x52e   : > { %12913 = vmatprep.subr.bf16.mxu1 %v15483_v59 }
 0x530   : > { %3801 = vmatmul.mubr.bf16.vlgmr.msra.gmra.mrb[8].mxu1 %v16232_v8 }
 0x531   : > { %12914 = vmatpush3.bf16.msra.mxu1 %v13923_v48  ;;  %12929 = vmatprep.mubr.msk.bf16.mxu1 %vm15484_vm3, %v15483_v59 }
 0x532   : > { %12915 = vmatprep.subr.bf16.mxu1 %v15483_v59 }
 0x535   : > { %12916 = vmatpush3.bf16.msra.mxu1 %v13924_v49 }
 0x536   : > { %12917 = vmatprep.subr.bf16.mxu1 %v15483_v59 }
 0x539   : > { %12918 = vmatpush3.bf16.msra.mxu1 %v13925_v60 }
 0x53a   : > { %12919 = vmatprep.subr.bf16.mxu1 %v15483_v59 }
 0x53d   : > { %12920 = vmatpush3.bf16.msra.mxu1 %v13926_v61 }
 0x53e   : > { %12921 = vmatprep.subr.bf16.mxu1 %v15483_v59 }
 0x541   : > { %12922 = vmatpush3.bf16.msra.mxu1 %v13927_v47 }
 0x542   : > { %v3544_v1 = vpop.f32.mrb[0].mxu0  ;;  %12923 = vmatprep.subr.bf16.mxu1 %v15483_v59 }
 0x543   : > { %v3501_v2 = vpop.f32.mrb[0].mxu1  ;;  %v3546_v3 = vpop.f32.mrb[1].mxu0 }
 0x544   : > { %v3502_v56 = vadd.f32 %v3501_v2, %v2321_v63  ;;  %v3503_v4 = vpop.f32.mrb[1].mxu1  ;;  %v3548_v5 = vpop.f32.mrb[2].mxu0 }
 0x545   : > { %v3504_v57 = vadd.f32 %v3503_v4, %v2325_v0  ;;  %12924 = vmatpush3.bf16.msra.mxu1 %v13928_v7  ;;  %v3505_v6 = vpop.f32.mrb[2].mxu1  ;;  %v3550_v55 = vpop.f32.mrb[3].mxu0  ;;  %v16502_v7 = vsub.s32 6, %v16204_v35 }
 0x546   : > { %v3545_v11 = vadd.f32 %v3544_v1, %v3502_v56  ;;  %v3506_v12 = vadd.f32 %v3505_v6, %v2321_v63  ;;  %v3507_v13 = vpop.f32.mrb[3].mxu1  ;;  %12925 = vmatprep.subr.bf16.mxu1 %v15483_v59  ;;  %v16505_v1 = vsub.s32 7, %v16204_v35 }
 0x547   : > { %v16431_v14 = vadd.f32 %v3546_v3, %v3504_v57  ;;  %v3508_v15 = vadd.f32 %v3507_v13, %v2325_v0  ;;  %v2345_v2 = vrot.slane %v16420_v62, %v16502_v7 }
 0x548   : > { %v3893_v16 = vmul.f32 0.125, %v3545_v11  ;;  %v3549_v17 = vadd.f32 %v3548_v5, %v3506_v12  ;;  %v2349_v56 = vrot.slane %v16420_v62, %v16505_v1 }
 0x549   : > { %v16433_v18 = vadd.f32 %v3550_v55, %v3508_v15  ;;  %12926 = vmatpush3.bf16.msra.mxu1 %v13929_v10 }
 0x54a   : > { %4087 = vrot.lane.b32.xlu1 %v3893_v16, %s15485_s11  ;;  %12927 = vmatprep.subr.bf16.mxu1 %v15483_v59  ;;  %v3894_v20 = vmul.f32 0.125, %v3549_v17 }
 0x54d   : > { %12928 = vmatpush3.bf16.msra.mxu1 %v13930_v19  ;;  %v11638_v19 = vld [vmem:[%s16060_s9 + $0x8] ss:$0 sm:$0xff] }
 0x54e   : > { %4089 = vrot.lane.b32.xlu1 %v3894_v20, %s15485_s11 }
 0x550   : > { %12930 = vmatmul.mubr.bf16.vlgmr.msra.gmra.mrb[12].mxu1 %v16232_v8  ;;  %v2337_v8 = vrot.slane %v16420_v62, %v16445_v22 }
 0x551   : > { %12937 = vmatprep.mubr.msk.f32.mxu1 %vm3895_vm4, %v3893_v16 }
 0x5a2   : > { %v3716_v26 = vpop.f32.mrb[4].mxu0 }
 0x5a3   : > { %v3630_v28 = vpop.f32.mrb[4].mxu1  ;;  %v3718_v29 = vpop.f32.mrb[5].mxu0  ;;  %v16466_v34 = vadd.f32 %v3716_v26, %v2337_v8 }
 0x5a4   : > { %v16464_v31 = vadd.f32 %v3630_v28, %v16455_v25  ;;  %v3632_v32 = vpop.f32.mrb[5].mxu1  ;;  %v3720_v33 = vpop.f32.mrb[6].mxu0  ;;  %v16472_v41 = vadd.f32 %v3718_v29, %v2341_v27 }
 0x5a5   : > { %v16468_v36 = vadd.f32 %v3720_v33, %v2337_v8  ;;  %v16470_v38 = vpop.f32.mrb[6].mxu1  ;;  %v3722_v40 = vpop.f32.mrb[7].mxu0  ;;  %v13134_v45 = vadd.f32 %v3632_v32, %v2333_v30 }
 0x5a6   : > { %v16474_v43 = vadd.f32 %v3722_v40, %v2341_v27  ;;  %v3636_v44 = vpop.f32.mrb[7].mxu1 }
 0x5a7   : > { %v13584_v9 = vpack.i.bf16 %v16468_v36, %v16466_v34  ;;  %v16480_v46 = vpack.c.bf16 %v16468_v36, %v16466_v34  ;;  %v13136_v50 = vadd.f32 %v3636_v44, %v2333_v30 }
 0x5a8   : > { %v13594_v51 = vpack.i.bf16 %v16474_v43, %v16472_v41  ;;  %v16486_v52 = vpack.c.bf16 %v16474_v43, %v16472_v41 }
 0x5a9   : > { %v13574_v54 = vpack.i.bf16 %v13136_v50, %v13134_v45  ;;  %v13057_v58 = vpack.c.bf16 %v13136_v50, %v13134_v45  ;;  %v16546_v50 = vld [vmem:[%s17892_s21 + $0x8] sm:$0xff] }
 0x5ab   : > { %13575 = vrot.lane.b32.xlu0 %v13574_v54, %s15485_s11  ;;  %13059 = vmatprep.subr.msk.bf16.mxu1 %vm16490_vm5, %v13057_v58  ;;  %v16551_v54 = vld [vmem:[%s17893_s28] sm:$0xff] }
 0x5ac   : > { %13062 = vmatpush3.bf16.xpose.msk.msra.mxu1 %vm16490_vm5, %v13057_v58 }
 0x5b3   : > { %12938 = vmatmul.mubr.msk.f32.vlgmr.msra.gmra.mrb[16].mxu1 %vm3895_vm4, %v3894_v20 }
 0x5bc   : > { %v4088_v48 = vpop.permute.xlu1 %4087 }
 0x5bd   : > { %12951 = vmatprep.mubr.msk.f32.mxu0 %vm3895_vm4, %v4088_v48 }
 0x5c0   : > { %v4090_v45 = vpop.permute.xlu1 %4089 }
 0x5c2   : > { %v12636_v49 = vpop.f32.mrb[8].mxu0 }
 0x5c3   : > { %v12637_v60 = vpop.f32.mrb[9].mxu0 }
 0x5c4   : > { %v12638_v61 = vadd.f32 %v12637_v60, %v12636_v49  ;;  %v12639_v47 = vpop.f32.mrb[10].mxu0 }
 0x5c5   : > { %v12640_v63 = vpop.f32.mrb[11].mxu0 }
 0x5c6   : > { %v12641_v0 = vadd.f32 %v12640_v63, %v12639_v47  ;;  %v3846_v8 = vadd.f32 %v12638_v61, %v11638_v19 }
 0x5c8   : > { %v3849_v29 = vadd.f32 %v12641_v0, %v11638_v19 }
 0x603   : > { %v3802_v3 = vpop.f32.mrb[8].mxu1 }
 0x604   : > { %v3804_v4 = vpop.f32.mrb[9].mxu1  ;;  %v16511_v57 = vadd.f32 %v3802_v3, %v2345_v2 }
 0x605   : > { %v3806_v5 = vpop.f32.mrb[10].mxu1  ;;  %v16515_v10 = vadd.f32 %v3804_v4, %v2349_v56 }
 0x606   : > { %v16513_v6 = vadd.f32 %v3806_v5, %v2345_v2  ;;  %v3808_v55 = vpop.f32.mrb[11].mxu1 }
 0x607   : > { %v16517_v11 = vadd.f32 %v3808_v55, %v2349_v56 }
 0x608   : > { %v13579_v35 = vpack.i.bf16 %v16513_v6, %v16511_v57  ;;  %v13063_v12 = vpack.c.bf16 %v16513_v6, %v16511_v57 }
 0x609   : > { %v13589_v62 = vpack.i.bf16 %v16517_v11, %v16515_v10  ;;  %v16527_v13 = vpack.c.bf16 %v16517_v11, %v16515_v10 }
 0x60a   : > { %13064 = vmatprep.subr.bf16.mxu1 %v13063_v12 }
 0x60b   : > { %13066 = vmatpush3.bf16.msra.mxu1 %v13063_v12 }
 0x61d   : > { %v13576_v15 = vpop.permute.xlu0 %13575 }
 0x61e   : > { %v13578_v16 = vunpack.i.h.bf16 %v13576_v15  ;;  %v13577_v17 = vunpack.i.l.bf16 %v13576_v15 }
 0x620   : > { %v13067_v20 = vpack.c.bf16 %v13578_v16, %v13577_v17 }
 0x622   : > { %13069 = vmatprep.subr.msk.bf16.mxu0 %vm16490_vm5, %v13067_v20 }
 0x623   : > { %v3886_v26 = vpop.f32.mrb[12].mxu1  ;;  %13072 = vmatpush3.bf16.xpose.msk.msra.mxu0 %vm16490_vm5, %v13067_v20 }
 0x624   : > { %v16534_v27 = vadd.f32 %v3886_v26, %v3846_v8  ;;  %v12931_v28 = vpop.f32.mrb[13].mxu1 }
 0x625   : > { %v3889_v30 = vpop.f32.mrb[14].mxu1 }
 0x626   : > { %v16536_v32 = vadd.f32 %v3889_v30, %v3849_v29  ;;  %v12932_v33 = vpop.f32.mrb[15].mxu1 }
 0x628   : > { %v13599_v40 = vpack.i.bf16 %v16536_v32, %v16534_v27  ;;  %v13103_v44 = vpack.c.bf16 %v16536_v32, %v16534_v27 }
 0x62a   : > { %12952 = vmatmul.mubr.msk.f32.vlgmr.msra.gmra.mrb[12].mxu0 %vm3895_vm4, %v4090_v45  ;;  %13104 = vmatprep.subr.bf16.mxu0 %v13103_v44 }
 0x62b   : > { %13106 = vmatpush3.bf16.msra.mxu0 %v13103_v44 }
 0x686   : > { %v12939_v58 = vpop.f32.mrb[16].mxu1 }
 0x687   : > { %v3980_v48 = vadd.f32 %v12939_v58, %v16546_v50  ;;  %v3974_v49 = vpop.f32.mrb[17].mxu1 }
 0x688   : > { %v3975_v60 = vadd.f32 %v3974_v49, %v16551_v54 }
 0x689   : > { %v3987_v61 = vsel %vm3983_vm6, %v3980_v48, -inf }
 0x68a   : > { %3988 = vmax.xlane.f32.xlu0 %v3987_v61  ;;  %v3984_v47 = vsel %vm3983_vm6, %v3975_v60, -inf }
 0x68b   : > { %3985 = vmax.xlane.f32.xlu1 %v3984_v47 }
 0x6fd   : > { %v12953_v63 = vpop.f32.mrb[12].mxu0 }
 0x6fe   : > { %v4169_v0 = vpop.f32.mrb[13].mxu0  ;;  %v4175_v3 = vadd.f32 %v12953_v63, %v16546_v50  ;;  %v4290_v63 = vmul.f32 0.125, %v16433_v18 }
 0x6ff   : > { %v4170_v2 = vadd.f32 %v4169_v0, %v16551_v54 }
 0x700   : > { %v4181_v4 = vsel %vm3983_vm6, %v4175_v3, -inf }
 0x701   : > { %v4178_v56 = vsel %vm3983_vm6, %v4170_v2, -inf }
 0x702   : > { %4179 = vmax.xlane.f32.xlu0 %v4178_v56 }
 0x706   : > { %4182 = vmax.xlane.f32.xlu0 %v4181_v4 }
 0x717   : > { %v3989_v5 = vpop.xlane.xlu0 %3988 }
 0x718   : > { %v3991_v55 = vsub.f32 %v3980_v48, %v3989_v5  ;;  %v3986_v12 = vpop.xlane.xlu1 %3985 }
 0x719   : > { %v3990_v15 = vsub.f32 %v3975_v60, %v3986_v12  ;;  %v4289_v12 = vmul.f32 0.125, %v16431_v14 }
 0x71a   : > { %v3994_v16 = vmul.f32 1.442695, %v3991_v55 }
 0x71b   : > { %v3992_v17 = vmul.f32 1.442695, %v3990_v15 }
 0x71c   : > { %14847 = vpow2.f32 %v3994_v16 }
 0x71d   : > { %14849 = vpow2.f32 %v3992_v17 }
 0x726   : > { %v14848_v19 = vpop.eup %14847 }
 0x727   : > { %v14850_v20 = vpop.eup %14849  ;;  %v3999_v8 = vsel %vm3983_vm6, %v14848_v19, 0.0 }
 0x728   : > { %4000 = vadd.xlane.f32.xlu0 %v3999_v8  ;;  %v3996_v26 = vsel %vm3983_vm6, %v14850_v20, 0.0 }
 0x729   : > { %3997 = vadd.xlane.f32.xlu1 %v3996_v26 }
 0x78f   : > { %v4180_v28 = vpop.xlane.xlu0 %4179 }
 0x790   : > { %v4184_v29 = vsub.f32 %v4170_v2, %v4180_v28 }
 0x792   : > { %v4186_v30 = vmul.f32 1.442695, %v4184_v29 }
 0x793   : > { %v4183_v33 = vpop.xlane.xlu0 %4182 }
 0x794   : > { %14851 = vpow2.f32 %v4186_v30  ;;  %v4185_v44 = vsub.f32 %v4175_v3, %v4183_v33 }
 0x796   : > { %v4188_v45 = vmul.f32 1.442695, %v4185_v44 }
 0x798   : > { %14853 = vpow2.f32 %v4188_v45 }
 0x79e   : > { %v14852_v58 = vpop.eup %14851 }
 0x79f   : > { %v4190_v48 = vsel %vm3983_vm6, %v14852_v58, 0.0 }
 0x7a0   : > { %4191 = vadd.xlane.f32.xlu1 %v4190_v48 }
 0x7a2   : > { %v14854_v49 = vpop.eup %14853 }
 0x7a3   : > { %v4193_v60 = vsel %vm3983_vm6, %v14854_v49, 0.0 }
 0x7a4   : > { %4194 = vadd.xlane.f32.xlu0 %v4193_v60 }
 0x7b1   : > { %13580 = vrot.lane.b32.xlu1 %v13579_v35, %s15485_s11 }
 0x7b5   : > { %v4001_v61 = vpop.xlane.xlu0 %4000  ;;  %13585 = vrot.lane.b32.xlu1 %v13584_v9, %s15485_s11 }
 0x7b6   : > { %14855 = vrcp.f32 %v4001_v61  ;;  %v3998_v47 = vpop.xlane.xlu1 %3997 }
 0x7b7   : > { %14857 = vrcp.f32 %v3998_v47 }
 0x7b9   : > { %4483 = vrot.lane.b32.xlu1 %v4290_v63, %s15485_s11 }
 0x7c0   : > { %v14856_v0 = vpop.eup %14855 }
 0x7c1   : > { %v14858_v2 = vpop.eup %14857  ;;  %v4005_v56 = vmul.f32 %v14856_v0, %v14848_v19 }
 0x7c2   : > { %v4004_v3 = vmul.f32 %v14858_v2, %v14850_v20 }
 0x7c4   : > { %12944 = vmatprep.mubr.msk.f32.mxu1 %vm3983_vm6, %v4004_v3 }
 0x7c5   : > { %12945 = vmatmul.mubr.msk.f32.vlgmr.msra.gmra.mrb[18].mxu1 %vm3983_vm6, %v4005_v56 }
 0x82d   : > { %v4192_v57 = vpop.xlane.xlu1 %4191 }
 0x82e   : > { %14859 = vrcp.f32 %v4192_v57 }
 0x831   : > { %v4195_v6 = vpop.xlane.xlu0 %4194  ;;  %v13581_v34 = vpop.permute.xlu1 %13580 }
 0x832   : > { %14861 = vrcp.f32 %v4195_v6  ;;  %v13583_v36 = vunpack.i.h.bf16 %v13581_v34  ;;  %v13582_v9 = vunpack.i.l.bf16 %v13581_v34 }
 0x834   : > { %v13073_v35 = vpack.c.bf16 %v13583_v36, %v13582_v9 }
 0x835   : > { %v13586_v15 = vpop.permute.xlu1 %13585 }
 0x836   : > { %13074 = vmatprep.subr.bf16.mxu1 %v13073_v35  ;;  %v13588_v16 = vunpack.i.h.bf16 %v13586_v15  ;;  %v13587_v17 = vunpack.i.l.bf16 %v13586_v15 }
 0x837   : > { %13076 = vmatpush3.bf16.msra.mxu1 %v13073_v35 }
 0x838   : > { %v14860_v18 = vpop.eup %14859  ;;  %13079 = vmatprep.subr.msk.bf16.mxu1 %vm16490_vm5, %v16480_v46  ;;  %v13087_v19 = vpack.c.bf16 %v13588_v16, %v13587_v17 }
 0x839   : > { %v4198_v4 = vmul.f32 %v14860_v18, %v14852_v58  ;;  %v4484_v35 = vpop.permute.xlu1 %4483 }
 0x83b   : > { %12958 = vmatprep.mubr.msk.f32.mxu1 %vm3983_vm6, %v4198_v4 }
 0x83c   : > { %v14862_v5 = vpop.eup %14861 }
 0x83d   : > { %v4199_v55 = vmul.f32 %v14862_v5, %v14854_v49 }
 0x83f   : > { %12959 = vmatmul.mubr.msk.f32.vlgmr.msra.gmra.mrb[20].mxu1 %vm3983_vm6, %v4199_v55 }
 0x840   : > { %13082 = vmatpush3.bf16.xpose.msk.msra.mxu1 %vm16490_vm5, %v16480_v46  ;;  %12965 = vmatprep.mubr.msk.f32.mxu1 %vm3895_vm4, %v4289_v12 }
 0x841   : > { %13084 = vmatprep.subr.bf16.mxu1 %v16527_v13 }
 0x847   : > { %12966 = vmatmul.mubr.msk.f32.vlgmr.msra.gmra.mrb[22].mxu1 %vm3895_vm4, %v4290_v63 }
 0x848   : > { %13086 = vmatpush3.bf16.msra.mxu1 %v16527_v13 }
 0x849   : > { %13089 = vmatprep.subr.msk.bf16.mxu1 %vm16490_vm5, %v13087_v19 }
 0x898   : > { %v16592_v14 = vpop.f32.mrb[18].mxu1 }
 0x899   : > { %v16594_v20 = vpop.f32.mrb[19].mxu1 }
 0x912   : > { %v16596_v8 = vpop.f32.mrb[20].mxu1 }
 0x913   : > { %v16598_v46 = vpop.f32.mrb[21].mxu1 }
 0x914   : > { %v13609_v26 = vpack.i.bf16 %v16596_v8, %v16598_v46 }
 0x91a   : > { %v12967_v28 = vpop.f32.mrb[22].mxu1 }
 0x91b   : > { %v4369_v29 = vpop.f32.mrb[23].mxu1  ;;  %v4375_v13 = vadd.f32 %v12967_v28, %v16546_v50 }
 0x91c   : > { %v4370_v30 = vadd.f32 %v4369_v29, %v16551_v54 }
 0x91d   : > { %v4381_v44 = vsel %vm3983_vm6, %v4375_v13, -inf }
 0x91e   : > { %v4378_v33 = vsel %vm3983_vm6, %v4370_v30, -inf }
 0x91f   : > { %4379 = vmax.xlane.f32.xlu0 %v4378_v33 }
 0x923   : > { %4382 = vmax.xlane.f32.xlu0 %v4381_v44 }
 0x9ac   : > { %v4380_v45 = vpop.xlane.xlu0 %4379 }
 0x9ad   : > { %v4384_v58 = vsub.f32 %v4370_v30, %v4380_v45 }
 0x9af   : > { %v4386_v48 = vmul.f32 1.442695, %v4384_v58 }
 0x9b0   : > { %v4383_v49 = vpop.xlane.xlu0 %4382 }
 0x9b1   : > { %14863 = vpow2.f32 %v4386_v48  ;;  %v4385_v60 = vsub.f32 %v4375_v13, %v4383_v49  ;;  %v13135_v49 = vadd.f32 %v16470_v38, %v16455_v25 }
 0x9b3   : > { %v4388_v61 = vmul.f32 1.442695, %v4385_v60  ;;  %v4684_v60 = vmul.f32 0.125, %v13135_v49 }
 0x9b5   : > { %14865 = vpow2.f32 %v4388_v61 }
 0x9bb   : > { %v14864_v47 = vpop.eup %14863 }
 0x9bc   : > { %v4390_v63 = vsel %vm3983_vm6, %v14864_v47, 0.0 }
 0x9bd   : > { %4391 = vadd.xlane.f32.xlu0 %v4390_v63 }
 0x9bf   : > { %v14866_v0 = vpop.eup %14865 }
 0x9c0   : > { %v4393_v2 = vsel %vm3983_vm6, %v14866_v0, 0.0 }
 0x9c1   : > { %4394 = vadd.xlane.f32.xlu0 %v4393_v2 }
 0x9d7   : > { %4481 = vrot.lane.b32.xlu0 %v4289_v12, %s15485_s11 }
 0xa4a   : > { %v4392_v3 = vpop.xlane.xlu0 %4391 }
 0xa4b   : > { %14867 = vrcp.f32 %v4392_v3 }
 0xa4e   : > { %v4395_v56 = vpop.xlane.xlu0 %4394 }
 0xa4f   : > { %14869 = vrcp.f32 %v4395_v56  ;;  %v4683_v56 = vmul.f32 0.125, %v16464_v31 }
 0xa52   : > { %v4482_v9 = vpop.permute.xlu0 %4481 }
 0xa55   : > { %v14868_v57 = vpop.eup %14867 }
 0xa56   : > { %v4398_v6 = vmul.f32 %v14868_v57, %v14864_v47 }
 0xa58   : > { %12972 = vmatprep.mubr.msk.f32.mxu1 %vm3983_vm6, %v4398_v6 }
 0xa59   : > { %v14870_v34 = vpop.eup %14869 }
 0xa5a   : > { %v4399_v36 = vmul.f32 %v14870_v34, %v14866_v0 }
 0xa5c   : > { %12973 = vmatmul.mubr.msk.f32.vlgmr.msra.gmra.mrb[24].mxu1 %vm3983_vm6, %v4399_v36 }
 0xa5d   : > { %13092 = vmatpush3.bf16.xpose.msk.msra.mxu1 %vm16490_vm5, %v13087_v19  ;;  %12979 = vmatprep.mubr.msk.f32.mxu1 %vm3895_vm4, %v4482_v9 }
 0xa64   : > { %12980 = vmatmul.mubr.msk.f32.vlgmr.msra.gmra.mrb[26].mxu1 %vm3895_vm4, %v4484_v35 }
 0xb2f   : > { %v16615_v18 = vpop.f32.mrb[24].mxu1 }
 0xb30   : > { %v16617_v4 = vpop.f32.mrb[25].mxu1 }
 0xb37   : > { %v12981_v5 = vpop.f32.mrb[26].mxu1 }
 0xb38   : > { %v4569_v55 = vadd.f32 %v12981_v5, %v16546_v50  ;;  %v4563_v12 = vpop.f32.mrb[27].mxu1 }
 0xb39   : > { %v4564_v15 = vadd.f32 %v4563_v12, %v16551_v54 }
 0xb3a   : > { %v4575_v16 = vsel %vm3983_vm6, %v4569_v55, -inf }
 0xb3b   : > { %4576 = vmax.xlane.f32.xlu0 %v4575_v16  ;;  %v4572_v17 = vsel %vm3983_vm6, %v4564_v15, -inf }
 0xb3c   : > { %4573 = vmax.xlane.f32.xlu1 %v4572_v17 }
 0xbc8   : > { %v4577_v19 = vpop.xlane.xlu0 %4576 }
 0xbc9   : > { %v4579_v28 = vsub.f32 %v4569_v55, %v4577_v19  ;;  %v4574_v29 = vpop.xlane.xlu1 %4573 }
 0xbca   : > { %v4578_v30 = vsub.f32 %v4564_v15, %v4574_v29 }
 0xbcb   : > { %v4582_v13 = vmul.f32 1.442695, %v4579_v28 }
 0xbcc   : > { %v4580_v33 = vmul.f32 1.442695, %v4578_v30 }
 0xbcd   : > { %14871 = vpow2.f32 %v4582_v13 }
 0xbce   : > { %14873 = vpow2.f32 %v4580_v33 }
 0xbd7   : > { %v14872_v44 = vpop.eup %14871 }
 0xbd8   : > { %v4587_v45 = vsel %vm3983_vm6, %v14872_v44, 0.0  ;;  %v14874_v58 = vpop.eup %14873 }
 0xbd9   : > { %4588 = vadd.xlane.f32.xlu1 %v4587_v45  ;;  %v4584_v48 = vsel %vm3983_vm6, %v14874_v58, 0.0 }
 0xbdd   : > { %4585 = vadd.xlane.f32.xlu1 %v4584_v48 }
 0xbee   : > { %13590 = vrot.lane.b32.xlu1 %v13589_v62, %s15485_s11 }
 0xbf2   : > { %13595 = vrot.lane.b32.xlu1 %v13594_v51, %s15485_s11 }
 0xbf6   : > { %4877 = vrot.lane.b32.xlu1 %v4684_v60, %s15485_s11 }
 0xc66   : > { %v4589_v61 = vpop.xlane.xlu1 %4588 }
 0xc67   : > { %14875 = vrcp.f32 %v4589_v61 }
 0xc6a   : > { %v4586_v47 = vpop.xlane.xlu1 %4585 }
 0xc6b   : > { %14877 = vrcp.f32 %v4586_v47 }
 0xc6e   : > { %v13591_v63 = vpop.permute.xlu1 %13590 }
 0xc6f   : > { %v13593_v0 = vunpack.i.h.bf16 %v13591_v63  ;;  %v13592_v2 = vunpack.i.l.bf16 %v13591_v63 }
 0xc71   : > { %v13093_v10 = vpack.c.bf16 %v13593_v0, %v13592_v2  ;;  %v14876_v25 = vpop.eup %14875 }
 0xc72   : > { %v13596_v11 = vpop.permute.xlu1 %13595  ;;  %v4593_v51 = vmul.f32 %v14876_v25, %v14872_v44  ;;  %v13932_v25 = vld [vmem:[%s16070_s5 + $0x8] ss:$12 sps:$4 sm:$0xff]  }
 0xc73   : > { %v13598_v62 = vunpack.i.h.bf16 %v13596_v11  ;;  %v13597_v3 = vunpack.i.l.bf16 %v13596_v11  ;;  %13094 = vmatprep.subr.bf16.mxu1 %v13093_v10 }
 0xc74   : > { %13096 = vmatpush3.bf16.msra.mxu1 %v13093_v10 }
 0xc75   : > { %v14878_v38 = vpop.eup %14877  ;;  %v13107_v41 = vpack.c.bf16 %v13598_v62, %v13597_v3  ;;  %13099 = vmatprep.subr.msk.bf16.mxu1 %vm16490_vm5, %v16486_v52  ;;  %v13931_v3 = vld [vmem:[%s16070_s5 + $0xc8] ss:$12 sps:$4 sm:$0xff]  }
 0xc76   : > { %v4592_v43 = vmul.f32 %v14878_v38, %v14874_v58  ;;  %v4878_v61 = vpop.permute.xlu1 %4877  ;;  %v13933_v38 = vld [vmem:[%s16070_s5 + $0xe0] ss:$12 sps:$4 sm:$0xff]  }
 0xc77   : > { %13109 = vmatprep.subr.msk.bf16.mxu0 %vm16490_vm5, %v13107_v41 }
 0xc78   : > { %12986 = vmatprep.mubr.msk.f32.mxu1 %vm3983_vm6, %v4592_v43  ;;  %v13937_v43 = vld [vmem:[%s16070_s5 + $0x110] ss:$12 sps:$4 sm:$0xff]  }
 0xc79   : > { %12987 = vmatmul.mubr.msk.f32.vlgmr.msra.gmra.mrb[28].mxu1 %vm3983_vm6, %v4593_v51  ;;  %v13938_v51 = vld [vmem:[%s16070_s5 + $0x50] ss:$12 sps:$4 sm:$0xff]  }
 0xc7a   : > { %12993 = vmatprep.mubr.msk.f32.mxu1 %vm3895_vm4, %v4683_v56 }
 0xc7d   : > { %13102 = vmatpush3.bf16.xpose.msk.msra.mxu1 %vm16490_vm5, %v16486_v52 }
 0xc84   : > { %12994 = vmatmul.mubr.msk.f32.vlgmr.msra.gmra.mrb[30].mxu1 %vm3895_vm4, %v4684_v60 }
 0xd4c   : > { %v12988_v57 = vpop.f32.mrb[28].mxu1 }
 0xd4d   : > { %v4674_v6 = vpop.f32.mrb[29].mxu1 }
 0xd4e   : > { %v13604_v34 = vpack.i.bf16 %v12988_v57, %v4674_v6 }
 0xd57   : > { %v12995_v36 = vpop.f32.mrb[30].mxu1 }
 0xd58   : > { %v4763_v9 = vpop.f32.mrb[31].mxu1  ;;  %v4769_v31 = vadd.f32 %v12995_v36, %v16546_v50 }
 0xd59   : > { %v4764_v35 = vadd.f32 %v4763_v9, %v16551_v54 }
 0xd5a   : > { %v4775_v55 = vsel %vm3983_vm6, %v4769_v31, -inf }
 0xd5b   : > { %v4772_v5 = vsel %vm3983_vm6, %v4764_v35, -inf }
 0xd5c   : > { %4773 = vmax.xlane.f32.xlu0 %v4772_v5 }
 0xd60   : > { %4776 = vmax.xlane.f32.xlu0 %v4775_v55 }
 0xde9   : > { %v4774_v12 = vpop.xlane.xlu0 %4773 }
 0xdea   : > { %v4778_v15 = vsub.f32 %v4764_v35, %v4774_v12 }
 0xdec   : > { %v4780_v52 = vmul.f32 1.442695, %v4778_v15 }
 0xded   : > { %v4777_v16 = vpop.xlane.xlu0 %4776 }
 0xdee   : > { %14879 = vpow2.f32 %v4780_v52  ;;  %v4779_v17 = vsub.f32 %v4769_v31, %v4777_v16 }
 0xdf0   : > { %v4782_v19 = vmul.f32 1.442695, %v4779_v17 }
 0xdf2   : > { %14881 = vpow2.f32 %v4782_v19 }
 0xdf8   : > { %v14880_v28 = vpop.eup %14879 }
 0xdf9   : > { %v4784_v29 = vsel %vm3983_vm6, %v14880_v28, 0.0 }
 0xdfa   : > { %4785 = vadd.xlane.f32.xlu0 %v4784_v29  ;;  %v13940_v29 = vld [vmem:[%s16070_s5 + $0x68] ss:$12 sps:$4 sm:$0xff]  }
 0xdfc   : > { %v14882_v30 = vpop.eup %14881 }
 0xdfd   : > { %v4787_v13 = vsel %vm3983_vm6, %v14882_v30, 0.0 }
 0xdfe   : > { %4788 = vadd.xlane.f32.xlu0 %v4787_v13  ;;  %v13944_v13 = vld [vmem:[%s16070_s5 + $0x98] ss:$12 sps:$4 sm:$0xff]  }
 0xe14   : > { %4875 = vrot.lane.b32.xlu0 %v4683_v56, %s15485_s11 }
 0xe87   : > { %v4786_v33 = vpop.xlane.xlu0 %4785 }
 0xe88   : > { %14883 = vrcp.f32 %v4786_v33  ;;  %v13945_v33 = vld [vmem:[%s16070_s5 + $0x170] ss:$12 sps:$4 sm:$0xff]  }
 0xe8b   : > { %v4789_v44 = vpop.xlane.xlu0 %4788 }
 0xe8c   : > { %14885 = vrcp.f32 %v4789_v44  ;;  %v13946_v44 = vld [vmem:[%s16070_s5 + $0xb0] ss:$12 sps:$4 sm:$0xff]  }
 0xe8f   : > { %v4876_v60 = vpop.permute.xlu0 %4875 }
 0xe92   : > { %v14884_v45 = vpop.eup %14883 }
 0xe93   : > { %v4792_v58 = vmul.f32 %v14884_v45, %v14880_v28  ;;  %v13939_v28 = vld [vmem:[%s16070_s5 + $0x128] ss:$12 sps:$4 sm:$0xff]  }
 0xe95   : > { %13000 = vmatprep.mubr.msk.f32.mxu0 %vm3983_vm6, %v4792_v58 }
 0xe96   : > { %v14886_v48 = vpop.eup %14885 }
 0xe97   : > { %v4793_v49 = vmul.f32 %v14886_v48, %v14882_v30  ;;  %v13943_v30 = vld [vmem:[%s16070_s5 + $0x158] ss:$12 sps:$4 sm:$0xff]  }
 0xe99   : > { %13001 = vmatmul.mubr.msk.f32.vlgmr.msra.gmra.mrb[14].mxu0 %vm3983_vm6, %v4793_v49  ;;  %v13949_v49 = vld [vmem:[%s16070_s5 + $0x4] ss:$12 sps:$4 sm:$0xff]  }
 0xe9a   : > { %13112 = vmatpush3.bf16.xpose.msk.msra.mxu0 %vm16490_vm5, %v13107_v41  ;;  %13007 = vmatprep.mubr.msk.f32.mxu0 %vm3895_vm4, %v4876_v60  ;;  %v13935_v41 = vld [vmem:[%s16070_s5 + $0xf8] ss:$12 sps:$4 sm:$0xff]  }
 0xe9b   : > { %12699 = vmatprep.subr.bf16.mxu0 %v13931_v3  ;;  %v13952_v3 = vld [vmem:[%s16070_s5 + $0x1c] ss:$12 sps:$4 sm:$0xff]  }
 0xea1   : > { %13008 = vmatmul.mubr.msk.f32.vlgmr.msra.gmra.mrb[16].mxu0 %vm3895_vm4, %v4878_v61 }
 0xea2   : > { %12700 = vmatpush3.bf16.msra.mxu0 %v13932_v25  ;;  %v13953_v25 = vld [vmem:[%s16070_s5 + $0x30] ss:$12 sps:$4 sm:$0xff]  }
 0xea3   : > { %12701 = vmatprep.subr.bf16.mxu0 %v13933_v38  ;;  %v13958_v38 = vld [vmem:[%s16070_s5 + $0x4c] ss:$12 sps:$4 sm:$0xff]  }
 0xf6c   : > { %v16662_v47 = vpop.f32.mrb[14].mxu0 }
 0xf6d   : > { %v16664_v63 = vpop.f32.mrb[15].mxu0 }
 0xf74   : > { %v13009_v0 = vpop.f32.mrb[16].mxu0 }
 0xf75   : > { %v4963_v2 = vadd.f32 %v13009_v0, %v16546_v50  ;;  %v4957_v10 = vpop.f32.mrb[17].mxu0  ;;  %v13934_v50 = vld [vmem:[%s16070_s5 + $0x20] ss:$12 sps:$4 sm:$0xff]  }
 0xf76   : > { %v4958_v53 = vadd.f32 %v4957_v10, %v16551_v54  ;;  %12702 = vmatpush3.bf16.msra.mxu0 %v13934_v50  ;;  %v13936_v54 = vld [vmem:[%s16070_s5 + $0x38] ss:$12 sps:$4 sm:$0xff]   ;;  %v13956_v50 = vld [vmem:[%s16070_s5 + $0x48] ss:$12 sps:$4 sm:$0xff]  }
 0xf77   : > { %v4969_v11 = vsel %vm3983_vm6, %v4963_v2, -inf  ;;  %12703 = vmatprep.subr.bf16.mxu0 %v13935_v41  ;;  %v13961_v41 = vld [vmem:[%s16070_s5 + $0x64] ss:$12 sps:$4 sm:$0xff]  }
 0xf78   : > { %4970 = vmax.xlane.f32.xlu0 %v4969_v11  ;;  %v4966_v62 = vsel %vm3983_vm6, %v4958_v53, -inf  ;;  %v13947_v11 = vld [vmem:[%s16070_s5] ss:$12 sps:$4 sm:$0xff]  }
 0xf79   : > { %4967 = vmax.xlane.f32.xlu1 %v4966_v62 }
 0xf7a   : > { %12704 = vmatpush3.bf16.msra.mxu0 %v13936_v54  ;;  %v13959_v54 = vld [vmem:[%s16070_s5 + $0x60] ss:$12 sps:$4 sm:$0xff]  }
 0xf7b   : > { %12705 = vmatprep.subr.bf16.mxu0 %v13937_v43  ;;  %v13964_v43 = vld [vmem:[%s16070_s5 + $0x7c] ss:$12 sps:$4 sm:$0xff]  }
 0xf7e   : > { %12706 = vmatpush3.bf16.msra.mxu0 %v13938_v51  ;;  %v13962_v51 = vld [vmem:[%s16070_s5 + $0x78] ss:$12 sps:$4 sm:$0xff]  }
 0xf7f   : > { %12707 = vmatprep.subr.bf16.mxu0 %v13939_v28  ;;  %v13991_v28 = vld [vmem:[%s16070_s5 + $0x154] ss:$12 sps:$4 sm:$0xff]  }
 0xf82   : > { %12708 = vmatpush3.bf16.msra.mxu0 %v13940_v29  ;;  %v13989_v29 = vld [vmem:[%s16070_s5 + $0x150] ss:$12 sps:$4 sm:$0xff]  }
 0xf8e   : > { %13605 = vrot.lane.b32.xlu0 %v13604_v34, %s15485_s11 }
0x1005   : > { %v4971_v56 = vpop.xlane.xlu0 %4970 }
0x1006   : > { %v4973_v57 = vsub.f32 %v4963_v2, %v4971_v56  ;;  %v4968_v6 = vpop.xlane.xlu1 %4967  ;;  %v13967_v56 = vld [vmem:[%s16070_s5 + $0x94] ss:$12 sps:$4 sm:$0xff]  }
0x1007   : > { %v4972_v34 = vsub.f32 %v4958_v53, %v4968_v6  ;;  %v13970_v6 = vld [vmem:[%s16070_s5 + $0xac] ss:$12 sps:$4 sm:$0xff]  }
0x1008   : > { %v4976_v36 = vmul.f32 1.442695, %v4973_v57  ;;  %v13965_v57 = vld [vmem:[%s16070_s5 + $0x90] ss:$12 sps:$4 sm:$0xff]  }
0x1009   : > { %v4974_v9 = vmul.f32 1.442695, %v4972_v34  ;;  %v13606_v35 = vpop.permute.xlu0 %13605  ;;  %v13968_v34 = vld [vmem:[%s16070_s5 + $0xa8] ss:$12 sps:$4 sm:$0xff]  }
0x100a   : > { %14887 = vpow2.f32 %v4976_v36  ;;  %v13608_v31 = vunpack.i.h.bf16 %v13606_v35  ;;  %v13607_v5 = vunpack.i.l.bf16 %v13606_v35  ;;  %v13973_v36 = vld [vmem:[%s16070_s5 + $0xc4] ss:$12 sps:$4 sm:$0xff]   ;;  %v13976_v35 = vld [vmem:[%s16070_s5 + $0xdc] ss:$12 sps:$4 sm:$0xff]  }
0x100b   : > { %14889 = vpow2.f32 %v4974_v9  ;;  %v13971_v9 = vld [vmem:[%s16070_s5 + $0xc0] ss:$12 sps:$4 sm:$0xff]  }
0x100c   : > { %v5103_v55 = vsel %vm3895_vm4, %v16617_v4, %v13607_v5  ;;  %v5104_v12 = vsel %vm3895_vm4, %v16615_v18, %v13608_v31  ;;  %v13941_v4 = vld [vmem:[%s16070_s5 + $0x140] ss:$12 sps:$4 sm:$0xff]   ;;  %v13974_v31 = vld [vmem:[%s16070_s5 + $0xd8] ss:$12 sps:$4 sm:$0xff]  }
0x100d   : > { %v5108_v15 = vpack.c.bf16 %v5104_v12, %v5103_v55  ;;  %v13942_v18 = vld [vmem:[%s16070_s5 + $0x80] ss:$12 sps:$4 sm:$0xff]   ;;  %12709 = vmatprep.subr.bf16.mxu0 %v13941_v4  ;;  %v13977_v55 = vld [vmem:[%s16070_s5 + $0xf0] ss:$12 sps:$4 sm:$0xff]  }
0x100e   : > { %12710 = vmatpush3.bf16.msra.mxu0 %v13942_v18  ;;  %v13979_v5 = vld [vmem:[%s16070_s5 + $0xf4] ss:$12 sps:$4 sm:$0xff]   ;;  %v13982_v12 = vld [vmem:[%s16070_s5 + $0x10c] ss:$12 sps:$4 sm:$0xff]  }
0x100f   : > { %5720 = vmatprep.mubr.bf16.mxu0 %v5108_v15  ;;  %12711 = vmatprep.subr.bf16.mxu0 %v13943_v30  ;;  %v13994_v4 = vld [vmem:[%s16070_s5 + $0x16c] ss:$12 sps:$4 sm:$0xff]   ;;  %v13992_v18 = vld [vmem:[%s16070_s5 + $0x168] ss:$12 sps:$4 sm:$0xff]  }
0x1010   : > { %v13995_v30 = vld [vmem:[%s16070_s5 + $0x180] ss:$12 sps:$4 sm:$0xff]  }
0x1012   : > { %12712 = vmatpush3.bf16.msra.mxu0 %v13944_v13  ;;  %v13997_v13 = vld [vmem:[%s16070_s5 + $0x184] ss:$12 sps:$4 sm:$0xff]  }
0x1013   : > { %12713 = vmatprep.subr.bf16.mxu0 %v13945_v33  ;;  %v13998_v33 = vld [vmem:[%s16070_s5 + $0x188] ss:$12 sps:$4 sm:$0xff]  }
0x1014   : > { %v14888_v52 = vpop.eup %14887 }
0x1015   : > { %v4981_v16 = vsel %vm3983_vm6, %v14888_v52, 0.0  ;;  %v14890_v17 = vpop.eup %14889 }
0x1016   : > { %4982 = vadd.xlane.f32.xlu1 %v4981_v16  ;;  %v4978_v19 = vsel %vm3983_vm6, %v14890_v17, 0.0  ;;  %12714 = vmatpush3.bf16.msra.mxu0 %v13946_v44  ;;  %v13983_v16 = vld [vmem:[%s16070_s5 + $0x120] ss:$12 sps:$4 sm:$0xff]   ;;  %v14001_v44 = vld [vmem:[%s16070_s5 + $0x19c] ss:$12 sps:$4 sm:$0xff]  }
0x1017   : > { %13017 = vmatprep.subr.bf16.mxu0 %v15483_v59 }
0x101a   : > { %4979 = vadd.xlane.f32.xlu1 %v4978_v19  ;;  %v13986_v19 = vld [vmem:[%s16070_s5 + $0x138] ss:$12 sps:$4 sm:$0xff]  }
0x102b   : > { %13600 = vrot.lane.b32.xlu1 %v13599_v40, %s15485_s11 }
0x102f   : > { %13610 = vrot.lane.b32.xlu1 %v13609_v26, %s15485_s11 }
0x10a3   : > { %v4983_v45 = vpop.xlane.xlu1 %4982 }
0x10a4   : > { %14891 = vrcp.f32 %v4983_v45  ;;  %v14002_v45 = vld [vmem:[%s16070_s5 + $0x1a0] ss:$12 sps:$4 sm:$0xff]  }
0x10a7   : > { %v4980_v27 = vpop.xlane.xlu1 %4979 }
0x10a8   : > { %14893 = vrcp.f32 %v4980_v27  ;;  %v13999_v27 = vld [vmem:[%s16070_s5 + $0x198] ss:$12 sps:$4 sm:$0xff]  }
0x10ab   : > { %v13601_v32 = vpop.permute.xlu1 %13600 }
0x10ac   : > { %v13603_v40 = vunpack.i.h.bf16 %v13601_v32  ;;  %v13602_v58 = vunpack.i.l.bf16 %v13601_v32  ;;  %v14005_v32 = vld [vmem:[%s16070_s5 + $0x1b4] ss:$12 sps:$4 sm:$0xff]  }
0x10ae   : > { %v13113_v48 = vpack.c.bf16 %v13603_v40, %v13602_v58  ;;  %v14892_v26 = vpop.eup %14891  ;;  %v14006_v40 = vld [vmem:[%s16070_s5 + $0x1b8] ss:$12 sps:$4 sm:$0xff]   ;;  %v14003_v58 = vld [vmem:[%s16070_s5 + $0x1b0] ss:$12 sps:$4 sm:$0xff]  }
0x10af   : > { %v13611_v60 = vpop.permute.xlu1 %13610  ;;  %v4987_v62 = vmul.f32 %v14892_v26, %v14888_v52  ;;  %v13985_v52 = vld [vmem:[%s16070_s5 + $0x124] ss:$12 sps:$4 sm:$0xff]   ;;  %v14011_v26 = vld [vmem:[%s16070_s5 + $0x1e0] ss:$12 sps:$4 sm:$0xff]  }
0x10b0   : > { %v13613_v8 = vunpack.i.h.bf16 %v13611_v60  ;;  %v13612_v46 = vunpack.i.l.bf16 %v13611_v60  ;;  %13114 = vmatprep.subr.bf16.mxu1 %v13113_v48  ;;  %v14007_v60 = vld [vmem:[%s16070_s5 + $0x1c8] ss:$12 sps:$4 sm:$0xff]  }
0x10b1   : > { %13116 = vmatpush3.bf16.msra.mxu1 %v13113_v48  ;;  %v14009_v48 = vld [vmem:[%s16070_s5 + $0x1cc] ss:$12 sps:$4 sm:$0xff]  }
0x10b2   : > { %v14894_v61 = vpop.eup %14893  ;;  %v5102_v0 = vsel %vm3895_vm4, %v16592_v14, %v13613_v8  ;;  %v5101_v2 = vsel %vm3895_vm4, %v16594_v20, %v13612_v46  ;;  %5602 = vmatprep.subr.bf16.mxu1 %v13949_v49  ;;  %v13950_v14 = vld [vmem:[%s16070_s5 + $0x18] ss:$12 sps:$4 sm:$0xff]   ;;  %v13955_v20 = vld [vmem:[%s16070_s5 + $0x34] ss:$12 sps:$4 sm:$0xff]   ;;  %v14010_v49 = vld [vmem:[%s16070_s5 + $0x1d0] ss:$12 sps:$4 sm:$0xff]  }
0x10b3   : > { %v16707_v10 = vpack.c.bf16 %v5102_v0, %v5101_v2  ;;  %v4986_v53 = vmul.f32 %v14894_v61, %v14890_v17  ;;  %v13988_v17 = vld [vmem:[%s16070_s5 + $0x13c] ss:$12 sps:$4 sm:$0xff]   ;;  %v14013_v8 = vld [vmem:[%s16070_s5 + $0x1e4] ss:$12 sps:$4 sm:$0xff]   ;;  %v14018_v0 = vld [vmem:[%s16070_s5 + $0x200] ss:$12 sps:$4 sm:$0xff]  }
0x10b4   : > { %v14014_v46 = vld [vmem:[%s16070_s5 + $0x1e8] ss:$12 sps:$4 sm:$0xff]   ;;  %v14015_v2 = vld [vmem:[%s16070_s5 + $0x1f8] ss:$12 sps:$4 sm:$0xff]  }
0x10b5   : > { %13014 = vmatprep.mubr.msk.f32.mxu1 %vm3983_vm6, %v4986_v53  ;;  %5721 = vmatmul.mubr.bf16.vlgmr.msra.gmra.mrb[20].mxu0 %v16707_v10  ;;  %v14017_v61 = vld [vmem:[%s16070_s5 + $0x1fc] ss:$12 sps:$4 sm:$0xff]   ;;  %v14022_v53 = vld [vmem:[%s16070_s5 + $0x218] ss:$12 sps:$4 sm:$0xff]  }
0x10b6   : > { %13015 = vmatmul.mubr.msk.f32.vlgmr.msra.gmra.mrb[32].mxu1 %vm3983_vm6, %v4987_v62  ;;  %13033 = vmatprep.mubr.msk.bf16.mxu0 %vm15484_vm3, %v15483_v59  ;;  %v14025_v62 = vld [vmem:[%s16070_s5 + $0x22c] ss:$12 sps:$4 sm:$0xff]  }
0x10b7   : > { %5603 = vmatpush1.bf16.msra.mxu1 %v13947_v11  ;;  %5634 = vmatprep.mubr.bf16.mxu1 %v5108_v15  ;;  %v13980_v15 = vld [vmem:[%s16070_s5 + $0x108] ss:$12 sps:$4 sm:$0xff]   ;;  %v14019_v11 = vld [vmem:[%s16070_s5 + $0x210] ss:$12 sps:$4 sm:$0xff]  }
0x10b8   : > { %5604 = vmatprep.subr.bf16.mxu1 %v13952_v3  ;;  %13018 = vmatpush3.bf16.msra.mxu0 %v13998_v33  ;;  %v14023_v3 = vld [vmem:[%s16070_s5 + $0x228] ss:$12 sps:$4 sm:$0xff]  }
0x10b9   : > { %13019 = vmatprep.subr.bf16.mxu0 %v15483_v59 }
0x10bb   : > { %5605 = vmatpush1.bf16.msra.mxu1 %v13950_v14  ;;  %v14026_v14 = vld [vmem:[%s16070_s5 + $0x230] ss:$12 sps:$4 sm:$0xff]  }
0x10bc   : > { %5606 = vmatprep.subr.bf16.mxu1 %v13955_v20  ;;  %13020 = vmatpush3.bf16.msra.mxu0 %v14002_v45 }
0x10bd   : > { %13021 = vmatprep.subr.bf16.mxu0 %v15483_v59 }
0x10bf   : > { %5607 = vmatpush1.bf16.msra.mxu1 %v13953_v25 }
0x10c0   : > { %5608 = vmatprep.subr.bf16.mxu1 %v13958_v38  ;;  %13022 = vmatpush3.bf16.msra.mxu0 %v14006_v40 }
0x10c1   : > { %13023 = vmatprep.subr.bf16.mxu0 %v15483_v59 }
0x10c3   : > { %5609 = vmatpush1.bf16.msra.mxu1 %v13956_v50 }
0x10c4   : > { %5610 = vmatprep.subr.bf16.mxu1 %v13961_v41  ;;  %13024 = vmatpush3.bf16.msra.mxu0 %v14010_v49 }
0x10c5   : > { %13025 = vmatprep.subr.bf16.mxu0 %v15483_v59 }
0x10c7   : > { %5611 = vmatpush1.bf16.msra.mxu1 %v13959_v54 }
0x10c8   : > { %5612 = vmatprep.subr.bf16.mxu1 %v13964_v43  ;;  %13026 = vmatpush3.bf16.msra.mxu0 %v14014_v46 }
0x10c9   : > { %13027 = vmatprep.subr.bf16.mxu0 %v15483_v59 }
0x10cb   : > { %5613 = vmatpush1.bf16.msra.mxu1 %v13962_v51 }
0x10cc   : > { %5614 = vmatprep.subr.bf16.mxu1 %v13967_v56  ;;  %13028 = vmatpush3.bf16.msra.mxu0 %v14018_v0 }
0x10cd   : > { %13029 = vmatprep.subr.bf16.mxu0 %v15483_v59 }
0x10cf   : > { %5615 = vmatpush1.bf16.msra.mxu1 %v13965_v57 }
0x10d0   : > { %5616 = vmatprep.subr.bf16.mxu1 %v13970_v6  ;;  %13030 = vmatpush3.bf16.msra.mxu0 %v14022_v53  ;;  %v14952_v53 = vld [vmem:[#allocation2 + $0x18] sm:$0xff] }
0x10d1   : > { %13031 = vmatprep.subr.bf16.mxu0 %v15483_v59 }
0x10d3   : > { %5617 = vmatpush1.bf16.msra.mxu1 %v13968_v34 }
0x10d4   : > { %5618 = vmatprep.subr.bf16.mxu1 %v13973_v36  ;;  %13032 = vmatpush3.bf16.msra.mxu0 %v14026_v14  ;;  %v14954_v14 = vld [vmem:[#allocation2 + $0x20] sm:$0xff] }
0x10d7   : > { %5619 = vmatpush1.bf16.msra.mxu1 %v13971_v9 }
0x10d8   : > { %5620 = vmatprep.subr.bf16.mxu1 %v13976_v35  ;;  %v16784_v35 = vld [vmem:[%s16054_s2 + $0x10] sm:$0xff] }
0x10db   : > { %5621 = vmatpush1.bf16.msra.mxu1 %v13974_v31  ;;  %v5217_v31 = vrot.slane %v16784_v35, %v16442_v21 }
0x10dc   : > { %5622 = vmatprep.subr.bf16.mxu1 %v13979_v5  ;;  %v16789_v5 = vld [vmem:[%s16054_s2] sm:$0xff] }
0x10df   : > { %5623 = vmatpush1.bf16.msra.mxu1 %v13977_v55  ;;  %v5209_v55 = vrot.slane %v16789_v5, %v16442_v21 }
0x10e0   : > { %5624 = vmatprep.subr.bf16.mxu1 %v13982_v12  ;;  %v16794_v12 = vld [vmem:[%s16054_s2 + $0x8] sm:$0xff] }
0x10e3   : > { %5625 = vmatpush1.bf16.msra.mxu1 %v13980_v15 }
0x10e4   : > { %5626 = vmatprep.subr.bf16.mxu1 %v13985_v52 }
0x10e7   : > { %5627 = vmatpush1.bf16.msra.mxu1 %v13983_v16 }
0x10e8   : > { %5628 = vmatprep.subr.bf16.mxu1 %v13988_v17  ;;  %v5781_v17 = vrot.slane %v16784_v35, %v16451_v24 }
0x10eb   : > { %5629 = vmatpush1.bf16.msra.mxu1 %v13986_v19  ;;  %v5777_v19 = vrot.slane %v16794_v12, %v16451_v24 }
0x10ec   : > { %5630 = vmatprep.subr.bf16.mxu1 %v13991_v28 }
0x10ef   : > { %5631 = vmatpush1.bf16.msra.mxu1 %v13989_v29 }
0x10f0   : > { %5632 = vmatprep.subr.bf16.mxu1 %v13994_v4 }
0x10f3   : > { %5633 = vmatpush1.bf16.msra.mxu1 %v13992_v18 }
0x10f4   : > { %5645 = vmatprep.subr.bf16.mxu1 %v13997_v13 }
0x10f6   : > { %5635 = vmatmul.mubr.bf16.vlgmr.msra.gmra.mrb[36].mxu1 %v16707_v10  ;;  %v14021_v10 = vld [vmem:[%s16070_s5 + $0x214] ss:$12 sps:$4 sm:$0xff]  }
0x10f7   : > { %5677 = vmatprep.mubr.bf16.mxu1 %v15482_v23  ;;  %5646 = vmatpush1.bf16.msra.mxu1 %v13995_v30 }
0x10f8   : > { %5647 = vmatprep.subr.bf16.mxu1 %v14001_v44 }
0x10fb   : > { %5648 = vmatpush1.bf16.msra.mxu1 %v13999_v27 }
0x10fc   : > { %5649 = vmatprep.subr.bf16.mxu1 %v14005_v32 }
0x10ff   : > { %5650 = vmatpush1.bf16.msra.mxu1 %v14003_v58 }
0x1100   : > { %5651 = vmatprep.subr.bf16.mxu1 %v14009_v48 }
0x1103   : > { %5652 = vmatpush1.bf16.msra.mxu1 %v14007_v60 }
0x1104   : > { %5653 = vmatprep.subr.bf16.mxu1 %v14013_v8  ;;  %v14950_v8 = vld [vmem:[#allocation2] sm:$0xff] }
0x1107   : > { %5654 = vmatpush1.bf16.msra.mxu1 %v14011_v26 }
0x1108   : > { %5655 = vmatprep.subr.bf16.mxu1 %v14017_v61  ;;  %v14951_v61 = vld [vmem:[#allocation2 + $0x8] sm:$0xff] }
0x110b   : > { %5656 = vmatpush1.bf16.msra.mxu1 %v14015_v2 }
0x110c   : > { %5657 = vmatprep.subr.bf16.mxu1 %v14021_v10 }
0x110f   : > { %5658 = vmatpush1.bf16.msra.mxu1 %v14019_v11 }
0x1110   : > { %5659 = vmatprep.subr.bf16.mxu1 %v14025_v62  ;;  %v14953_v62 = vld [vmem:[#allocation2 + $0x10] sm:$0xff] }
0x1113   : > { %5660 = vmatpush1.bf16.msra.mxu1 %v14023_v3 }
0x1188   : > { %v12715_v20 = vpop.f32.mrb[20].mxu0 }
0x1189   : > { %v13016_v25 = vpop.f32.mrb[32].mxu1  ;;  %v12716_v38 = vpop.f32.mrb[21].mxu0 }
0x118a   : > { %v12717_v50 = vadd.f32 %v12716_v38, %v12715_v20  ;;  %v5068_v41 = vpop.f32.mrb[33].mxu1  ;;  %v12718_v54 = vpop.f32.mrb[22].mxu0  ;;  %v14955_v38 = vld [vmem:[#allocation2 + $0x28] sm:$0xff] }
0x118b   : > { %v13614_v43 = vpack.i.bf16 %v13016_v25, %v5068_v41  ;;  %v12719_v51 = vpop.f32.mrb[23].mxu0 }
0x118c   : > { %v12720_v56 = vadd.f32 %v12719_v51, %v12718_v54  ;;  %v5723_v15 = vadd.f32 %v12717_v50, %v5217_v31  ;;  %v14027_v51 = vld [vmem:[%s16076_s25] ss:$48 sps:$4 sm:$0xff]  }
0x118d   : > { %13615 = vrot.lane.b32.xlu1 %v13614_v43, %s15485_s11 }
0x118e   : > { %v5726_v30 = vadd.f32 %v12720_v56, %v5217_v31  ;;  %v14029_v56 = vld [vmem:[%s16076_s25 + $0x4] ss:$48 sps:$4 sm:$0xff]  }
0x118f   : > { %7667 = vmatprep.subr.bf16.mxu0 %v14029_v56  ;;  %v14041_v31 = vld [vmem:[%s16076_s25 + $0xc4] ss:$48 sps:$4 sm:$0xff]  }
0x11ff   : > { %v13616_v59 = vpop.permute.xlu1 %13615 }
0x1200   : > { %v13618_v57 = vunpack.i.h.bf16 %v13616_v59  ;;  %v13617_v6 = vunpack.i.l.bf16 %v13616_v59  ;;  %v14030_v59 = vld [vmem:[%s16076_s25 + $0x8] ss:$48 sps:$4 sm:$0xff]  }
0x1202   : > { %v5106_v34 = vsel %vm3895_vm4, %v16662_v47, %v13618_v57  ;;  %v5105_v36 = vsel %vm3895_vm4, %v16664_v63, %v13617_v6  ;;  %v5213_v47 = vrot.slane %v16794_v12, %v16442_v21  ;;  %v5773_v63 = vrot.slane %v16789_v5, %v16451_v24  ;;  %v14032_v57 = vld [vmem:[%s16076_s25 + $0xc] ss:$48 sps:$4 sm:$0xff]   ;;  %v14035_v6 = vld [vmem:[%s16076_s25 + $0x64] ss:$48 sps:$4 sm:$0xff]  }
0x1203   : > { %v5109_v9 = vpack.c.bf16 %v5106_v34, %v5105_v36  ;;  %v14038_v34 = vld [vmem:[%s16076_s25 + $0x6c] ss:$48 sps:$4 sm:$0xff]   ;;  %7753 = vmatprep.subr.bf16.mxu1 %v14032_v57  ;;  %v14033_v36 = vld [vmem:[%s16076_s25 + $0x60] ss:$48 sps:$4 sm:$0xff]  }
0x1205   : > { %5678 = vmatmul.mubr.bf16.vlgmr.msra.gmra.mrb[36].mxu1 %v5109_v9  ;;  %13034 = vmatmul.mubr.bf16.vlgmr.msra.gmra.mrb[24].mxu0 %v5109_v9  ;;  %v14036_v9 = vld [vmem:[%s16076_s25 + $0x68] ss:$48 sps:$4 sm:$0xff]  }
0x1206   : > { %7668 = vmatpush1.bf16.msra.mxu0 %v14027_v51  ;;  %7754 = vmatpush1.bf16.msra.mxu1 %v14030_v59 }
0x1207   : > { %7669 = vmatprep.subr.bf16.mxu0 %v14035_v6  ;;  %7755 = vmatprep.subr.bf16.mxu1 %v14038_v34 }
0x120a   : > { %7670 = vmatpush1.bf16.msra.mxu0 %v14033_v36  ;;  %7756 = vmatpush1.bf16.msra.mxu1 %v14036_v9 }
0x120b   : > { %7671 = vmatprep.subr.bf16.mxu0 %v14041_v31 }
0x12d8   : > { %v5679_v52 = vpop.f32.mrb[36].mxu1  ;;  %v5763_v16 = vpop.f32.mrb[24].mxu0 }
0x12d9   : > { %v13145_v28 = vadd.f32 %v5679_v52, %v5209_v55  ;;  %v5764_v29 = vadd.f32 %v5763_v16, %v5723_v15  ;;  %v5681_v4 = vpop.f32.mrb[37].mxu1  ;;  %v13035_v18 = vpop.f32.mrb[25].mxu0  ;;  %v14047_v15 = vld [vmem:[%s16076_s25 + $0x124] ss:$48 sps:$4 sm:$0xff]   ;;  %v14050_v52 = vld [vmem:[%s16076_s25 + $0x12c] ss:$48 sps:$4 sm:$0xff]  }
0x12da   : > { %v13146_v13 = vadd.f32 %v5681_v4, %v5213_v47  ;;  %v5683_v33 = vpop.f32.mrb[38].mxu1  ;;  %v5766_v44 = vpop.f32.mrb[26].mxu0  ;;  %v14045_v16 = vld [vmem:[%s16076_s25 + $0x120] ss:$48 sps:$4 sm:$0xff]   ;;  %v14054_v4 = vld [vmem:[%s16076_s25 + $0x188] ss:$48 sps:$4 sm:$0xff]  }
0x12db   : > { %v5782_v45 = vmul.f32 %v13145_v28, %v5773_v63  ;;  %v13147_v27 = vadd.f32 %v5683_v33, %v5209_v55  ;;  %v5767_v32 = vadd.f32 %v5766_v44, %v5726_v30  ;;  %v5685_v40 = vpop.f32.mrb[39].mxu1  ;;  %v13036_v58 = vpop.f32.mrb[27].mxu0  ;;  %v5784_v48 = vmul.f32 %v5781_v17, %v5764_v29  ;;  %v14044_v55 = vld [vmem:[%s16076_s25 + $0xcc] ss:$48 sps:$4 sm:$0xff]   ;;  %v14051_v29 = vld [vmem:[%s16076_s25 + $0x180] ss:$48 sps:$4 sm:$0xff]  }
0x12dc   : > { %v5783_v49 = vmul.f32 %v13146_v13, %v5777_v19  ;;  %v13148_v60 = vadd.f32 %v5685_v40, %v5213_v47  ;;  %v14039_v47 = vld [vmem:[%s16076_s25 + $0xc0] ss:$48 sps:$4 sm:$0xff]   ;;  %7757 = vmatprep.subr.bf16.mxu1 %v14044_v55  ;;  %v14056_v28 = vld [vmem:[%s16076_s25 + $0x18c] ss:$48 sps:$4 sm:$0xff]   ;;  %v14059_v18 = vld [vmem:[%s16076_s25 + $0x1e4] ss:$48 sps:$4 sm:$0xff]  }
0x12dd   : > { %v16804_v46 = vadd.f32 %v14950_v8, %v5782_v45  ;;  %v5785_v26 = vmul.f32 %v13147_v27, %v5773_v63  ;;  %v5787_v2 = vmul.f32 %v5781_v17, %v5767_v32  ;;  %v16810_v3 = vadd.f32 %v14953_v62, %v5784_v48  ;;  %v14042_v63 = vld [vmem:[%s16076_s25 + $0xc8] ss:$48 sps:$4 sm:$0xff]   ;;  %7672 = vmatpush1.bf16.msra.mxu0 %v14039_v47  ;;  %v14062_v30 = vld [vmem:[%s16076_s25 + $0x1ec] ss:$48 sps:$4 sm:$0xff]   ;;  %v14057_v13 = vld [vmem:[%s16076_s25 + $0x1e0] ss:$48 sps:$4 sm:$0xff]  }
0x12de   : > { %v16806_v0 = vadd.f32 %v14951_v61, %v5783_v49  ;;  %v5786_v10 = vmul.f32 %v13148_v60, %v5777_v19  ;;  %7758 = vmatpush1.bf16.msra.mxu1 %v14042_v63  ;;  %7673 = vmatprep.subr.bf16.mxu0 %v14047_v15  ;;  %v14048_v17 = vld [vmem:[%s16076_s25 + $0x128] ss:$48 sps:$4 sm:$0xff]   ;;  %v14053_v19 = vld [vmem:[%s16076_s25 + $0x184] ss:$48 sps:$4 sm:$0xff]   ;;  %v14068_v45 = vld [vmem:[%s16076_s25 + $0x24c] ss:$48 sps:$4 sm:$0xff]  }
0x12df   : > { %v16808_v11 = vadd.f32 %v14952_v53, %v5785_v26  ;;  %v16816_v50 = vadd.f32 %v14955_v38, %v5787_v2  ;;  %7759 = vmatprep.subr.bf16.mxu1 %v14050_v52  ;;  %v14060_v33 = vld [vmem:[%s16076_s25 + $0x1e8] ss:$48 sps:$4 sm:$0xff]   ;;  %v14065_v44 = vld [vmem:[%s16076_s25 + $0x244] ss:$48 sps:$4 sm:$0xff]   ;;  %v14063_v27 = vld [vmem:[%s16076_s25 + $0x240] ss:$48 sps:$4 sm:$0xff]  }
0x12e0   : > { %v16812_v20 = vadd.f32 %v14954_v14, %v5786_v10  ;;  %v5794_v25 = vadd.f32 %v16806_v0, %v16804_v46  ;;  %v14066_v32 = vld [vmem:[%s16076_s25 + $0x248] ss:$48 sps:$4 sm:$0xff]   ;;  %v14071_v40 = vld [vmem:[%s16076_s25 + $0x2a4] ss:$48 sps:$4 sm:$0xff]   ;;  %v14074_v58 = vld [vmem:[%s16076_s25 + $0x2ac] ss:$48 sps:$4 sm:$0xff]  }
0x12e1   : > { %7674 = vmatpush1.bf16.msra.mxu0 %v14045_v16  ;;  %v14069_v48 = vld [vmem:[%s16076_s25 + $0x2a0] ss:$48 sps:$4 sm:$0xff]   ;;  %v14072_v49 = vld [vmem:[%s16076_s25 + $0x2a8] ss:$48 sps:$4 sm:$0xff]   ;;  %v14077_v60 = vld [vmem:[%s16076_s25 + $0x304] ss:$48 sps:$4 sm:$0xff]  }
0x12e2   : > { %v5795_v41 = vadd.f32 %v5794_v25, %v16810_v3  ;;  %v5798_v54 = vadd.f32 %v16812_v20, %v16808_v11  ;;  %7760 = vmatpush1.bf16.msra.mxu1 %v14048_v17  ;;  %7675 = vmatprep.subr.bf16.mxu0 %v14053_v19  ;;  %v14080_v8 = vld [vmem:[%s16076_s25 + $0x30c] ss:$48 sps:$4 sm:$0xff]   ;;  %v14075_v26 = vld [vmem:[%s16076_s25 + $0x300] ss:$48 sps:$4 sm:$0xff]   ;;  %v14078_v61 = vld [vmem:[%s16076_s25 + $0x308] ss:$48 sps:$4 sm:$0xff]  }
0x12e3   : > { %7761 = vmatprep.subr.bf16.mxu1 %v14056_v28  ;;  %v14083_v2 = vld [vmem:[%s16076_s25 + $0x364] ss:$48 sps:$4 sm:$0xff]   ;;  %v14086_v10 = vld [vmem:[%s16076_s25 + $0x36c] ss:$48 sps:$4 sm:$0xff]   ;;  %v14081_v53 = vld [vmem:[%s16076_s25 + $0x360] ss:$48 sps:$4 sm:$0xff]  }
0x12e4   : > { %5796 = vadd.xlane.f32.xlu1 %v5795_v41  ;;  %v5799_v43 = vadd.f32 %v5798_v54, %v16816_v50  ;;  %v14084_v62 = vld [vmem:[%s16076_s25 + $0x368] ss:$48 sps:$4 sm:$0xff]   ;;  %v14089_v16 = vld [vmem:[%s16076_s25 + $0x3c4] ss:$48 sps:$4 sm:$0xff]   ;;  %v14092_v17 = vld [vmem:[%s16076_s25 + $0x3cc] ss:$48 sps:$4 sm:$0xff]  }
0x12e5   : > { %7676 = vmatpush1.bf16.msra.mxu0 %v14051_v29  ;;  %v14087_v19 = vld [vmem:[%s16076_s25 + $0x3c0] ss:$48 sps:$4 sm:$0xff]   ;;  %v14090_v28 = vld [vmem:[%s16076_s25 + $0x3c8] ss:$48 sps:$4 sm:$0xff]   ;;  %v14095_v29 = vld [vmem:[%s16076_s25 + $0x424] ss:$48 sps:$4 sm:$0xff]  }
0x12e6   : > { %5800 = vadd.xlane.f32.xlu0 %v5799_v43  ;;  %7762 = vmatpush1.bf16.msra.mxu1 %v14054_v4  ;;  %v14098_v4 = vld [vmem:[%s16076_s25 + $0x42c] ss:$48 sps:$4 sm:$0xff]  }
0x12e7   : > { %7677 = vmatprep.subr.bf16.mxu0 %v14059_v18  ;;  %7763 = vmatprep.subr.bf16.mxu1 %v14062_v30  ;;  %v14093_v18 = vld [vmem:[%s16076_s25 + $0x420] ss:$48 sps:$4 sm:$0xff]   ;;  %v14096_v30 = vld [vmem:[%s16076_s25 + $0x428] ss:$48 sps:$4 sm:$0xff]  }
0x12e9   : > { %7678 = vmatpush1.bf16.msra.mxu0 %v14057_v13  ;;  %v14099_v13 = vld [vmem:[%s16076_s25 + $0x480] ss:$48 sps:$4 sm:$0xff]  }
0x12ea   : > { %7764 = vmatpush1.bf16.msra.mxu1 %v14060_v33  ;;  %7679 = vmatprep.subr.bf16.mxu0 %v14065_v44  ;;  %v14101_v33 = vld [vmem:[%s16076_s25 + $0x484] ss:$48 sps:$4 sm:$0xff]   ;;  %v14102_v44 = vld [vmem:[%s16076_s25 + $0x488] ss:$48 sps:$4 sm:$0xff]  }
0x12eb   : > { %7765 = vmatprep.subr.bf16.mxu1 %v14068_v45  ;;  %v14104_v45 = vld [vmem:[%s16076_s25 + $0x48c] ss:$48 sps:$4 sm:$0xff]  }
0x12ed   : > { %7680 = vmatpush1.bf16.msra.mxu0 %v14063_v27  ;;  %v14107_v27 = vld [vmem:[%s16076_s25 + $0x4e4] ss:$48 sps:$4 sm:$0xff]  }
0x12ee   : > { %7766 = vmatpush1.bf16.msra.mxu1 %v14066_v32  ;;  %7681 = vmatprep.subr.bf16.mxu0 %v14071_v40  ;;  %v14110_v32 = vld [vmem:[%s16076_s25 + $0x4ec] ss:$48 sps:$4 sm:$0xff]   ;;  %v14105_v40 = vld [vmem:[%s16076_s25 + $0x4e0] ss:$48 sps:$4 sm:$0xff]  }
0x12ef   : > { %7767 = vmatprep.subr.bf16.mxu1 %v14074_v58  ;;  %v14108_v58 = vld [vmem:[%s16076_s25 + $0x4e8] ss:$48 sps:$4 sm:$0xff]  }
0x12f1   : > { %7682 = vmatpush1.bf16.msra.mxu0 %v14069_v48  ;;  %v14113_v48 = vld [vmem:[%s16076_s25 + $0x544] ss:$48 sps:$4 sm:$0xff]  }
0x12f2   : > { %7768 = vmatpush1.bf16.msra.mxu1 %v14072_v49  ;;  %7683 = vmatprep.subr.bf16.mxu0 %v14077_v60  ;;  %v14116_v49 = vld [vmem:[%s16076_s25 + $0x54c] ss:$48 sps:$4 sm:$0xff]   ;;  %v14111_v60 = vld [vmem:[%s16076_s25 + $0x540] ss:$48 sps:$4 sm:$0xff]  }
0x12f3   : > { %7769 = vmatprep.subr.bf16.mxu1 %v14080_v8  ;;  %v14114_v8 = vld [vmem:[%s16076_s25 + $0x548] ss:$48 sps:$4 sm:$0xff]  }
0x12f5   : > { %7684 = vmatpush1.bf16.msra.mxu0 %v14075_v26  ;;  %v14119_v26 = vld [vmem:[%s16076_s25 + $0x5a4] ss:$48 sps:$4 sm:$0xff]  }
0x12f6   : > { %7770 = vmatpush1.bf16.msra.mxu1 %v14078_v61  ;;  %7685 = vmatprep.subr.bf16.mxu0 %v14083_v2  ;;  %v14122_v61 = vld [vmem:[%s16076_s25 + $0x5ac] ss:$48 sps:$4 sm:$0xff]   ;;  %v14117_v2 = vld [vmem:[%s16076_s25 + $0x5a0] ss:$48 sps:$4 sm:$0xff]  }
0x12f7   : > { %7771 = vmatprep.subr.bf16.mxu1 %v14086_v10  ;;  %v14120_v10 = vld [vmem:[%s16076_s25 + $0x5a8] ss:$48 sps:$4 sm:$0xff]  }
0x12f9   : > { %7686 = vmatpush1.bf16.msra.mxu0 %v14081_v53  ;;  %v14125_v53 = vld [vmem:[%s16076_s25 + $0x604] ss:$48 sps:$4 sm:$0xff]  }
0x12fa   : > { %7772 = vmatpush1.bf16.msra.mxu1 %v14084_v62  ;;  %7687 = vmatprep.subr.bf16.mxu0 %v14089_v16  ;;  %v14128_v62 = vld [vmem:[%s16076_s25 + $0x60c] ss:$48 sps:$4 sm:$0xff]  }
0x12fb   : > { %7773 = vmatprep.subr.bf16.mxu1 %v14092_v17 }
0x12fd   : > { %7688 = vmatpush1.bf16.msra.mxu0 %v14087_v19 }
0x12fe   : > { %7774 = vmatpush1.bf16.msra.mxu1 %v14090_v28  ;;  %7689 = vmatprep.subr.bf16.mxu0 %v14095_v29 }
0x12ff   : > { %7775 = vmatprep.subr.bf16.mxu1 %v14098_v4 }
0x1301   : > { %7690 = vmatpush1.bf16.msra.mxu0 %v14093_v18 }
0x1302   : > { %7776 = vmatpush1.bf16.msra.mxu1 %v14096_v30  ;;  %7691 = vmatprep.subr.bf16.mxu0 %v14101_v33  ;;  %v14131_v33 = vld [vmem:[%s16076_s25 + $0x664] ss:$48 sps:$4 sm:$0xff]  }
0x1303   : > { %7777 = vmatprep.subr.bf16.mxu1 %v14104_v45  ;;  %v14132_v45 = vld [vmem:[%s16076_s25 + $0x668] ss:$48 sps:$4 sm:$0xff]  }
0x1305   : > { %7692 = vmatpush1.bf16.msra.mxu0 %v14099_v13  ;;  %v14126_v13 = vld [vmem:[%s16076_s25 + $0x608] ss:$48 sps:$4 sm:$0xff]  }
0x1306   : > { %7778 = vmatpush1.bf16.msra.mxu1 %v14102_v44  ;;  %7693 = vmatprep.subr.bf16.mxu0 %v14107_v27  ;;  %v14134_v44 = vld [vmem:[%s16076_s25 + $0x66c] ss:$48 sps:$4 sm:$0xff]   ;;  %v14137_v27 = vld [vmem:[%s16076_s25 + $0x6c4] ss:$48 sps:$4 sm:$0xff]  }
0x1307   : > { %7779 = vmatprep.subr.bf16.mxu1 %v14110_v32  ;;  %v14140_v32 = vld [vmem:[%s16076_s25 + $0x6cc] ss:$48 sps:$4 sm:$0xff]  }
0x1309   : > { %7694 = vmatpush1.bf16.msra.mxu0 %v14105_v40  ;;  %v14135_v40 = vld [vmem:[%s16076_s25 + $0x6c0] ss:$48 sps:$4 sm:$0xff]  }
0x130a   : > { %7780 = vmatpush1.bf16.msra.mxu1 %v14108_v58  ;;  %7695 = vmatprep.subr.bf16.mxu0 %v14113_v48  ;;  %v14138_v58 = vld [vmem:[%s16076_s25 + $0x6c8] ss:$48 sps:$4 sm:$0xff]   ;;  %v14143_v48 = vld [vmem:[%s16076_s25 + $0x724] ss:$48 sps:$4 sm:$0xff]  }
0x130b   : > { %7781 = vmatprep.subr.bf16.mxu1 %v14116_v49  ;;  %v14146_v49 = vld [vmem:[%s16076_s25 + $0x72c] ss:$48 sps:$4 sm:$0xff]  }
0x130d   : > { %7696 = vmatpush1.bf16.msra.mxu0 %v14111_v60  ;;  %v14141_v60 = vld [vmem:[%s16076_s25 + $0x720] ss:$48 sps:$4 sm:$0xff]  }
0x130e   : > { %7782 = vmatpush1.bf16.msra.mxu1 %v14114_v8  ;;  %7697 = vmatprep.subr.bf16.mxu0 %v14119_v26  ;;  %v14144_v8 = vld [vmem:[%s16076_s25 + $0x728] ss:$48 sps:$4 sm:$0xff]   ;;  %v14149_v26 = vld [vmem:[%s16076_s25 + $0x784] ss:$48 sps:$4 sm:$0xff]  }
0x130f   : > { %7783 = vmatprep.subr.bf16.mxu1 %v14122_v61  ;;  %v14152_v61 = vld [vmem:[%s16076_s25 + $0x78c] ss:$48 sps:$4 sm:$0xff]  }
0x1311   : > { %7698 = vmatpush1.bf16.msra.mxu0 %v14117_v2  ;;  %v14147_v2 = vld [vmem:[%s16076_s25 + $0x780] ss:$48 sps:$4 sm:$0xff]  }
0x1312   : > { %7784 = vmatpush1.bf16.msra.mxu1 %v14120_v10  ;;  %7710 = vmatprep.subr.bf16.mxu0 %v14125_v53  ;;  %v14150_v10 = vld [vmem:[%s16076_s25 + $0x788] ss:$48 sps:$4 sm:$0xff]   ;;  %v14155_v53 = vld [vmem:[%s16076_s25 + $0x7e4] ss:$48 sps:$4 sm:$0xff]  }
0x1313   : > { %7796 = vmatprep.subr.bf16.mxu1 %v14128_v62  ;;  %v14158_v62 = vld [vmem:[%s16076_s25 + $0x7ec] ss:$48 sps:$4 sm:$0xff]  }
0x1371   : > { %v5797_v14 = vpop.xlane.xlu1 %5796 }
0x1372   : > { %v5802_v25 = vmul.f32 0.0026041667, %v5797_v14 }
0x1373   : > { %v5801_v38 = vpop.xlane.xlu0 %5800 }
0x1374   : > { %v16863_v41 = vsub.f32 %v16804_v46, %v5802_v25  ;;  %v16866_v54 = vsub.f32 %v16806_v0, %v5802_v25  ;;  %v5803_v43 = vmul.f32 0.0026041667, %v5801_v38  ;;  %v16869_v51 = vsub.f32 %v16810_v3, %v5802_v25 }
0x1376   : > { %v16872_v56 = vsub.f32 %v16808_v11, %v5803_v43  ;;  %v16875_v59 = vsub.f32 %v16812_v20, %v5803_v43  ;;  %v5810_v57 = vmul.f32 %v16863_v41, %v16863_v41  ;;  %v5811_v6 = vmul.f32 %v16866_v54, %v16866_v54 }
0x1377   : > { %v16886_v9 = vsub.f32 %v16816_v50, %v5803_v43  ;;  %v5812_v31 = vmul.f32 %v16869_v51, %v16869_v51 }
0x1378   : > { %v5813_v34 = vmul.f32 %v16872_v56, %v16872_v56  ;;  %v5814_v36 = vmul.f32 %v16875_v59, %v16875_v59  ;;  %v5816_v55 = vadd.f32 %v5811_v6, %v5810_v57 }
0x1379   : > { %v5815_v15 = vmul.f32 %v16886_v9, %v16886_v9 }
0x137a   : > { %v5817_v47 = vadd.f32 %v5816_v55, %v5812_v31  ;;  %v5820_v63 = vadd.f32 %v5814_v36, %v5813_v34  ;;  %v5843_v31 = vrot.slane %v16794_v12, %v16445_v22 }
0x137c   : > { %5818 = vadd.xlane.f32.xlu0 %v5817_v47  ;;  %v5821_v52 = vadd.f32 %v5820_v63, %v5815_v15  ;;  %v5839_v47 = vrot.slane %v16789_v5, %v16445_v22  ;;  %v5861_v15 = vrot.slane %v16794_v12, %v16448_v37 }
0x1380   : > { %5822 = vadd.xlane.f32.xlu0 %v5821_v52 }
0x1409   : > { %v5819_v14 = vpop.xlane.xlu0 %5818 }
0x140a   : > { %v5824_v25 = vmul.f32 0.0026041667, %v5819_v14  ;;  %v14153_v14 = vld [vmem:[%s16076_s25 + $0x7e0] ss:$48 sps:$4 sm:$0xff]  }
0x140c   : > { %v5826_v38 = vadd.f32 1e-06, %v5824_v25  ;;  %v14156_v25 = vld [vmem:[%s16076_s25 + $0x7e8] ss:$48 sps:$4 sm:$0xff]  }
0x140d   : > { %v5823_v43 = vpop.xlane.xlu0 %5822 }
0x140e   : > { %14895 = vrsqrt.f32 %v5826_v38  ;;  %v5825_v57 = vmul.f32 0.0026041667, %v5823_v43  ;;  %v14161_v38 = vld [vmem:[%s16076_s25 + $0x844] ss:$48 sps:$4 sm:$0xff]   ;;  %v14164_v43 = vld [vmem:[%s16076_s25 + $0x84c] ss:$48 sps:$4 sm:$0xff]  }
0x1410   : > { %v5827_v6 = vadd.f32 1e-06, %v5825_v57 }
0x1412   : > { %14897 = vrsqrt.f32 %v5827_v6 }
0x1418   : > { %v16918_v34 = vpop.eup %14895 }
0x1419   : > { %v5831_v36 = vmul.f32 %v16918_v34, %v16866_v54  ;;  %v5830_v55 = vmul.f32 %v16918_v34, %v16863_v41  ;;  %v5857_v54 = vrot.slane %v16789_v5, %v16448_v37  ;;  %v14123_v5 = vld [vmem:[%s16076_s25 + $0x600] ss:$48 sps:$4 sm:$0xff]   ;;  %v5832_v6 = vmul.f32 %v16918_v34, %v16869_v51 }
0x141a   : > { %v5865_v51 = vrot.slane %v16784_v35, %v16448_v37  ;;  %v14165_v34 = vld [vmem:[%s16076_s25 + $0x8a0] ss:$48 sps:$4 sm:$0xff]  }
0x141b   : > { %v5849_v16 = vmul.f32 %v5843_v31, %v5831_v36  ;;  %v5848_v17 = vmul.f32 %v5839_v47, %v5830_v55  ;;  %v5847_v36 = vrot.slane %v16784_v35, %v16445_v22  ;;  %v14162_v55 = vld [vmem:[%s16076_s25 + $0x848] ss:$48 sps:$4 sm:$0xff]  }
0x141c   : > { %v16928_v63 = vpop.eup %14897 }
0x141d   : > { %v5834_v52 = vmul.f32 %v16928_v63, %v16875_v59  ;;  %v5833_v41 = vmul.f32 %v16928_v63, %v16872_v56  ;;  %v5867_v29 = vadd.f32 %v5861_v15, %v5849_v16  ;;  %v5866_v12 = vadd.f32 %v5857_v54, %v5848_v17  ;;  %v14129_v56 = vld [vmem:[%s16076_s25 + $0x660] ss:$48 sps:$4 sm:$0xff]   ;;  %v14173_v16 = vld [vmem:[%s16076_s25 + $0x14] ss:$48 sps:$4 sm:$0xff]  }
0x141e   : > { %v5835_v57 = vmul.f32 %v16928_v63, %v16886_v9  ;;  %v5850_v63 = vmul.f32 %v5847_v36, %v5832_v6  ;;  %v14224_v6 = vld [vmem:[%s16076_s25 + $0x31c] ss:$48 sps:$4 sm:$0xff]  }
0x141f   : > { %v5852_v19 = vmul.f32 %v5843_v31, %v5834_v52  ;;  %v5851_v28 = vmul.f32 %v5839_v47, %v5833_v41  ;;  %v14159_v31 = vld [vmem:[%s16076_s25 + $0x840] ss:$48 sps:$4 sm:$0xff]   ;;  %v14167_v47 = vld [vmem:[%s16076_s25 + $0x8a4] ss:$48 sps:$4 sm:$0xff]   ;;  %v14176_v41 = vld [vmem:[%s16076_s25 + $0x1c] ss:$48 sps:$4 sm:$0xff]  }
0x1420   : > { %v5853_v9 = vmul.f32 %v5847_v36, %v5835_v57  ;;  %v5868_v17 = vadd.f32 %v5865_v51, %v5850_v63  ;;  %v14221_v57 = vld [vmem:[%s16076_s25 + $0x314] ss:$48 sps:$4 sm:$0xff]   ;;  %v14219_v36 = vld [vmem:[%s16076_s25 + $0x310] ss:$48 sps:$4 sm:$0xff]  }
0x1421   : > { %v5870_v4 = vadd.f32 %v5861_v15, %v5852_v19  ;;  %v5869_v18 = vadd.f32 %v5857_v54, %v5851_v28  ;;  %v14170_v15 = vld [vmem:[%s16076_s25 + $0x8ac] ss:$48 sps:$4 sm:$0xff]   ;;  %v14168_v54 = vld [vmem:[%s16076_s25 + $0x8a8] ss:$48 sps:$4 sm:$0xff]   ;;  %v14171_v19 = vld [vmem:[%s16076_s25 + $0x10] ss:$48 sps:$4 sm:$0xff]  }
0x1422   : > { %v5871_v52 = vadd.f32 %v5865_v51, %v5853_v9  ;;  %v14174_v28 = vld [vmem:[%s16076_s25 + $0x18] ss:$48 sps:$4 sm:$0xff]   ;;  %v14233_v63 = vld [vmem:[%s16076_s25 + $0x3d4] ss:$48 sps:$4 sm:$0xff]   ;;  %v14236_v51 = vld [vmem:[%s16076_s25 + $0x3dc] ss:$48 sps:$4 sm:$0xff]  }
0x1423   : > { %v16938_v30 = vpack.c.bf16 %v5870_v4, %v5867_v29  ;;  %v16942_v59 = vpack.c.bf16 %v5869_v18, %v5866_v12  ;;  %v14179_v29 = vld [vmem:[%s16076_s25 + $0x74] ss:$48 sps:$4 sm:$0xff]   ;;  %v14182_v4 = vld [vmem:[%s16076_s25 + $0x7c] ss:$48 sps:$4 sm:$0xff]   ;;  %v14177_v12 = vld [vmem:[%s16076_s25 + $0x70] ss:$48 sps:$4 sm:$0xff]  }
0x1424   : > { %v16989_v35 = vpack.c.bf16 %v5871_v52, %v5868_v17  ;;  %v14180_v18 = vld [vmem:[%s16076_s25 + $0x78] ss:$48 sps:$4 sm:$0xff]   ;;  %v14239_v52 = vld [vmem:[%s16076_s25 + $0x434] ss:$48 sps:$4 sm:$0xff]  }
0x1425   : > { %7699 = vmatprep.mubr.bf16.mxu0 %v16938_v30  ;;  %7785 = vmatprep.mubr.bf16.mxu1 %v16938_v30  ;;  %v14228_v9 = vld [vmem:[%s16076_s25 + $0x378] ss:$48 sps:$4 sm:$0xff]  }
0x1426   : > { %7700 = vmatmul.mubr.bf16.vlgmr.msra.gmra.mrb[28].mxu0 %v16942_v59  ;;  %7786 = vmatmul.mubr.bf16.vlgmr.msra.gmra.mrb[40].mxu1 %v16942_v59  ;;  %v14240_v17 = vld [vmem:[%s16076_s25 + $0x438] ss:$48 sps:$4 sm:$0xff]  }
0x1427   : > { %7711 = vmatpush1.bf16.msra.mxu0 %v14123_v5  ;;  %7797 = vmatpush1.bf16.msra.mxu1 %v14126_v13  ;;  %v14185_v5 = vld [vmem:[%s16076_s25 + $0xd4] ss:$48 sps:$4 sm:$0xff]   ;;  %v14188_v13 = vld [vmem:[%s16076_s25 + $0xdc] ss:$48 sps:$4 sm:$0xff]  }
0x1428   : > { %7712 = vmatprep.subr.bf16.mxu0 %v14131_v33  ;;  %7798 = vmatprep.subr.bf16.mxu1 %v14134_v44  ;;  %v14183_v33 = vld [vmem:[%s16076_s25 + $0xd0] ss:$48 sps:$4 sm:$0xff]   ;;  %v14186_v44 = vld [vmem:[%s16076_s25 + $0xd8] ss:$48 sps:$4 sm:$0xff]  }
0x1429   : > { %7742 = vmatprep.mubr.bf16.mxu0 %v15482_v23  ;;  %7828 = vmatprep.mubr.bf16.mxu1 %v15482_v23 }
0x142b   : > { %7713 = vmatpush1.bf16.msra.mxu0 %v14129_v56  ;;  %7799 = vmatpush1.bf16.msra.mxu1 %v14132_v45  ;;  %v14191_v56 = vld [vmem:[%s16076_s25 + $0x134] ss:$48 sps:$4 sm:$0xff]   ;;  %v14194_v45 = vld [vmem:[%s16076_s25 + $0x13c] ss:$48 sps:$4 sm:$0xff]  }
0x142c   : > { %7714 = vmatprep.subr.bf16.mxu0 %v14137_v27  ;;  %7800 = vmatprep.subr.bf16.mxu1 %v14140_v32  ;;  %v14189_v27 = vld [vmem:[%s16076_s25 + $0x130] ss:$48 sps:$4 sm:$0xff]   ;;  %v14192_v32 = vld [vmem:[%s16076_s25 + $0x138] ss:$48 sps:$4 sm:$0xff]  }
0x142f   : > { %7715 = vmatpush1.bf16.msra.mxu0 %v14135_v40  ;;  %7801 = vmatpush1.bf16.msra.mxu1 %v14138_v58  ;;  %v14197_v40 = vld [vmem:[%s16076_s25 + $0x194] ss:$48 sps:$4 sm:$0xff]   ;;  %v14200_v58 = vld [vmem:[%s16076_s25 + $0x19c] ss:$48 sps:$4 sm:$0xff]  }
0x1430   : > { %7716 = vmatprep.subr.bf16.mxu0 %v14143_v48  ;;  %7802 = vmatprep.subr.bf16.mxu1 %v14146_v49  ;;  %v14195_v48 = vld [vmem:[%s16076_s25 + $0x190] ss:$48 sps:$4 sm:$0xff]   ;;  %v14198_v49 = vld [vmem:[%s16076_s25 + $0x198] ss:$48 sps:$4 sm:$0xff]  }
0x1433   : > { %7717 = vmatpush1.bf16.msra.mxu0 %v14141_v60  ;;  %7803 = vmatpush1.bf16.msra.mxu1 %v14144_v8  ;;  %v14203_v60 = vld [vmem:[%s16076_s25 + $0x1f4] ss:$48 sps:$4 sm:$0xff]   ;;  %v14206_v8 = vld [vmem:[%s16076_s25 + $0x1fc] ss:$48 sps:$4 sm:$0xff]  }
0x1434   : > { %7718 = vmatprep.subr.bf16.mxu0 %v14149_v26  ;;  %7804 = vmatprep.subr.bf16.mxu1 %v14152_v61  ;;  %v14201_v26 = vld [vmem:[%s16076_s25 + $0x1f0] ss:$48 sps:$4 sm:$0xff]   ;;  %v14204_v61 = vld [vmem:[%s16076_s25 + $0x1f8] ss:$48 sps:$4 sm:$0xff]  }
0x1437   : > { %7719 = vmatpush1.bf16.msra.mxu0 %v14147_v2  ;;  %7805 = vmatpush1.bf16.msra.mxu1 %v14150_v10  ;;  %v14209_v2 = vld [vmem:[%s16076_s25 + $0x254] ss:$48 sps:$4 sm:$0xff]   ;;  %v14212_v10 = vld [vmem:[%s16076_s25 + $0x25c] ss:$48 sps:$4 sm:$0xff]  }
0x1438   : > { %7720 = vmatprep.subr.bf16.mxu0 %v14155_v53  ;;  %7806 = vmatprep.subr.bf16.mxu1 %v14158_v62  ;;  %v14207_v53 = vld [vmem:[%s16076_s25 + $0x250] ss:$48 sps:$4 sm:$0xff]   ;;  %v14210_v62 = vld [vmem:[%s16076_s25 + $0x258] ss:$48 sps:$4 sm:$0xff]  }
0x143b   : > { %7721 = vmatpush1.bf16.msra.mxu0 %v14153_v14  ;;  %7807 = vmatpush1.bf16.msra.mxu1 %v14156_v25  ;;  %v14215_v14 = vld [vmem:[%s16076_s25 + $0x2b4] ss:$48 sps:$4 sm:$0xff]   ;;  %v14218_v25 = vld [vmem:[%s16076_s25 + $0x2bc] ss:$48 sps:$4 sm:$0xff]  }
0x143c   : > { %7722 = vmatprep.subr.bf16.mxu0 %v14161_v38  ;;  %7808 = vmatprep.subr.bf16.mxu1 %v14164_v43  ;;  %v14213_v38 = vld [vmem:[%s16076_s25 + $0x2b0] ss:$48 sps:$4 sm:$0xff]   ;;  %v14216_v43 = vld [vmem:[%s16076_s25 + $0x2b8] ss:$48 sps:$4 sm:$0xff]  }
0x143f   : > { %7723 = vmatpush1.bf16.msra.mxu0 %v14159_v31  ;;  %7809 = vmatpush1.bf16.msra.mxu1 %v14162_v55  ;;  %v14222_v31 = vld [vmem:[%s16076_s25 + $0x318] ss:$48 sps:$4 sm:$0xff]   ;;  %v14227_v55 = vld [vmem:[%s16076_s25 + $0x374] ss:$48 sps:$4 sm:$0xff]  }
0x1440   : > { %7724 = vmatprep.subr.bf16.mxu0 %v14167_v47  ;;  %7810 = vmatprep.subr.bf16.mxu1 %v14170_v15  ;;  %v14230_v47 = vld [vmem:[%s16076_s25 + $0x37c] ss:$48 sps:$4 sm:$0xff]   ;;  %v14225_v15 = vld [vmem:[%s16076_s25 + $0x370] ss:$48 sps:$4 sm:$0xff]  }
0x1443   : > { %7725 = vmatpush1.bf16.msra.mxu0 %v14165_v34  ;;  %7811 = vmatpush1.bf16.msra.mxu1 %v14168_v54  ;;  %v14231_v34 = vld [vmem:[%s16076_s25 + $0x3d0] ss:$48 sps:$4 sm:$0xff]   ;;  %v14234_v54 = vld [vmem:[%s16076_s25 + $0x3d8] ss:$48 sps:$4 sm:$0xff]  }
0x1444   : > { %7839 = vmatprep.subr.bf16.mxu0 %v14173_v16  ;;  %7925 = vmatprep.subr.bf16.mxu1 %v14176_v41  ;;  %v14242_v16 = vld [vmem:[%s16076_s25 + $0x43c] ss:$48 sps:$4 sm:$0xff]   ;;  %v14237_v41 = vld [vmem:[%s16076_s25 + $0x430] ss:$48 sps:$4 sm:$0xff]  }
0x1446   : > { %7743 = vmatmul.mubr.bf16.vlgmr.msra.gmra.mrb[28].mxu0 %v16989_v35  ;;  %7829 = vmatmul.mubr.bf16.vlgmr.msra.gmra.mrb[40].mxu1 %v16989_v35 }
0x1447   : > { %7840 = vmatpush1.bf16.msra.mxu0 %v14171_v19  ;;  %7871 = vmatprep.mubr.bf16.mxu0 %v16938_v30  ;;  %v14245_v19 = vld [vmem:[%s16076_s25 + $0x494] ss:$48 sps:$4 sm:$0xff]  }
0x1448   : > { %7926 = vmatpush1.bf16.msra.mxu1 %v14174_v28  ;;  %7957 = vmatprep.mubr.bf16.mxu1 %v16938_v30  ;;  %v14248_v28 = vld [vmem:[%s16076_s25 + $0x49c] ss:$48 sps:$4 sm:$0xff]  }
0x1449   : > { %7841 = vmatprep.subr.bf16.mxu0 %v14179_v29  ;;  %7927 = vmatprep.subr.bf16.mxu1 %v14182_v4  ;;  %v14243_v29 = vld [vmem:[%s16076_s25 + $0x490] ss:$48 sps:$4 sm:$0xff]   ;;  %v14246_v4 = vld [vmem:[%s16076_s25 + $0x498] ss:$48 sps:$4 sm:$0xff]  }
0x144b   : > { %7842 = vmatpush1.bf16.msra.mxu0 %v14177_v12  ;;  %v14251_v12 = vld [vmem:[%s16076_s25 + $0x4f4] ss:$48 sps:$4 sm:$0xff]  }
0x144c   : > { %7928 = vmatpush1.bf16.msra.mxu1 %v14180_v18  ;;  %7843 = vmatprep.subr.bf16.mxu0 %v14185_v5  ;;  %v14254_v18 = vld [vmem:[%s16076_s25 + $0x4fc] ss:$48 sps:$4 sm:$0xff]   ;;  %v14249_v5 = vld [vmem:[%s16076_s25 + $0x4f0] ss:$48 sps:$4 sm:$0xff]  }
0x144d   : > { %7929 = vmatprep.subr.bf16.mxu1 %v14188_v13  ;;  %v14252_v13 = vld [vmem:[%s16076_s25 + $0x4f8] ss:$48 sps:$4 sm:$0xff]  }
0x144f   : > { %7844 = vmatpush1.bf16.msra.mxu0 %v14183_v33  ;;  %v14257_v33 = vld [vmem:[%s16076_s25 + $0x554] ss:$48 sps:$4 sm:$0xff]  }
0x1450   : > { %7930 = vmatpush1.bf16.msra.mxu1 %v14186_v44  ;;  %7845 = vmatprep.subr.bf16.mxu0 %v14191_v56  ;;  %v14260_v44 = vld [vmem:[%s16076_s25 + $0x55c] ss:$48 sps:$4 sm:$0xff]   ;;  %v14255_v56 = vld [vmem:[%s16076_s25 + $0x550] ss:$48 sps:$4 sm:$0xff]  }
0x1451   : > { %7931 = vmatprep.subr.bf16.mxu1 %v14194_v45  ;;  %v14258_v45 = vld [vmem:[%s16076_s25 + $0x558] ss:$48 sps:$4 sm:$0xff]  }
0x1453   : > { %7846 = vmatpush1.bf16.msra.mxu0 %v14189_v27  ;;  %v14263_v27 = vld [vmem:[%s16076_s25 + $0x5b4] ss:$48 sps:$4 sm:$0xff]  }
0x1454   : > { %7932 = vmatpush1.bf16.msra.mxu1 %v14192_v32  ;;  %7847 = vmatprep.subr.bf16.mxu0 %v14197_v40  ;;  %v14266_v32 = vld [vmem:[%s16076_s25 + $0x5bc] ss:$48 sps:$4 sm:$0xff]   ;;  %v14261_v40 = vld [vmem:[%s16076_s25 + $0x5b0] ss:$48 sps:$4 sm:$0xff]  }
0x1455   : > { %7933 = vmatprep.subr.bf16.mxu1 %v14200_v58  ;;  %v14264_v58 = vld [vmem:[%s16076_s25 + $0x5b8] ss:$48 sps:$4 sm:$0xff]  }
0x1457   : > { %7848 = vmatpush1.bf16.msra.mxu0 %v14195_v48  ;;  %v14269_v48 = vld [vmem:[%s16076_s25 + $0x614] ss:$48 sps:$4 sm:$0xff]  }
0x1458   : > { %7934 = vmatpush1.bf16.msra.mxu1 %v14198_v49  ;;  %7849 = vmatprep.subr.bf16.mxu0 %v14203_v60  ;;  %v14272_v49 = vld [vmem:[%s16076_s25 + $0x61c] ss:$48 sps:$4 sm:$0xff]   ;;  %v14267_v60 = vld [vmem:[%s16076_s25 + $0x610] ss:$48 sps:$4 sm:$0xff]  }
0x1459   : > { %7935 = vmatprep.subr.bf16.mxu1 %v14206_v8  ;;  %v14270_v8 = vld [vmem:[%s16076_s25 + $0x618] ss:$48 sps:$4 sm:$0xff]  }
0x145b   : > { %7850 = vmatpush1.bf16.msra.mxu0 %v14201_v26  ;;  %v14275_v26 = vld [vmem:[%s16076_s25 + $0x674] ss:$48 sps:$4 sm:$0xff]  }
0x145c   : > { %7936 = vmatpush1.bf16.msra.mxu1 %v14204_v61  ;;  %7851 = vmatprep.subr.bf16.mxu0 %v14209_v2  ;;  %v14278_v61 = vld [vmem:[%s16076_s25 + $0x67c] ss:$48 sps:$4 sm:$0xff]   ;;  %v14273_v2 = vld [vmem:[%s16076_s25 + $0x670] ss:$48 sps:$4 sm:$0xff]  }
0x145d   : > { %7937 = vmatprep.subr.bf16.mxu1 %v14212_v10  ;;  %v14276_v10 = vld [vmem:[%s16076_s25 + $0x678] ss:$48 sps:$4 sm:$0xff]  }
0x145f   : > { %7852 = vmatpush1.bf16.msra.mxu0 %v14207_v53  ;;  %v14281_v53 = vld [vmem:[%s16076_s25 + $0x6d4] ss:$48 sps:$4 sm:$0xff]  }
0x1460   : > { %7938 = vmatpush1.bf16.msra.mxu1 %v14210_v62  ;;  %7853 = vmatprep.subr.bf16.mxu0 %v14215_v14  ;;  %v14284_v62 = vld [vmem:[%s16076_s25 + $0x6dc] ss:$48 sps:$4 sm:$0xff]   ;;  %v14279_v14 = vld [vmem:[%s16076_s25 + $0x6d0] ss:$48 sps:$4 sm:$0xff]  }
0x1461   : > { %7939 = vmatprep.subr.bf16.mxu1 %v14218_v25  ;;  %v14282_v25 = vld [vmem:[%s16076_s25 + $0x6d8] ss:$48 sps:$4 sm:$0xff]  }
0x1463   : > { %7854 = vmatpush1.bf16.msra.mxu0 %v14213_v38  ;;  %v14287_v38 = vld [vmem:[%s16076_s25 + $0x734] ss:$48 sps:$4 sm:$0xff]  }
0x1464   : > { %7940 = vmatpush1.bf16.msra.mxu1 %v14216_v43  ;;  %7855 = vmatprep.subr.bf16.mxu0 %v14221_v57  ;;  %v14290_v43 = vld [vmem:[%s16076_s25 + $0x73c] ss:$48 sps:$4 sm:$0xff]   ;;  %v14285_v57 = vld [vmem:[%s16076_s25 + $0x730] ss:$48 sps:$4 sm:$0xff]  }
0x1465   : > { %7941 = vmatprep.subr.bf16.mxu1 %v14224_v6  ;;  %v14288_v6 = vld [vmem:[%s16076_s25 + $0x738] ss:$48 sps:$4 sm:$0xff]  }
0x1467   : > { %7856 = vmatpush1.bf16.msra.mxu0 %v14219_v36  ;;  %v14293_v36 = vld [vmem:[%s16076_s25 + $0x794] ss:$48 sps:$4 sm:$0xff]  }
0x1468   : > { %7942 = vmatpush1.bf16.msra.mxu1 %v14222_v31  ;;  %7857 = vmatprep.subr.bf16.mxu0 %v14227_v55  ;;  %v14296_v31 = vld [vmem:[%s16076_s25 + $0x79c] ss:$48 sps:$4 sm:$0xff]   ;;  %v14291_v55 = vld [vmem:[%s16076_s25 + $0x790] ss:$48 sps:$4 sm:$0xff]  }
0x1469   : > { %7943 = vmatprep.subr.bf16.mxu1 %v14230_v47  ;;  %v14294_v47 = vld [vmem:[%s16076_s25 + $0x798] ss:$48 sps:$4 sm:$0xff]  }
0x146b   : > { %7858 = vmatpush1.bf16.msra.mxu0 %v14225_v15  ;;  %v14299_v15 = vld [vmem:[%s16076_s25 + $0x7f4] ss:$48 sps:$4 sm:$0xff]  }
0x146c   : > { %7944 = vmatpush1.bf16.msra.mxu1 %v14228_v9  ;;  %7859 = vmatprep.subr.bf16.mxu0 %v14233_v63  ;;  %v14302_v9 = vld [vmem:[%s16076_s25 + $0x7fc] ss:$48 sps:$4 sm:$0xff]   ;;  %v14297_v63 = vld [vmem:[%s16076_s25 + $0x7f0] ss:$48 sps:$4 sm:$0xff]  }
0x146d   : > { %7945 = vmatprep.subr.bf16.mxu1 %v14236_v51  ;;  %v14300_v51 = vld [vmem:[%s16076_s25 + $0x7f8] ss:$48 sps:$4 sm:$0xff]  }
0x146f   : > { %7860 = vmatpush1.bf16.msra.mxu0 %v14231_v34  ;;  %v14305_v34 = vld [vmem:[%s16076_s25 + $0x854] ss:$48 sps:$4 sm:$0xff]  }
0x1470   : > { %7946 = vmatpush1.bf16.msra.mxu1 %v14234_v54  ;;  %7861 = vmatprep.subr.bf16.mxu0 %v14239_v52  ;;  %v14308_v54 = vld [vmem:[%s16076_s25 + $0x85c] ss:$48 sps:$4 sm:$0xff]   ;;  %v14303_v52 = vld [vmem:[%s16076_s25 + $0x850] ss:$48 sps:$4 sm:$0xff]  }
0x1471   : > { %7947 = vmatprep.subr.bf16.mxu1 %v14242_v16  ;;  %v14306_v16 = vld [vmem:[%s16076_s25 + $0x858] ss:$48 sps:$4 sm:$0xff]  }
0x1473   : > { %7862 = vmatpush1.bf16.msra.mxu0 %v14237_v41  ;;  %v14311_v41 = vld [vmem:[%s16076_s25 + $0x8b4] ss:$48 sps:$4 sm:$0xff]  }
0x1474   : > { %7948 = vmatpush1.bf16.msra.mxu1 %v14240_v17  ;;  %7863 = vmatprep.subr.bf16.mxu0 %v14245_v19  ;;  %v14314_v17 = vld [vmem:[%s16076_s25 + $0x8bc] ss:$48 sps:$4 sm:$0xff]   ;;  %v14309_v19 = vld [vmem:[%s16076_s25 + $0x8b0] ss:$48 sps:$4 sm:$0xff]  }
0x1475   : > { %7949 = vmatprep.subr.bf16.mxu1 %v14248_v28  ;;  %v14312_v28 = vld [vmem:[%s16076_s25 + $0x8b8] ss:$48 sps:$4 sm:$0xff]  }
0x1477   : > { %7864 = vmatpush1.bf16.msra.mxu0 %v14243_v29  ;;  %v14317_v29 = vld [vmem:[%s16076_s25 + $0x24] ss:$48 sps:$4 sm:$0xff]  }
0x1478   : > { %7950 = vmatpush1.bf16.msra.mxu1 %v14246_v4  ;;  %7865 = vmatprep.subr.bf16.mxu0 %v14251_v12  ;;  %v14320_v4 = vld [vmem:[%s16076_s25 + $0x2c] ss:$48 sps:$4 sm:$0xff]   ;;  %v14315_v12 = vld [vmem:[%s16076_s25 + $0x20] ss:$48 sps:$4 sm:$0xff]  }
0x1479   : > { %7951 = vmatprep.subr.bf16.mxu1 %v14254_v18  ;;  %v14318_v18 = vld [vmem:[%s16076_s25 + $0x28] ss:$48 sps:$4 sm:$0xff]  }
0x147b   : > { %7866 = vmatpush1.bf16.msra.mxu0 %v14249_v5  ;;  %v14323_v5 = vld [vmem:[%s16076_s25 + $0x84] ss:$48 sps:$4 sm:$0xff]  }
0x147c   : > { %7952 = vmatpush1.bf16.msra.mxu1 %v14252_v13  ;;  %7867 = vmatprep.subr.bf16.mxu0 %v14257_v33  ;;  %v14326_v13 = vld [vmem:[%s16076_s25 + $0x8c] ss:$48 sps:$4 sm:$0xff]   ;;  %v14321_v33 = vld [vmem:[%s16076_s25 + $0x80] ss:$48 sps:$4 sm:$0xff]  }
0x147d   : > { %7953 = vmatprep.subr.bf16.mxu1 %v14260_v44  ;;  %v14324_v44 = vld [vmem:[%s16076_s25 + $0x88] ss:$48 sps:$4 sm:$0xff]  }
0x147f   : > { %7868 = vmatpush1.bf16.msra.mxu0 %v14255_v56  ;;  %v14329_v56 = vld [vmem:[%s16076_s25 + $0xe4] ss:$48 sps:$4 sm:$0xff]  }
0x1480   : > { %7954 = vmatpush1.bf16.msra.mxu1 %v14258_v45  ;;  %7869 = vmatprep.subr.bf16.mxu0 %v14263_v27  ;;  %v14332_v45 = vld [vmem:[%s16076_s25 + $0xec] ss:$48 sps:$4 sm:$0xff]   ;;  %v14327_v27 = vld [vmem:[%s16076_s25 + $0xe0] ss:$48 sps:$4 sm:$0xff]  }
0x1481   : > { %7955 = vmatprep.subr.bf16.mxu1 %v14266_v32  ;;  %v14330_v32 = vld [vmem:[%s16076_s25 + $0xe8] ss:$48 sps:$4 sm:$0xff]  }
0x1483   : > { %7870 = vmatpush1.bf16.msra.mxu0 %v14261_v40  ;;  %v14335_v40 = vld [vmem:[%s16076_s25 + $0x144] ss:$48 sps:$4 sm:$0xff]  }
0x1484   : > { %7956 = vmatpush1.bf16.msra.mxu1 %v14264_v58  ;;  %7882 = vmatprep.subr.bf16.mxu0 %v14269_v48  ;;  %v14338_v58 = vld [vmem:[%s16076_s25 + $0x14c] ss:$48 sps:$4 sm:$0xff]   ;;  %v14336_v48 = vld [vmem:[%s16076_s25 + $0x148] ss:$48 sps:$4 sm:$0xff]  }
0x1485   : > { %7968 = vmatprep.subr.bf16.mxu1 %v14272_v49  ;;  %v14341_v49 = vld [vmem:[%s16076_s25 + $0x1a4] ss:$48 sps:$4 sm:$0xff]  }
0x1486   : > { %7872 = vmatmul.mubr.bf16.vlgmr.msra.gmra.mrb[32].mxu0 %v16942_v59 }
0x1487   : > { %7958 = vmatmul.mubr.bf16.vlgmr.msra.gmra.mrb[44].mxu1 %v16942_v59  ;;  %7883 = vmatpush1.bf16.msra.mxu0 %v14267_v60  ;;  %v14344_v60 = vld [vmem:[%s16076_s25 + $0x1ac] ss:$48 sps:$4 sm:$0xff]  }
0x1488   : > { %7969 = vmatpush1.bf16.msra.mxu1 %v14270_v8  ;;  %7884 = vmatprep.subr.bf16.mxu0 %v14275_v26  ;;  %v14339_v8 = vld [vmem:[%s16076_s25 + $0x1a0] ss:$48 sps:$4 sm:$0xff]   ;;  %v14342_v26 = vld [vmem:[%s16076_s25 + $0x1a8] ss:$48 sps:$4 sm:$0xff]  }
0x1489   : > { %7970 = vmatprep.subr.bf16.mxu1 %v14278_v61  ;;  %7914 = vmatprep.mubr.bf16.mxu0 %v15482_v23  ;;  %v14347_v61 = vld [vmem:[%s16076_s25 + $0x204] ss:$48 sps:$4 sm:$0xff]  }
0x148a   : > { %8000 = vmatprep.mubr.bf16.mxu1 %v15482_v23 }
0x148b   : > { %7885 = vmatpush1.bf16.msra.mxu0 %v14273_v2  ;;  %v14350_v2 = vld [vmem:[%s16076_s25 + $0x20c] ss:$48 sps:$4 sm:$0xff]  }
0x148c   : > { %7971 = vmatpush1.bf16.msra.mxu1 %v14276_v10  ;;  %7886 = vmatprep.subr.bf16.mxu0 %v14281_v53  ;;  %v14345_v10 = vld [vmem:[%s16076_s25 + $0x200] ss:$48 sps:$4 sm:$0xff]   ;;  %v14348_v53 = vld [vmem:[%s16076_s25 + $0x208] ss:$48 sps:$4 sm:$0xff]  }
0x148d   : > { %7972 = vmatprep.subr.bf16.mxu1 %v14284_v62  ;;  %v14353_v62 = vld [vmem:[%s16076_s25 + $0x264] ss:$48 sps:$4 sm:$0xff]  }
0x148f   : > { %7887 = vmatpush1.bf16.msra.mxu0 %v14279_v14  ;;  %v14356_v14 = vld [vmem:[%s16076_s25 + $0x26c] ss:$48 sps:$4 sm:$0xff]  }
0x1490   : > { %7973 = vmatpush1.bf16.msra.mxu1 %v14282_v25  ;;  %7888 = vmatprep.subr.bf16.mxu0 %v14287_v38  ;;  %v14351_v25 = vld [vmem:[%s16076_s25 + $0x260] ss:$48 sps:$4 sm:$0xff]   ;;  %v14354_v38 = vld [vmem:[%s16076_s25 + $0x268] ss:$48 sps:$4 sm:$0xff]  }
0x1491   : > { %7974 = vmatprep.subr.bf16.mxu1 %v14290_v43  ;;  %v14359_v43 = vld [vmem:[%s16076_s25 + $0x2c4] ss:$48 sps:$4 sm:$0xff]  }
0x1493   : > { %7889 = vmatpush1.bf16.msra.mxu0 %v14285_v57  ;;  %v14362_v57 = vld [vmem:[%s16076_s25 + $0x2cc] ss:$48 sps:$4 sm:$0xff]  }
0x1494   : > { %7975 = vmatpush1.bf16.msra.mxu1 %v14288_v6  ;;  %7890 = vmatprep.subr.bf16.mxu0 %v14293_v36  ;;  %v14357_v6 = vld [vmem:[%s16076_s25 + $0x2c0] ss:$48 sps:$4 sm:$0xff]   ;;  %v14360_v36 = vld [vmem:[%s16076_s25 + $0x2c8] ss:$48 sps:$4 sm:$0xff]  }
0x1495   : > { %7976 = vmatprep.subr.bf16.mxu1 %v14296_v31  ;;  %v14365_v31 = vld [vmem:[%s16076_s25 + $0x324] ss:$48 sps:$4 sm:$0xff]  }
0x1497   : > { %7891 = vmatpush1.bf16.msra.mxu0 %v14291_v55  ;;  %v14368_v55 = vld [vmem:[%s16076_s25 + $0x32c] ss:$48 sps:$4 sm:$0xff]  }
0x1498   : > { %7977 = vmatpush1.bf16.msra.mxu1 %v14294_v47  ;;  %7892 = vmatprep.subr.bf16.mxu0 %v14299_v15  ;;  %v14363_v47 = vld [vmem:[%s16076_s25 + $0x320] ss:$48 sps:$4 sm:$0xff]   ;;  %v14366_v15 = vld [vmem:[%s16076_s25 + $0x328] ss:$48 sps:$4 sm:$0xff]  }
0x1499   : > { %7978 = vmatprep.subr.bf16.mxu1 %v14302_v9  ;;  %v14371_v9 = vld [vmem:[%s16076_s25 + $0x384] ss:$48 sps:$4 sm:$0xff]  }
0x149b   : > { %7893 = vmatpush1.bf16.msra.mxu0 %v14297_v63  ;;  %v14374_v63 = vld [vmem:[%s16076_s25 + $0x38c] ss:$48 sps:$4 sm:$0xff]  }
0x149c   : > { %7979 = vmatpush1.bf16.msra.mxu1 %v14300_v51  ;;  %7894 = vmatprep.subr.bf16.mxu0 %v14305_v34  ;;  %v14369_v51 = vld [vmem:[%s16076_s25 + $0x380] ss:$48 sps:$4 sm:$0xff]   ;;  %v14372_v34 = vld [vmem:[%s16076_s25 + $0x388] ss:$48 sps:$4 sm:$0xff]  }
0x149d   : > { %7980 = vmatprep.subr.bf16.mxu1 %v14308_v54  ;;  %v14377_v54 = vld [vmem:[%s16076_s25 + $0x3e4] ss:$48 sps:$4 sm:$0xff]  }
0x149f   : > { %7895 = vmatpush1.bf16.msra.mxu0 %v14303_v52  ;;  %v14380_v52 = vld [vmem:[%s16076_s25 + $0x3ec] ss:$48 sps:$4 sm:$0xff]  }
0x14a0   : > { %7981 = vmatpush1.bf16.msra.mxu1 %v14306_v16  ;;  %7896 = vmatprep.subr.bf16.mxu0 %v14311_v41  ;;  %v14375_v16 = vld [vmem:[%s16076_s25 + $0x3e0] ss:$48 sps:$4 sm:$0xff]   ;;  %v14378_v41 = vld [vmem:[%s16076_s25 + $0x3e8] ss:$48 sps:$4 sm:$0xff]  }
0x14a1   : > { %7982 = vmatprep.subr.bf16.mxu1 %v14314_v17  ;;  %v14383_v17 = vld [vmem:[%s16076_s25 + $0x444] ss:$48 sps:$4 sm:$0xff]  }
0x14a3   : > { %7897 = vmatpush1.bf16.msra.mxu0 %v14309_v19  ;;  %v14386_v19 = vld [vmem:[%s16076_s25 + $0x44c] ss:$48 sps:$4 sm:$0xff]  }
0x14a4   : > { %7983 = vmatpush1.bf16.msra.mxu1 %v14312_v28  ;;  %8011 = vmatprep.subr.bf16.mxu0 %v14317_v29  ;;  %v14381_v28 = vld [vmem:[%s16076_s25 + $0x440] ss:$48 sps:$4 sm:$0xff]   ;;  %v14384_v29 = vld [vmem:[%s16076_s25 + $0x448] ss:$48 sps:$4 sm:$0xff]  }
0x14a5   : > { %8097 = vmatprep.subr.bf16.mxu1 %v14320_v4  ;;  %v14389_v4 = vld [vmem:[%s16076_s25 + $0x4a4] ss:$48 sps:$4 sm:$0xff]  }
0x14a6   : > { %7915 = vmatmul.mubr.bf16.vlgmr.msra.gmra.mrb[32].mxu0 %v16989_v35 }
0x14a7   : > { %8001 = vmatmul.mubr.bf16.vlgmr.msra.gmra.mrb[44].mxu1 %v16989_v35  ;;  %8012 = vmatpush1.bf16.msra.mxu0 %v14315_v12  ;;  %v14392_v12 = vld [vmem:[%s16076_s25 + $0x4ac] ss:$48 sps:$4 sm:$0xff]  }
0x14a8   : > { %8043 = vmatprep.mubr.bf16.mxu0 %v16938_v30  ;;  %8098 = vmatpush1.bf16.msra.mxu1 %v14318_v18  ;;  %v14387_v18 = vld [vmem:[%s16076_s25 + $0x4a0] ss:$48 sps:$4 sm:$0xff]  }
0x14a9   : > { %8129 = vmatprep.mubr.bf16.mxu1 %v16938_v30  ;;  %8013 = vmatprep.subr.bf16.mxu0 %v14323_v5  ;;  %v14333_v30 = vld [vmem:[%s16076_s25 + $0x140] ss:$48 sps:$4 sm:$0xff]   ;;  %v14390_v5 = vld [vmem:[%s16076_s25 + $0x4a8] ss:$48 sps:$4 sm:$0xff]  }
0x14aa   : > { %8099 = vmatprep.subr.bf16.mxu1 %v14326_v13  ;;  %v14395_v13 = vld [vmem:[%s16076_s25 + $0x504] ss:$48 sps:$4 sm:$0xff]  }
0x14ab   : > { %8014 = vmatpush1.bf16.msra.mxu0 %v14321_v33  ;;  %v14398_v33 = vld [vmem:[%s16076_s25 + $0x50c] ss:$48 sps:$4 sm:$0xff]  }
0x14ac   : > { %8100 = vmatpush1.bf16.msra.mxu1 %v14324_v44  ;;  %8015 = vmatprep.subr.bf16.mxu0 %v14329_v56  ;;  %v14393_v44 = vld [vmem:[%s16076_s25 + $0x500] ss:$48 sps:$4 sm:$0xff]   ;;  %v14396_v56 = vld [vmem:[%s16076_s25 + $0x508] ss:$48 sps:$4 sm:$0xff]  }
0x14ad   : > { %8101 = vmatprep.subr.bf16.mxu1 %v14332_v45  ;;  %v14401_v45 = vld [vmem:[%s16076_s25 + $0x564] ss:$48 sps:$4 sm:$0xff]  }
0x14af   : > { %8016 = vmatpush1.bf16.msra.mxu0 %v14327_v27  ;;  %v14404_v27 = vld [vmem:[%s16076_s25 + $0x56c] ss:$48 sps:$4 sm:$0xff]  }
0x14b0   : > { %8102 = vmatpush1.bf16.msra.mxu1 %v14330_v32  ;;  %8017 = vmatprep.subr.bf16.mxu0 %v14335_v40  ;;  %v14399_v32 = vld [vmem:[%s16076_s25 + $0x560] ss:$48 sps:$4 sm:$0xff]   ;;  %v14402_v40 = vld [vmem:[%s16076_s25 + $0x568] ss:$48 sps:$4 sm:$0xff]  }
0x14b1   : > { %8103 = vmatprep.subr.bf16.mxu1 %v14338_v58  ;;  %v14407_v58 = vld [vmem:[%s16076_s25 + $0x5c4] ss:$48 sps:$4 sm:$0xff]  }
0x14b3   : > { %8018 = vmatpush1.bf16.msra.mxu0 %v14333_v30  ;;  %v14410_v30 = vld [vmem:[%s16076_s25 + $0x5cc] ss:$48 sps:$4 sm:$0xff]  }
0x14b4   : > { %8104 = vmatpush1.bf16.msra.mxu1 %v14336_v48  ;;  %8019 = vmatprep.subr.bf16.mxu0 %v14341_v49  ;;  %v14405_v48 = vld [vmem:[%s16076_s25 + $0x5c0] ss:$48 sps:$4 sm:$0xff]   ;;  %v14408_v49 = vld [vmem:[%s16076_s25 + $0x5c8] ss:$48 sps:$4 sm:$0xff]  }
0x14b5   : > { %8105 = vmatprep.subr.bf16.mxu1 %v14344_v60  ;;  %v14413_v60 = vld [vmem:[%s16076_s25 + $0x624] ss:$48 sps:$4 sm:$0xff]  }
0x14b7   : > { %8020 = vmatpush1.bf16.msra.mxu0 %v14339_v8  ;;  %v14416_v8 = vld [vmem:[%s16076_s25 + $0x62c] ss:$48 sps:$4 sm:$0xff]  }
0x14b8   : > { %8106 = vmatpush1.bf16.msra.mxu1 %v14342_v26  ;;  %8021 = vmatprep.subr.bf16.mxu0 %v14347_v61  ;;  %v14411_v26 = vld [vmem:[%s16076_s25 + $0x620] ss:$48 sps:$4 sm:$0xff]   ;;  %v14414_v61 = vld [vmem:[%s16076_s25 + $0x628] ss:$48 sps:$4 sm:$0xff]  }
0x14b9   : > { %8107 = vmatprep.subr.bf16.mxu1 %v14350_v2  ;;  %v14419_v2 = vld [vmem:[%s16076_s25 + $0x684] ss:$48 sps:$4 sm:$0xff]  }
0x14bb   : > { %8022 = vmatpush1.bf16.msra.mxu0 %v14345_v10  ;;  %v14422_v10 = vld [vmem:[%s16076_s25 + $0x68c] ss:$48 sps:$4 sm:$0xff]  }
0x14bc   : > { %8108 = vmatpush1.bf16.msra.mxu1 %v14348_v53  ;;  %8023 = vmatprep.subr.bf16.mxu0 %v14353_v62  ;;  %v14417_v53 = vld [vmem:[%s16076_s25 + $0x680] ss:$48 sps:$4 sm:$0xff]   ;;  %v14420_v62 = vld [vmem:[%s16076_s25 + $0x688] ss:$48 sps:$4 sm:$0xff]  }
0x14bd   : > { %8109 = vmatprep.subr.bf16.mxu1 %v14356_v14  ;;  %v14425_v14 = vld [vmem:[%s16076_s25 + $0x6e4] ss:$48 sps:$4 sm:$0xff]  }
0x14bf   : > { %8024 = vmatpush1.bf16.msra.mxu0 %v14351_v25  ;;  %v14428_v25 = vld [vmem:[%s16076_s25 + $0x6ec] ss:$48 sps:$4 sm:$0xff]  }
0x14c0   : > { %8110 = vmatpush1.bf16.msra.mxu1 %v14354_v38  ;;  %8025 = vmatprep.subr.bf16.mxu0 %v14359_v43  ;;  %v14426_v38 = vld [vmem:[%s16076_s25 + $0x6e8] ss:$48 sps:$4 sm:$0xff]   ;;  %v14431_v43 = vld [vmem:[%s16076_s25 + $0x744] ss:$48 sps:$4 sm:$0xff]  }
0x14c1   : > { %8111 = vmatprep.subr.bf16.mxu1 %v14362_v57  ;;  %v14434_v57 = vld [vmem:[%s16076_s25 + $0x74c] ss:$48 sps:$4 sm:$0xff]  }
0x14c3   : > { %8026 = vmatpush1.bf16.msra.mxu0 %v14357_v6  ;;  %v14429_v6 = vld [vmem:[%s16076_s25 + $0x740] ss:$48 sps:$4 sm:$0xff]  }
0x14c4   : > { %8112 = vmatpush1.bf16.msra.mxu1 %v14360_v36  ;;  %8027 = vmatprep.subr.bf16.mxu0 %v14365_v31  ;;  %v14432_v36 = vld [vmem:[%s16076_s25 + $0x748] ss:$48 sps:$4 sm:$0xff]   ;;  %v14440_v31 = vld [vmem:[%s16076_s25 + $0x7ac] ss:$48 sps:$4 sm:$0xff]  }
0x14c5   : > { %8113 = vmatprep.subr.bf16.mxu1 %v14368_v55  ;;  %v14435_v55 = vld [vmem:[%s16076_s25 + $0x7a0] ss:$48 sps:$4 sm:$0xff]  }
0x14c7   : > { %8028 = vmatpush1.bf16.msra.mxu0 %v14363_v47  ;;  %v14438_v47 = vld [vmem:[%s16076_s25 + $0x7a8] ss:$48 sps:$4 sm:$0xff]  }
0x14c8   : > { %8114 = vmatpush1.bf16.msra.mxu1 %v14366_v15  ;;  %8029 = vmatprep.subr.bf16.mxu0 %v14371_v9  ;;  %v14443_v15 = vld [vmem:[%s16076_s25 + $0x804] ss:$48 sps:$4 sm:$0xff]   ;;  %v14446_v9 = vld [vmem:[%s16076_s25 + $0x80c] ss:$48 sps:$4 sm:$0xff]  }
0x14c9   : > { %8115 = vmatprep.subr.bf16.mxu1 %v14374_v63  ;;  %v14441_v63 = vld [vmem:[%s16076_s25 + $0x800] ss:$48 sps:$4 sm:$0xff]  }
0x14cb   : > { %8030 = vmatpush1.bf16.msra.mxu0 %v14369_v51  ;;  %v14444_v51 = vld [vmem:[%s16076_s25 + $0x808] ss:$48 sps:$4 sm:$0xff]  }
0x14cc   : > { %8116 = vmatpush1.bf16.msra.mxu1 %v14372_v34  ;;  %8031 = vmatprep.subr.bf16.mxu0 %v14377_v54  ;;  %v14449_v34 = vld [vmem:[%s16076_s25 + $0x864] ss:$48 sps:$4 sm:$0xff]   ;;  %v14452_v54 = vld [vmem:[%s16076_s25 + $0x86c] ss:$48 sps:$4 sm:$0xff]  }
0x14cd   : > { %8117 = vmatprep.subr.bf16.mxu1 %v14380_v52  ;;  %v14447_v52 = vld [vmem:[%s16076_s25 + $0x860] ss:$48 sps:$4 sm:$0xff]  }
0x14cf   : > { %8032 = vmatpush1.bf16.msra.mxu0 %v14375_v16  ;;  %v14450_v16 = vld [vmem:[%s16076_s25 + $0x868] ss:$48 sps:$4 sm:$0xff]  }
0x14d0   : > { %8118 = vmatpush1.bf16.msra.mxu1 %v14378_v41  ;;  %8033 = vmatprep.subr.bf16.mxu0 %v14383_v17  ;;  %v14455_v41 = vld [vmem:[%s16076_s25 + $0x8c4] ss:$48 sps:$4 sm:$0xff]   ;;  %v14458_v17 = vld [vmem:[%s16076_s25 + $0x8cc] ss:$48 sps:$4 sm:$0xff]  }
0x14d1   : > { %8119 = vmatprep.subr.bf16.mxu1 %v14386_v19  ;;  %v14453_v19 = vld [vmem:[%s16076_s25 + $0x8c0] ss:$48 sps:$4 sm:$0xff]  }
0x14d3   : > { %8034 = vmatpush1.bf16.msra.mxu0 %v14381_v28  ;;  %v14456_v28 = vld [vmem:[%s16076_s25 + $0x8c8] ss:$48 sps:$4 sm:$0xff]  }
0x14d4   : > { %8120 = vmatpush1.bf16.msra.mxu1 %v14384_v29  ;;  %8035 = vmatprep.subr.bf16.mxu0 %v14389_v4  ;;  %v14461_v29 = vld [vmem:[%s16078_s19 + $0x4] ss:$12 sps:$4 sm:$0xff]   ;;  %v14477_v4 = vld [vmem:[%s16078_s19 + $0xc8] ss:$12 sps:$4 sm:$0xff]  }
0x14d5   : > { %8121 = vmatprep.subr.bf16.mxu1 %v14392_v12  ;;  %v14459_v12 = vld [vmem:[%s16078_s19] ss:$12 sps:$4 sm:$0xff]  }
0x14d7   : > { %8036 = vmatpush1.bf16.msra.mxu0 %v14387_v18  ;;  %v14464_v18 = vld [vmem:[%s16078_s19 + $0x1c] ss:$12 sps:$4 sm:$0xff]  }
0x14d8   : > { %8122 = vmatpush1.bf16.msra.mxu1 %v14390_v5  ;;  %8037 = vmatprep.subr.bf16.mxu0 %v14395_v13  ;;  %v14478_v5 = vld [vmem:[%s16078_s19 + $0x8] ss:$12 sps:$4 sm:$0xff]   ;;  %v14482_v13 = vld [vmem:[%s16078_s19 + $0xe0] ss:$12 sps:$4 sm:$0xff]  }
0x14d9   : > { %8123 = vmatprep.subr.bf16.mxu1 %v14398_v33  ;;  %v14462_v33 = vld [vmem:[%s16078_s19 + $0x18] ss:$12 sps:$4 sm:$0xff]  }
0x14db   : > { %8038 = vmatpush1.bf16.msra.mxu0 %v14393_v44  ;;  %v14467_v44 = vld [vmem:[%s16078_s19 + $0x34] ss:$12 sps:$4 sm:$0xff]  }
0x14dc   : > { %8124 = vmatpush1.bf16.msra.mxu1 %v14396_v56  ;;  %8039 = vmatprep.subr.bf16.mxu0 %v14401_v45  ;;  %v14483_v56 = vld [vmem:[%s16078_s19 + $0x20] ss:$12 sps:$4 sm:$0xff]   ;;  %v14487_v45 = vld [vmem:[%s16078_s19 + $0xf8] ss:$12 sps:$4 sm:$0xff]  }
0x14dd   : > { %8125 = vmatprep.subr.bf16.mxu1 %v14404_v27  ;;  %v14465_v27 = vld [vmem:[%s16078_s19 + $0x30] ss:$12 sps:$4 sm:$0xff]  }
0x14df   : > { %8040 = vmatpush1.bf16.msra.mxu0 %v14399_v32  ;;  %v14470_v32 = vld [vmem:[%s16078_s19 + $0x4c] ss:$12 sps:$4 sm:$0xff]  }
0x14e0   : > { %8126 = vmatpush1.bf16.msra.mxu1 %v14402_v40  ;;  %8041 = vmatprep.subr.bf16.mxu0 %v14407_v58  ;;  %v14492_v40 = vld [vmem:[%s16078_s19 + $0x110] ss:$12 sps:$4 sm:$0xff]   ;;  %v14468_v58 = vld [vmem:[%s16078_s19 + $0x48] ss:$12 sps:$4 sm:$0xff]  }
0x14e1   : > { %8127 = vmatprep.subr.bf16.mxu1 %v14410_v30  ;;  %v14473_v30 = vld [vmem:[%s16078_s19 + $0x64] ss:$12 sps:$4 sm:$0xff]  }
0x14e3   : > { %8042 = vmatpush1.bf16.msra.mxu0 %v14405_v48  ;;  %v14493_v48 = vld [vmem:[%s16078_s19 + $0x50] ss:$12 sps:$4 sm:$0xff]  }
0x14e4   : > { %8128 = vmatpush1.bf16.msra.mxu1 %v14408_v49  ;;  %8054 = vmatprep.subr.bf16.mxu0 %v14413_v60  ;;  %v14497_v49 = vld [vmem:[%s16078_s19 + $0x128] ss:$12 sps:$4 sm:$0xff]   ;;  %v14471_v60 = vld [vmem:[%s16078_s19 + $0x60] ss:$12 sps:$4 sm:$0xff]  }
0x14e5   : > { %8140 = vmatprep.subr.bf16.mxu1 %v14416_v8  ;;  %v17218_v8 = vld [vmem:[%s16062_s24] sm:$0xff] }
0x14e6   : > { %8044 = vmatmul.mubr.bf16.vlgmr.msra.gmra.mrb[36].mxu0 %v16942_v59 }
0x14e7   : > { %8130 = vmatmul.mubr.bf16.vlgmr.msra.gmra.mrb[48].mxu1 %v16942_v59  ;;  %8055 = vmatpush1.bf16.msra.mxu0 %v14411_v26  ;;  %v14423_v59 = vld [vmem:[%s16076_s25 + $0x6e0] ss:$48 sps:$4 sm:$0xff]   ;;  %v14476_v26 = vld [vmem:[%s16078_s19 + $0x7c] ss:$12 sps:$4 sm:$0xff]  }
0x14e8   : > { %8141 = vmatpush1.bf16.msra.mxu1 %v14414_v61  ;;  %8056 = vmatprep.subr.bf16.mxu0 %v14419_v2  ;;  %v14498_v61 = vld [vmem:[%s16078_s19 + $0x68] ss:$12 sps:$4 sm:$0xff]   ;;  %v14502_v2 = vld [vmem:[%s16078_s19 + $0x140] ss:$12 sps:$4 sm:$0xff]  }
0x14e9   : > { %8142 = vmatprep.subr.bf16.mxu1 %v14422_v10  ;;  %8086 = vmatprep.mubr.bf16.mxu0 %v15482_v23  ;;  %v6170_v10 = vrot.slane %v17218_v8, %v16209_v39 }
0x14ea   : > { %8172 = vmatprep.mubr.bf16.mxu1 %v15482_v23  ;;  %v14437_v23 = vld [vmem:[%s16076_s25 + $0x7a4] ss:$48 sps:$4 sm:$0xff]  }
0x14eb   : > { %8057 = vmatpush1.bf16.msra.mxu0 %v14417_v53  ;;  %v6178_v53 = vrot.slane %v17218_v8, %v16442_v21 }
0x14ec   : > { %8143 = vmatpush1.bf16.msra.mxu1 %v14420_v62  ;;  %8058 = vmatprep.subr.bf16.mxu0 %v14425_v14  ;;  %v6174_v62 = vrot.slane %v17218_v8, %v16213_v42  ;;  %v6182_v14 = vrot.slane %v17218_v8, %v16451_v24 }
0x14ed   : > { %8144 = vmatprep.subr.bf16.mxu1 %v14428_v25  ;;  %v14474_v25 = vld [vmem:[%s16078_s19 + $0x78] ss:$12 sps:$4 sm:$0xff]  }
0x14ef   : > { %8059 = vmatpush1.bf16.msra.mxu0 %v14423_v59  ;;  %v14481_v59 = vld [vmem:[%s16078_s19 + $0x94] ss:$12 sps:$4 sm:$0xff]  }
0x14f0   : > { %8145 = vmatpush1.bf16.msra.mxu1 %v14426_v38  ;;  %8060 = vmatprep.subr.bf16.mxu0 %v14431_v43  ;;  %v14503_v38 = vld [vmem:[%s16078_s19 + $0x80] ss:$12 sps:$4 sm:$0xff]  }
0x14f1   : > { %8146 = vmatprep.subr.bf16.mxu1 %v14434_v57 }
0x14f3   : > { %8061 = vmatpush1.bf16.msra.mxu0 %v14429_v6  ;;  %v14507_v6 = vld [vmem:[%s16078_s19 + $0x158] ss:$12 sps:$4 sm:$0xff]  }
0x14f4   : > { %8147 = vmatpush1.bf16.msra.mxu1 %v14432_v36  ;;  %8062 = vmatprep.subr.bf16.mxu0 %v14437_v23 }
0x14f5   : > { %8148 = vmatprep.subr.bf16.mxu1 %v14440_v31 }
0x14f7   : > { %8063 = vmatpush1.bf16.msra.mxu0 %v14435_v55 }
0x14f8   : > { %8149 = vmatpush1.bf16.msra.mxu1 %v14438_v47  ;;  %8064 = vmatprep.subr.bf16.mxu0 %v14443_v15 }
0x14f9   : > { %8150 = vmatprep.subr.bf16.mxu1 %v14446_v9 }
0x14fb   : > { %8065 = vmatpush1.bf16.msra.mxu0 %v14441_v63 }
0x14fc   : > { %8151 = vmatpush1.bf16.msra.mxu1 %v14444_v51  ;;  %8066 = vmatprep.subr.bf16.mxu0 %v14449_v34  ;;  %v14479_v51 = vld [vmem:[%s16078_s19 + $0x90] ss:$12 sps:$4 sm:$0xff]   ;;  %v14486_v34 = vld [vmem:[%s16078_s19 + $0xac] ss:$12 sps:$4 sm:$0xff]  }
0x14fd   : > { %8152 = vmatprep.subr.bf16.mxu1 %v14452_v54 }
0x14ff   : > { %8067 = vmatpush1.bf16.msra.mxu0 %v14447_v52 }
0x1500   : > { %8153 = vmatpush1.bf16.msra.mxu1 %v14450_v16  ;;  %8068 = vmatprep.subr.bf16.mxu0 %v14455_v41 }
0x1501   : > { %8154 = vmatprep.subr.bf16.mxu1 %v14458_v17 }
0x1503   : > { %8069 = vmatpush1.bf16.msra.mxu0 %v14453_v19 }
0x1504   : > { %8155 = vmatpush1.bf16.msra.mxu1 %v14456_v28  ;;  %10343 = vmatprep.subr.bf16.mxu0 %v14461_v29 }
0x1505   : > { %12730 = vmatprep.subr.bf16.mxu1 %v14477_v4 }
0x1506   : > { %8087 = vmatmul.mubr.bf16.vlgmr.msra.gmra.mrb[36].mxu0 %v16989_v35 }
0x1507   : > { %8173 = vmatmul.mubr.bf16.vlgmr.msra.gmra.mrb[48].mxu1 %v16989_v35  ;;  %10344 = vmatpush1.bf16.msra.mxu0 %v14459_v12  ;;  %v14488_v35 = vld [vmem:[%s16078_s19 + $0x38] ss:$12 sps:$4 sm:$0xff]  }
0x1508   : > { %10345 = vmatprep.subr.bf16.mxu0 %v14464_v18  ;;  %12731 = vmatpush3.bf16.msra.mxu1 %v14478_v5  ;;  %v14508_v18 = vld [vmem:[%s16078_s19 + $0x98] ss:$12 sps:$4 sm:$0xff]  }
0x1509   : > { %12732 = vmatprep.subr.bf16.mxu1 %v14482_v13 }
0x150b   : > { %10346 = vmatpush1.bf16.msra.mxu0 %v14462_v33 }
0x150c   : > { %10347 = vmatprep.subr.bf16.mxu0 %v14467_v44  ;;  %12733 = vmatpush3.bf16.msra.mxu1 %v14483_v56  ;;  %v14512_v56 = vld [vmem:[%s16078_s19 + $0x170] ss:$12 sps:$4 sm:$0xff]  }
0x150d   : > { %12734 = vmatprep.subr.bf16.mxu1 %v14487_v45 }
0x150f   : > { %10348 = vmatpush1.bf16.msra.mxu0 %v14465_v27 }
0x1510   : > { %10349 = vmatprep.subr.bf16.mxu0 %v14470_v32  ;;  %12735 = vmatpush3.bf16.msra.mxu1 %v14488_v35 }
0x1511   : > { %12736 = vmatprep.subr.bf16.mxu1 %v14492_v40  ;;  %v14484_v40 = vld [vmem:[%s16078_s19 + $0xa8] ss:$12 sps:$4 sm:$0xff]  }
0x1513   : > { %10350 = vmatpush1.bf16.msra.mxu0 %v14468_v58 }
0x1514   : > { %10351 = vmatprep.subr.bf16.mxu0 %v14473_v30  ;;  %12737 = vmatpush3.bf16.msra.mxu1 %v14493_v48 }
0x1515   : > { %12738 = vmatprep.subr.bf16.mxu1 %v14497_v49 }
0x1517   : > { %10352 = vmatpush1.bf16.msra.mxu0 %v14471_v60  ;;  %v14491_v60 = vld [vmem:[%s16078_s19 + $0xc4] ss:$12 sps:$4 sm:$0xff]  }
0x1518   : > { %10353 = vmatprep.subr.bf16.mxu0 %v14476_v26  ;;  %12739 = vmatpush3.bf16.msra.mxu1 %v14498_v61 }
0x1519   : > { %v7744_v43 = vpop.f32.mrb[28].mxu0  ;;  %v7830_v57 = vpop.f32.mrb[40].mxu1  ;;  %12740 = vmatprep.subr.bf16.mxu1 %v14502_v2 }
0x151a   : > { %v17235_v36 = vadd.f32 %v7744_v43, %v6170_v10  ;;  %v17237_v23 = vadd.f32 %v7830_v57, %v6178_v53  ;;  %v7746_v31 = vpop.f32.mrb[29].mxu0  ;;  %v7832_v55 = vpop.f32.mrb[41].mxu1 }
0x151b   : > { %v17239_v47 = vadd.f32 %v7746_v31, %v6174_v62  ;;  %v17241_v15 = vadd.f32 %v7832_v55, %v6182_v14  ;;  %v7748_v9 = vpop.f32.mrb[30].mxu0  ;;  %v7834_v63 = vpop.f32.mrb[42].mxu1  ;;  %10354 = vmatpush1.bf16.msra.mxu0 %v14474_v25 }
0x151c   : > { %v8207_v54 = vmul.f32 0.044715, %v17235_v36  ;;  %v8209_v52 = vmul.f32 0.044715, %v17237_v23  ;;  %v17247_v16 = vadd.f32 %v7748_v9, %v6170_v10  ;;  %v17249_v41 = vadd.f32 %v7834_v63, %v6178_v53  ;;  %v7750_v17 = vpop.f32.mrb[31].mxu0  ;;  %v7836_v19 = vpop.f32.mrb[43].mxu1  ;;  %10355 = vmatprep.subr.bf16.mxu0 %v14481_v59  ;;  %12741 = vmatpush3.bf16.msra.mxu1 %v14503_v38 }
0x151d   : > { %v8208_v28 = vmul.f32 0.044715, %v17239_v47  ;;  %v8210_v29 = vmul.f32 0.044715, %v17241_v15  ;;  %v17253_v4 = vadd.f32 %v7750_v17, %v6174_v62  ;;  %v17255_v12 = vadd.f32 %v7836_v19, %v6182_v14  ;;  %12742 = vmatprep.subr.bf16.mxu1 %v14507_v6  ;;  %v14513_v10 = vld [vmem:[%s16078_s19 + $0xb0] ss:$12 sps:$4 sm:$0xff]  }
0x151e   : > { %v8231_v5 = vmul.f32 %v17235_v36, %v8207_v54  ;;  %v8233_v13 = vmul.f32 %v17237_v23, %v8209_v52  ;;  %v8219_v33 = vmul.f32 0.044715, %v17247_v16  ;;  %v8221_v44 = vmul.f32 0.044715, %v17249_v41  ;;  %v14517_v59 = vld [vmem:[%s16078_s19 + $0x248] ss:$12 sps:$4 sm:$0xff]  }
0x151f   : > { %v8232_v45 = vmul.f32 %v17239_v47, %v8208_v28  ;;  %v8234_v27 = vmul.f32 %v17241_v15, %v8210_v29  ;;  %v8220_v32 = vmul.f32 0.044715, %v17253_v4  ;;  %v8222_v35 = vmul.f32 0.044715, %v17255_v12  ;;  %10356 = vmatpush1.bf16.msra.mxu0 %v14479_v51  ;;  %v14489_v6 = vld [vmem:[%s16078_s19 + $0xc0] ss:$12 sps:$4 sm:$0xff]  }
0x1520   : > { %v8255_v58 = vmul.f32 %v17235_v36, %v8231_v5  ;;  %v8257_v30 = vmul.f32 %v17237_v23, %v8233_v13  ;;  %v8243_v48 = vmul.f32 %v17247_v16, %v8219_v33  ;;  %v8245_v49 = vmul.f32 %v17249_v41, %v8221_v44  ;;  %10357 = vmatprep.subr.bf16.mxu0 %v14486_v34  ;;  %v14496_v51 = vld [vmem:[%s16078_s19 + $0xdc] ss:$12 sps:$4 sm:$0xff]   ;;  %v14494_v19 = vld [vmem:[%s16078_s19 + $0xd8] ss:$12 sps:$4 sm:$0xff]  }
0x1521   : > { %v8256_v26 = vmul.f32 %v17239_v47, %v8232_v45  ;;  %v8244_v61 = vmul.f32 %v17253_v4, %v8220_v32  ;;  %v8246_v2 = vmul.f32 %v17255_v12, %v8222_v35  ;;  %12743 = vmatpush3.bf16.msra.mxu1 %v14508_v18  ;;  %v8258_v38 = vmul.f32 %v17241_v15, %v8234_v27  ;;  %v14501_v18 = vld [vmem:[%s16078_s19 + $0xf4] ss:$12 sps:$4 sm:$0xff]   ;;  %v14506_v45 = vld [vmem:[%s16078_s19 + $0x10c] ss:$12 sps:$4 sm:$0xff]   ;;  %v14511_v35 = vld [vmem:[%s16078_s19 + $0x124] ss:$12 sps:$4 sm:$0xff]  }
0x1522   : > { %v8279_v53 = vadd.f32 %v17235_v36, %v8255_v58  ;;  %v8281_v62 = vadd.f32 %v17237_v23, %v8257_v30  ;;  %v8267_v14 = vmul.f32 %v17247_v16, %v8243_v48  ;;  %v8269_v25 = vmul.f32 %v17249_v41, %v8245_v49  ;;  %12744 = vmatprep.subr.bf16.mxu1 %v14512_v56  ;;  %v14499_v56 = vld [vmem:[%s16078_s19 + $0xf0] ss:$12 sps:$4 sm:$0xff]   ;;  %v14504_v27 = vld [vmem:[%s16078_s19 + $0x108] ss:$12 sps:$4 sm:$0xff]  }
0x1523   : > { %v8268_v43 = vmul.f32 %v17253_v4, %v8244_v61  ;;  %v8270_v57 = vmul.f32 %v17255_v12, %v8246_v2  ;;  %10358 = vmatpush1.bf16.msra.mxu0 %v14484_v40  ;;  %v8280_v34 = vadd.f32 %v17239_v47, %v8256_v26  ;;  %v8282_v5 = vadd.f32 %v17241_v15, %v8258_v38 }
0x1524   : > { %v8303_v31 = vmul.f32 0.7978846, %v8279_v53  ;;  %v8305_v55 = vmul.f32 0.7978846, %v8281_v62  ;;  %v8291_v9 = vadd.f32 %v17247_v16, %v8267_v14  ;;  %v8293_v63 = vadd.f32 %v17249_v41, %v8269_v25  ;;  %10359 = vmatprep.subr.bf16.mxu0 %v14491_v60  ;;  %v14509_v60 = vld [vmem:[%s16078_s19 + $0x120] ss:$12 sps:$4 sm:$0xff]  }
0x1525   : > { %12745 = vmatpush3.bf16.msra.mxu1 %v14513_v10  ;;  %v8292_v54 = vadd.f32 %v17253_v4, %v8268_v43  ;;  %v8304_v28 = vmul.f32 0.7978846, %v8280_v34  ;;  %v8294_v13 = vadd.f32 %v17255_v12, %v8270_v57  ;;  %v8306_v33 = vmul.f32 0.7978846, %v8282_v5  ;;  %v14516_v53 = vld [vmem:[%s16078_s19 + $0x13c] ss:$12 sps:$4 sm:$0xff]  }
0x1526   : > { %14899 = vtanh.f32 %v8303_v31  ;;  %v8315_v52 = vmul.f32 0.7978846, %v8291_v9  ;;  %v8317_v17 = vmul.f32 0.7978846, %v8293_v63  ;;  %12752 = vmatprep.subr.bf16.mxu1 %v14517_v59  ;;  %v8183_v26 = vmul.f32 0.5, %v17235_v36 }
0x1527   : > { %14901 = vtanh.f32 %v8305_v55  ;;  %10360 = vmatpush1.bf16.msra.mxu0 %v14489_v6  ;;  %v8316_v29 = vmul.f32 0.7978846, %v8292_v54  ;;  %v8318_v44 = vmul.f32 0.7978846, %v8294_v13  ;;  %v8195_v61 = vmul.f32 0.5, %v17247_v16 }
0x1528   : > { %14903 = vtanh.f32 %v8315_v52  ;;  %10361 = vmatprep.subr.bf16.mxu0 %v14496_v51  ;;  %v8185_v62 = vmul.f32 0.5, %v17237_v23  ;;  %v8197_v14 = vmul.f32 0.5, %v17249_v41  ;;  %v8184_v38 = vmul.f32 0.5, %v17239_v47  ;;  %v14514_v23 = vld [vmem:[%s16078_s19 + $0x138] ss:$12 sps:$4 sm:$0xff]  }
0x1529   : > { %14905 = vtanh.f32 %v8317_v17  ;;  %v8196_v36 = vmul.f32 0.5, %v17253_v4  ;;  %v8186_v51 = vmul.f32 0.5, %v17241_v15  ;;  %v8198_v47 = vmul.f32 0.5, %v17255_v12  ;;  %v14519_v15 = vld [vmem:[%s16078_s19 + $0x150] ss:$12 sps:$4 sm:$0xff]  }
0x152a   : > { %14907 = vtanh.f32 %v8304_v28  ;;  %v14522_v12 = vld [vmem:[%s16078_s19 + $0x260] ss:$12 sps:$4 sm:$0xff]  }
0x152b   : > { %10362 = vmatpush1.bf16.msra.mxu0 %v14494_v19  ;;  %14909 = vtanh.f32 %v8316_v29  ;;  %v14521_v19 = vld [vmem:[%s16078_s19 + $0x154] ss:$12 sps:$4 sm:$0xff]  }
0x152c   : > { %10363 = vmatprep.subr.bf16.mxu0 %v14501_v18  ;;  %14911 = vtanh.f32 %v8306_v33  ;;  %v14518_v29 = vld [vmem:[%s16078_s19 + $0x188] ss:$12 sps:$4 sm:$0xff]   ;;  %v14526_v33 = vld [vmem:[%s16078_s19 + $0x16c] ss:$12 sps:$4 sm:$0xff]  }
0x152d   : > { %14913 = vtanh.f32 %v8318_v44  ;;  %v14523_v44 = vld [vmem:[%s16078_s19 + $0x1a0] ss:$12 sps:$4 sm:$0xff]  }
0x152f   : > { %10364 = vmatpush1.bf16.msra.mxu0 %v14499_v56  ;;  %v14524_v56 = vld [vmem:[%s16078_s19 + $0x168] ss:$12 sps:$4 sm:$0xff]  }
0x1530   : > { %v14900_v32 = vpop.eup %14899  ;;  %10365 = vmatprep.subr.bf16.mxu0 %v14506_v45  ;;  %v14527_v45 = vld [vmem:[%s16078_s19 + $0x278] ss:$12 sps:$4 sm:$0xff]  }
0x1531   : > { %v14902_v40 = vpop.eup %14901  ;;  %v8351_v58 = vadd.f32 1.0, %v14900_v32  ;;  %v14528_v32 = vld [vmem:[%s16078_s19 + $0x1b8] ss:$12 sps:$4 sm:$0xff]  }
0x1532   : > { %v14904_v30 = vpop.eup %14903  ;;  %v8353_v48 = vadd.f32 1.0, %v14902_v40  ;;  %v14532_v40 = vld [vmem:[%s16078_s19 + $0x290] ss:$12 sps:$4 sm:$0xff]  }
0x1533   : > { %v14906_v49 = vpop.eup %14905  ;;  %10366 = vmatpush1.bf16.msra.mxu0 %v14504_v27  ;;  %v8363_v2 = vadd.f32 1.0, %v14904_v30  ;;  %v8375_v57 = vmul.f32 %v8351_v58, %v8183_v26  ;;  %v14531_v27 = vld [vmem:[%s16078_s19 + $0x184] ss:$12 sps:$4 sm:$0xff]   ;;  %v14536_v58 = vld [vmem:[%s16078_s19 + $0x19c] ss:$12 sps:$4 sm:$0xff]  }
0x1534   : > { %v14908_v10 = vpop.eup %14907  ;;  %10367 = vmatprep.subr.bf16.mxu0 %v14511_v35  ;;  %v8365_v25 = vadd.f32 1.0, %v14906_v49  ;;  %v8377_v55 = vmul.f32 %v8353_v48, %v8185_v62  ;;  %v14529_v35 = vld [vmem:[%s16078_s19 + $0x180] ss:$12 sps:$4 sm:$0xff]   ;;  %v14533_v30 = vld [vmem:[%s16078_s19 + $0x1d0] ss:$12 sps:$4 sm:$0xff]  }
0x1535   : > { %v14910_v59 = vpop.eup %14909  ;;  %v8352_v43 = vadd.f32 1.0, %v14908_v10  ;;  %v8387_v6 = vmul.f32 %v8363_v2, %v8195_v61  ;;  %v14534_v48 = vld [vmem:[%s16078_s19 + $0x198] ss:$12 sps:$4 sm:$0xff]   ;;  %v14537_v49 = vld [vmem:[%s16078_s19 + $0x2a8] ss:$12 sps:$4 sm:$0xff]  }
0x1536   : > { %v14912_v31 = vpop.eup %14911  ;;  %v8364_v16 = vadd.f32 1.0, %v14910_v59  ;;  %v8389_v9 = vmul.f32 %v8365_v25, %v8197_v14  ;;  %v14538_v26 = vld [vmem:[%s16078_s19 + $0x1e8] ss:$12 sps:$4 sm:$0xff]   ;;  %v14539_v61 = vld [vmem:[%s16078_s19 + $0x1b0] ss:$12 sps:$4 sm:$0xff]  }
0x1537   : > { %v14914_v63 = vpop.eup %14913  ;;  %10368 = vmatpush1.bf16.msra.mxu0 %v14509_v60  ;;  %v8399_v41 = vpack.c.bf16 %v8387_v6, %v8375_v57  ;;  %v8354_v34 = vadd.f32 1.0, %v14912_v31  ;;  %v8376_v54 = vmul.f32 %v8352_v43, %v8184_v38  ;;  %v14541_v60 = vld [vmem:[%s16078_s19 + $0x1b4] ss:$12 sps:$4 sm:$0xff]   ;;  %v14546_v10 = vld [vmem:[%s16078_s19 + $0x1cc] ss:$12 sps:$4 sm:$0xff]  }
0x1538   : > { %10369 = vmatprep.subr.bf16.mxu0 %v14516_v53  ;;  %v8388_v4 = vmul.f32 %v8364_v16, %v8196_v36  ;;  %v8366_v52 = vadd.f32 1.0, %v14914_v63  ;;  %v17310_v17 = vpack.c.bf16 %v8389_v9, %v8377_v55  ;;  %v14542_v2 = vld [vmem:[%s16078_s19 + $0x2c0] ss:$12 sps:$4 sm:$0xff]   ;;  %v14544_v62 = vld [vmem:[%s16078_s19 + $0x1c8] ss:$12 sps:$4 sm:$0xff]  }
0x1539   : > { %v8378_v18 = vmul.f32 %v8354_v34, %v8186_v51  ;;  %v14543_v53 = vld [vmem:[%s16078_s19 + $0x200] ss:$12 sps:$4 sm:$0xff]   ;;  %v14547_v14 = vld [vmem:[%s16078_s19 + $0x2d8] ss:$12 sps:$4 sm:$0xff]   ;;  %v14552_v43 = vld [vmem:[%s16078_s19 + $0x2f0] ss:$12 sps:$4 sm:$0xff]  }
0x153a   : > { %v8400_v28 = vpack.c.bf16 %v8388_v4, %v8376_v54  ;;  %v8390_v5 = vmul.f32 %v8366_v52, %v8198_v47  ;;  %v14551_v25 = vld [vmem:[%s16078_s19 + $0x1e4] ss:$12 sps:$4 sm:$0xff]   ;;  %v14549_v38 = vld [vmem:[%s16078_s19 + $0x1e0] ss:$12 sps:$4 sm:$0xff]   ;;  %v14556_v57 = vld [vmem:[%s16078_s19 + $0x1fc] ss:$12 sps:$4 sm:$0xff]  }
0x153b   : > { %10370 = vmatpush1.bf16.msra.mxu0 %v14514_v23  ;;  %v14548_v59 = vld [vmem:[%s16078_s19 + $0x218] ss:$12 sps:$4 sm:$0xff]   ;;  %v14553_v6 = vld [vmem:[%s16078_s19 + $0x230] ss:$12 sps:$4 sm:$0xff]   ;;  %v14581_v36 = vld [vmem:[%s16078_s19 + $0x3c8] ss:$12 sps:$4 sm:$0xff]  }
0x153c   : > { %10375 = vmatprep.mubr.bf16.mxu0 %v8400_v28  ;;  %10633 = vmatprep.mubr.bf16.mxu1 %v8400_v28  ;;  %v8402_v13 = vpack.c.bf16 %v8390_v5, %v8378_v18  ;;  %v14554_v31 = vld [vmem:[%s16078_s19 + $0x1f8] ss:$12 sps:$4 sm:$0xff]   ;;  %v14559_v16 = vld [vmem:[%s16078_s19 + $0x214] ss:$12 sps:$4 sm:$0xff]   ;;  %v14557_v9 = vld [vmem:[%s16078_s19 + $0x210] ss:$12 sps:$4 sm:$0xff]  }
0x153d   : > { %10634 = vmatmul.mubr.bf16.vlgmr.msra.gmra.mrb[52].mxu1 %v8399_v41  ;;  %10371 = vmatprep.subr.bf16.mxu0 %v14521_v19  ;;  %v14582_v55 = vld [vmem:[%s16078_s19 + $0x308] ss:$12 sps:$4 sm:$0xff]   ;;  %v14586_v63 = vld [vmem:[%s16078_s19 + $0x3e0] ss:$12 sps:$4 sm:$0xff]   ;;  %v14591_v47 = vld [vmem:[%s16078_s19 + $0x3f8] ss:$12 sps:$4 sm:$0xff]  }
0x153e   : > { %12753 = vmatpush3.bf16.msra.mxu1 %v14518_v29  ;;  %10674 = vmatprep.mubr.bf16.mxu1 %v8402_v13  ;;  %v14562_v23 = vld [vmem:[%s16078_s19 + $0x22c] ss:$12 sps:$4 sm:$0xff]   ;;  %v14560_v51 = vld [vmem:[%s16078_s19 + $0x228] ss:$12 sps:$4 sm:$0xff]   ;;  %v14565_v34 = vld [vmem:[%s16078_s19 + $0x244] ss:$12 sps:$4 sm:$0xff]  }
0x153f   : > { %12754 = vmatprep.subr.bf16.mxu1 %v14522_v12  ;;  %10372 = vmatpush1.bf16.msra.mxu0 %v14519_v15  ;;  %v14592_v54 = vld [vmem:[%s16078_s19 + $0x338] ss:$12 sps:$4 sm:$0xff]   ;;  %v14563_v4 = vld [vmem:[%s16078_s19 + $0x240] ss:$12 sps:$4 sm:$0xff]   ;;  %v14596_v52 = vld [vmem:[%s16078_s19 + $0x410] ss:$12 sps:$4 sm:$0xff]  }
0x1540   : > { %10373 = vmatprep.subr.bf16.mxu0 %v14526_v33  ;;  %v14568_v19 = vld [vmem:[%s16078_s19 + $0x25c] ss:$12 sps:$4 sm:$0xff]   ;;  %v14566_v29 = vld [vmem:[%s16078_s19 + $0x258] ss:$12 sps:$4 sm:$0xff]   ;;  %v14571_v5 = vld [vmem:[%s16078_s19 + $0x274] ss:$12 sps:$4 sm:$0xff]  }
0x1541   : > { %v14597_v28 = vld [vmem:[%s16078_s19 + $0x350] ss:$12 sps:$4 sm:$0xff]   ;;  %v14601_v18 = vld [vmem:[%s16078_s19 + $0x428] ss:$12 sps:$4 sm:$0xff]   ;;  %v14574_v33 = vld [vmem:[%s16078_s19 + $0x28c] ss:$12 sps:$4 sm:$0xff]  }
0x1542   : > { %12755 = vmatpush3.bf16.msra.mxu1 %v14523_v44  ;;  %v14602_v15 = vld [vmem:[%s16078_s19 + $0x368] ss:$12 sps:$4 sm:$0xff]   ;;  %v14569_v12 = vld [vmem:[%s16078_s19 + $0x270] ss:$12 sps:$4 sm:$0xff]   ;;  %v14607_v44 = vld [vmem:[%s16078_s19 + $0x380] ss:$12 sps:$4 sm:$0xff]  }
0x1543   : > { %12756 = vmatprep.subr.bf16.mxu1 %v14527_v45  ;;  %10374 = vmatpush1.bf16.msra.mxu0 %v14524_v56  ;;  %v14572_v56 = vld [vmem:[%s16078_s19 + $0x288] ss:$12 sps:$4 sm:$0xff]   ;;  %v14611_v45 = vld [vmem:[%s16078_s19 + $0x458] ss:$12 sps:$4 sm:$0xff]  }
0x1544   : > { %10386 = vmatprep.subr.bf16.mxu0 %v14531_v27  ;;  %v14577_v27 = vld [vmem:[%s16078_s19 + $0x2a4] ss:$12 sps:$4 sm:$0xff]  }
0x1546   : > { %12757 = vmatpush3.bf16.msra.mxu1 %v14528_v32  ;;  %10376 = vmatmul.mubr.bf16.vlgmr.msra.gmra.mrb[40].mxu0 %v8399_v41  ;;  %v14587_v41 = vld [vmem:[%s16078_s19 + $0x320] ss:$12 sps:$4 sm:$0xff]   ;;  %v14612_v32 = vld [vmem:[%s16078_s19 + $0x398] ss:$12 sps:$4 sm:$0xff]  }
0x1547   : > { %12758 = vmatprep.subr.bf16.mxu1 %v14532_v40  ;;  %10387 = vmatpush1.bf16.msra.mxu0 %v14529_v35  ;;  %v14575_v35 = vld [vmem:[%s16078_s19 + $0x2a0] ss:$12 sps:$4 sm:$0xff]   ;;  %v14616_v40 = vld [vmem:[%s16078_s19 + $0x470] ss:$12 sps:$4 sm:$0xff]  }
0x1548   : > { %10418 = vmatprep.mubr.bf16.mxu0 %v8402_v13  ;;  %10388 = vmatprep.subr.bf16.mxu0 %v14536_v58  ;;  %v14606_v13 = vld [vmem:[%s16078_s19 + $0x440] ss:$12 sps:$4 sm:$0xff]   ;;  %v14580_v58 = vld [vmem:[%s16078_s19 + $0x2bc] ss:$12 sps:$4 sm:$0xff]  }
0x154a   : > { %12759 = vmatpush3.bf16.msra.mxu1 %v14533_v30  ;;  %v6186_v30 = vrot.slane %v17218_v8, %v16445_v22 }
0x154b   : > { %12760 = vmatprep.subr.bf16.mxu1 %v14537_v49  ;;  %10389 = vmatpush1.bf16.msra.mxu0 %v14534_v48  ;;  %v14617_v48 = vld [vmem:[%s16078_s19 + $0x3b0] ss:$12 sps:$4 sm:$0xff]   ;;  %v6194_v49 = vrot.slane %v17218_v8, %v16502_v7 }
0x154c   : > { %10390 = vmatprep.subr.bf16.mxu0 %v14541_v60  ;;  %v6190_v60 = vrot.slane %v17218_v8, %v16448_v37 }
0x154e   : > { %12761 = vmatpush3.bf16.msra.mxu1 %v14538_v26  ;;  %v14578_v26 = vld [vmem:[%s16078_s19 + $0x2b8] ss:$12 sps:$4 sm:$0xff]  }
0x154f   : > { %12762 = vmatprep.subr.bf16.mxu1 %v14542_v2  ;;  %10391 = vmatpush1.bf16.msra.mxu0 %v14539_v61  ;;  %v14621_v61 = vld [vmem:[%s16078_s19 + $0x548] ss:$12 sps:$4 sm:$0xff]   ;;  %v6198_v2 = vrot.slane %v17218_v8, %v16505_v1 }
0x1550   : > { %10392 = vmatprep.subr.bf16.mxu0 %v14546_v10  ;;  %v14585_v10 = vld [vmem:[%s16078_s19 + $0x2d4] ss:$12 sps:$4 sm:$0xff]  }
0x1552   : > { %12763 = vmatpush3.bf16.msra.mxu1 %v14543_v53 }
0x1553   : > { %12764 = vmatprep.subr.bf16.mxu1 %v14547_v14  ;;  %10393 = vmatpush1.bf16.msra.mxu0 %v14544_v62 }
0x1554   : > { %10394 = vmatprep.subr.bf16.mxu0 %v14551_v25 }
0x1556   : > { %12765 = vmatpush3.bf16.msra.mxu1 %v14548_v59 }
0x1557   : > { %12766 = vmatprep.subr.bf16.mxu1 %v14552_v43  ;;  %10395 = vmatpush1.bf16.msra.mxu0 %v14549_v38  ;;  %v14583_v43 = vld [vmem:[%s16078_s19 + $0x2d0] ss:$12 sps:$4 sm:$0xff]  }
0x1558   : > { %10396 = vmatprep.subr.bf16.mxu0 %v14556_v57 }
0x155a   : > { %12767 = vmatpush3.bf16.msra.mxu1 %v14553_v6 }
0x155b   : > { %10397 = vmatpush1.bf16.msra.mxu0 %v14554_v31  ;;  %12774 = vmatprep.subr.bf16.mxu1 %v14581_v36 }
0x155c   : > { %10398 = vmatprep.subr.bf16.mxu0 %v14559_v16  ;;  %v14590_v16 = vld [vmem:[%s16078_s19 + $0x2ec] ss:$12 sps:$4 sm:$0xff]  }
0x155d   : > { %10675 = vmatmul.mubr.bf16.vlgmr.msra.gmra.mrb[56].mxu1 %v17310_v17 }
0x155e   : > { %12775 = vmatpush3.bf16.msra.mxu1 %v14582_v55 }
0x155f   : > { %10399 = vmatpush1.bf16.msra.mxu0 %v14557_v9  ;;  %12776 = vmatprep.subr.bf16.mxu1 %v14586_v63 }
0x1560   : > { %10400 = vmatprep.subr.bf16.mxu0 %v14562_v23 }
0x1562   : > { %12777 = vmatpush3.bf16.msra.mxu1 %v14587_v41 }
0x1563   : > { %10401 = vmatpush1.bf16.msra.mxu0 %v14560_v51  ;;  %12778 = vmatprep.subr.bf16.mxu1 %v14591_v47 }
0x1564   : > { %10402 = vmatprep.subr.bf16.mxu0 %v14565_v34 }
0x1566   : > { %12779 = vmatpush3.bf16.msra.mxu1 %v14592_v54 }
0x1567   : > { %10403 = vmatpush1.bf16.msra.mxu0 %v14563_v4  ;;  %12780 = vmatprep.subr.bf16.mxu1 %v14596_v52 }
0x1568   : > { %10404 = vmatprep.subr.bf16.mxu0 %v14568_v19 }
0x156a   : > { %12781 = vmatpush3.bf16.msra.mxu1 %v14597_v28 }
0x156b   : > { %10405 = vmatpush1.bf16.msra.mxu0 %v14566_v29  ;;  %12782 = vmatprep.subr.bf16.mxu1 %v14601_v18  ;;  %v14588_v29 = vld [vmem:[%s16078_s19 + $0x2e8] ss:$12 sps:$4 sm:$0xff]  }
0x156c   : > { %10406 = vmatprep.subr.bf16.mxu0 %v14571_v5 }
0x156e   : > { %12783 = vmatpush3.bf16.msra.mxu1 %v14602_v15 }
0x156f   : > { %10407 = vmatpush1.bf16.msra.mxu0 %v14569_v12  ;;  %12784 = vmatprep.subr.bf16.mxu1 %v14606_v13  ;;  %v14595_v13 = vld [vmem:[%s16078_s19 + $0x304] ss:$12 sps:$4 sm:$0xff]  }
0x1570   : > { %10408 = vmatprep.subr.bf16.mxu0 %v14574_v33 }
0x1572   : > { %12785 = vmatpush3.bf16.msra.mxu1 %v14607_v44 }
0x1573   : > { %10409 = vmatpush1.bf16.msra.mxu0 %v14572_v56  ;;  %12786 = vmatprep.subr.bf16.mxu1 %v14611_v45 }
0x1574   : > { %10410 = vmatprep.subr.bf16.mxu0 %v14577_v27 }
0x1576   : > { %12787 = vmatpush3.bf16.msra.mxu1 %v14612_v32 }
0x1577   : > { %10411 = vmatpush1.bf16.msra.mxu0 %v14575_v35  ;;  %12788 = vmatprep.subr.bf16.mxu1 %v14616_v40 }
0x1578   : > { %10412 = vmatprep.subr.bf16.mxu0 %v14580_v58 }
0x1579   : > { %v7916_v53 = vpop.f32.mrb[32].mxu0 }
0x157a   : > { %v17386_v22 = vadd.f32 %v7916_v53, %v6186_v30  ;;  %v8002_v62 = vpop.f32.mrb[44].mxu1  ;;  %v7918_v14 = vpop.f32.mrb[33].mxu0  ;;  %12789 = vmatpush3.bf16.msra.mxu1 %v14617_v48  ;;  %v14593_v48 = vld [vmem:[%s16078_s19 + $0x300] ss:$12 sps:$4 sm:$0xff]  }
0x157b   : > { %v17388_v25 = vadd.f32 %v8002_v62, %v6194_v49  ;;  %v17390_v59 = vadd.f32 %v7918_v14, %v6190_v60  ;;  %v8004_v37 = vpop.f32.mrb[45].mxu1  ;;  %v7920_v38 = vpop.f32.mrb[34].mxu0  ;;  %10413 = vmatpush1.bf16.msra.mxu0 %v14578_v26  ;;  %12796 = vmatprep.subr.bf16.mxu1 %v14621_v61 }
0x157c   : > { %v8211_v8 = vmul.f32 0.044715, %v17386_v22  ;;  %v17394_v57 = vadd.f32 %v8004_v37, %v6198_v2  ;;  %v17396_v6 = vadd.f32 %v7920_v38, %v6186_v30  ;;  %v8006_v31 = vpop.f32.mrb[46].mxu1  ;;  %v7922_v36 = vpop.f32.mrb[35].mxu0  ;;  %10414 = vmatprep.subr.bf16.mxu0 %v14585_v10  ;;  %v14598_v38 = vld [vmem:[%s16078_s19 + $0x318] ss:$12 sps:$4 sm:$0xff]  }
0x157d   : > { %v8213_v55 = vmul.f32 0.044715, %v17388_v25  ;;  %v8212_v9 = vmul.f32 0.044715, %v17390_v59  ;;  %v17401_v63 = vadd.f32 %v8006_v31, %v6194_v49  ;;  %v17403_v23 = vadd.f32 %v7922_v36, %v6190_v60  ;;  %v8008_v41 = vpop.f32.mrb[47].mxu1 }
0x157e   : > { %v8235_v51 = vmul.f32 %v17386_v22, %v8211_v8  ;;  %v8214_v47 = vmul.f32 0.044715, %v17394_v57  ;;  %v8223_v34 = vmul.f32 0.044715, %v17396_v6  ;;  %v17408_v54 = vadd.f32 %v8008_v41, %v6198_v2  ;;  %v14600_v2 = vld [vmem:[%s16078_s19 + $0x31c] ss:$12 sps:$4 sm:$0xff]  }
0x157f   : > { %v8237_v4 = vmul.f32 %v17388_v25, %v8213_v55  ;;  %v8236_v52 = vmul.f32 %v17390_v59, %v8212_v9  ;;  %v8225_v19 = vmul.f32 0.044715, %v17401_v63  ;;  %v8224_v28 = vmul.f32 0.044715, %v17403_v23  ;;  %10415 = vmatpush1.bf16.msra.mxu0 %v14583_v43  ;;  %v14605_v36 = vld [vmem:[%s16078_s19 + $0x334] ss:$12 sps:$4 sm:$0xff]  }
0x1580   : > { %v8259_v18 = vmul.f32 %v17386_v22, %v8235_v51  ;;  %v8238_v5 = vmul.f32 %v17394_v57, %v8214_v47  ;;  %v8247_v15 = vmul.f32 %v17396_v6, %v8223_v34  ;;  %v8226_v12 = vmul.f32 0.044715, %v17408_v54  ;;  %10416 = vmatprep.subr.bf16.mxu0 %v14590_v16  ;;  %v14603_v41 = vld [vmem:[%s16078_s19 + $0x330] ss:$12 sps:$4 sm:$0xff]   ;;  %v14610_v51 = vld [vmem:[%s16078_s19 + $0x34c] ss:$12 sps:$4 sm:$0xff]  }
0x1581   : > { %v8261_v33 = vmul.f32 %v17388_v25, %v8237_v4  ;;  %v8260_v44 = vmul.f32 %v17390_v59, %v8236_v52  ;;  %v8249_v56 = vmul.f32 %v17401_v63, %v8225_v19  ;;  %v8248_v45 = vmul.f32 %v17403_v23, %v8224_v28  ;;  %v14608_v47 = vld [vmem:[%s16078_s19 + $0x348] ss:$12 sps:$4 sm:$0xff]   ;;  %v14615_v4 = vld [vmem:[%s16078_s19 + $0x364] ss:$12 sps:$4 sm:$0xff]  }
0x1582   : > { %v8283_v27 = vadd.f32 %v17386_v22, %v8259_v18  ;;  %v8271_v32 = vmul.f32 %v17396_v6, %v8247_v15  ;;  %v8250_v35 = vmul.f32 %v17408_v54, %v8226_v12  ;;  %v8262_v60 = vmul.f32 %v17394_v57, %v8238_v5  ;;  %v14613_v5 = vld [vmem:[%s16078_s19 + $0x360] ss:$12 sps:$4 sm:$0xff]  }
0x1583   : > { %v8285_v40 = vadd.f32 %v17388_v25, %v8261_v33  ;;  %v8273_v58 = vmul.f32 %v17401_v63, %v8249_v56  ;;  %v8272_v30 = vmul.f32 %v17403_v23, %v8248_v45  ;;  %10417 = vmatpush1.bf16.msra.mxu0 %v14588_v29  ;;  %v8284_v62 = vadd.f32 %v17390_v59, %v8260_v44  ;;  %v14620_v44 = vld [vmem:[%s16078_s19 + $0x37c] ss:$12 sps:$4 sm:$0xff]  }
0x1584   : > { %v8307_v49 = vmul.f32 0.7978846, %v8283_v27  ;;  %v8295_v26 = vadd.f32 %v17396_v6, %v8271_v32  ;;  %v8274_v61 = vmul.f32 %v17408_v54, %v8250_v35  ;;  %10429 = vmatprep.subr.bf16.mxu0 %v14595_v13  ;;  %v8286_v16 = vadd.f32 %v17394_v57, %v8262_v60 }
0x1585   : > { %v8309_v10 = vmul.f32 0.7978846, %v8285_v40  ;;  %v8297_v53 = vadd.f32 %v17401_v63, %v8273_v58  ;;  %v8296_v14 = vadd.f32 %v17403_v23, %v8272_v30  ;;  %v8308_v8 = vmul.f32 0.7978846, %v8284_v62 }
0x1586   : > { %14915 = vtanh.f32 %v8307_v49  ;;  %v8319_v37 = vmul.f32 0.7978846, %v8295_v26  ;;  %10419 = vmatmul.mubr.bf16.vlgmr.msra.gmra.mrb[40].mxu0 %v17310_v17  ;;  %v8298_v55 = vadd.f32 %v17408_v54, %v8274_v61  ;;  %v8310_v17 = vmul.f32 0.7978846, %v8286_v16  ;;  %v14627_v16 = vld [vmem:[%s16078_s19 + $0x4a0] ss:$12 sps:$4 sm:$0xff]  }
0x1587   : > { %14917 = vtanh.f32 %v8309_v10  ;;  %v8321_v43 = vmul.f32 0.7978846, %v8297_v53  ;;  %10430 = vmatpush1.bf16.msra.mxu0 %v14593_v48  ;;  %v8320_v31 = vmul.f32 0.7978846, %v8296_v14  ;;  %v8187_v15 = vmul.f32 0.5, %v17386_v22 }
0x1588   : > { %14919 = vtanh.f32 %v8319_v37  ;;  %10431 = vmatprep.subr.bf16.mxu0 %v14600_v2  ;;  %v8322_v9 = vmul.f32 0.7978846, %v8298_v55  ;;  %v8199_v12 = vmul.f32 0.5, %v17396_v6  ;;  %v8189_v56 = vmul.f32 0.5, %v17388_v25  ;;  %v14618_v25 = vld [vmem:[%s16078_s19 + $0x378] ss:$12 sps:$4 sm:$0xff]  }
0x1589   : > { %14921 = vtanh.f32 %v8321_v43  ;;  %v8201_v45 = vmul.f32 0.5, %v17401_v63  ;;  %v8188_v35 = vmul.f32 0.5, %v17390_v59  ;;  %v8200_v22 = vmul.f32 0.5, %v17403_v23  ;;  %v14625_v14 = vld [vmem:[%s16078_s19 + $0x394] ss:$12 sps:$4 sm:$0xff]  }
0x158a   : > { %14923 = vtanh.f32 %v8308_v8  ;;  %v8190_v59 = vmul.f32 0.5, %v17394_v57  ;;  %v8202_v61 = vmul.f32 0.5, %v17408_v54  ;;  %v14623_v57 = vld [vmem:[%s16078_s19 + $0x390] ss:$12 sps:$4 sm:$0xff]   ;;  %v14626_v54 = vld [vmem:[%s16078_s19 + $0x560] ss:$12 sps:$4 sm:$0xff]  }
0x158b   : > { %10432 = vmatpush1.bf16.msra.mxu0 %v14598_v38  ;;  %14925 = vtanh.f32 %v8320_v31  ;;  %v14622_v38 = vld [vmem:[%s16078_s19 + $0x488] ss:$12 sps:$4 sm:$0xff]  }
0x158c   : > { %10433 = vmatprep.subr.bf16.mxu0 %v14605_v36  ;;  %14927 = vtanh.f32 %v8310_v17  ;;  %v14630_v36 = vld [vmem:[%s16078_s19 + $0x3ac] ss:$12 sps:$4 sm:$0xff]   ;;  %v14628_v55 = vld [vmem:[%s16078_s19 + $0x3a8] ss:$12 sps:$4 sm:$0xff]  }
0x158d   : > { %14929 = vtanh.f32 %v8322_v9  ;;  %v14631_v17 = vld [vmem:[%s16078_s19 + $0x578] ss:$12 sps:$4 sm:$0xff]  }
0x158e   : > { %v14635_v9 = vld [vmem:[%s16078_s19 + $0x3c4] ss:$12 sps:$4 sm:$0xff]  }
0x158f   : > { %10434 = vmatpush1.bf16.msra.mxu0 %v14603_v41  ;;  %v14632_v41 = vld [vmem:[%s16078_s19 + $0x4b8] ss:$12 sps:$4 sm:$0xff]  }
0x1590   : > { %v14916_v34 = vpop.eup %14915  ;;  %10435 = vmatprep.subr.bf16.mxu0 %v14610_v51  ;;  %v14633_v51 = vld [vmem:[%s16078_s19 + $0x3c0] ss:$12 sps:$4 sm:$0xff]  }
0x1591   : > { %v14918_v52 = vpop.eup %14917  ;;  %v8355_v19 = vadd.f32 1.0, %v14916_v34  ;;  %v14640_v34 = vld [vmem:[%s16078_s19 + $0x3dc] ss:$12 sps:$4 sm:$0xff]  }
0x1592   : > { %v14920_v28 = vpop.eup %14919  ;;  %v8357_v29 = vadd.f32 1.0, %v14918_v52  ;;  %v14638_v52 = vld [vmem:[%s16078_s19 + $0x3d8] ss:$12 sps:$4 sm:$0xff]  }
0x1593   : > { %v14922_v18 = vpop.eup %14921  ;;  %10436 = vmatpush1.bf16.msra.mxu0 %v14608_v47  ;;  %v8367_v13 = vadd.f32 1.0, %v14920_v28  ;;  %v8379_v58 = vmul.f32 %v8355_v19, %v8187_v15  ;;  %v14636_v47 = vld [vmem:[%s16078_s19 + $0x590] ss:$12 sps:$4 sm:$0xff]   ;;  %v14641_v19 = vld [vmem:[%s16078_s19 + $0x5a8] ss:$12 sps:$4 sm:$0xff]  }
0x1594   : > { %v14924_v33 = vpop.eup %14923  ;;  %10437 = vmatprep.subr.bf16.mxu0 %v14615_v4  ;;  %v8369_v27 = vadd.f32 1.0, %v14922_v18  ;;  %v8381_v49 = vmul.f32 %v8357_v29, %v8189_v56  ;;  %v14637_v4 = vld [vmem:[%s16078_s19 + $0x4d0] ss:$12 sps:$4 sm:$0xff]   ;;  %v14645_v28 = vld [vmem:[%s16078_s19 + $0x3f4] ss:$12 sps:$4 sm:$0xff]  }
0x1595   : > { %v14926_v32 = vpop.eup %14925  ;;  %v8356_v40 = vadd.f32 1.0, %v14924_v33  ;;  %v8391_v30 = vmul.f32 %v8367_v13, %v8199_v12  ;;  %v14642_v29 = vld [vmem:[%s16078_s19 + $0x4e8] ss:$12 sps:$4 sm:$0xff]   ;;  %v14643_v18 = vld [vmem:[%s16078_s19 + $0x3f0] ss:$12 sps:$4 sm:$0xff]  }
0x1596   : > { %v14928_v48 = vpop.eup %14927  ;;  %v8368_v6 = vadd.f32 1.0, %v14926_v32  ;;  %v8393_v60 = vmul.f32 %v8369_v27, %v8201_v45  ;;  %v14650_v15 = vld [vmem:[%s16078_s19 + $0x40c] ss:$12 sps:$4 sm:$0xff]   ;;  %v14648_v13 = vld [vmem:[%s16078_s19 + $0x408] ss:$12 sps:$4 sm:$0xff]  }
0x1597   : > { %v14930_v26 = vpop.eup %14929  ;;  %10438 = vmatpush1.bf16.msra.mxu0 %v14613_v5  ;;  %v17456_v63 = vpack.c.bf16 %v8391_v30, %v8379_v58  ;;  %v8358_v2 = vadd.f32 1.0, %v14928_v48  ;;  %v8380_v23 = vmul.f32 %v8356_v40, %v8188_v35  ;;  %v14646_v5 = vld [vmem:[%s16078_s19 + $0x5c0] ss:$12 sps:$4 sm:$0xff]   ;;  %v14651_v33 = vld [vmem:[%s16078_s19 + $0x5d8] ss:$12 sps:$4 sm:$0xff]  }
0x1598   : > { %10439 = vmatprep.subr.bf16.mxu0 %v14620_v44  ;;  %v8392_v10 = vmul.f32 %v8368_v6, %v8200_v22  ;;  %v8370_v53 = vadd.f32 1.0, %v14930_v26  ;;  %v17460_v62 = vpack.c.bf16 %v8393_v60, %v8381_v49  ;;  %v14647_v12 = vld [vmem:[%s16078_s19 + $0x500] ss:$12 sps:$4 sm:$0xff]   ;;  %v14655_v44 = vld [vmem:[%s16078_s19 + $0x424] ss:$12 sps:$4 sm:$0xff]  }
0x1599   : > { %v8382_v43 = vmul.f32 %v8358_v2, %v8190_v59  ;;  %v14652_v56 = vld [vmem:[%s16078_s19 + $0x518] ss:$12 sps:$4 sm:$0xff]   ;;  %v14653_v45 = vld [vmem:[%s16078_s19 + $0x420] ss:$12 sps:$4 sm:$0xff]   ;;  %v14656_v27 = vld [vmem:[%s16078_s19 + $0x5f0] ss:$12 sps:$4 sm:$0xff]  }
0x159a   : > { %v8404_v37 = vpack.c.bf16 %v8392_v10, %v8380_v23  ;;  %v8394_v8 = vmul.f32 %v8370_v53, %v8202_v61  ;;  %v14660_v32 = vld [vmem:[%s16078_s19 + $0x43c] ss:$12 sps:$4 sm:$0xff]   ;;  %v14658_v40 = vld [vmem:[%s16078_s19 + $0x438] ss:$12 sps:$4 sm:$0xff]   ;;  %v14663_v30 = vld [vmem:[%s16078_s19 + $0x454] ss:$12 sps:$4 sm:$0xff]  }
0x159b   : > { %10440 = vmatpush1.bf16.msra.mxu0 %v14618_v25  ;;  %v14657_v35 = vld [vmem:[%s16078_s19 + $0x530] ss:$12 sps:$4 sm:$0xff]   ;;  %v14685_v58 = vld [vmem:[%s16078_s19 + $0x6c8] ss:$12 sps:$4 sm:$0xff]   ;;  %v14690_v6 = vld [vmem:[%s16078_s19 + $0x6e0] ss:$12 sps:$4 sm:$0xff]  }
0x159c   : > { %10461 = vmatprep.mubr.bf16.mxu0 %v8404_v37  ;;  %10715 = vmatprep.mubr.bf16.mxu1 %v8404_v37  ;;  %v17466_v31 = vpack.c.bf16 %v8394_v8, %v8382_v43  ;;  %v14686_v48 = vld [vmem:[%s16078_s19 + $0x608] ss:$12 sps:$4 sm:$0xff]   ;;  %v14661_v22 = vld [vmem:[%s16078_s19 + $0x450] ss:$12 sps:$4 sm:$0xff]   ;;  %v14666_v49 = vld [vmem:[%s16078_s19 + $0x46c] ss:$12 sps:$4 sm:$0xff]  }
0x159d   : > { %10716 = vmatmul.mubr.bf16.vlgmr.msra.gmra.mrb[60].mxu1 %v17456_v63  ;;  %10441 = vmatprep.subr.bf16.mxu0 %v14625_v14  ;;  %v14691_v60 = vld [vmem:[%s16078_s19 + $0x620] ss:$12 sps:$4 sm:$0xff]   ;;  %v14664_v26 = vld [vmem:[%s16078_s19 + $0x468] ss:$12 sps:$4 sm:$0xff]   ;;  %v14695_v25 = vld [vmem:[%s16078_s19 + $0x6f8] ss:$12 sps:$4 sm:$0xff]  }
0x159e   : > { %12797 = vmatpush3.bf16.msra.mxu1 %v14622_v38  ;;  %10756 = vmatprep.mubr.bf16.mxu1 %v17466_v31  ;;  %v14669_v59 = vld [vmem:[%s16078_s19 + $0x484] ss:$12 sps:$4 sm:$0xff]   ;;  %v14667_v2 = vld [vmem:[%s16078_s19 + $0x480] ss:$12 sps:$4 sm:$0xff]   ;;  %v14672_v23 = vld [vmem:[%s16078_s19 + $0x49c] ss:$12 sps:$4 sm:$0xff]  }
0x159f   : > { %12798 = vmatprep.subr.bf16.mxu1 %v14626_v54  ;;  %10442 = vmatpush1.bf16.msra.mxu0 %v14623_v57  ;;  %v14696_v61 = vld [vmem:[%s16078_s19 + $0x638] ss:$12 sps:$4 sm:$0xff]   ;;  %v14700_v10 = vld [vmem:[%s16078_s19 + $0x710] ss:$12 sps:$4 sm:$0xff]   ;;  %v14705_v37 = vld [vmem:[%s16078_s19 + $0x728] ss:$12 sps:$4 sm:$0xff]  }
0x15a0   : > { %10443 = vmatprep.subr.bf16.mxu0 %v14630_v36  ;;  %v14701_v53 = vld [vmem:[%s16078_s19 + $0x650] ss:$12 sps:$4 sm:$0xff]   ;;  %v14670_v14 = vld [vmem:[%s16078_s19 + $0x498] ss:$12 sps:$4 sm:$0xff]   ;;  %v14675_v38 = vld [vmem:[%s16078_s19 + $0x4b4] ss:$12 sps:$4 sm:$0xff]  }
0x15a1   : > { %v14706_v43 = vld [vmem:[%s16078_s19 + $0x668] ss:$12 sps:$4 sm:$0xff]   ;;  %v14710_v8 = vld [vmem:[%s16078_s19 + $0x740] ss:$12 sps:$4 sm:$0xff]   ;;  %v14715_v36 = vld [vmem:[%s16078_s19 + $0x758] ss:$12 sps:$4 sm:$0xff]  }
0x15a2   : > { %12799 = vmatpush3.bf16.msra.mxu1 %v14627_v16  ;;  %v14678_v57 = vld [vmem:[%s16078_s19 + $0x4cc] ss:$12 sps:$4 sm:$0xff]   ;;  %v14681_v16 = vld [vmem:[%s16078_s19 + $0x4e4] ss:$12 sps:$4 sm:$0xff]  }
0x15a3   : > { %12800 = vmatprep.subr.bf16.mxu1 %v14631_v17  ;;  %10444 = vmatpush1.bf16.msra.mxu0 %v14628_v55  ;;  %v14711_v54 = vld [vmem:[%s16078_s19 + $0x680] ss:$12 sps:$4 sm:$0xff]   ;;  %v14716_v55 = vld [vmem:[%s16078_s19 + $0x698] ss:$12 sps:$4 sm:$0xff]  }
0x15a4   : > { %10445 = vmatprep.subr.bf16.mxu0 %v14635_v9  ;;  %v14679_v17 = vld [vmem:[%s16078_s19 + $0x4e0] ss:$12 sps:$4 sm:$0xff]   ;;  %v6164_v9 = vld [vmem:[%s16062_s24 + $0x8] sm:$0xf]  ;;  %s17894_s24 = sld [smem:[#allocation47_spill]] (!%p12539_p0) }
0x15a6   : > { %12801 = vmatpush3.bf16.msra.mxu1 %v14632_v41  ;;  %v14720_v41 = vld [vmem:[%s16078_s19 + $0x770] ss:$12 sps:$4 sm:$0xff]  }
0x15a7   : > { %12802 = vmatprep.subr.bf16.mxu1 %v14636_v47  ;;  %10446 = vmatpush1.bf16.msra.mxu0 %v14633_v51  ;;  %v14684_v51 = vld [vmem:[%s16078_s19 + $0x4fc] ss:$12 sps:$4 sm:$0xff]   ;;  %v6202_v47 = vrot.slane %v6164_v9, %v16209_v39 }
0x15a8   : > { %10447 = vmatprep.subr.bf16.mxu0 %v14640_v34  ;;  %v14721_v34 = vld [vmem:[%s16078_s19 + $0x6b0] ss:$12 sps:$4 sm:$0xff]  }
0x15aa   : > { %12803 = vmatpush3.bf16.msra.mxu1 %v14637_v4  ;;  %v6210_v4 = vrot.slane %v6164_v9, %v16442_v21  ;;  %s17895_s5 = smov (!%p12539_p0), %s17894_s24 }
0x15ab   : > { %12804 = vmatprep.subr.bf16.mxu1 %v14641_v19  ;;  %10448 = vmatpush1.bf16.msra.mxu0 %v14638_v52  ;;  %v6206_v52 = vrot.slane %v6164_v9, %v16213_v42  ;;  %v14682_v19 = vld [vmem:[%s16078_s19 + $0x4f8] ss:$12 sps:$4 sm:$0xff]  }
0x15ac   : > { %10449 = vmatprep.subr.bf16.mxu0 %v14645_v28  ;;  %v14725_v28 = vld [vmem:[%s16078_s19 + $0x848] ss:$12 sps:$4 sm:$0xff]  }
0x15ae   : > { %12805 = vmatpush3.bf16.msra.mxu1 %v14642_v29  ;;  %v6214_v29 = vrot.slane %v6164_v9, %v16451_v24 }
0x15af   : > { %12806 = vmatprep.subr.bf16.mxu1 %v14646_v5  ;;  %10450 = vmatpush1.bf16.msra.mxu0 %v14643_v18  ;;  %v14689_v18 = vld [vmem:[%s16078_s19 + $0x514] ss:$12 sps:$4 sm:$0xff]  }
0x15b0   : > { %10451 = vmatprep.subr.bf16.mxu0 %v14650_v15 }
0x15b2   : > { %12807 = vmatpush3.bf16.msra.mxu1 %v14647_v12 }
0x15b3   : > { %12808 = vmatprep.subr.bf16.mxu1 %v14651_v33  ;;  %10452 = vmatpush1.bf16.msra.mxu0 %v14648_v13 }
0x15b4   : > { %10453 = vmatprep.subr.bf16.mxu0 %v14655_v44 }
0x15b6   : > { %12809 = vmatpush3.bf16.msra.mxu1 %v14652_v56 }
0x15b7   : > { %12810 = vmatprep.subr.bf16.mxu1 %v14656_v27  ;;  %10454 = vmatpush1.bf16.msra.mxu0 %v14653_v45  ;;  %v14687_v27 = vld [vmem:[%s16078_s19 + $0x510] ss:$12 sps:$4 sm:$0xff]  }
0x15b8   : > { %10455 = vmatprep.subr.bf16.mxu0 %v14660_v32 }
0x15ba   : > { %12811 = vmatpush3.bf16.msra.mxu1 %v14657_v35 }
0x15bb   : > { %10456 = vmatpush1.bf16.msra.mxu0 %v14658_v40  ;;  %12818 = vmatprep.subr.bf16.mxu1 %v14685_v58 }
0x15bc   : > { %10457 = vmatprep.subr.bf16.mxu0 %v14663_v30  ;;  %v14694_v30 = vld [vmem:[%s16078_s19 + $0x52c] ss:$12 sps:$4 sm:$0xff]  }
0x15bd   : > { %10757 = vmatmul.mubr.bf16.vlgmr.msra.gmra.mrb[64].mxu1 %v17460_v62 }
0x15be   : > { %12819 = vmatpush3.bf16.msra.mxu1 %v14686_v48 }
0x15bf   : > { %10458 = vmatpush1.bf16.msra.mxu0 %v14661_v22  ;;  %12820 = vmatprep.subr.bf16.mxu1 %v14690_v6 }
0x15c0   : > { %10459 = vmatprep.subr.bf16.mxu0 %v14666_v49 }
0x15c2   : > { %12821 = vmatpush3.bf16.msra.mxu1 %v14691_v60 }
0x15c3   : > { %10460 = vmatpush1.bf16.msra.mxu0 %v14664_v26  ;;  %12822 = vmatprep.subr.bf16.mxu1 %v14695_v25 }
0x15c4   : > { %10472 = vmatprep.subr.bf16.mxu0 %v14669_v59 }
0x15c6   : > { %10462 = vmatmul.mubr.bf16.vlgmr.msra.gmra.mrb[40].mxu0 %v17456_v63  ;;  %12823 = vmatpush3.bf16.msra.mxu1 %v14696_v61  ;;  %v14673_v63 = vld [vmem:[%s16078_s19 + $0x4b0] ss:$12 sps:$4 sm:$0xff]  }
0x15c7   : > { %10473 = vmatpush1.bf16.msra.mxu0 %v14667_v2  ;;  %10504 = vmatprep.mubr.bf16.mxu0 %v17466_v31  ;;  %v14676_v31 = vld [vmem:[%s16078_s19 + $0x4c8] ss:$12 sps:$4 sm:$0xff]  }
0x15c8   : > { %10474 = vmatprep.subr.bf16.mxu0 %v14672_v23  ;;  %12824 = vmatprep.subr.bf16.mxu1 %v14700_v10 }
0x15ca   : > { %12825 = vmatpush3.bf16.msra.mxu1 %v14701_v53 }
0x15cb   : > { %10475 = vmatpush1.bf16.msra.mxu0 %v14670_v14  ;;  %12826 = vmatprep.subr.bf16.mxu1 %v14705_v37  ;;  %v14692_v14 = vld [vmem:[%s16078_s19 + $0x528] ss:$12 sps:$4 sm:$0xff]  }
0x15cc   : > { %10476 = vmatprep.subr.bf16.mxu0 %v14675_v38 }
0x15ce   : > { %12827 = vmatpush3.bf16.msra.mxu1 %v14706_v43 }
0x15cf   : > { %10477 = vmatpush1.bf16.msra.mxu0 %v14673_v63  ;;  %12828 = vmatprep.subr.bf16.mxu1 %v14710_v8  ;;  %v14699_v8 = vld [vmem:[%s16078_s19 + $0x544] ss:$12 sps:$4 sm:$0xff]  }
0x15d0   : > { %10478 = vmatprep.subr.bf16.mxu0 %v14678_v57 }
0x15d2   : > { %12829 = vmatpush3.bf16.msra.mxu1 %v14711_v54 }
0x15d3   : > { %10479 = vmatpush1.bf16.msra.mxu0 %v14676_v31  ;;  %12830 = vmatprep.subr.bf16.mxu1 %v14715_v36 }
0x15d4   : > { %10480 = vmatprep.subr.bf16.mxu0 %v14681_v16 }
0x15d6   : > { %12831 = vmatpush3.bf16.msra.mxu1 %v14716_v55 }
0x15d7   : > { %10481 = vmatpush1.bf16.msra.mxu0 %v14679_v17  ;;  %12832 = vmatprep.subr.bf16.mxu1 %v14720_v41 }
0x15d8   : > { %10482 = vmatprep.subr.bf16.mxu0 %v14684_v51 }
0x15d9   : > { %v8088_v5 = vpop.f32.mrb[36].mxu0 }
0x15da   : > { %v17539_v15 = vadd.f32 %v8088_v5, %v6202_v47  ;;  %v8174_v12 = vpop.f32.mrb[48].mxu1  ;;  %v8090_v13 = vpop.f32.mrb[37].mxu0  ;;  %12833 = vmatpush3.bf16.msra.mxu1 %v14721_v34 }
0x15db   : > { %v17541_v33 = vadd.f32 %v8174_v12, %v6210_v4  ;;  %v17543_v44 = vadd.f32 %v8090_v13, %v6206_v52  ;;  %v8176_v56 = vpop.f32.mrb[49].mxu1  ;;  %v8092_v45 = vpop.f32.mrb[38].mxu0  ;;  %10483 = vmatpush1.bf16.msra.mxu0 %v14682_v19  ;;  %12840 = vmatprep.subr.bf16.mxu1 %v14725_v28  ;;  %v14704_v28 = vld [vmem:[%s16078_s19 + $0x55c] ss:$12 sps:$4 sm:$0xff]  }
0x15dc   : > { %v8215_v24 = vmul.f32 0.044715, %v17539_v15  ;;  %v17547_v32 = vadd.f32 %v8176_v56, %v6214_v29  ;;  %v17549_v35 = vadd.f32 %v8092_v45, %v6202_v47  ;;  %v8178_v40 = vpop.f32.mrb[50].mxu1  ;;  %v8094_v58 = vpop.f32.mrb[39].mxu0  ;;  %10484 = vmatprep.subr.bf16.mxu0 %v14689_v18  ;;  %v14697_v47 = vld [vmem:[%s16078_s19 + $0x540] ss:$12 sps:$4 sm:$0xff]  }
0x15dd   : > { %v8217_v48 = vmul.f32 0.044715, %v17541_v33  ;;  %v8216_v22 = vmul.f32 0.044715, %v17543_v44  ;;  %v17554_v6 = vadd.f32 %v8178_v40, %v6210_v4  ;;  %v17556_v49 = vadd.f32 %v8094_v58, %v6206_v52  ;;  %v8180_v60 = vpop.f32.mrb[51].mxu1 }
0x15de   : > { %v8239_v26 = vmul.f32 %v17539_v15, %v8215_v24  ;;  %v8218_v25 = vmul.f32 0.044715, %v17547_v32  ;;  %v8227_v59 = vmul.f32 0.044715, %v17549_v35  ;;  %v17561_v61 = vadd.f32 %v8180_v60, %v6214_v29  ;;  %v14702_v56 = vld [vmem:[%s16078_s19 + $0x558] ss:$12 sps:$4 sm:$0xff]  }
0x15df   : > { %v8241_v2 = vmul.f32 %v17541_v33, %v8217_v48  ;;  %v8240_v23 = vmul.f32 %v17543_v44, %v8216_v22  ;;  %v8229_v10 = vmul.f32 0.044715, %v17554_v6  ;;  %v8228_v53 = vmul.f32 0.044715, %v17556_v49  ;;  %10485 = vmatpush1.bf16.msra.mxu0 %v14687_v27  ;;  %v14709_v40 = vld [vmem:[%s16078_s19 + $0x574] ss:$12 sps:$4 sm:$0xff]  }
0x15e0   : > { %v8263_v37 = vmul.f32 %v17539_v15, %v8239_v26  ;;  %v8242_v38 = vmul.f32 %v17547_v32, %v8218_v25  ;;  %v8251_v43 = vmul.f32 %v17549_v35, %v8227_v59  ;;  %v8230_v63 = vmul.f32 0.044715, %v17561_v61  ;;  %10486 = vmatprep.subr.bf16.mxu0 %v14694_v30  ;;  %v14707_v60 = vld [vmem:[%s16078_s19 + $0x570] ss:$12 sps:$4 sm:$0xff]   ;;  %v14714_v26 = vld [vmem:[%s16078_s19 + $0x58c] ss:$12 sps:$4 sm:$0xff]  }
0x15e1   : > { %v8265_v57 = vmul.f32 %v17541_v33, %v8241_v2  ;;  %v8264_v54 = vmul.f32 %v17543_v44, %v8240_v23  ;;  %v8253_v31 = vmul.f32 %v17554_v6, %v8229_v10  ;;  %v8252_v36 = vmul.f32 %v17556_v49, %v8228_v53  ;;  %v14712_v25 = vld [vmem:[%s16078_s19 + $0x588] ss:$12 sps:$4 sm:$0xff]   ;;  %v14719_v2 = vld [vmem:[%s16078_s19 + $0x5a4] ss:$12 sps:$4 sm:$0xff]  }
0x15e2   : > { %v8287_v16 = vadd.f32 %v17539_v15, %v8263_v37  ;;  %v8275_v55 = vmul.f32 %v17549_v35, %v8251_v43  ;;  %v8254_v17 = vmul.f32 %v17561_v61, %v8230_v63  ;;  %v8266_v4 = vmul.f32 %v17547_v32, %v8242_v38  ;;  %v14717_v38 = vld [vmem:[%s16078_s19 + $0x5a0] ss:$12 sps:$4 sm:$0xff]  }
0x15e3   : > { %v8289_v9 = vadd.f32 %v17541_v33, %v8265_v57  ;;  %v8277_v41 = vmul.f32 %v17554_v6, %v8253_v31  ;;  %v8276_v51 = vmul.f32 %v17556_v49, %v8252_v36  ;;  %10487 = vmatpush1.bf16.msra.mxu0 %v14692_v14  ;;  %v8288_v5 = vadd.f32 %v17543_v44, %v8264_v54  ;;  %v14724_v54 = vld [vmem:[%s16078_s19 + $0x5bc] ss:$12 sps:$4 sm:$0xff]  }
0x15e4   : > { %v8311_v34 = vmul.f32 0.7978846, %v8287_v16  ;;  %v8299_v52 = vadd.f32 %v17549_v35, %v8275_v55  ;;  %v8278_v19 = vmul.f32 %v17561_v61, %v8254_v17  ;;  %10488 = vmatprep.subr.bf16.mxu0 %v14699_v8  ;;  %v8290_v58 = vadd.f32 %v17547_v32, %v8266_v4 }
0x15e5   : > { %v8313_v29 = vmul.f32 0.7978846, %v8289_v9  ;;  %v8301_v18 = vadd.f32 %v17554_v6, %v8277_v41  ;;  %v8300_v12 = vadd.f32 %v17556_v49, %v8276_v51  ;;  %v8312_v27 = vmul.f32 0.7978846, %v8288_v5  ;;  %v14729_v5 = vld [vmem:[%s16078_s19 + $0x5d4] ss:$12 sps:$4 sm:$0xff]  }
0x15e6   : > { %14931 = vtanh.f32 %v8311_v34  ;;  %v8323_v13 = vmul.f32 0.7978846, %v8299_v52  ;;  %v8302_v30 = vadd.f32 %v17561_v61, %v8278_v19  ;;  %v8314_v48 = vmul.f32 0.7978846, %v8290_v58  ;;  %v14731_v58 = vld [vmem:[%s16078_s19 + $0x7a0] ss:$12 sps:$4 sm:$0xff]  }
0x15e7   : > { %14933 = vtanh.f32 %v8313_v29  ;;  %v8325_v45 = vmul.f32 0.7978846, %v8301_v18  ;;  %10489 = vmatpush1.bf16.msra.mxu0 %v14697_v47  ;;  %v8324_v24 = vmul.f32 0.7978846, %v8300_v12  ;;  %v8191_v43 = vmul.f32 0.5, %v17539_v15 }
0x15e8   : > { %14935 = vtanh.f32 %v8323_v13  ;;  %10490 = vmatprep.subr.bf16.mxu0 %v14704_v28  ;;  %v8326_v22 = vmul.f32 0.7978846, %v8302_v30  ;;  %v8203_v63 = vmul.f32 0.5, %v17549_v35  ;;  %v8193_v31 = vmul.f32 0.5, %v17541_v33  ;;  %v14722_v33 = vld [vmem:[%s16078_s19 + $0x5b8] ss:$12 sps:$4 sm:$0xff]  }
0x15e9   : > { %14937 = vtanh.f32 %v8325_v45  ;;  %v8205_v36 = vmul.f32 0.5, %v17554_v6  ;;  %v8192_v17 = vmul.f32 0.5, %v17543_v44  ;;  %v8204_v15 = vmul.f32 0.5, %v17556_v49  ;;  %v14732_v30 = vld [vmem:[%s16078_s19 + $0x5e8] ss:$12 sps:$4 sm:$0xff]  }
0x15ea   : > { %14939 = vtanh.f32 %v8312_v27  ;;  %v8194_v44 = vmul.f32 0.5, %v17547_v32  ;;  %v8206_v19 = vmul.f32 0.5, %v17561_v61  ;;  %v14727_v32 = vld [vmem:[%s16078_s19 + $0x5d0] ss:$12 sps:$4 sm:$0xff]   ;;  %v14730_v61 = vld [vmem:[%s16078_s19 + $0x860] ss:$12 sps:$4 sm:$0xff]  }
0x15eb   : > { %10491 = vmatpush1.bf16.msra.mxu0 %v14702_v56  ;;  %14941 = vtanh.f32 %v8324_v24  ;;  %v14726_v56 = vld [vmem:[%s16078_s19 + $0x788] ss:$12 sps:$4 sm:$0xff]  }
0x15ec   : > { %10492 = vmatprep.subr.bf16.mxu0 %v14709_v40  ;;  %14943 = vtanh.f32 %v8314_v48  ;;  %v14734_v40 = vld [vmem:[%s16078_s19 + $0x5ec] ss:$12 sps:$4 sm:$0xff]  }
0x15ed   : > { %14945 = vtanh.f32 %v8326_v22  ;;  %v14735_v48 = vld [vmem:[%s16078_s19 + $0x878] ss:$12 sps:$4 sm:$0xff]  }
0x15ee   : > { %v14739_v22 = vld [vmem:[%s16078_s19 + $0x604] ss:$12 sps:$4 sm:$0xff]  }
0x15ef   : > { %10493 = vmatpush1.bf16.msra.mxu0 %v14707_v60  ;;  %v14736_v60 = vld [vmem:[%s16078_s19 + $0x7b8] ss:$12 sps:$4 sm:$0xff]  }
0x15f0   : > { %v14932_v59 = vpop.eup %14931  ;;  %10494 = vmatprep.subr.bf16.mxu0 %v14714_v26  ;;  %v14737_v26 = vld [vmem:[%s16078_s19 + $0x600] ss:$12 sps:$4 sm:$0xff]  }
0x15f1   : > { %v14934_v23 = vpop.eup %14933  ;;  %v8359_v10 = vadd.f32 1.0, %v14932_v59  ;;  %v14744_v59 = vld [vmem:[%s16078_s19 + $0x61c] ss:$12 sps:$4 sm:$0xff]  }
0x15f2   : > { %v14936_v53 = vpop.eup %14935  ;;  %v8361_v14 = vadd.f32 1.0, %v14934_v23  ;;  %v14742_v23 = vld [vmem:[%s16078_s19 + $0x618] ss:$12 sps:$4 sm:$0xff]  }
0x15f3   : > { %v14938_v37 = vpop.eup %14937  ;;  %10495 = vmatpush1.bf16.msra.mxu0 %v14712_v25  ;;  %v8371_v8 = vadd.f32 1.0, %v14936_v53  ;;  %v8383_v41 = vmul.f32 %v8359_v10, %v8191_v43  ;;  %v14740_v25 = vld [vmem:[%s16078_s19 + $0x890] ss:$12 sps:$4 sm:$0xff]   ;;  %v14745_v10 = vld [vmem:[%s16078_s19 + $0x8a8] ss:$12 sps:$4 sm:$0xff]  }
0x15f4   : > { %v14940_v57 = vpop.eup %14939  ;;  %10496 = vmatprep.subr.bf16.mxu0 %v14719_v2  ;;  %v8373_v16 = vadd.f32 1.0, %v14938_v37  ;;  %v8385_v34 = vmul.f32 %v8361_v14, %v8193_v31  ;;  %v14741_v2 = vld [vmem:[%s16078_s19 + $0x7d0] ss:$12 sps:$4 sm:$0xff]   ;;  %v14749_v53 = vld [vmem:[%s16078_s19 + $0x634] ss:$12 sps:$4 sm:$0xff]  }
0x15f5   : > { %v14942_v55 = vpop.eup %14941  ;;  %v8360_v9 = vadd.f32 1.0, %v14940_v57  ;;  %v8395_v51 = vmul.f32 %v8371_v8, %v8203_v63  ;;  %v14746_v14 = vld [vmem:[%s16078_s19 + $0x7e8] ss:$12 sps:$4 sm:$0xff]   ;;  %v14747_v37 = vld [vmem:[%s16078_s19 + $0x630] ss:$12 sps:$4 sm:$0xff]  }
0x15f6   : > { %v14944_v47 = vpop.eup %14943  ;;  %v8372_v35 = vadd.f32 1.0, %v14942_v55  ;;  %v8397_v4 = vmul.f32 %v8373_v16, %v8205_v36  ;;  %v14751_v43 = vld [vmem:[%s16078_s19 + $0x800] ss:$12 sps:$4 sm:$0xff]   ;;  %v14752_v63 = vld [vmem:[%s16078_s19 + $0x648] ss:$12 sps:$4 sm:$0xff]  }
0x15f7   : > { %v14946_v52 = vpop.eup %14945  ;;  %10497 = vmatpush1.bf16.msra.mxu0 %v14717_v38  ;;  %v17608_v6 = vpack.c.bf16 %v8395_v51, %v8383_v41  ;;  %v8362_v28 = vadd.f32 1.0, %v14944_v47  ;;  %v8384_v29 = vmul.f32 %v8360_v9, %v8192_v17  ;;  %v14750_v38 = vld [vmem:[%s16078_s19 + $0x8c0] ss:$12 sps:$4 sm:$0xff]   ;;  %v14755_v8 = vld [vmem:[%s16078_s19 + $0x8d8] ss:$12 sps:$4 sm:$0xff]  }
0x15f8   : > { %10498 = vmatprep.subr.bf16.mxu0 %v14724_v54  ;;  %v8396_v49 = vmul.f32 %v8372_v35, %v8204_v15  ;;  %v8374_v18 = vadd.f32 1.0, %v14946_v52  ;;  %v17613_v12 = vpack.c.bf16 %v8397_v4, %v8385_v34  ;;  %v14759_v54 = vld [vmem:[%s16078_s19 + $0x664] ss:$12 sps:$4 sm:$0xff]   ;;  %v14757_v9 = vld [vmem:[%s16078_s19 + $0x660] ss:$12 sps:$4 sm:$0xff]  }
0x15f9   : > { %v8386_v45 = vmul.f32 %v8362_v28, %v8194_v44  ;;  %v14756_v55 = vld [vmem:[%s16078_s19 + $0x818] ss:$12 sps:$4 sm:$0xff]   ;;  %v14760_v41 = vld [vmem:[%s16078_s19 + $0x8f0] ss:$12 sps:$4 sm:$0xff]   ;;  %v14767_v34 = vld [vmem:[%s16078_s19 + $0x694] ss:$12 sps:$4 sm:$0xff]  }
0x15fa   : > { %v8408_v13 = vpack.c.bf16 %v8396_v49, %v8384_v29  ;;  %v8398_v27 = vmul.f32 %v8374_v18, %v8206_v19  ;;  %v14764_v47 = vld [vmem:[%s16078_s19 + $0x67c] ss:$12 sps:$4 sm:$0xff]   ;;  %v14762_v35 = vld [vmem:[%s16078_s19 + $0x678] ss:$12 sps:$4 sm:$0xff]   ;;  %v14771_v19 = vld [vmem:[%s16078_s19 + $0x6c0] ss:$12 sps:$4 sm:$0xff]  }
0x15fb   : > { %10499 = vmatpush1.bf16.msra.mxu0 %v14722_v33  ;;  %v14761_v15 = vld [vmem:[%s16078_s19 + $0x830] ss:$12 sps:$4 sm:$0xff]   ;;  %v14770_v52 = vld [vmem:[%s16078_s19 + $0x6ac] ss:$12 sps:$4 sm:$0xff]   ;;  %v14768_v33 = vld [vmem:[%s16078_s19 + $0x6a8] ss:$12 sps:$4 sm:$0xff]  }
0x15fc   : > { %10797 = vmatprep.mubr.bf16.mxu1 %v8408_v13  ;;  %v17618_v24 = vpack.c.bf16 %v8398_v27, %v8386_v45  ;;  %10500 = vmatprep.subr.bf16.mxu0 %v14729_v5  ;;  %v14765_v4 = vld [vmem:[%s16078_s19 + $0x690] ss:$12 sps:$4 sm:$0xff]   ;;  %v14774_v29 = vld [vmem:[%s16078_s19 + $0x6d8] ss:$12 sps:$4 sm:$0xff]   ;;  %v14779_v49 = vld [vmem:[%s16078_s19 + $0x6f4] ss:$12 sps:$4 sm:$0xff]  }
0x15fd   : > { %10798 = vmatmul.mubr.bf16.vlgmr.msra.gmra.mrb[68].mxu1 %v17608_v6  ;;  %v14773_v44 = vld [vmem:[%s16078_s19 + $0x6c4] ss:$12 sps:$4 sm:$0xff]   ;;  %v14776_v28 = vld [vmem:[%s16078_s19 + $0x6dc] ss:$12 sps:$4 sm:$0xff]   ;;  %v14782_v5 = vld [vmem:[%s16078_s19 + $0x70c] ss:$12 sps:$4 sm:$0xff]  }
0x15fe   : > { %12841 = vmatpush3.bf16.msra.mxu1 %v14726_v56  ;;  %10838 = vmatprep.mubr.bf16.mxu1 %v17618_v24  ;;  %v14777_v18 = vld [vmem:[%s16078_s19 + $0x6f0] ss:$12 sps:$4 sm:$0xff]   ;;  %v14780_v45 = vld [vmem:[%s16078_s19 + $0x708] ss:$12 sps:$4 sm:$0xff]  }
0x15ff   : > { %12842 = vmatprep.subr.bf16.mxu1 %v14730_v61  ;;  %10501 = vmatpush1.bf16.msra.mxu0 %v14727_v32  ;;  %v14785_v32 = vld [vmem:[%s16078_s19 + $0x724] ss:$12 sps:$4 sm:$0xff]  }
0x1600   : > { %10502 = vmatprep.subr.bf16.mxu0 %v14734_v40 }
0x1602   : > { %12843 = vmatpush3.bf16.msra.mxu1 %v14731_v58 }
0x1603   : > { %12844 = vmatprep.subr.bf16.mxu1 %v14735_v48  ;;  %10503 = vmatpush1.bf16.msra.mxu0 %v14732_v30 }
0x1604   : > { %10515 = vmatprep.subr.bf16.mxu0 %v14739_v22  ;;  %v14783_v22 = vld [vmem:[%s16078_s19 + $0x720] ss:$12 sps:$4 sm:$0xff]  }
0x1606   : > { %12845 = vmatpush3.bf16.msra.mxu1 %v14736_v60  ;;  %10505 = vmatmul.mubr.bf16.vlgmr.msra.gmra.mrb[40].mxu0 %v17460_v62  ;;  %v14754_v62 = vld [vmem:[%s16078_s19 + $0x64c] ss:$12 sps:$4 sm:$0xff]  }
0x1607   : > { %12846 = vmatprep.subr.bf16.mxu1 %v14740_v25  ;;  %10516 = vmatpush1.bf16.msra.mxu0 %v14737_v26 }
0x1608   : > { %10547 = vmatprep.mubr.bf16.mxu0 %v8408_v13  ;;  %10517 = vmatprep.subr.bf16.mxu0 %v14744_v59  ;;  %v17663_v13 = vld [vmem:[%s16054_s2 + $0x10] sm:$0xff] }
0x1609   : > { %v8806_v56 = vrot.slane %v17663_v13, %v16502_v7  ;;  %v14788_v59 = vld [vmem:[%s16078_s19 + $0x73c] ss:$12 sps:$4 sm:$0xff]  }
0x160a   : > { %12847 = vmatpush3.bf16.msra.mxu1 %v14741_v2 }
0x160b   : > { %12848 = vmatprep.subr.bf16.mxu1 %v14745_v10  ;;  %10518 = vmatpush1.bf16.msra.mxu0 %v14742_v23  ;;  %v14786_v23 = vld [vmem:[%s16078_s19 + $0x738] ss:$12 sps:$4 sm:$0xff]   ;;  %v14791_v10 = vld [vmem:[%s16078_s19 + $0x754] ss:$12 sps:$4 sm:$0xff]  }
0x160c   : > { %10519 = vmatprep.subr.bf16.mxu0 %v14749_v53  ;;  %v14789_v53 = vld [vmem:[%s16078_s19 + $0x750] ss:$12 sps:$4 sm:$0xff]  }
0x160e   : > { %12849 = vmatpush3.bf16.msra.mxu1 %v14746_v14  ;;  %v14794_v14 = vld [vmem:[%s16078_s19 + $0x76c] ss:$12 sps:$4 sm:$0xff]  }
0x160f   : > { %12850 = vmatprep.subr.bf16.mxu1 %v14750_v38  ;;  %10520 = vmatpush1.bf16.msra.mxu0 %v14747_v37  ;;  %v14792_v37 = vld [vmem:[%s16078_s19 + $0x768] ss:$12 sps:$4 sm:$0xff]   ;;  %v14797_v38 = vld [vmem:[%s16078_s19 + $0x784] ss:$12 sps:$4 sm:$0xff]  }
0x1610   : > { %v12746_v57 = vpop.f32.mrb[52].mxu1  ;;  %10521 = vmatprep.subr.bf16.mxu0 %v14754_v62  ;;  %v14795_v62 = vld [vmem:[%s16078_s19 + $0x780] ss:$12 sps:$4 sm:$0xff]  }
0x1611   : > { %v12747_v31 = vpop.f32.mrb[53].mxu1 }
0x1612   : > { %v12748_v36 = vadd.f32 %v12747_v31, %v12746_v57  ;;  %12851 = vmatpush3.bf16.msra.mxu1 %v14751_v43  ;;  %v12749_v16 = vpop.f32.mrb[54].mxu1  ;;  %v14800_v43 = vld [vmem:[%s16078_s19 + $0x79c] ss:$12 sps:$4 sm:$0xff]  }
0x1613   : > { %v12750_v17 = vpop.f32.mrb[55].mxu1  ;;  %12852 = vmatprep.subr.bf16.mxu1 %v14755_v8  ;;  %10522 = vmatpush1.bf16.msra.mxu0 %v14752_v63  ;;  %v14798_v63 = vld [vmem:[%s16078_s19 + $0x798] ss:$12 sps:$4 sm:$0xff]   ;;  %v14803_v8 = vld [vmem:[%s16078_s19 + $0x7b4] ss:$12 sps:$4 sm:$0xff]  }
0x1614   : > { %v12751_v51 = vadd.f32 %v12750_v17, %v12749_v16  ;;  %10523 = vmatprep.subr.bf16.mxu0 %v14759_v54  ;;  %v10636_v40 = vadd.f32 %v12748_v36, %v8806_v56  ;;  %v14801_v57 = vld [vmem:[%s16078_s19 + $0x7b0] ss:$12 sps:$4 sm:$0xff]   ;;  %v14806_v54 = vld [vmem:[%s16078_s19 + $0x7cc] ss:$12 sps:$4 sm:$0xff]   ;;  %v14804_v31 = vld [vmem:[%s16078_s19 + $0x7c8] ss:$12 sps:$4 sm:$0xff]  }
0x1615   : > { %v14807_v36 = vld [vmem:[%s16078_s19 + $0x7e0] ss:$12 sps:$4 sm:$0xff]   ;;  %v14810_v16 = vld [vmem:[%s16078_s19 + $0x7f8] ss:$12 sps:$4 sm:$0xff]   ;;  %v14813_v17 = vld [vmem:[%s16078_s19 + $0x810] ss:$12 sps:$4 sm:$0xff]  }
0x1616   : > { %12853 = vmatpush3.bf16.msra.mxu1 %v14756_v55  ;;  %v10639_v60 = vadd.f32 %v12751_v51, %v8806_v56  ;;  %v14815_v55 = vld [vmem:[%s16078_s19 + $0x814] ss:$12 sps:$4 sm:$0xff]   ;;  %v14821_v51 = vld [vmem:[%s16078_s19 + $0x844] ss:$12 sps:$4 sm:$0xff]  }
0x1617   : > { %12854 = vmatprep.subr.bf16.mxu1 %v14760_v41  ;;  %10524 = vmatpush1.bf16.msra.mxu0 %v14757_v9  ;;  %v14818_v9 = vld [vmem:[%s16078_s19 + $0x82c] ss:$12 sps:$4 sm:$0xff]   ;;  %v14816_v41 = vld [vmem:[%s16078_s19 + $0x828] ss:$12 sps:$4 sm:$0xff]  }
0x1618   : > { %10525 = vmatprep.subr.bf16.mxu0 %v14764_v47  ;;  %v14819_v47 = vld [vmem:[%s16078_s19 + $0x840] ss:$12 sps:$4 sm:$0xff]  }
0x161a   : > { %12855 = vmatpush3.bf16.msra.mxu1 %v14761_v15  ;;  %v14824_v15 = vld [vmem:[%s16078_s19 + $0x85c] ss:$12 sps:$4 sm:$0xff]  }
0x161b   : > { %10526 = vmatpush1.bf16.msra.mxu0 %v14762_v35  ;;  %v14822_v35 = vld [vmem:[%s16078_s19 + $0x858] ss:$12 sps:$4 sm:$0xff]  }
0x161c   : > { %10527 = vmatprep.subr.bf16.mxu0 %v14767_v34  ;;  %v14827_v34 = vld [vmem:[%s16078_s19 + $0x874] ss:$12 sps:$4 sm:$0xff]  }
0x161d   : > { %10839 = vmatmul.mubr.bf16.vlgmr.msra.gmra.mrb[72].mxu1 %v17613_v12 }
0x161f   : > { %10528 = vmatpush1.bf16.msra.mxu0 %v14765_v4  ;;  %v14825_v4 = vld [vmem:[%s16078_s19 + $0x870] ss:$12 sps:$4 sm:$0xff]  }
0x1620   : > { %10529 = vmatprep.subr.bf16.mxu0 %v14770_v52  ;;  %v14830_v52 = vld [vmem:[%s16078_s19 + $0x88c] ss:$12 sps:$4 sm:$0xff]  }
0x1623   : > { %10530 = vmatpush1.bf16.msra.mxu0 %v14768_v33  ;;  %v14828_v33 = vld [vmem:[%s16078_s19 + $0x888] ss:$12 sps:$4 sm:$0xff]  }
0x1624   : > { %10531 = vmatprep.subr.bf16.mxu0 %v14773_v44 }
0x1627   : > { %10532 = vmatpush1.bf16.msra.mxu0 %v14771_v19  ;;  %v14833_v19 = vld [vmem:[%s16078_s19 + $0x8a4] ss:$12 sps:$4 sm:$0xff]  }
0x1628   : > { %10533 = vmatprep.subr.bf16.mxu0 %v14776_v28 }
0x162b   : > { %10534 = vmatpush1.bf16.msra.mxu0 %v14774_v29 }
0x162c   : > { %10535 = vmatprep.subr.bf16.mxu0 %v14779_v49 }
0x162f   : > { %10536 = vmatpush1.bf16.msra.mxu0 %v14777_v18 }
0x1630   : > { %v12768_v27 = vpop.f32.mrb[56].mxu1  ;;  %10537 = vmatprep.subr.bf16.mxu0 %v14782_v5  ;;  %v14831_v5 = vld [vmem:[%s16078_s19 + $0x8a0] ss:$12 sps:$4 sm:$0xff]  }
0x1631   : > { %v12769_v61 = vpop.f32.mrb[57].mxu1 }
0x1632   : > { %v12770_v58 = vadd.f32 %v12769_v61, %v12768_v27  ;;  %v12771_v30 = vpop.f32.mrb[58].mxu1  ;;  %v14836_v27 = vld [vmem:[%s16078_s19 + $0x8bc] ss:$12 sps:$4 sm:$0xff]   ;;  %v14834_v61 = vld [vmem:[%s16078_s19 + $0x8b8] ss:$12 sps:$4 sm:$0xff]  }
0x1633   : > { %v12772_v48 = vpop.f32.mrb[59].mxu1  ;;  %10538 = vmatpush1.bf16.msra.mxu0 %v14780_v45 }
0x1634   : > { %v17670_v26 = vadd.f32 %v12770_v58, %v10636_v40  ;;  %v12773_v25 = vadd.f32 %v12772_v48, %v12771_v30  ;;  %10539 = vmatprep.subr.bf16.mxu0 %v14785_v32  ;;  %v14839_v40 = vld [vmem:[%s16078_s19 + $0x8d4] ss:$12 sps:$4 sm:$0xff]   ;;  %v14837_v58 = vld [vmem:[%s16078_s19 + $0x8d0] ss:$12 sps:$4 sm:$0xff]   ;;  %v14842_v30 = vld [vmem:[%s16078_s19 + $0x8ec] ss:$12 sps:$4 sm:$0xff]  }
0x1635   : > { %v14840_v48 = vld [vmem:[%s16078_s19 + $0x8e8] ss:$12 sps:$4 sm:$0xff]  }
0x1636   : > { %v17673_v2 = vadd.f32 %v12773_v25, %v10639_v60 }
0x1637   : > { %10540 = vmatpush1.bf16.msra.mxu0 %v14783_v22 }
0x1638   : > { %10541 = vmatprep.subr.bf16.mxu0 %v14788_v59 }
0x163b   : > { %10542 = vmatpush1.bf16.msra.mxu0 %v14786_v23 }
0x163c   : > { %10543 = vmatprep.subr.bf16.mxu0 %v14791_v10 }
0x163f   : > { %10544 = vmatpush1.bf16.msra.mxu0 %v14789_v53 }
0x1640   : > { %10545 = vmatprep.subr.bf16.mxu0 %v14794_v14 }
0x1643   : > { %10546 = vmatpush1.bf16.msra.mxu0 %v14792_v37 }
0x1644   : > { %10558 = vmatprep.subr.bf16.mxu0 %v14797_v38 }
0x1646   : > { %10548 = vmatmul.mubr.bf16.vlgmr.msra.gmra.mrb[40].mxu0 %v17608_v6  ;;  %v14809_v6 = vld [vmem:[%s16078_s19 + $0x7e4] ss:$12 sps:$4 sm:$0xff]  }
0x1647   : > { %10559 = vmatpush1.bf16.msra.mxu0 %v14795_v62  ;;  %10590 = vmatprep.mubr.bf16.mxu0 %v17618_v24  ;;  %v14812_v24 = vld [vmem:[%s16078_s19 + $0x7fc] ss:$12 sps:$4 sm:$0xff]  }
0x1648   : > { %10560 = vmatprep.subr.bf16.mxu0 %v14800_v43 }
0x164b   : > { %10561 = vmatpush1.bf16.msra.mxu0 %v14798_v63 }
0x164c   : > { %10562 = vmatprep.subr.bf16.mxu0 %v14803_v8 }
0x164f   : > { %10563 = vmatpush1.bf16.msra.mxu0 %v14801_v57 }
0x1650   : > { %10564 = vmatprep.subr.bf16.mxu0 %v14806_v54 }
0x1653   : > { %10565 = vmatpush1.bf16.msra.mxu0 %v14804_v31  ;;  %v10858_v31 = vrot.slane %v17663_v13, %v16505_v1 }
0x1654   : > { %10566 = vmatprep.subr.bf16.mxu0 %v14809_v6 }
0x1657   : > { %10567 = vmatpush1.bf16.msra.mxu0 %v14807_v36 }
0x1658   : > { %10568 = vmatprep.subr.bf16.mxu0 %v14812_v24 }
0x165b   : > { %10569 = vmatpush1.bf16.msra.mxu0 %v14810_v16 }
0x165c   : > { %10570 = vmatprep.subr.bf16.mxu0 %v14815_v55 }
0x165f   : > { %10571 = vmatpush1.bf16.msra.mxu0 %v14813_v17 }
0x1660   : > { %10572 = vmatprep.subr.bf16.mxu0 %v14818_v9 }
0x1663   : > { %10573 = vmatpush1.bf16.msra.mxu0 %v14816_v41 }
0x1664   : > { %10574 = vmatprep.subr.bf16.mxu0 %v14821_v51 }
0x1667   : > { %10575 = vmatpush1.bf16.msra.mxu0 %v14819_v47  ;;  %v14957_v47 = vld [vmem:[%s16054_s2] sm:$0xff] }
0x1668   : > { %10576 = vmatprep.subr.bf16.mxu0 %v14824_v15  ;;  %v8798_v15 = vrot.slane %v14957_v47, %v16502_v7  ;;  %v10850_v13 = vrot.slane %v14957_v47, %v16505_v1  ;;  %v14973_v47 = vld [vmem:[#allocation11 + $0x20] sm:$0xff] (!%p12539_p0)  }
0x166b   : > { %10577 = vmatpush1.bf16.msra.mxu0 %v14822_v35  ;;  %v14958_v35 = vld [vmem:[%s16054_s2 + $0x8] sm:$0xff] }
0x166c   : > { %10578 = vmatprep.subr.bf16.mxu0 %v14827_v34  ;;  %v8802_v34 = vrot.slane %v14958_v35, %v16502_v7 }
0x166f   : > { %10579 = vmatpush1.bf16.msra.mxu0 %v14825_v4 }
0x1670   : > { %v12790_v44 = vpop.f32.mrb[60].mxu1  ;;  %10580 = vmatprep.subr.bf16.mxu0 %v14830_v52  ;;  %v10854_v52 = vrot.slane %v14958_v35, %v16505_v1  ;;  %v14975_v35 = vld [vmem:[#allocation11 + $0xa8] sm:$0xff] (!%p12539_p0)  }
0x1671   : > { %v12791_v28 = vpop.f32.mrb[61].mxu1 }
0x1672   : > { %v12792_v29 = vadd.f32 %v12791_v28, %v12790_v44  ;;  %v12793_v49 = vpop.f32.mrb[62].mxu1 }
0x1673   : > { %v12794_v18 = vpop.f32.mrb[63].mxu1  ;;  %10581 = vmatpush1.bf16.msra.mxu0 %v14828_v33 }
0x1674   : > { %v10718_v56 = vadd.f32 %v12792_v29, %v17670_v26  ;;  %v12795_v45 = vadd.f32 %v12794_v18, %v12793_v49  ;;  %10582 = vmatprep.subr.bf16.mxu0 %v14833_v19 }
0x1676   : > { %v10721_v32 = vadd.f32 %v12795_v45, %v17673_v2 }
0x1677   : > { %10583 = vmatpush1.bf16.msra.mxu0 %v14831_v5 }
0x1678   : > { %10584 = vmatprep.subr.bf16.mxu0 %v14836_v27 }
0x167b   : > { %10585 = vmatpush1.bf16.msra.mxu0 %v14834_v61 }
0x167c   : > { %10586 = vmatprep.subr.bf16.mxu0 %v14839_v40 }
0x167f   : > { %10587 = vmatpush1.bf16.msra.mxu0 %v14837_v58  ;;  %v14959_v58 = vld [vmem:[#allocation11 + $0x40] sm:$0xff] (!%p12539_p0)  }
0x1680   : > { %10588 = vmatprep.subr.bf16.mxu0 %v14842_v30  ;;  %v14961_v30 = vld [vmem:[#allocation11] sm:$0xff] (!%p12539_p0)  }
0x1683   : > { %10589 = vmatpush1.bf16.msra.mxu0 %v14840_v48  ;;  %v15486_v48 = vmov (!%p12539_p0), 0.0  }
0x1684   : > { %13037 = vmatprep.subr.bf16.mxu1 (!%p12539_p0), %v15486_v48  ;;  %12862 = vmatprep.subr.bf16.mxu0 (!%p12539_p0), %v14959_v58 }
0x1685   : > { %13053 = vmatprep.mubr.msk.bf16.mxu1 (!%p12539_p0), %vm15487_vm7, %v15486_v48 }
0x1686   : > { %10591 = vmatmul.mubr.bf16.vlgmr.msra.gmra.mrb[40].mxu0 %v17613_v12 }
0x1687   : > { %12863 = vmatpush3.bf16.msra.mxu0 (!%p12539_p0), %v14961_v30 }
0x1690   : > { %v12812_v22 = vpop.f32.mrb[64].mxu1 }
0x1691   : > { %v12813_v60 = vpop.f32.mrb[65].mxu1 }
0x1692   : > { %v12814_v26 = vadd.f32 %v12813_v60, %v12812_v22  ;;  %v12815_v25 = vpop.f32.mrb[66].mxu1 }
0x1693   : > { %v12816_v59 = vpop.f32.mrb[67].mxu1 }
0x1694   : > { %v10759_v2 = vadd.f32 %v12814_v26, %v10718_v56  ;;  %v12817_v23 = vadd.f32 %v12816_v59, %v12815_v25 }
0x1696   : > { %v10762_v10 = vadd.f32 %v12817_v23, %v10721_v32 }
0x16d0   : > { %v12834_v53 = vpop.f32.mrb[68].mxu1 }
0x16d1   : > { %v12835_v14 = vpop.f32.mrb[69].mxu1 }
0x16d2   : > { %v12836_v37 = vadd.f32 %v12835_v14, %v12834_v53  ;;  %v12837_v38 = vpop.f32.mrb[70].mxu1 }
0x16d3   : > { %v12838_v62 = vpop.f32.mrb[71].mxu1 }
0x16d4   : > { %v10800_v43 = vadd.f32 %v12836_v37, %v10759_v2  ;;  %v12839_v63 = vadd.f32 %v12838_v62, %v12837_v38 }
0x16d6   : > { %v10803_v8 = vadd.f32 %v12839_v63, %v10762_v10 }
0x16f0   : > { %v12856_v57 = vpop.f32.mrb[72].mxu1 }
0x16f1   : > { %v12857_v54 = vpop.f32.mrb[73].mxu1 }
0x16f2   : > { %v12858_v12 = vadd.f32 %v12857_v54, %v12856_v57  ;;  %v12859_v6 = vpop.f32.mrb[74].mxu1 }
0x16f3   : > { %v12860_v36 = vpop.f32.mrb[75].mxu1 }
0x16f4   : > { %v10841_v24 = vadd.f32 %v12858_v12, %v10800_v43  ;;  %v12861_v16 = vadd.f32 %v12860_v36, %v12859_v6  ;;  %v14962_v12 = vld [vmem:[#allocation11 + $0x48] sm:$0xff] (!%p12539_p0)   ;;  %v14965_v36 = vld [vmem:[#allocation11 + $0x50] sm:$0xff] (!%p12539_p0)  }
0x16f5   : > { %v14964_v6 = vld [vmem:[#allocation11 + $0x8] sm:$0xff] (!%p12539_p0)   ;;  %12864 = vmatprep.subr.bf16.mxu0 (!%p12539_p0), %v14962_v12 }
0x16f6   : > { %v10861_v55 = vmul.f32 %v10858_v31, %v10841_v24  ;;  %v10844_v17 = vadd.f32 %v12861_v16, %v10803_v8  ;;  %12865 = vmatpush3.bf16.msra.mxu0 (!%p12539_p0), %v14964_v6  ;;  %v14966_v24 = vld [vmem:[#allocation11 + $0x90] sm:$0xff] (!%p12539_p0)  }
0x16f7   : > { %v14967_v16 = vld [vmem:[#allocation11 + $0x10] sm:$0xff] (!%p12539_p0)   ;;  %12866 = vmatprep.subr.bf16.mxu0 (!%p12539_p0), %v14965_v36 }
0x16f8   : > { %v10867_v9 = vadd.f32 %v10861_v55, %v16810_v3  ;;  %v10864_v41 = vmul.f32 %v10858_v31, %v10844_v17  ;;  %v14963_v31 = vld [vmem:[#allocation11 + $0x88] sm:$0xff] (!%p12539_p0)   ;;  %v14968_v55 = vld [vmem:[#allocation11 + $0x58] sm:$0xff] (!%p12539_p0)  }
0x16f9   : > { %v14969_v17 = vld [vmem:[#allocation11 + $0x98] sm:$0xff] (!%p12539_p0)  }
0x16fa   : > { %10873 = vst [vmem:[#allocation2 + $0x10] sm:$0xff] %v10867_v9  ;;  %v10870_v51 = vadd.f32 %v10864_v41, %v16816_v50  ;;  %12867 = vmatpush3.bf16.msra.mxu0 (!%p12539_p0), %v14967_v16  ;;  %v14971_v41 = vld [vmem:[#allocation11 + $0x60] sm:$0xff] (!%p12539_p0)  }
0x16fb   : > { %12868 = vmatprep.subr.bf16.mxu0 (!%p12539_p0), %v14968_v55 }
0x16fc   : > { %10876 = vst [vmem:[#allocation2 + $0x28] sm:$0xff] %v10870_v51 }
0x1759   : > { %v10592_v4 = vpop.f32.mrb[40].mxu0 }
0x175a   : > { %v13173_v33 = vadd.f32 %v10592_v4, %v8798_v15  ;;  %v10594_v44 = vpop.f32.mrb[41].mxu0  ;;  %v14978_v4 = vld [vmem:[#allocation11 + $0xb0] sm:$0xff] (!%p12539_p0)  }
0x175b   : > { %v13174_v19 = vadd.f32 %v10594_v44, %v8802_v34  ;;  %v10596_v3 = vpop.f32.mrb[42].mxu0  ;;  %v14981_v44 = vld [vmem:[#allocation11 + $0xb8] sm:$0xff] (!%p12539_p0)  }
0x175c   : > { %v10859_v28 = vmul.f32 %v13173_v33, %v10850_v13  ;;  %v13175_v29 = vadd.f32 %v10596_v3, %v8798_v15  ;;  %v10598_v49 = vpop.f32.mrb[43].mxu0  ;;  %v14974_v15 = vld [vmem:[#allocation11 + $0x68] sm:$0xff] (!%p12539_p0)   ;;  %v14980_v33 = vld [vmem:[#allocation11 + $0x78] sm:$0xff] (!%p12539_p0)  }
0x175d   : > { %v10860_v50 = vmul.f32 %v13174_v19, %v10854_v52  ;;  %v13176_v18 = vadd.f32 %v10598_v49, %v8802_v34  ;;  %10880 = sbr.rel (%p12539_p0) target bundleno = 6533 (0x1985), region = 148  ;;  %v14976_v34 = vld [vmem:[#allocation11 + $0x28] sm:$0xff] (!%p12539_p0)   ;;  %v14982_v19 = vld [vmem:[#allocation11 + $0x38] sm:$0xff] (!%p12539_p0)  }
0x175e   : > { %v10865_v5 = vadd.f32 %v10859_v28, %v16804_v46  ;;  %v10862_v56 = vmul.f32 %v13175_v29, %v10850_v13  ;;  %v14977_v13 = vld [vmem:[#allocation11 + $0x70] sm:$0xff] (!%p12539_p0)  }
0x175f   : > { %v10866_v45 = vadd.f32 %v10860_v50, %v16806_v0  ;;  %v10863_v7 = vmul.f32 %v13176_v18, %v10854_v52  ;;  %v14960_v0 = vld [vmem:[#allocation11 + $0x80] sm:$0xff] (!%p12539_p0)   ;;  %v14979_v52 = vld [vmem:[#allocation11 + $0x30] sm:$0xff] (!%p12539_p0)  }
0x1760   : > { %10871 = vst [vmem:[#allocation2] sm:$0xff] %v10865_v5  ;;  %v10868_v27 = vadd.f32 %v10862_v56, %v16808_v11  ;;  %13038 = vmatpush3.bf16.msra.mxu1 (!%p12539_p0), %v14960_v0 }
0x1761   : > { %10872 = vst [vmem:[#allocation2 + $0x8] sm:$0xff] %v10866_v45  ;;  %v10869_v1 = vadd.f32 %v10863_v7, %v16812_v20  ;;  %v10883_v32 = vadd.f32 (!%p12539_p0), %v10866_v45, %v10865_v5  ;;  %13039 = vmatprep.subr.bf16.mxu1 (!%p12539_p0), %v15486_v48 }
0x1762   : > { %10874 = vst [vmem:[#allocation2 + $0x18] sm:$0xff] %v10868_v27 }
0x1763   : > { %10875 = vst [vmem:[#allocation2 + $0x20] sm:$0xff] %v10869_v1  ;;  %v10887_v61 = vadd.f32 (!%p12539_p0), %v10869_v1, %v10868_v27  ;;  %v10884_v40 = vadd.f32 (!%p12539_p0), %v10883_v32, %v10867_v9 }
0x1764   : > { %13040 = vmatpush3.bf16.msra.mxu1 %v14963_v31 }
0x1765   : > { %10885 = vadd.xlane.f32.xlu0 %v10884_v40  ;;  %v10888_v46 = vadd.f32 %v10887_v61, %v10870_v51  ;;  %13041 = vmatprep.subr.bf16.mxu1 %v15486_v48 }
0x1768   : > { %13042 = vmatpush3.bf16.msra.mxu1 %v14966_v24 }
0x1769   : > { %10889 = vadd.xlane.f32.xlu0 %v10888_v46  ;;  %13043 = vmatprep.subr.bf16.mxu1 %v15486_v48 }
0x176c   : > { %13044 = vmatpush3.bf16.msra.mxu1 %v14969_v17 }
0x176d   : > { %13045 = vmatprep.subr.bf16.mxu1 %v15486_v48 }
0x17f2   : > { %v10886_v11 = vpop.xlane.xlu0 %10885 }
0x17f3   : > { %v10891_v20 = vmul.f32 0.0026041667, %v10886_v11 }
0x17f5   : > { %v17734_v22 = vsub.f32 %v10865_v5, %v10891_v20  ;;  %v17736_v60 = vsub.f32 %v10866_v45, %v10891_v20  ;;  %v17738_v26 = vsub.f32 %v10867_v9, %v10891_v20  ;;  %v14970_v9 = vld [vmem:[#allocation11 + $0x18] sm:$0xff]  }
0x17f6   : > { %v10890_v25 = vpop.xlane.xlu0 %10889  ;;  %12869 = vmatpush3.bf16.msra.mxu0 %v14970_v9  ;;  %v10881_v5 = vld [vmem:[#allocation8] sm:$0x7]  ;;  %v10882_v45 = vld [vmem:[#allocation10] sm:$0x7] }
0x17f7   : > { %v10892_v59 = vmul.f32 0.0026041667, %v10890_v25  ;;  %v10899_v2 = vmul.f32 %v17734_v22, %v17734_v22  ;;  %v10900_v23 = vmul.f32 %v17736_v60, %v17736_v60  ;;  %v10901_v10 = vmul.f32 %v17738_v26, %v17738_v26  ;;  %12870 = vmatprep.subr.bf16.mxu0 %v14971_v41 }
0x17f8   : > { %v10937_v32 = vrot.slane %v10881_v5, %v16442_v21  ;;  %v10929_v40 = vrot.slane %v10881_v5, %v16209_v39  ;;  %v10955_v58 = vrot.slane %v10882_v45, %v16213_v42  ;;  %v10959_v0 = vrot.slane %v10882_v45, %v16442_v21 }
0x17f9   : > { %v17746_v53 = vsub.f32 %v10868_v27, %v10892_v59  ;;  %v17748_v14 = vsub.f32 %v10869_v1, %v10892_v59  ;;  %v17750_v37 = vsub.f32 %v10870_v51, %v10892_v59  ;;  %v10905_v38 = vadd.f32 %v10900_v23, %v10899_v2  ;;  %v14972_v51 = vld [vmem:[#allocation11 + $0xa0] sm:$0xff]  }
0x17fa   : > { %13046 = vmatpush3.bf16.msra.mxu1 %v14972_v51  ;;  %12871 = vmatpush3.bf16.msra.mxu0 %v14973_v47  ;;  %v10933_v27 = vrot.slane %v10881_v5, %v16213_v42  ;;  %v10951_v25 = vrot.slane %v10882_v45, %v16209_v39 }
0x17fb   : > { %v10906_v62 = vadd.f32 %v10905_v38, %v10901_v10  ;;  %v10902_v43 = vmul.f32 %v17746_v53, %v17746_v53  ;;  %v10903_v63 = vmul.f32 %v17748_v14, %v17748_v14  ;;  %v10904_v8 = vmul.f32 %v17750_v37, %v17750_v37  ;;  %13047 = vmatprep.subr.bf16.mxu1 %v15486_v48 }
0x17fc   : > { %12872 = vmatprep.subr.bf16.mxu0 %v14974_v15 }
0x17fd   : > { %10907 = vadd.xlane.f32.xlu1 %v10906_v62  ;;  %v10909_v57 = vadd.f32 %v10903_v63, %v10902_v43 }
0x17fe   : > { %13048 = vmatpush3.bf16.msra.mxu1 %v14975_v35  ;;  %12873 = vmatpush3.bf16.msra.mxu0 %v14976_v34 }
0x17ff   : > { %v10910_v54 = vadd.f32 %v10909_v57, %v10904_v8  ;;  %13049 = vmatprep.subr.bf16.mxu1 %v15486_v48  ;;  %12874 = vmatprep.subr.bf16.mxu0 %v14977_v13  ;;  %v12540_v57 = vld [vmem:[#allocation13] ss:$0 sm:$0xff] }
0x1801   : > { %10911 = vadd.xlane.f32.xlu1 %v10910_v54 }
0x1802   : > { %13050 = vmatpush3.bf16.msra.mxu1 %v14978_v4  ;;  %12875 = vmatpush3.bf16.msra.mxu0 %v14979_v52 }
0x1803   : > { %13051 = vmatprep.subr.bf16.mxu1 %v15486_v48  ;;  %12876 = vmatprep.subr.bf16.mxu0 %v14980_v33 }
0x1806   : > { %13052 = vmatpush3.bf16.msra.mxu1 %v14981_v44  ;;  %12877 = vmatpush3.bf16.msra.mxu0 %v14982_v19 }
0x188a   : > { %v10908_v3 = vpop.xlane.xlu1 %10907 }
0x188b   : > { %v10913_v28 = vmul.f32 0.0026041667, %v10908_v3 }
0x188d   : > { %v10915_v29 = vadd.f32 1e-06, %v10913_v28 }
0x188e   : > { %v10912_v49 = vpop.xlane.xlu1 %10911 }
0x188f   : > { %14983 = vrsqrt.f32 %v10915_v29  ;;  %v10914_v50 = vmul.f32 0.0026041667, %v10912_v49 }
0x1891   : > { %v10916_v18 = vadd.f32 1e-06, %v10914_v50 }
0x1893   : > { %14985 = vrsqrt.f32 %v10916_v18 }
0x1899   : > { %v14984_v56 = vpop.eup %14983 }
0x189a   : > { %v10920_v7 = vmul.f32 %v14984_v56, %v17736_v60  ;;  %v10921_v1 = vmul.f32 %v14984_v56, %v17738_v26  ;;  %v10919_v61 = vmul.f32 %v14984_v56, %v17734_v22 }
0x189c   : > { %v10942_v48 = vmul.f32 %v10933_v27, %v10920_v7  ;;  %v10943_v20 = vmul.f32 %v10937_v32, %v10921_v1  ;;  %v10941_v26 = vmul.f32 %v10929_v40, %v10919_v61 }
0x189d   : > { %v14986_v46 = vpop.eup %14985 }
0x189e   : > { %v10923_v30 = vmul.f32 %v14986_v46, %v17748_v14  ;;  %v10924_v11 = vmul.f32 %v14986_v46, %v17750_v37  ;;  %v10922_v60 = vmul.f32 %v14986_v46, %v17746_v53  ;;  %v10964_v23 = vadd.f32 %v10955_v58, %v10942_v48 }
0x189f   : > { %v10965_v38 = vadd.f32 %v10959_v0, %v10943_v20  ;;  %v10963_v62 = vadd.f32 %v10951_v25, %v10941_v26 }
0x18a0   : > { %v10945_v59 = vmul.f32 %v10933_v27, %v10923_v30  ;;  %v10946_v22 = vmul.f32 %v10937_v32, %v10924_v11  ;;  %v10944_v2 = vmul.f32 %v10929_v40, %v10922_v60 }
0x18a2   : > { %v10967_v10 = vadd.f32 %v10955_v58, %v10945_v59  ;;  %v10968_v42 = vadd.f32 %v10959_v0, %v10946_v22  ;;  %v10966_v21 = vadd.f32 %v10951_v25, %v10944_v2 }
0x18a4   : > { %v10970_v43 = vpack.c.bf16 %v10967_v10, %v10964_v23  ;;  %v10971_v14 = vpack.c.bf16 %v10968_v42, %v10965_v38  ;;  %v10969_v63 = vpack.c.bf16 %v10966_v21, %v10963_v62 }
0x18a6   : > { %11203 = vmatprep.mubr.bf16.mxu0 %v10970_v43  ;;  %13054 = vmatmul.mubr.bf16.vlgmr.msra.gmra.mrb[0].mxu1 %v10971_v14 }
0x18a7   : > { %11204 = vmatmul.mubr.bf16.vlgmr.msra.gmra.mrb[0].mxu0 %v10969_v63 }
0x1979   : > { %v11246_v37 = vpop.f32.mrb[0].mxu1 }
0x197a   : > { %v12878_v53 = vpop.f32.mrb[0].mxu0  ;;  %v13055_v8 = vpop.f32.mrb[1].mxu1 }
0x197b   : > { %v12879_v39 = vpop.f32.mrb[1].mxu0  ;;  %v11249_v54 = vpop.f32.mrb[2].mxu1 }
0x197c   : > { %v12880_v12 = vadd.f32 %v12879_v39, %v12878_v53  ;;  %v12881_v31 = vpop.f32.mrb[2].mxu0  ;;  %v13056_v6 = vpop.f32.mrb[3].mxu1 }
0x197d   : > { %v12882_v36 = vpop.f32.mrb[3].mxu0 }
0x197e   : > { %v11206_v24 = vadd.f32 %v12880_v12, %v12540_v57  ;;  %v12883_v16 = vadd.f32 %v12882_v36, %v12881_v31 }
0x1980   : > { %v11247_v55 = vadd.f32 %v11246_v37, %v11206_v24  ;;  %v11209_v17 = vadd.f32 %v12883_v16, %v12540_v57 }
0x1982   : > { %11253 = vst [vmem:[%s17894_s24] sm:$0xff] %v11247_v55  ;;  %v11250_v9 = vadd.f32 %v11249_v54, %v11209_v17 }
0x1984   : > { %11254 = vst [vmem:[%s17895_s5 + $0x8] sm:$0xff] %v11250_v9 }
0x1985 PF: > { %s17896_s24 = sld [smem:[#allocation35_spill]]  ;;  %s17897_s14 = sld [smem:[#allocation33_spill]] }
0x1986   : > { %s17898_s23 = sld [smem:[#allocation36_spill]]  ;;  %s17899_s21 = smov %s15447_s22 }
0x198b   : > { %p39_p2 = scmp.ge.s32.totalorder %s17896_s24, 14   ;;  %s17900_s22 = smov %s17897_s14 }
0x198d   :  { %41 = sbr.rel (!%p39_p2) target bundleno = 25 (0x19), region = 229 }
0x1994   :  { %11266 = vsyncpa [#allocation4], 1 }
0x1995   :  { %11268 = vsyncpa [#allocation4 + $0x1], 1 }
0x1996   :  { %11269 = vsyncpa [#allocation6], 1 }
0x1997   :  { %11270 = vsyncpa [#allocation9], 1 }
0x1998   :  { %11271 = vsyncpa [#allocation12], 1 }
0x1999   :  { %11272 = vsyncpa [#allocation15], 1 }
0x199a   :  { %11274 = vsyncpa [#allocation15 + $0x1], 1 }
0x199b   :  { %11275 = vsyncpa [#allocation18], 1 }
0x199c   :  { %11277 = vsyncpa [#allocation18 + $0x1], 1 }
0x199d   :  { %11278 = vsyncpa [#allocation21], 1 }
0x199e   :  { %11280 = vsyncpa [#allocation21 + $0x1], 1 }
0x199f   :  { %11281 = vsyncpa [#allocation24], 1 }
0x19a0   :  { %11283 = vsyncpa [#allocation24 + $0x1], 1 }

</bundles_post_ra>
